<compile_context>
chip_gen: v5e
topology: v5e:2x2
jax: 0.10.0
libtpu: 0.0.40
codegen_flags: <defaults>
</compile_context>

<pallas_src>
import functools

import jax
import jax.numpy as jnp
from jax.experimental import pallas as pl
from jax.experimental.pallas import tpu as pltpu

# Real layer sizes from the PyTorch module.
D_IN, D_H1, D_H2, D_H3, D_OUT = 28 * 28, 500, 250, 125, 10
# Lane-dense padded sizes (multiples of 128).
P_H1, P_H2, P_H3, P_OUT = 512, 256, 128, 128

# Batch tile: multiple of 128/256; sized for v7x's 64 MiB VMEM
# (x tile = 256*784*2B ~= 0.4 MB per buffer, weights ~1.2 MB bf16 resident).
TILE_B = 256


def mlp_kernel(x_ref, w1_ref, b1_ref, w2_ref, b2_ref,
               w3_ref, b3_ref, w4_ref, b4_ref, o_ref):
    # x tile (TILE_B, 784) bf16.  4 MXU matmuls with f32 accumulation; bias
    # add + ReLU in f32 on the VPU, cast back to bf16 only at dot boundaries.
    x = x_ref[...]
    h = jnp.dot(x, w1_ref[...], preferred_element_type=jnp.float32) + b1_ref[...]
    h = jnp.maximum(h, 0.0).astype(jnp.bfloat16)
    h = jnp.dot(h, w2_ref[...], preferred_element_type=jnp.float32) + b2_ref[...]
    h = jnp.maximum(h, 0.0).astype(jnp.bfloat16)
    h = jnp.dot(h, w3_ref[...], preferred_element_type=jnp.float32) + b3_ref[...]
    h = jnp.maximum(h, 0.0).astype(jnp.bfloat16)
    out = jnp.dot(h, w4_ref[...], preferred_element_type=jnp.float32) + b4_ref[...]
    o_ref[...] = out.astype(o_ref.dtype)


@functools.partial(jax.jit)
def mlp_forward(x_nchw, params):
    """x_nchw: (B, 1, 28, 28) float32 -> logits (B, 10) float32."""
    b = x_nchw.shape[0]
    x = x_nchw.reshape(b, D_IN)                        # same as torch .view(-1, 784)
    b_pad = pl.cdiv(b, TILE_B) * TILE_B
    if b_pad != b:
        x = jnp.pad(x, ((0, b_pad - b), (0, 0)))
    x = x.astype(jnp.bfloat16)

    w1, b1, w2, b2, w3, b3, w4, b4 = params
    grid = (b_pad // TILE_B,)

    # Weights/biases: full blocks with constant index_map -> VMEM-resident
    # across all batch-tile grid steps.
    const = lambda arr: pl.BlockSpec(arr.shape, lambda i: (0, 0))
    in_specs = [
        pl.BlockSpec((TILE_B, D_IN), lambda i: (i, 0)),   # x tiles, pipelined
        const(w1), const(b1), const(w2), const(b2),
        const(w3), const(b3), const(w4), const(b4),
    ]

    out_padded = pl.pallas_call(
        mlp_kernel,
        out_shape=jax.ShapeDtypeStruct((b_pad, P_OUT), jnp.float32),
        grid=grid,
        in_specs=in_specs,
        out_specs=pl.BlockSpec((TILE_B, P_OUT), lambda i: (i, 0)),
        compiler_params=pltpu.CompilerParams(
            dimension_semantics=("parallel",)),
    )(x, w1, b1, w2, b2, w3, b3, w4, b4)

    # Drop batch padding and the padded logit lanes.
    return out_padded[:b, :D_OUT]


def init_params(key):
    """nn.Linear-style init (U[-1/sqrt(fan_in), +]), zero-padded to lane-dense
    shapes.  Returns (padded kernel params, real unpadded params)."""
    real_dims = [(D_IN, D_H1), (D_H1, D_H2), (D_H2, D_H3), (D_H3, D_OUT)]
    pad_dims = [(D_IN, P_H1), (P_H1, P_H2), (P_H2, P_H3), (P_H3, P_OUT)]
    params, real = [], []
    for (fan_in, fan_out), (pin, pout) in zip(real_dims, pad_dims):
        key, kw, kb = jax.random.split(key, 3)
        bound = 1.0 / float(fan_in) ** 0.5
        w = jax.random.uniform(kw, (fan_in, fan_out), jnp.float32, -bound, bound)
        bias = jax.random.uniform(kb, (1, fan_out), jnp.float32, -bound, bound)
        real += [w, bias]
        # Zero-pad so the extra lanes contribute nothing downstream.
        w_p = jnp.zeros((pin, pout), jnp.float32).at[:fan_in, :fan_out].set(w)
        b_p = jnp.zeros((1, pout), jnp.float32).at[:, :fan_out].set(bias)
        params += [w_p.astype(jnp.bfloat16), b_p]      # bf16 weights, f32 biases
    return tuple(params), tuple(real)


def mlp_reference(x_nchw, real_params):
    """Reference with the same dtype semantics (bf16 inputs, f32 accumulate),
    using the real unpadded weights."""
    x = x_nchw.reshape(x_nchw.shape[0], D_IN).astype(jnp.bfloat16)
    w1, b1, w2, b2, w3, b3, w4, b4 = real_params

    def layer(h, w, b, relu=True):
        y = jnp.dot(h, w.astype(jnp.bfloat16),
                    preferred_element_type=jnp.float32) + b
        if relu:
            y = jnp.maximum(y, 0.0).astype(jnp.bfloat16)
        return y

    h = layer(x, w1, b1)
    h = layer(h, w2, b2)
    h = layer(h, w3, b3)
    return layer(h, w4, b4, relu=False)


if __name__ == "__main__":
    key = jax.random.PRNGKey(0)
    key, kx = jax.random.split(key)
    # MNIST-shaped input, small batch (wrapper pads batch up to TILE_B).
    x = jax.random.normal(kx, (2, 1, 28, 28), jnp.float32)
    params, real_params = init_params(key)

    out = mlp_forward(x, params)
    out = jax.block_until_ready(out)

    ref = mlp_reference(x, real_params)
    assert out.shape == (2, 10)
    assert jnp.allclose(out, ref, atol=2e-3, rtol=2e-2), "mismatch vs reference"

    print("KERNEL_OK")
</pallas_src>

<mosaic_0001>
module attributes {stable_mosaic.version = 11 : i64} {
  func.func @mlp_kernel(%arg0: i32, %arg1: memref<256x784xbf16, #tpu.memory_space<vmem>>, %arg2: memref<784x512xbf16, #tpu.memory_space<vmem>>, %arg3: memref<1x512xf32, #tpu.memory_space<vmem>>, %arg4: memref<512x256xbf16, #tpu.memory_space<vmem>>, %arg5: memref<1x256xf32, #tpu.memory_space<vmem>>, %arg6: memref<256x128xbf16, #tpu.memory_space<vmem>>, %arg7: memref<1x128xf32, #tpu.memory_space<vmem>>, %arg8: memref<128x128xbf16, #tpu.memory_space<vmem>>, %arg9: memref<1x128xf32, #tpu.memory_space<vmem>>, %arg10: memref<256x128xf32, #tpu.memory_space<vmem>>) attributes {dimension_semantics = [#tpu.dimension_semantics<parallel>], iteration_bounds = array<i64: 1>, scalar_prefetch = 0 : i64, scratch_operands = 0 : i64, tpu.core_type = #tpu.core_type<tc>, window_params = [{transform_indices = @transform_0, window_bounds = array<i64: 256, 784>}, {pipeline_mode = #tpu.pipeline_mode<synchronous>, transform_indices = @transform_1, window_bounds = array<i64: 784, 512>}, {pipeline_mode = #tpu.pipeline_mode<synchronous>, transform_indices = @transform_2, window_bounds = array<i64: 1, 512>}, {pipeline_mode = #tpu.pipeline_mode<synchronous>, transform_indices = @transform_3, window_bounds = array<i64: 512, 256>}, {pipeline_mode = #tpu.pipeline_mode<synchronous>, transform_indices = @transform_4, window_bounds = array<i64: 1, 256>}, {pipeline_mode = #tpu.pipeline_mode<synchronous>, transform_indices = @transform_5, window_bounds = array<i64: 256, 128>}, {pipeline_mode = #tpu.pipeline_mode<synchronous>, transform_indices = @transform_6, window_bounds = array<i64: 1, 128>}, {pipeline_mode = #tpu.pipeline_mode<synchronous>, transform_indices = @transform_7, window_bounds = array<i64: 128, 128>}, {pipeline_mode = #tpu.pipeline_mode<synchronous>, transform_indices = @transform_8, window_bounds = array<i64: 1, 128>}, {transform_indices = @transform_9, window_bounds = array<i64: 256, 128>}]} {
    %c0 = arith.constant 0 : index
    %c0_0 = arith.constant 0 : index
    %0 = vector.load %arg1[%c0, %c0_0] : memref<256x784xbf16, #tpu.memory_space<vmem>>, vector<256x784xbf16>
    %c0_1 = arith.constant 0 : index
    %c0_2 = arith.constant 0 : index
    %1 = vector.load %arg2[%c0_1, %c0_2] : memref<784x512xbf16, #tpu.memory_space<vmem>>, vector<784x512xbf16>
    %cst = arith.constant dense<0.000000e+00> : vector<256x512xf32>
    %2 = tpu.matmul %0, %1, %cst {dimension_numbers = #tpu.dot_dimension_numbers<[1], [0], [0], [1], [0, 0, 1, 1], [], []>} : vector<256x784xbf16>, vector<784x512xbf16>, vector<256x512xf32> -> vector<256x512xf32>
    %c0_3 = arith.constant 0 : index
    %c0_4 = arith.constant 0 : index
    %3 = vector.load %arg3[%c0_3, %c0_4] : memref<1x512xf32, #tpu.memory_space<vmem>>, vector<1x512xf32>
    %4 = vector.broadcast %3 : vector<1x512xf32> to vector<256x512xf32>
    %5 = arith.addf %2, %4 : vector<256x512xf32>
    %cst_5 = arith.constant 0.000000e+00 : f32
    %6 = vector.broadcast %cst_5 : f32 to vector<256x512xf32>
    %7 = arith.maximumf %5, %6 : vector<256x512xf32>
    %8 = arith.truncf %7 : vector<256x512xf32> to vector<256x512xbf16>
    %c0_6 = arith.constant 0 : index
    %c0_7 = arith.constant 0 : index
    %9 = vector.load %arg4[%c0_6, %c0_7] : memref<512x256xbf16, #tpu.memory_space<vmem>>, vector<512x256xbf16>
    %cst_8 = arith.constant dense<0.000000e+00> : vector<256x256xf32>
    %10 = tpu.matmul %8, %9, %cst_8 {dimension_numbers = #tpu.dot_dimension_numbers<[1], [0], [0], [1], [0, 0, 1, 1], [], []>} : vector<256x512xbf16>, vector<512x256xbf16>, vector<256x256xf32> -> vector<256x256xf32>
    %c0_9 = arith.constant 0 : index
    %c0_10 = arith.constant 0 : index
    %11 = vector.load %arg5[%c0_9, %c0_10] : memref<1x256xf32, #tpu.memory_space<vmem>>, vector<1x256xf32>
    %12 = vector.broadcast %11 : vector<1x256xf32> to vector<256x256xf32>
    %13 = arith.addf %10, %12 : vector<256x256xf32>
    %cst_11 = arith.constant 0.000000e+00 : f32
    %14 = vector.broadcast %cst_11 : f32 to vector<256x256xf32>
    %15 = arith.maximumf %13, %14 : vector<256x256xf32>
    %16 = arith.truncf %15 : vector<256x256xf32> to vector<256x256xbf16>
    %c0_12 = arith.constant 0 : index
    %c0_13 = arith.constant 0 : index
    %17 = vector.load %arg6[%c0_12, %c0_13] : memref<256x128xbf16, #tpu.memory_space<vmem>>, vector<256x128xbf16>
    %cst_14 = arith.constant dense<0.000000e+00> : vector<256x128xf32>
    %18 = tpu.matmul %16, %17, %cst_14 {dimension_numbers = #tpu.dot_dimension_numbers<[1], [0], [0], [1], [0, 0, 1, 1], [], []>} : vector<256x256xbf16>, vector<256x128xbf16>, vector<256x128xf32> -> vector<256x128xf32>
    %c0_15 = arith.constant 0 : index
    %c0_16 = arith.constant 0 : index
    %19 = vector.load %arg7[%c0_15, %c0_16] : memref<1x128xf32, #tpu.memory_space<vmem>>, vector<1x128xf32>
    %20 = vector.broadcast %19 : vector<1x128xf32> to vector<256x128xf32>
    %21 = arith.addf %18, %20 : vector<256x128xf32>
    %cst_17 = arith.constant 0.000000e+00 : f32
    %22 = vector.broadcast %cst_17 : f32 to vector<256x128xf32>
    %23 = arith.maximumf %21, %22 : vector<256x128xf32>
    %24 = arith.truncf %23 : vector<256x128xf32> to vector<256x128xbf16>
    %c0_18 = arith.constant 0 : index
    %c0_19 = arith.constant 0 : index
    %25 = vector.load %arg8[%c0_18, %c0_19] : memref<128x128xbf16, #tpu.memory_space<vmem>>, vector<128x128xbf16>
    %cst_20 = arith.constant dense<0.000000e+00> : vector<256x128xf32>
    %26 = tpu.matmul %24, %25, %cst_20 {dimension_numbers = #tpu.dot_dimension_numbers<[1], [0], [0], [1], [0, 0, 1, 1], [], []>} : vector<256x128xbf16>, vector<128x128xbf16>, vector<256x128xf32> -> vector<256x128xf32>
    %c0_21 = arith.constant 0 : index
    %c0_22 = arith.constant 0 : index
    %27 = vector.load %arg9[%c0_21, %c0_22] : memref<1x128xf32, #tpu.memory_space<vmem>>, vector<1x128xf32>
    %28 = vector.broadcast %27 : vector<1x128xf32> to vector<256x128xf32>
    %29 = arith.addf %26, %28 : vector<256x128xf32>
    %c0_23 = arith.constant 0 : index
    %c0_24 = arith.constant 0 : index
    %30 = vector.load %arg10[%c0_23, %c0_24] : memref<256x128xf32, #tpu.memory_space<vmem>>, vector<256x128xf32>
    tpu.vector_store %arg10[%c0_23, %c0_24], %29 {strides = array<i32>} : memref<256x128xf32, #tpu.memory_space<vmem>>, vector<256x128xf32>,
    return
  }
  func.func @transform_0(%arg0: i32) -> (i32, i32) {
    %c0_i32 = arith.constant 0 : i32
    %c0_i32_0 = arith.constant 0 : i32
    return %arg0, %c0_i32 : i32, i32
  }
  func.func @transform_1(%arg0: i32) -> (i32, i32) {
    %c0_i32 = arith.constant 0 : i32
    %c0_i32_0 = arith.constant 0 : i32
    %c0_i32_1 = arith.constant 0 : i32
    return %c0_i32, %c0_i32_0 : i32, i32
  }
  func.func @transform_2(%arg0: i32) -> (i32, i32) {
    %c0_i32 = arith.constant 0 : i32
    %c0_i32_0 = arith.constant 0 : i32
    %c0_i32_1 = arith.constant 0 : i32
    return %c0_i32, %c0_i32_0 : i32, i32
  }
  func.func @transform_3(%arg0: i32) -> (i32, i32) {
    %c0_i32 = arith.constant 0 : i32
    %c0_i32_0 = arith.constant 0 : i32
    %c0_i32_1 = arith.constant 0 : i32
    return %c0_i32, %c0_i32_0 : i32, i32
  }
  func.func @transform_4(%arg0: i32) -> (i32, i32) {
    %c0_i32 = arith.constant 0 : i32
    %c0_i32_0 = arith.constant 0 : i32
    %c0_i32_1 = arith.constant 0 : i32
    return %c0_i32, %c0_i32_0 : i32, i32
  }
  func.func @transform_5(%arg0: i32) -> (i32, i32) {
    %c0_i32 = arith.constant 0 : i32
    %c0_i32_0 = arith.constant 0 : i32
    %c0_i32_1 = arith.constant 0 : i32
    return %c0_i32, %c0_i32_0 : i32, i32
  }
  func.func @transform_6(%arg0: i32) -> (i32, i32) {
    %c0_i32 = arith.constant 0 : i32
    %c0_i32_0 = arith.constant 0 : i32
    %c0_i32_1 = arith.constant 0 : i32
    return %c0_i32, %c0_i32_0 : i32, i32
  }
  func.func @transform_7(%arg0: i32) -> (i32, i32) {
    %c0_i32 = arith.constant 0 : i32
    %c0_i32_0 = arith.constant 0 : i32
    %c0_i32_1 = arith.constant 0 : i32
    return %c0_i32, %c0_i32_0 : i32, i32
  }
  func.func @transform_8(%arg0: i32) -> (i32, i32) {
    %c0_i32 = arith.constant 0 : i32
    %c0_i32_0 = arith.constant 0 : i32
    %c0_i32_1 = arith.constant 0 : i32
    return %c0_i32, %c0_i32_0 : i32, i32
  }
  func.func @transform_9(%arg0: i32) -> (i32, i32) {
    %c0_i32 = arith.constant 0 : i32
    %c0_i32_0 = arith.constant 0 : i32
    return %arg0, %c0_i32 : i32, i32
  }
}

</mosaic_0001>

<bundles_post_ra>
// kernel: mlp_forward.1
= control target key start
LH: loop header
LB: loop body
LE: loop exit
PB: predicated region body
PF: predicated region fallthrough
CT: control target
= control target key end

     0   :  { %14 = vsyncpa [#allocation3], 0  ;;  %s8507_s12 = smov [#allocation2]   ;;  %s8508_s14 = smov 256   ;;  %s12078_s0 = inlined_call_operand.vmem [shape: bf16[256,784], index: 0, kind: input, shape index: {}]   ;;  %s12079_s1 = inlined_call_operand.hbm [shape: bf16[784,512], index: 1, kind: input, shape index: {}]   ;;  %s12080_s2 = inlined_call_operand.vmem [shape: f32[1,512], index: 2, kind: input, shape index: {}]   ;;  %s12081_s3 = inlined_call_operand.vmem [shape: bf16[512,256], index: 3, kind: input, shape index: {}]   ;;  %s12082_s4 = inlined_call_operand.vmem [shape: f32[1,256], index: 4, kind: input, shape index: {}]   ;;  %s12083_s5 = inlined_call_operand.vmem [shape: bf16[256,128], index: 5, kind: input, shape index: {}]   ;;  %s12084_s6 = inlined_call_operand.vmem [shape: f32[1,128], index: 6, kind: input, shape index: {}]   ;;  %s12085_s7 = inlined_call_operand.vmem [shape: bf16[128,128], index: 7, kind: input, shape index: {}]   ;;  %s12086_s8 = inlined_call_operand.vmem [shape: f32[1,128], index: 8, kind: input, shape index: {}]   ;;  %s12087_s9 = inlined_call_operand.vmem [shape: f32[256,128], index: 9, kind: output, shape index: {}]  }
   0x1   :  { %s21_s11 = sshll.u32 %s12079_s1, 4  ;;  %s23_s13 = sshll.u32 %s8507_s12, 4  ;;  %s22_s11 = int_to_ptr.hbm [resolvable:$true] %s21_s11  ;;  %s24_s13 = int_to_ptr.vmem [resolvable:$true] %s23_s13 }
   0x2   :  { %s8509_s15 = smov 16  }
   0x3   :  { %29 = dma.hbm_to_vmem [thread:$0]  %s22_s11, 25088, %s24_s13, [#allocation3], %s8508_s14, %s8508_s14, %s8509_s15  }
   0x4   :  { %8505 = dma.done.wait [#allocation3], 25088  }
   0x5   :  { %8506 = vsyncadd [#allocation3], 4294942208  ;;  %v6968_v0 = vld [vmem:[#allocation2 + $0xe0] sm:$0xf]  ;;  %v8196_v1 = vld [vmem:[#allocation2 + $0xec] sm:$0xf0] }
   0x6   :  { %v7096_v2 = vld [vmem:[#allocation2 + $0x1e0] sm:$0xf]  ;;  %v6969_v3 = vor.u32 %v8196_v1, %v6968_v0  ;;  %v8228_v4 = vld [vmem:[#allocation2 + $0x1ec] sm:$0xf0]  ;;  %vm1923_vm0 = vcmask 130048  }
   0x7   :  { %v7224_v5 = vld [vmem:[#allocation2 + $0x2e0] sm:$0xf]  ;;  %v8260_v6 = vld [vmem:[#allocation2 + $0x2ec] sm:$0xf0]  ;;  %v8563_v7 = vor.u32 %v8228_v4, %v7096_v2 }
   0x8   :  { %v8565_v8 = vor.u32 %v8260_v6, %v7224_v5  ;;  %v6952_v9 = vld [vmem:[#allocation2 + $0xc0] sm:$0xf]  ;;  %v8192_v10 = vld [vmem:[#allocation2 + $0xcc] sm:$0xf0]  ;;  %1972 = vmatpush.bf16.msra.mxu0 %v6969_v3  ;;  %8450 = vmatpush.bf16.msra.mxu3 %v6969_v3  ;;  %v8057_v6 = vld [vmem:[%s12078_s0 + $0x18] sm:$0xf0] }
   0x9   :  { %v7080_v11 = vld [vmem:[#allocation2 + $0x1c0] sm:$0xf]  ;;  %v6953_v12 = vor.u32 %v8192_v10, %v6952_v9  ;;  %v8224_v13 = vld [vmem:[#allocation2 + $0x1cc] sm:$0xf0]  ;;  %2061 = vmatpush.bf16.msra.mxu1 %v8563_v7 }
   0xa   :  { %v7208_v14 = vld [vmem:[#allocation2 + $0x2c0] sm:$0xf]  ;;  %v8256_v15 = vld [vmem:[#allocation2 + $0x2cc] sm:$0xf0]  ;;  %2150 = vmatpush.bf16.msra.mxu2 %v8565_v8  ;;  %v8569_v16 = vor.u32 %v8224_v13, %v7080_v11  ;;  %v8141_v11 = vld [vmem:[%s12078_s0 + $0x2b8] sm:$0xf0] }
   0xb   :  { %v8571_v17 = vor.u32 %v8256_v15, %v7208_v14  ;;  %v6936_v18 = vld [vmem:[#allocation2 + $0xa0] sm:$0xf]  ;;  %v8188_v19 = vld [vmem:[#allocation2 + $0xac] sm:$0xf0] }
   0xc   :  { %v7064_v20 = vld [vmem:[#allocation2 + $0x1a0] sm:$0xf]  ;;  %v8220_v21 = vld [vmem:[#allocation2 + $0x1ac] sm:$0xf0]  ;;  %1973 = vmatpush.bf16.msra.mxu0 %v6953_v12  ;;  %8451 = vmatpush.bf16.msra.mxu3 %v6953_v12  ;;  %v6937_v24 = vor.u32 %v8188_v19, %v6936_v18  ;;  %v8054_v12 = vld [vmem:[%s12078_s0 + $0x4] sm:$0xf] }
   0xd   :  { %v7192_v22 = vld [vmem:[#allocation2 + $0x2a0] sm:$0xf]  ;;  %v8252_v23 = vld [vmem:[#allocation2 + $0x2ac] sm:$0xf0]  ;;  %2062 = vmatpush.bf16.msra.mxu1 %v8569_v16  ;;  %v8575_v25 = vor.u32 %v8220_v21, %v7064_v20  ;;  %v6416_v18 = vld [vmem:[%s12078_s0 + $0x8] sm:$0xf] }
   0xe   :  { %2151 = vmatpush.bf16.msra.mxu2 %v8571_v17  ;;  %v8577_v26 = vor.u32 %v8252_v23, %v7192_v22  ;;  %v6920_v27 = vld [vmem:[#allocation2 + $0x80] sm:$0xf]  ;;  %v8184_v28 = vld [vmem:[#allocation2 + $0x8c] sm:$0xf0]  ;;  %v8058_v19 = vld [vmem:[%s12078_s0 + $0x20] sm:$0xf0] }
   0xf   :  { %v7048_v29 = vld [vmem:[#allocation2 + $0x180] sm:$0xf]  ;;  %v8216_v30 = vld [vmem:[#allocation2 + $0x18c] sm:$0xf0]  ;;  %v6921_v33 = vor.u32 %v8184_v28, %v6920_v27  ;;  %v8634_v23 = vor.u32 %v8058_v19, %v6416_v18  ;;  %v6772_v27 = vld [vmem:[%s12078_s0 + $0x2d8] sm:$0xf] }
  0x10   :  { %v7176_v31 = vld [vmem:[#allocation2 + $0x280] sm:$0xf]  ;;  %v8248_v32 = vld [vmem:[#allocation2 + $0x28c] sm:$0xf0]  ;;  %1974 = vmatpush.bf16.msra.mxu0 %v6937_v24  ;;  %8452 = vmatpush.bf16.msra.mxu3 %v6937_v24  ;;  %v8581_v34 = vor.u32 %v8216_v30, %v7048_v29  ;;  %v6436_v24 = vld [vmem:[%s12078_s0 + $0x38] sm:$0xf] }
  0x11   :  { %2063 = vmatpush.bf16.msra.mxu1 %v8575_v25  ;;  %v8583_v35 = vor.u32 %v8248_v32, %v7176_v31  ;;  %v6904_v36 = vld [vmem:[#allocation2 + $0x60] sm:$0xf]  ;;  %v8180_v37 = vld [vmem:[#allocation2 + $0x6c] sm:$0xf0]  ;;  %12371 = vst [vmem:[#allocation7_spill] sm:$0xff] %v8634_v23 }
  0x12   :  { %2152 = vmatpush.bf16.msra.mxu2 %v8577_v26  ;;  %v7032_v38 = vld [vmem:[#allocation2 + $0x160] sm:$0xf]  ;;  %v8212_v39 = vld [vmem:[#allocation2 + $0x16c] sm:$0xf0]  ;;  %v6905_v42 = vor.u32 %v8180_v37, %v6904_v36  ;;  %v8148_v28 = vld [vmem:[%s12078_s0 + $0x2f0] sm:$0xf0] }
  0x13   :  { %v7160_v40 = vld [vmem:[#allocation2 + $0x260] sm:$0xf]  ;;  %v8244_v41 = vld [vmem:[#allocation2 + $0x26c] sm:$0xf0]  ;;  %v8587_v43 = vor.u32 %v8212_v39, %v7032_v38  ;;  %v8065_v30 = vld [vmem:[%s12078_s0 + $0x58] sm:$0xf0]  ;;  %v8671_v32 = vor.u32 %v8148_v28, %v6772_v27 }
  0x14   :  { %1975 = vmatpush.bf16.msra.mxu0 %v6921_v33  ;;  %8453 = vmatpush.bf16.msra.mxu3 %v6921_v33  ;;  %v8589_v44 = vor.u32 %v8244_v41, %v7160_v40  ;;  %v6888_v45 = vld [vmem:[#allocation2 + $0x40] sm:$0xf]  ;;  %v8176_v46 = vld [vmem:[#allocation2 + $0x4c] sm:$0xf0]  ;;  %v8071_v37 = vld [vmem:[%s12078_s0 + $0x88] sm:$0xf0] }
  0x15   :  { %2064 = vmatpush.bf16.msra.mxu1 %v8581_v34  ;;  %v7016_v47 = vld [vmem:[#allocation2 + $0x140] sm:$0xf]  ;;  %v8208_v48 = vld [vmem:[#allocation2 + $0x14c] sm:$0xf0]  ;;  %v6889_v51 = vor.u32 %v8176_v46, %v6888_v45  ;;  %12373 = vst [vmem:[#allocation9_spill] sm:$0xff] %v8671_v32 }
  0x16   :  { %2153 = vmatpush.bf16.msra.mxu2 %v8583_v35  ;;  %v7144_v49 = vld [vmem:[#allocation2 + $0x240] sm:$0xf]  ;;  %v8240_v50 = vld [vmem:[#allocation2 + $0x24c] sm:$0xf0]  ;;  %v8593_v52 = vor.u32 %v8208_v48, %v7016_v47  ;;  %v8155_v39 = vld [vmem:[%s12078_s0 + $0x328] sm:$0xf0] }
  0x17   :  { %v8595_v53 = vor.u32 %v8240_v50, %v7144_v49  ;;  %v6872_v54 = vld [vmem:[#allocation2 + $0x20] sm:$0xf]  ;;  %v8172_v55 = vld [vmem:[#allocation2 + $0x2c] sm:$0xf0]  ;;  %v8068_v40 = vld [vmem:[%s12078_s0 + $0x74] sm:$0xf] }
  0x18   :  { %1976 = vmatpush.bf16.msra.mxu0 %v6905_v42  ;;  %8454 = vmatpush.bf16.msra.mxu3 %v6905_v42  ;;  %v7000_v56 = vld [vmem:[#allocation2 + $0x120] sm:$0xf]  ;;  %v8204_v57 = vld [vmem:[#allocation2 + $0x12c] sm:$0xf0]  ;;  %v6873_v60 = vor.u32 %v8172_v55, %v6872_v54  ;;  %v6472_v42 = vld [vmem:[%s12078_s0 + $0x78] sm:$0xf] }
  0x19   :  { %2065 = vmatpush.bf16.msra.mxu1 %v8587_v43  ;;  %v7128_v58 = vld [vmem:[#allocation2 + $0x220] sm:$0xf]  ;;  %v8236_v59 = vld [vmem:[#allocation2 + $0x22c] sm:$0xf0]  ;;  %v7001_v61 = vor.u32 %v8204_v57, %v7000_v56  ;;  %v8078_v49 = vld [vmem:[%s12078_s0 + $0xc0] sm:$0xf0] }
  0x1a   :  { %2154 = vmatpush.bf16.msra.mxu2 %v8589_v44  ;;  %v8599_v62 = vor.u32 %v8236_v59, %v7128_v58  ;;  %v6856_v63 = vld [vmem:[#allocation2] sm:$0xf]  ;;  %v8168_v0 = vld [vmem:[#allocation2 + $0xc] sm:$0xf0]  ;;  %v6828_v50 = vld [vmem:[%s12078_s0 + $0x348] sm:$0xf] }
  0x1b   :  { %v6984_v1 = vld [vmem:[#allocation2 + $0x100] sm:$0xf]  ;;  %v8200_v2 = vld [vmem:[#allocation2 + $0x10c] sm:$0xf0]  ;;  %v6857_v9 = vor.u32 %v8168_v0, %v6856_v63  ;;  %v8079_v54 = vld [vmem:[%s12078_s0 + $0xc8] sm:$0xf0] }
  0x1c   :  { %1977 = vmatpush.bf16.msra.mxu0 %v6889_v51  ;;  %8455 = vmatpush.bf16.msra.mxu3 %v6889_v51  ;;  %v7112_v3 = vld [vmem:[#allocation2 + $0x200] sm:$0xf]  ;;  %v8232_v4 = vld [vmem:[#allocation2 + $0x20c] sm:$0xf0]  ;;  %v6985_v13 = vor.u32 %v8200_v2, %v6984_v1  ;;  %v8162_v51 = vld [vmem:[%s12078_s0 + $0x360] sm:$0xf0] }
  0x1d   :  { %2066 = vmatpush.bf16.msra.mxu1 %v8593_v52  ;;  %v6408_v5 = vld [vmem:[%s12078_s0] sm:$0xf]  ;;  %v8617_v14 = vor.u32 %v8232_v4, %v7112_v3  ;;  %v6800_v38 = vld [vmem:[%s12078_s0 + $0x310] sm:$0xf]  ;;  %v8749_v56 = vor.u32 %v8162_v51, %v6828_v50  ;;  %v8082_v59 = vld [vmem:[%s12078_s0 + $0xe4] sm:$0xf] }
  0x1e   :  { %2155 = vmatpush.bf16.msra.mxu2 %v8595_v53  ;;  %v6744_v10 = vld [vmem:[%s12078_s0 + $0x2a0] sm:$0xf]  ;;  %v8628_v20 = vor.u32 %v8057_v6, %v6408_v5  ;;  %v6466_v41 = vld [vmem:[%s12078_s0 + $0x8c] sm:$0xf0]  ;;  %v8709_v46 = vor.u32 %v8155_v39, %v6800_v38  ;;  %v8086_v63 = vld [vmem:[%s12078_s0 + $0x100] sm:$0xf0] }
  0x1f   :  { %v6410_v15 = vld [vmem:[%s12078_s0 + $0x1c] sm:$0xf0]  ;;  %v8630_v21 = vor.u32 %v8141_v11, %v6744_v10  ;;  %v8712_v47 = vor.u32 %v8068_v40, %v6466_v41  ;;  %12380 = vst [vmem:[#allocation16_spill] sm:$0xff] %v8749_v56  ;;  %v6548_v4 = vld [vmem:[%s12078_s0 + $0x118] sm:$0xf] }
  0x20   :  { %1978 = vmatpush.bf16.msra.mxu0 %v6873_v60  ;;  %8456 = vmatpush.bf16.msra.mxu3 %v6873_v60  ;;  %12369 = vst [vmem:[#allocation5_spill] sm:$0xff] %v8628_v20  ;;  %v8632_v22 = vor.u32 %v8054_v12, %v6410_v15  ;;  %v6444_v29 = vld [vmem:[%s12078_s0 + $0x40] sm:$0xf]  ;;  %v8138_v60 = vld [vmem:[%s12078_s0 + $0x2a4] sm:$0xf] }
  0x21   :  { %2067 = vmatpush.bf16.msra.mxu1 %v7001_v61  ;;  %12370 = vst [vmem:[#allocation6_spill] sm:$0xff] %v8630_v21  ;;  %v8675_v36 = vor.u32 %v8065_v30, %v6444_v29  ;;  %v8092_v5 = vld [vmem:[%s12078_s0 + $0x130] sm:$0xf0]  ;;  %v8089_v6 = vld [vmem:[%s12078_s0 + $0x11c] sm:$0xf] }
  0x22   :  { %2156 = vmatpush.bf16.msra.mxu2 %v8599_v62  ;;  %12376 = vst [vmem:[#allocation12_spill] sm:$0xff] %v8709_v46  ;;  %v6774_v10 = vld [vmem:[%s12078_s0 + $0x2f4] sm:$0xf0]  ;;  %v6556_v12 = vld [vmem:[%s12078_s0 + $0x120] sm:$0xf] }
  0x23   :  { %12374 = vst [vmem:[#allocation10_spill] sm:$0xff] %v8675_v36  ;;  %v6550_v11 = vld [vmem:[%s12078_s0 + $0x134] sm:$0xf0]  ;;  %v8096_v27 = vld [vmem:[%s12078_s0 + $0x154] sm:$0xf] }
  0x24   :  { %1979 = vmatpush.bf16.msra.mxu0 %v6857_v9  ;;  %8457 = vmatpush.bf16.msra.mxu3 %v6857_v9  ;;  %12377 = vst [vmem:[#allocation13_spill] sm:$0xff] %v8712_v47  ;;  %v8145_v9 = vld [vmem:[%s12078_s0 + $0x2dc] sm:$0xf]  ;;  %v8827_v18 = vor.u32 %v8089_v6, %v6550_v11  ;;  %v8152_v28 = vld [vmem:[%s12078_s0 + $0x314] sm:$0xf] }
  0x25   :  { %2068 = vmatpush.bf16.msra.mxu1 %v6985_v13  ;;  %v8825_v15 = vor.u32 %v8145_v9, %v6774_v10  ;;  %v6584_v29 = vld [vmem:[%s12078_s0 + $0x158] sm:$0xf]  ;;  %v8100_v30 = vld [vmem:[%s12078_s0 + $0x170] sm:$0xf0]  ;;  %v7352_v40 = vld [vmem:[#allocation2 + $0x3e0] sm:$0xf] }
  0x26   :  { %2157 = vmatpush.bf16.msra.mxu2 %v8617_v14  ;;  %12389 = vst [vmem:[#allocation25_spill] sm:$0xff] %v8827_v18  ;;  %v8865_v39 = vor.u32 %v8100_v30, %v6584_v29  ;;  %v8292_v41 = vld [vmem:[#allocation2 + $0x3ec] sm:$0xf0]  ;;  %v8103_v51 = vld [vmem:[%s12078_s0 + $0x18c] sm:$0xf] }
  0x27   :  { %1980 = vmatmul.bf16.vlgmr.msra.gmra.mxu0 %v8628_v20  ;;  %2040 = vmatmul.bf16.vlgmr.msra.gmra.mxu3 %v8630_v21  ;;  %12388 = vst [vmem:[#allocation24_spill] sm:$0xff] %v8825_v15  ;;  %v8288_v50 = vld [vmem:[#allocation2 + $0x3cc] sm:$0xf0]  ;;  %v7608_v9 = vld [vmem:[#allocation2 + $0x5e0] sm:$0xf] }
  0x28   :  { %8458 = vmatpush.bf16.msrb.mxu3 %v8563_v7  ;;  %2069 = vmatmul.bf16.vlgmr.msra.gmra.mxu1 %v8632_v22  ;;  %v8064_v7 = vld [vmem:[%s12078_s0 + $0x50] sm:$0xf0]  ;;  %12394 = vst [vmem:[#allocation30_spill] sm:$0xff] %v8865_v39  ;;  %v8324_v6 = vld [vmem:[#allocation2 + $0x4ec] sm:$0xf0] }
  0x29   :  { %2158 = vmatmul.bf16.vlgmr.msra.gmra.mxu2 %v8634_v23  ;;  %v8669_v31 = vor.u32 %v8064_v7, %v6436_v24  ;;  %v6576_v24 = vld [vmem:[%s12078_s0 + $0x150] sm:$0xf]  ;;  %v8099_v7 = vld [vmem:[%s12078_s0 + $0x168] sm:$0xf0]  ;;  %v8142_v29 = vld [vmem:[%s12078_s0 + $0x2c0] sm:$0xf0] }
  0x2a   :  { %v8356_v10 = vld [vmem:[#allocation2 + $0x5ec] sm:$0xf0] }
  0x2b   :  { %12372 = vst [vmem:[#allocation8_spill] sm:$0xff] %v8669_v31 }
  0x2c   :  { %8459 = vmatpush.bf16.msrb.mxu3 %v8569_v16  ;;  %v8061_v16 = vld [vmem:[%s12078_s0 + $0x3c] sm:$0xf] }
  0x30   :  { %8460 = vmatpush.bf16.msrb.mxu3 %v8575_v25  ;;  %v6438_v25 = vld [vmem:[%s12078_s0 + $0x54] sm:$0xf0] }
  0x31   :  { %v8673_v33 = vor.u32 %v8061_v16, %v6438_v25  ;;  %v6802_v16 = vld [vmem:[%s12078_s0 + $0x32c] sm:$0xf0] }
  0x32   :  { %v6578_v25 = vld [vmem:[%s12078_s0 + $0x16c] sm:$0xf0] }
  0x33   :  { %v8863_v38 = vor.u32 %v8096_v27, %v6578_v25  ;;  %v7304_v27 = vld [vmem:[#allocation2 + $0x380] sm:$0xf]  ;;  %v6752_v25 = vld [vmem:[%s12078_s0 + $0x2a8] sm:$0xf] }
  0x34   :  { %8461 = vmatpush.bf16.msrb.mxu3 %v8581_v34  ;;  %v6464_v34 = vld [vmem:[%s12078_s0 + $0x70] sm:$0xf] }
  0x35   :  { %v8707_v45 = vor.u32 %v8071_v37, %v6464_v34  ;;  %v8859_v34 = vor.u32 %v8099_v7, %v6576_v24  ;;  %v8861_v37 = vor.u32 %v8152_v28, %v6802_v16  ;;  %12393 = vst [vmem:[#allocation29_spill] sm:$0xff] %v8863_v38  ;;  %v6632_v24 = vld [vmem:[%s12078_s0 + $0x1c0] sm:$0xf]  ;;  %v8113_v7 = vld [vmem:[%s12078_s0 + $0x1d8] sm:$0xf0] }
  0x36   :  { %v8280_v28 = vld [vmem:[#allocation2 + $0x38c] sm:$0xf0]  ;;  %v8110_v16 = vld [vmem:[%s12078_s0 + $0x1c4] sm:$0xf] }
  0x37   :  { %1985 = vmatmul.bf16.gmra.mxu0 %v8669_v31  ;;  %2045 = vmatmul.bf16.gmra.mxu3 %v8671_v32  ;;  %12375 = vst [vmem:[#allocation11_spill] sm:$0xff] %v8707_v45  ;;  %v7305_v30 = vor.u32 %v8280_v28, %v7304_v27  ;;  %v6660_v28 = vld [vmem:[%s12078_s0 + $0x1f8] sm:$0xf] }
  0x38   :  { %8462 = vmatpush.bf16.msrb.mxu3 %v8587_v43  ;;  %2074 = vmatmul.bf16.gmra.mxu1 %v8673_v33  ;;  %v8072_v43 = vld [vmem:[%s12078_s0 + $0x90] sm:$0xf0]  ;;  %12391 = vst [vmem:[#allocation27_spill] sm:$0xff] %v8859_v34 }
  0x39   :  { %2163 = vmatmul.bf16.gmra.mxu2 %v8675_v36  ;;  %v8714_v48 = vor.u32 %v8072_v43, %v6472_v42  ;;  %12392 = vst [vmem:[#allocation28_spill] sm:$0xff] %v8861_v37  ;;  %v7353_v42 = vor.u32 %v8292_v41, %v7352_v40  ;;  %v6604_v43 = vld [vmem:[%s12078_s0 + $0x188] sm:$0xf]  ;;  %v6634_v40 = vld [vmem:[%s12078_s0 + $0x1dc] sm:$0xf0] }
  0x3a   :  { %v6640_v41 = vld [vmem:[%s12078_s0 + $0x1c8] sm:$0xf] }
  0x3b   :  { %12378 = vst [vmem:[#allocation14_spill] sm:$0xff] %v8714_v48 }
  0x3c   :  { %8463 = vmatpush.bf16.msrb.mxu3 %v8593_v52  ;;  %v6500_v52 = vld [vmem:[%s12078_s0 + $0xb0] sm:$0xf] }
  0x3d   :  { %v8753_v58 = vor.u32 %v8079_v54, %v6500_v52  ;;  %v6606_v54 = vld [vmem:[%s12078_s0 + $0x1a4] sm:$0xf0] }
  0x3f   :  { %12382 = vst [vmem:[#allocation18_spill] sm:$0xff] %v8753_v58 }
  0x40   :  { %8464 = vmatpush.bf16.msrb.mxu3 %v7001_v61  ;;  %v6522_v61 = vld [vmem:[%s12078_s0 + $0xfc] sm:$0xf0] }
  0x41   :  { %v8791_v2 = vor.u32 %v8082_v59, %v6522_v61 }
  0x43   :  { %12385 = vst [vmem:[#allocation21_spill] sm:$0xff] %v8791_v2 }
  0x44   :  { %8465 = vmatpush.bf16.msrb.mxu3 %v6985_v13  ;;  %v8093_v13 = vld [vmem:[%s12078_s0 + $0x138] sm:$0xf0] }
  0x45   :  { %v8829_v19 = vor.u32 %v8093_v13, %v6556_v12  ;;  %v7609_v12 = vor.u32 %v8356_v10, %v7608_v9  ;;  %v373_v13 = vld [vmem:[%s12080_s2] sm:$0xf] }
  0x47   :  { %1990 = vmatmul.bf16.gmra.mxu0 %v8707_v45  ;;  %2050 = vmatmul.bf16.gmra.mxu3 %v8709_v46  ;;  %12390 = vst [vmem:[#allocation26_spill] sm:$0xff] %v8829_v19  ;;  %v7624_v46 = vld [vmem:[#allocation2 + $0x600] sm:$0xf] }
  0x48   :  { %8466 = vmatpush.bf16.msra.mxu3 %v8565_v8  ;;  %2079 = vmatmul.bf16.gmra.mxu1 %v8712_v47  ;;  %v6492_v8 = vld [vmem:[%s12078_s0 + $0xa8] sm:$0xf] }
  0x49   :  { %2168 = vmatmul.bf16.gmra.mxu2 %v8714_v48  ;;  %v8747_v55 = vor.u32 %v8078_v49, %v6492_v8  ;;  %v8106_v8 = vld [vmem:[%s12078_s0 + $0x1a0] sm:$0xf0]  ;;  %v7336_v49 = vld [vmem:[#allocation2 + $0x3c0] sm:$0xf]  ;;  %2417 = vmatpush.bf16.msrb.mxu1 %v7609_v12 }
  0x4a   :  { %v7337_v52 = vor.u32 %v8288_v50, %v7336_v49  ;;  %v8895_v59 = vor.u32 %v8106_v8, %v6604_v43  ;;  %v8934_v43 = vperm.slane %v373_v13, 0  ;;  %v8936_v8 = vor.u32 %v8113_v7, %v6632_v24 }
  0x4b   :  { %12379 = vst [vmem:[#allocation15_spill] sm:$0xff] %v8747_v55  ;;  %v8938_v49 = vor.u32 %v8142_v29, %v6752_v25  ;;  %v7448_v25 = vld [vmem:[#allocation2 + $0x4a0] sm:$0xf]  ;;  %v8316_v29 = vld [vmem:[#allocation2 + $0x4ac] sm:$0xf0] }
  0x4c   :  { %8467 = vmatpush.bf16.msra.mxu3 %v8571_v17  ;;  %v8075_v17 = vld [vmem:[%s12078_s0 + $0xac] sm:$0xf]  ;;  %12395 = vst [vmem:[#allocation31_spill] sm:$0xff] %v8895_v59 }
  0x4d   :  { %12399 = vst [vmem:[#allocation35_spill] sm:$0xff] %v8936_v8 }
  0x4e   :  { %12400 = vst [vmem:[#allocation36_spill] sm:$0xff] %v8938_v49 }
  0x50   :  { %8468 = vmatpush.bf16.msra.mxu3 %v8577_v26  ;;  %v6494_v26 = vld [vmem:[%s12078_s0 + $0xc4] sm:$0xf0] }
  0x51   :  { %v8751_v57 = vor.u32 %v8075_v17, %v6494_v26  ;;  %v8159_v17 = vld [vmem:[%s12078_s0 + $0x34c] sm:$0xf]  ;;  %v6830_v26 = vld [vmem:[%s12078_s0 + $0x364] sm:$0xf0] }
  0x53   :  { %12381 = vst [vmem:[#allocation17_spill] sm:$0xff] %v8751_v57 }
  0x54   :  { %8469 = vmatpush.bf16.msra.mxu3 %v8583_v35  ;;  %v6520_v35 = vld [vmem:[%s12078_s0 + $0xe0] sm:$0xf] }
  0x57   :  { %1995 = vmatmul.bf16.gmra.mxu0 %v8747_v55  ;;  %2055 = vmatmul.bf16.gmra.mxu3 %v8749_v56  ;;  %v7368_v56 = vld [vmem:[#allocation2 + $0x400] sm:$0xf] }
  0x58   :  { %8470 = vmatpush.bf16.msra.mxu3 %v8589_v44  ;;  %2084 = vmatmul.bf16.gmra.mxu1 %v8751_v57  ;;  %v8085_v44 = vld [vmem:[%s12078_s0 + $0xf8] sm:$0xf0] }
  0x59   :  { %2173 = vmatmul.bf16.gmra.mxu2 %v8753_v58  ;;  %v8787_v0 = vor.u32 %v8085_v44, %v6520_v35  ;;  %v6612_v35 = vld [vmem:[%s12078_s0 + $0x190] sm:$0xf]  ;;  %v8107_v44 = vld [vmem:[%s12078_s0 + $0x1a8] sm:$0xf0] }
  0x5a   :  { %v8901_v61 = vor.u32 %v8107_v44, %v6612_v35  ;;  %v7288_v35 = vld [vmem:[#allocation2 + $0x360] sm:$0xf]  ;;  %v8276_v44 = vld [vmem:[#allocation2 + $0x36c] sm:$0xf0] }
  0x5b   :  { %12383 = vst [vmem:[#allocation19_spill] sm:$0xff] %v8787_v0 }
  0x5c   :  { %8471 = vmatpush.bf16.msra.mxu3 %v8595_v53  ;;  %v6746_v53 = vld [vmem:[%s12078_s0 + $0x2bc] sm:$0xf0]  ;;  %12398 = vst [vmem:[#allocation34_spill] sm:$0xff] %v8901_v61 }
  0x5d   :  { %v8789_v1 = vor.u32 %v8138_v60, %v6746_v53  ;;  %v8897_v60 = vor.u32 %v8159_v17, %v6830_v26  ;;  %v8899_v53 = vor.u32 %v8103_v51, %v6606_v54  ;;  %v8940_v51 = vor.u32 %v8110_v16, %v6634_v40  ;;  %v8120_v16 = vld [vmem:[%s12078_s0 + $0x210] sm:$0xf0] }
  0x5f   :  { %12384 = vst [vmem:[#allocation20_spill] sm:$0xff] %v8789_v1 }
  0x60   :  { %8472 = vmatpush.bf16.msra.mxu3 %v8599_v62  ;;  %v6528_v62 = vld [vmem:[%s12078_s0 + $0xe8] sm:$0xf]  ;;  %12396 = vst [vmem:[#allocation32_spill] sm:$0xff] %v8897_v60 }
  0x61   :  { %v8793_v3 = vor.u32 %v8086_v63, %v6528_v62  ;;  %12397 = vst [vmem:[#allocation33_spill] sm:$0xff] %v8899_v53  ;;  %v7320_v62 = vld [vmem:[#allocation2 + $0x3a0] sm:$0xf]  ;;  %v8284_v63 = vld [vmem:[#allocation2 + $0x3ac] sm:$0xf0] }
  0x62   :  { %12401 = vst [vmem:[#allocation37_spill] sm:$0xff] %v8940_v51 }
  0x63   :  { %12386 = vst [vmem:[#allocation22_spill] sm:$0xff] %v8793_v3 }
  0x64   :  { %8473 = vmatpush.bf16.msra.mxu3 %v8617_v14  ;;  %v8823_v14 = vor.u32 %v8092_v5, %v6548_v4  ;;  %v7480_v4 = vld [vmem:[#allocation2 + $0x4e0] sm:$0xf]  ;;  %v7321_v5 = vor.u32 %v8284_v63, %v7320_v62  ;;  %v7289_v62 = vor.u32 %v8276_v44, %v7288_v35  ;;  %v8149_v35 = vld [vmem:[%s12078_s0 + $0x2f8] sm:$0xf0] }
  0x65   :  { %v7481_v11 = vor.u32 %v8324_v6, %v7480_v4  ;;  %v7464_v4 = vld [vmem:[#allocation2 + $0x4c0] sm:$0xf] }
  0x66   :  { %12387 = vst [vmem:[#allocation23_spill] sm:$0xff] %v8823_v14  ;;  %v7592_v6 = vld [vmem:[#allocation2 + $0x5c0] sm:$0xf] }
  0x67   :  { %2000 = vmatmul.bf16.gmra.mxu0 %v8787_v0  ;;  %2129 = vmatmul.bf16.vlgmr.msrb.gmra.mxu3 %v8789_v1 }
  0x68   :  { %2089 = vmatmul.bf16.gmra.mxu1 %v8791_v2  ;;  %2239 = vmatpush.bf16.msrb.mxu3 %v7353_v42  ;;  %v8114_v42 = vld [vmem:[%s12078_s0 + $0x1e0] sm:$0xf0] }
  0x69   :  { %2178 = vmatmul.bf16.gmra.mxu2 %v8793_v3  ;;  %2328 = vmatpush.bf16.msrb.mxu0 %v7481_v11  ;;  %v8942_v17 = vor.u32 %v8114_v42, %v6640_v41  ;;  %v8352_v11 = vld [vmem:[#allocation2 + $0x5cc] sm:$0xf0]  ;;  %v7272_v41 = vld [vmem:[#allocation2 + $0x340] sm:$0xf] }
  0x6a   :  { %v7593_v24 = vor.u32 %v8352_v11, %v7592_v6  ;;  %v8272_v42 = vld [vmem:[#allocation2 + $0x34c] sm:$0xf0]  ;;  %v8121_v6 = vld [vmem:[%s12078_s0 + $0x218] sm:$0xf0] }
  0x6b   :  { %12402 = vst [vmem:[#allocation38_spill] sm:$0xff] %v8942_v17  ;;  %v7273_v44 = vor.u32 %v8272_v42, %v7272_v41  ;;  %v8312_v11 = vld [vmem:[#allocation2 + $0x48c] sm:$0xf0] }
  0x6c   :  { %2240 = vmatpush.bf16.msrb.mxu3 %v7337_v52  ;;  %2418 = vmatpush.bf16.msrb.mxu1 %v7593_v24 }
  0x70   :  { %2241 = vmatpush.bf16.msrb.mxu3 %v7321_v5  ;;  %v8320_v5 = vld [vmem:[#allocation2 + $0x4cc] sm:$0xf0] }
  0x71   :  { %v7465_v10 = vor.u32 %v8320_v5, %v7464_v4  ;;  %v6662_v4 = vld [vmem:[%s12078_s0 + $0x214] sm:$0xf0]  ;;  %v6668_v5 = vld [vmem:[%s12078_s0 + $0x200] sm:$0xf] }
  0x73   :  { %2329 = vmatpush.bf16.msrb.mxu0 %v7465_v10  ;;  %v7432_v10 = vld [vmem:[#allocation2 + $0x480] sm:$0xf] }
  0x74   :  { %2242 = vmatpush.bf16.msrb.mxu3 %v7305_v30  ;;  %v7576_v30 = vld [vmem:[#allocation2 + $0x5a0] sm:$0xf] }
  0x77   :  { %2005 = vmatmul.bf16.gmra.mxu0 %v8823_v14  ;;  %2134 = vmatmul.bf16.gmra.mxu3 %v8825_v15 }
  0x78   :  { %2094 = vmatmul.bf16.gmra.mxu1 %v8827_v18  ;;  %2243 = vmatpush.bf16.msrb.mxu3 %v7289_v62 }
  0x79   :  { %2183 = vmatmul.bf16.gmra.mxu2 %v8829_v19 }
  0x7c   :  { %2244 = vmatpush.bf16.msrb.mxu3 %v7273_v44 }
  0x87   :  { %2010 = vmatmul.bf16.gmra.mxu0 %v8859_v34  ;;  %2139 = vmatmul.bf16.gmra.mxu3 %v8861_v37  ;;  %v8296_v37 = vld [vmem:[#allocation2 + $0x40c] sm:$0xf0] }
  0x88   :  { %2099 = vmatmul.bf16.gmra.mxu1 %v8863_v38 }
  0x89   :  { %2188 = vmatmul.bf16.gmra.mxu2 %v8865_v39 }
  0x97   :  { %2015 = vmatmul.bf16.gmra.mxu0 %v8895_v59  ;;  %2144 = vmatmul.bf16.gmra.mxu3 %v8897_v60 }
  0x98   :  { %2104 = vmatmul.bf16.gmra.mxu1 %v8899_v53 }
  0x99   :  { %2193 = vmatmul.bf16.gmra.mxu2 %v8901_v61 }
  0xa4   :  { %v1981_v50 = vpop.f32.mrf.mxu0 }
  0xa5   :  { %v1982_v26 = vadd.f32 %v1981_v50, %v8934_v43  ;;  %v2070_v52 = vpop.f32.mrf.mxu1  ;;  %v7449_v50 = vor.u32 %v8316_v29, %v7448_v25  ;;  %v7433_v25 = vor.u32 %v8312_v11, %v7432_v10  ;;  %v8344_v29 = vld [vmem:[#allocation2 + $0x58c] sm:$0xf0]  ;;  %v7400_v11 = vld [vmem:[#allocation2 + $0x440] sm:$0xf] }
  0xa7   :  { %v2071_v54 = vadd.f32 %v2070_v52, %v1982_v26  ;;  %2020 = vmatmul.bf16.gmra.mxu0 %v8936_v8  ;;  %2218 = vmatmul.bf16.vlgmr.msra.gmra.mxu3 %v8938_v49  ;;  %v8348_v26 = vld [vmem:[#allocation2 + $0x5ac] sm:$0xf0]  ;;  %v8117_v52 = vld [vmem:[%s12078_s0 + $0x1fc] sm:$0xf] }
  0xa8   :  { %2109 = vmatmul.bf16.gmra.mxu1 %v8940_v51  ;;  %v7577_v62 = vor.u32 %v8348_v26, %v7576_v30  ;;  %2330 = vmatpush.bf16.msrb.mxu0 %v7449_v50  ;;  %v8986_v42 = vor.u32 %v8117_v52, %v6662_v4  ;;  %v8988_v50 = vor.u32 %v8121_v6, %v6668_v5  ;;  %v8308_v52 = vld [vmem:[#allocation2 + $0x46c] sm:$0xf0]  ;;  %v7544_v4 = vld [vmem:[#allocation2 + $0x560] sm:$0xf] }
  0xa9   :  { %2198 = vmatmul.bf16.gmra.mxu2 %v8942_v17  ;;  %v8340_v5 = vld [vmem:[#allocation2 + $0x56c] sm:$0xf0] }
  0xaa   :  { %v8949_v63 = vpop.f32.mrf.mxu3  ;;  %2419 = vmatpush.bf16.msrb.mxu1 %v7577_v62  ;;  %12405 = vst [vmem:[#allocation41_spill] sm:$0xff] %v8986_v42  ;;  %v7545_v10 = vor.u32 %v8340_v5, %v7544_v4  ;;  %v7512_v4 = vld [vmem:[#allocation2 + $0x520] sm:$0xf] }
  0xab   :  { %12406 = vst [vmem:[#allocation42_spill] sm:$0xff] %v8988_v50 }
  0xac   :  { %v2159_v9 = vpop.f32.mrf.mxu2  ;;  %v1983_v13 = vpop.f32.mrf.mxu0  ;;  %2331 = vmatpush.bf16.msrb.mxu0 %v7433_v25 }
  0xad   :  { %v8951_v12 = vadd.f32 %v2159_v9, %v2071_v54  ;;  %v1984_v7 = vadd.f32 %v1983_v13, %v8934_v43  ;;  %v2072_v27 = vpop.f32.mrf.mxu1  ;;  %v6780_v54 = vld [vmem:[%s12078_s0 + $0x2e0] sm:$0xf] }
  0xae   :  { %v7560_v13 = vld [vmem:[#allocation2 + $0x580] sm:$0xf] }
  0xaf   :  { %v2073_v40 = vadd.f32 %v2072_v27, %v1984_v7  ;;  %v8980_v7 = vor.u32 %v8120_v16, %v6660_v28  ;;  %v8982_v27 = vor.u32 %v8149_v35, %v6780_v54  ;;  %v7561_v26 = vor.u32 %v8344_v29, %v7560_v13  ;;  %v7416_v28 = vld [vmem:[#allocation2 + $0x460] sm:$0xf]  ;;  %v8304_v13 = vld [vmem:[#allocation2 + $0x44c] sm:$0xf0] }
  0xb0   :  { %v7256_v16 = vld [vmem:[#allocation2 + $0x320] sm:$0xf]  ;;  %v7417_v35 = vor.u32 %v8308_v52, %v7416_v28  ;;  %v7401_v29 = vor.u32 %v8304_v13, %v7400_v11  ;;  %v8127_v52 = vld [vmem:[%s12078_s0 + $0x248] sm:$0xf0]  ;;  %v8264_v11 = vld [vmem:[#allocation2 + $0x30c] sm:$0xf0] }
  0xb1   :  { %12403 = vst [vmem:[#allocation39_spill] sm:$0xff] %v8980_v7  ;;  %2420 = vmatpush.bf16.msrb.mxu1 %v7561_v26  ;;  %v8332_v13 = vld [vmem:[#allocation2 + $0x52c] sm:$0xf0] }
  0xb2   :  { %v8978_v9 = vpop.f32.mrf.mxu3  ;;  %12404 = vst [vmem:[#allocation40_spill] sm:$0xff] %v8982_v27  ;;  %2332 = vmatpush.bf16.msrb.mxu0 %v7417_v35  ;;  %v8300_v35 = vld [vmem:[#allocation2 + $0x42c] sm:$0xf0] }
  0xb4   :  { %v2161_v24 = vpop.f32.mrf.mxu2  ;;  %v1986_v41 = vpop.f32.mrf.mxu0 }
  0xb5   :  { %v8984_v30 = vadd.f32 %v2161_v24, %v2073_v40  ;;  %v1987_v44 = vadd.f32 %v1986_v41, %v8934_v43  ;;  %v2075_v62 = vpop.f32.mrf.mxu1  ;;  %v8268_v40 = vld [vmem:[#allocation2 + $0x32c] sm:$0xf0]  ;;  %v7528_v24 = vld [vmem:[#allocation2 + $0x540] sm:$0xf]  ;;  %2421 = vmatpush.bf16.msrb.mxu1 %v7545_v10 }
  0xb6   :  { %v7257_v54 = vor.u32 %v8268_v40, %v7256_v16  ;;  %v8336_v41 = vld [vmem:[#allocation2 + $0x54c] sm:$0xf0]  ;;  %2333 = vmatpush.bf16.msrb.mxu0 %v7401_v29 }
  0xb7   :  { %v2076_v60 = vadd.f32 %v2075_v62, %v1987_v44  ;;  %2025 = vmatmul.bf16.gmra.mxu0 %v8980_v7  ;;  %2223 = vmatmul.bf16.gmra.mxu3 %v8982_v27  ;;  %v7529_v62 = vor.u32 %v8336_v41, %v7528_v24  ;;  %v6688_v40 = vld [vmem:[%s12078_s0 + $0x230] sm:$0xf]  ;;  %v8124_v24 = vld [vmem:[%s12078_s0 + $0x234] sm:$0xf] }
  0xb8   :  { %2114 = vmatmul.bf16.gmra.mxu1 %v8986_v42  ;;  %2245 = vmatpush.bf16.msrb.mxu3 %v7257_v54  ;;  %v7384_v54 = vld [vmem:[#allocation2 + $0x420] sm:$0xf]  ;;  %v8156_v41 = vld [vmem:[%s12078_s0 + $0x330] sm:$0xf0]  ;;  %v6690_v29 = vld [vmem:[%s12078_s0 + $0x24c] sm:$0xf0] }
  0xb9   :  { %2203 = vmatmul.bf16.gmra.mxu2 %v8988_v50  ;;  %v7385_v10 = vor.u32 %v8300_v35, %v7384_v54  ;;  %2422 = vmatpush.bf16.msrb.mxu1 %v7529_v62  ;;  %v8128_v54 = vld [vmem:[%s12078_s0 + $0x250] sm:$0xf0]  ;;  %v7496_v62 = vld [vmem:[#allocation2 + $0x500] sm:$0xf]  ;;  %v8360_v27 = vld [vmem:[#allocation2 + $0x60c] sm:$0xf0]  ;;  %v9032_v49 = vor.u32 %v8124_v24, %v6690_v29 }
  0xba   :  { %v8995_v6 = vpop.f32.mrf.mxu3  ;;  %v8131_v29 = vld [vmem:[%s12078_s0 + $0x26c] sm:$0xf] }
  0xbb   :  { %2334 = vmatpush.bf16.msrb.mxu0 %v7385_v10  ;;  %12409 = vst [vmem:[#allocation45_spill] sm:$0xff] %v9032_v49  ;;  %v6970_v10 = vld [vmem:[#allocation2 + $0xf0] sm:$0xf0] }
  0xbc   :  { %v2164_v25 = vpop.f32.mrf.mxu2  ;;  %v1988_v44 = vpop.f32.mrf.mxu0 }
  0xbd   :  { %v8997_v26 = vadd.f32 %v2164_v25, %v2076_v60  ;;  %v1989_v28 = vadd.f32 %v1988_v44, %v8934_v43  ;;  %v2077_v16 = vpop.f32.mrf.mxu1  ;;  %v7240_v60 = vld [vmem:[#allocation2 + $0x300] sm:$0xf]  ;;  %v6808_v25 = vld [vmem:[%s12078_s0 + $0x318] sm:$0xf] }
  0xbe   :  { %v7241_v44 = vor.u32 %v8264_v11, %v7240_v60  ;;  %v9028_v11 = vor.u32 %v8156_v41, %v6808_v25  ;;  %v6716_v41 = vld [vmem:[%s12078_s0 + $0x268] sm:$0xf] }
  0xbf   :  { %v2078_v5 = vadd.f32 %v2077_v16, %v1989_v28  ;;  %v7513_v28 = vor.u32 %v8332_v13, %v7512_v4  ;;  %v6696_v16 = vld [vmem:[%s12078_s0 + $0x238] sm:$0xf]  ;;  %v9026_v4 = vor.u32 %v8127_v52, %v6688_v40  ;;  %v8328_v13 = vld [vmem:[#allocation2 + $0x50c] sm:$0xf0]  ;;  %v7369_v40 = vor.u32 %v8296_v37, %v7368_v56 }
  0xc0   :  { %2246 = vmatpush.bf16.msrb.mxu3 %v7241_v44  ;;  %12408 = vst [vmem:[#allocation44_spill] sm:$0xff] %v9028_v11  ;;  %v9034_v1 = vor.u32 %v8128_v54, %v6696_v16  ;;  %v7625_v44 = vor.u32 %v8360_v27, %v7624_v46  ;;  %v7497_v52 = vor.u32 %v8328_v13, %v7496_v62  ;;  %v6836_v16 = vld [vmem:[%s12078_s0 + $0x350] sm:$0xf]  ;;  %v8163_v54 = vld [vmem:[%s12078_s0 + $0x368] sm:$0xf0] }
  0xc1   :  { %12407 = vst [vmem:[#allocation43_spill] sm:$0xff] %v9026_v4  ;;  %2423 = vmatpush.bf16.msrb.mxu1 %v7513_v28  ;;  %2335 = vmatpush.bf16.msrb.mxu0 %v7369_v40  ;;  %v8134_v28 = vld [vmem:[%s12078_s0 + $0x280] sm:$0xf0]  ;;  %v6718_v62 = vld [vmem:[%s12078_s0 + $0x284] sm:$0xf0] }
  0xc2   :  { %v9024_v35 = vpop.f32.mrf.mxu3  ;;  %12410 = vst [vmem:[#allocation46_spill] sm:$0xff] %v9034_v1  ;;  %2513 = vmatpush.bf16.msrb.mxu2 %v7625_v44  ;;  %v8135_v13 = vld [vmem:[%s12078_s0 + $0x288] sm:$0xf0] }
  0xc4   :  { %v2166_v60 = vpop.f32.mrf.mxu2  ;;  %v1991_v32 = vpop.f32.mrf.mxu0 }
  0xc5   :  { %v9030_v15 = vadd.f32 %v2166_v60, %v2078_v5  ;;  %v1992_v21 = vadd.f32 %v1991_v32, %v8934_v43  ;;  %v2080_v50 = vpop.f32.mrf.mxu1  ;;  %v8194_v5 = vld [vmem:[#allocation2 + $0xe4] sm:$0xf]  ;;  %2424 = vmatpush.bf16.msrb.mxu1 %v7497_v52  ;;  %v6724_v60 = vld [vmem:[%s12078_s0 + $0x270] sm:$0xf]  ;;  %v9072_v52 = vor.u32 %v8134_v28, %v6716_v41 }
  0xc6   :  { %v6973_v46 = vor.u32 %v8194_v5, %v6970_v10 }
  0xc7   :  { %v2081_v25 = vadd.f32 %v2080_v50, %v1992_v21  ;;  %2030 = vmatmul.bf16.gmra.mxu0 %v9026_v4  ;;  %2228 = vmatmul.bf16.gmra.mxu3 %v9028_v11  ;;  %12411 = vst [vmem:[#allocation47_spill] sm:$0xff] %v9072_v52 }
  0xc8   :  { %2119 = vmatmul.bf16.gmra.mxu1 %v9032_v49  ;;  %2595 = vmatpush.bf16.msra.mxu3 %v6973_v46  ;;  %v9078_v46 = vor.u32 %v8131_v29, %v6718_v62 }
  0xc9   :  { %2208 = vmatmul.bf16.gmra.mxu2 %v9034_v1 }
  0xca   :  { %v9041_v27 = vpop.f32.mrf.mxu3  ;;  %12413 = vst [vmem:[#allocation49_spill] sm:$0xff] %v9078_v46 }
  0xcc   :  { %v2169_v32 = vpop.f32.mrf.mxu2  ;;  %v1993_v21 = vpop.f32.mrf.mxu0 }
  0xcd   :  { %v9043_v56 = vadd.f32 %v2169_v32, %v2081_v25  ;;  %v1994_v37 = vadd.f32 %v1993_v21, %v8934_v43  ;;  %v2082_v50 = vpop.f32.mrf.mxu1  ;;  %v9074_v25 = vor.u32 %v8163_v54, %v6836_v16  ;;  %v9080_v32 = vor.u32 %v8135_v13, %v6724_v60  ;;  %v8055_v60 = vld [vmem:[%s12078_s0 + $0xc] sm:$0xf]  ;;  %v6418_v13 = vld [vmem:[%s12078_s0 + $0x24] sm:$0xf0] }
  0xcf   :  { %v2083_v24 = vadd.f32 %v2082_v50, %v1994_v37  ;;  %12412 = vst [vmem:[#allocation48_spill] sm:$0xff] %v9074_v25 }
  0xd0   :  { %12414 = vst [vmem:[#allocation50_spill] sm:$0xff] %v9080_v32 }
  0xd2   :  { %v9070_v44 = vpop.f32.mrf.mxu3 }
  0xd4   :  { %v2171_v40 = vpop.f32.mrf.mxu2  ;;  %v1996_v10 = vpop.f32.mrf.mxu0 }
  0xd5   :  { %v9076_v5 = vadd.f32 %v2171_v40, %v2083_v24  ;;  %v1997_v21 = vadd.f32 %v1996_v10, %v8934_v43  ;;  %v2085_v37 = vpop.f32.mrf.mxu1  ;;  %v6424_v40 = vld [vmem:[%s12078_s0 + $0x10] sm:$0xf]  ;;  %v8059_v10 = vld [vmem:[%s12078_s0 + $0x28] sm:$0xf0] }
  0xd7   :  { %v2086_v50 = vadd.f32 %v2085_v37, %v1997_v21  ;;  %2035 = vmatmul.bf16.gmra.mxu0 %v9072_v52  ;;  %2233 = vmatmul.bf16.gmra.mxu3 %v9074_v25  ;;  %v8056_v21 = vld [vmem:[%s12078_s0 + $0x14] sm:$0xf]  ;;  %v6426_v37 = vld [vmem:[%s12078_s0 + $0x2c] sm:$0xf0]  ;;  %v9120_v25 = vor.u32 %v8059_v10, %v6424_v40 }
  0xd8   :  { %2124 = vmatmul.bf16.gmra.mxu1 %v9078_v46  ;;  %v9124_v46 = vor.u32 %v8056_v21, %v6426_v37 }
  0xd9   :  { %2213 = vmatmul.bf16.gmra.mxu2 %v9080_v32  ;;  %12416 = vst [vmem:[#allocation52_spill] sm:$0xff] %v9120_v25 }
  0xda   :  { %v9087_v41 = vpop.f32.mrf.mxu3  ;;  %12417 = vst [vmem:[#allocation53_spill] sm:$0xff] %v9124_v46 }
  0xdc   :  { %v2174_v24 = vpop.f32.mrf.mxu2  ;;  %v1998_v29 = vpop.f32.mrf.mxu0 }
  0xdd   :  { %v9089_v28 = vadd.f32 %v2174_v24, %v2086_v50  ;;  %v1999_v16 = vadd.f32 %v1998_v29, %v8934_v43  ;;  %v2087_v54 = vpop.f32.mrf.mxu1  ;;  %v6432_v50 = vld [vmem:[%s12078_s0 + $0x18] sm:$0xf]  ;;  %v8060_v24 = vld [vmem:[%s12078_s0 + $0x30] sm:$0xf0] }
  0xde   :  { %v9126_v52 = vor.u32 %v8060_v24, %v6432_v50 }
  0xdf   :  { %v2088_v62 = vadd.f32 %v2087_v54, %v1999_v16  ;;  %v9118_v54 = vor.u32 %v8055_v60, %v6418_v13  ;;  %v6954_v60 = vld [vmem:[#allocation2 + $0xd0] sm:$0xf0]  ;;  %v2042_v13 = vadd.f32 %v8949_v63, %v8934_v43  ;;  %v6446_v63 = vld [vmem:[%s12078_s0 + $0x5c] sm:$0xf0] }
  0xe0   :  { %12418 = vst [vmem:[#allocation54_spill] sm:$0xff] %v9126_v52 }
  0xe1   :  { %12415 = vst [vmem:[#allocation51_spill] sm:$0xff] %v9118_v54 }
  0xe2   :  { %v9116_v29 = vpop.f32.mrf.mxu3 }
  0xe4   :  { %v2176_v16 = vpop.f32.mrf.mxu2  ;;  %v2001_v32 = vpop.f32.mrf.mxu0 }
  0xe5   :  { %v9122_v11 = vadd.f32 %v2176_v16, %v2088_v62  ;;  %v2002_v1 = vadd.f32 %v2001_v32, %v8934_v43  ;;  %v2090_v49 = vpop.f32.mrf.mxu1  ;;  %v8190_v62 = vld [vmem:[#allocation2 + $0xc4] sm:$0xf] }
  0xe6   :  { %v6957_v40 = vor.u32 %v8190_v62, %v6954_v60  ;;  %v8062_v16 = vld [vmem:[%s12078_s0 + $0x44] sm:$0xf]  ;;  %v6452_v62 = vld [vmem:[%s12078_s0 + $0x48] sm:$0xf]  ;;  %v8063_v60 = vld [vmem:[%s12078_s0 + $0x4c] sm:$0xf] }
  0xe7   :  { %v2091_v4 = vadd.f32 %v2090_v49, %v2002_v1  ;;  %2247 = vmatmul.bf16.vlgmr.msrb.gmra.mxu3 %v9118_v54  ;;  %2336 = vmatmul.bf16.vlgmr.msrb.gmra.mxu0 %v9120_v25 }
  0xe8   :  { %2425 = vmatmul.bf16.vlgmr.msrb.gmra.mxu1 %v9124_v46  ;;  %2596 = vmatpush.bf16.msra.mxu3 %v6957_v40  ;;  %v6454_v40 = vld [vmem:[%s12078_s0 + $0x64] sm:$0xf0] }
  0xe9   :  { %7638 = vmatmul.msk.bf16.vlgmr.msrb.gmra.mxu2 %vm1923_vm0, %v9126_v52  ;;  %v9169_v52 = vor.u32 %v8062_v16, %v6446_v63  ;;  %v9175_v42 = vor.u32 %v8063_v60, %v6454_v40  ;;  %v6474_v40 = vld [vmem:[%s12078_s0 + $0x94] sm:$0xf0] }
  0xea   :  { %v2130_v10 = vpop.f32.mrf.mxu3 }
  0xeb   :  { %v9136_v32 = vadd.f32 %v2130_v10, %v2042_v13  ;;  %v2044_v13 = vadd.f32 %v8978_v9, %v8934_v43  ;;  %v6460_v10 = vld [vmem:[%s12078_s0 + $0x50] sm:$0xf]  ;;  %12419 = vst [vmem:[#allocation55_spill] sm:$0xff] %v9169_v52 }
  0xec   :  { %v2179_v21 = vpop.f32.mrf.mxu2  ;;  %v2003_v49 = vpop.f32.mrf.mxu0  ;;  %12421 = vst [vmem:[#allocation57_spill] sm:$0xff] %v9175_v42 }
  0xed   :  { %v9138_v1 = vadd.f32 %v2179_v21, %v2091_v4  ;;  %v2004_v37 = vadd.f32 %v2003_v49, %v8934_v43  ;;  %v2092_v50 = vpop.f32.mrf.mxu1  ;;  %v8066_v4 = vld [vmem:[%s12078_s0 + $0x60] sm:$0xf0]  ;;  %v8067_v21 = vld [vmem:[%s12078_s0 + $0x68] sm:$0xf0] }
  0xee   :  { %v9171_v46 = vor.u32 %v8066_v4, %v6452_v62  ;;  %v9177_v7 = vor.u32 %v8067_v21, %v6460_v10  ;;  %v8070_v10 = vld [vmem:[%s12078_s0 + $0x84] sm:$0xf]  ;;  %v2049_v21 = vadd.f32 %v9024_v35, %v8934_v43 }
  0xef   :  { %v2093_v24 = vadd.f32 %v2092_v50, %v2004_v37 }
  0xf0   :  { %12420 = vst [vmem:[#allocation56_spill] sm:$0xff] %v9171_v46 }
  0xf1   :  { %12422 = vst [vmem:[#allocation58_spill] sm:$0xff] %v9177_v7 }
  0xf2   :  { %v2132_v49 = vpop.f32.mrf.mxu3 }
  0xf3   :  { %v9167_v37 = vadd.f32 %v2132_v49, %v2044_v13  ;;  %v8069_v13 = vld [vmem:[%s12078_s0 + $0x7c] sm:$0xf]  ;;  %v6482_v49 = vld [vmem:[%s12078_s0 + $0x9c] sm:$0xf0] }
  0xf4   :  { %v2181_v50 = vpop.f32.mrf.mxu2  ;;  %v2006_v25 = vpop.f32.mrf.mxu0 }
  0xf5   :  { %v9173_v9 = vadd.f32 %v2181_v50, %v2093_v24  ;;  %v2007_v17 = vadd.f32 %v2006_v25, %v8934_v43  ;;  %v2095_v51 = vpop.f32.mrf.mxu1  ;;  %v2047_v24 = vadd.f32 %v8995_v6, %v8934_v43  ;;  %v6480_v6 = vld [vmem:[%s12078_s0 + $0x80] sm:$0xf]  ;;  %v6488_v50 = vld [vmem:[%s12078_s0 + $0x88] sm:$0xf] }
  0xf7   :  { %v2096_v8 = vadd.f32 %v2095_v51, %v2007_v17  ;;  %2252 = vmatmul.bf16.gmra.mxu3 %v9169_v52  ;;  %2341 = vmatmul.bf16.gmra.mxu0 %v9171_v46 }
  0xf8   :  { %2430 = vmatmul.bf16.gmra.mxu1 %v9175_v42  ;;  %v9226_v42 = vor.u32 %v8070_v10, %v6482_v49 }
  0xf9   :  { %7639 = vmatmul.msk.bf16.gmra.mxu2 %vm1923_vm0, %v9177_v7 }
  0xfa   :  { %v2135_v16 = vpop.f32.mrf.mxu3  ;;  %12425 = vst [vmem:[#allocation61_spill] sm:$0xff] %v9226_v42 }
  0xfb   :  { %v9187_v63 = vadd.f32 %v2135_v16, %v2047_v24  ;;  %v8074_v24 = vld [vmem:[%s12078_s0 + $0xa0] sm:$0xf0] }
  0xfc   :  { %v2184_v62 = vpop.f32.mrf.mxu2  ;;  %v2008_v25 = vpop.f32.mrf.mxu0  ;;  %v9228_v46 = vor.u32 %v8074_v24, %v6488_v50  ;;  %v8076_v24 = vld [vmem:[%s12078_s0 + $0xb4] sm:$0xf] }
  0xfd   :  { %v9189_v4 = vadd.f32 %v2184_v62, %v2096_v8  ;;  %v2009_v51 = vadd.f32 %v2008_v25, %v8934_v43  ;;  %v2097_v17 = vpop.f32.mrf.mxu1  ;;  %v8073_v8 = vld [vmem:[%s12078_s0 + $0x98] sm:$0xf0] }
  0xfe   :  { %12426 = vst [vmem:[#allocation62_spill] sm:$0xff] %v9228_v46 }
  0xff   :  { %v2098_v60 = vadd.f32 %v2097_v17, %v2009_v51  ;;  %v9220_v51 = vor.u32 %v8069_v13, %v6474_v40  ;;  %v9222_v17 = vor.u32 %v8073_v8, %v6480_v6  ;;  %v6938_v13 = vld [vmem:[#allocation2 + $0xb0] sm:$0xf0]  ;;  %v2052_v40 = vadd.f32 %v9041_v27, %v8934_v43  ;;  %v6502_v27 = vld [vmem:[%s12078_s0 + $0xcc] sm:$0xf0] }
 0x101   :  { %12423 = vst [vmem:[#allocation59_spill] sm:$0xff] %v9220_v51 }
 0x102   :  { %v2137_v16 = vpop.f32.mrf.mxu3  ;;  %12424 = vst [vmem:[#allocation60_spill] sm:$0xff] %v9222_v17 }
 0x103   :  { %v9218_v62 = vadd.f32 %v2137_v16, %v2049_v21  ;;  %v6508_v16 = vld [vmem:[%s12078_s0 + $0xb8] sm:$0xf] }
 0x104   :  { %v2186_v25 = vpop.f32.mrf.mxu2  ;;  %v2011_v7 = vpop.f32.mrf.mxu0 }
 0x105   :  { %v9224_v35 = vadd.f32 %v2186_v25, %v2098_v60  ;;  %v2012_v61 = vadd.f32 %v2011_v7, %v8934_v43  ;;  %v2100_v53 = vpop.f32.mrf.mxu1  ;;  %v8186_v60 = vld [vmem:[#allocation2 + $0xa4] sm:$0xf]  ;;  %v8077_v25 = vld [vmem:[%s12078_s0 + $0xbc] sm:$0xf] }
 0x106   :  { %v6941_v6 = vor.u32 %v8186_v60, %v6938_v13  ;;  %v2054_v60 = vadd.f32 %v9070_v44, %v8934_v43  ;;  %v6510_v13 = vld [vmem:[%s12078_s0 + $0xd4] sm:$0xf0] }
 0x107   :  { %v2101_v59 = vadd.f32 %v2100_v53, %v2012_v61  ;;  %2257 = vmatmul.bf16.gmra.mxu3 %v9220_v51  ;;  %2346 = vmatmul.bf16.gmra.mxu0 %v9222_v17 }
 0x108   :  { %2435 = vmatmul.bf16.gmra.mxu1 %v9226_v42  ;;  %2597 = vmatpush.bf16.msra.mxu3 %v6941_v6  ;;  %v8081_v6 = vld [vmem:[%s12078_s0 + $0xd8] sm:$0xf0]  ;;  %v9277_v42 = vor.u32 %v8077_v25, %v6510_v13  ;;  %v6530_v13 = vld [vmem:[%s12078_s0 + $0x104] sm:$0xf0] }
 0x109   :  { %7640 = vmatmul.msk.bf16.gmra.mxu2 %vm1923_vm0, %v9228_v46 }
 0x10a   :  { %v2140_v8 = vpop.f32.mrf.mxu3  ;;  %12429 = vst [vmem:[#allocation65_spill] sm:$0xff] %v9277_v42 }
 0x10b   :  { %v9238_v10 = vadd.f32 %v2140_v8, %v2052_v40  ;;  %v6516_v40 = vld [vmem:[%s12078_s0 + $0xc0] sm:$0xf] }
 0x10c   :  { %v2189_v7 = vpop.f32.mrf.mxu2  ;;  %v2013_v61 = vpop.f32.mrf.mxu0  ;;  %v9279_v17 = vor.u32 %v8081_v6, %v6516_v40  ;;  %v8084_v40 = vld [vmem:[%s12078_s0 + $0xf4] sm:$0xf]  ;;  %v2059_v6 = vadd.f32 %v9116_v29, %v8934_v43 }
 0x10d   :  { %v9240_v53 = vadd.f32 %v2189_v7, %v2101_v59  ;;  %v2014_v21 = vadd.f32 %v2013_v61, %v8934_v43  ;;  %v2102_v49 = vpop.f32.mrf.mxu1  ;;  %v8080_v59 = vld [vmem:[%s12078_s0 + $0xd0] sm:$0xf0] }
 0x10e   :  { %12430 = vst [vmem:[#allocation66_spill] sm:$0xff] %v9279_v17 }
 0x10f   :  { %v2103_v50 = vadd.f32 %v2102_v49, %v2014_v21  ;;  %v9271_v21 = vor.u32 %v8076_v24, %v6502_v27  ;;  %v9273_v49 = vor.u32 %v8080_v59, %v6508_v16 }
 0x111   :  { %12427 = vst [vmem:[#allocation63_spill] sm:$0xff] %v9271_v21 }
 0x112   :  { %v2142_v8 = vpop.f32.mrf.mxu3  ;;  %12428 = vst [vmem:[#allocation64_spill] sm:$0xff] %v9273_v49 }
 0x113   :  { %v9269_v7 = vadd.f32 %v2142_v8, %v2054_v60  ;;  %v8083_v60 = vld [vmem:[%s12078_s0 + $0xec] sm:$0xf]  ;;  %v6538_v8 = vld [vmem:[%s12078_s0 + $0x10c] sm:$0xf0] }
 0x114   :  { %v2191_v61 = vpop.f32.mrf.mxu2  ;;  %v2016_v46 = vpop.f32.mrf.mxu0 }
 0x115   :  { %v9275_v44 = vadd.f32 %v2191_v61, %v2103_v50  ;;  %v2017_v39 = vadd.f32 %v2016_v46, %v8934_v43  ;;  %v2105_v38 = vpop.f32.mrf.mxu1  ;;  %v2057_v50 = vadd.f32 %v9087_v41, %v8934_v43  ;;  %v6536_v41 = vld [vmem:[%s12078_s0 + $0xf0] sm:$0xf]  ;;  %v6544_v61 = vld [vmem:[%s12078_s0 + $0xf8] sm:$0xf] }
 0x117   :  { %v2106_v34 = vadd.f32 %v2105_v38, %v2017_v39  ;;  %2262 = vmatmul.bf16.gmra.mxu3 %v9271_v21  ;;  %2351 = vmatmul.bf16.gmra.mxu0 %v9273_v49 }
 0x118   :  { %2440 = vmatmul.bf16.gmra.mxu1 %v9277_v42  ;;  %v9328_v42 = vor.u32 %v8084_v40, %v6538_v8 }
 0x119   :  { %7641 = vmatmul.msk.bf16.gmra.mxu2 %vm1923_vm0, %v9279_v17 }
 0x11a   :  { %v2145_v24 = vpop.f32.mrf.mxu3  ;;  %12433 = vst [vmem:[#allocation69_spill] sm:$0xff] %v9328_v42 }
 0x11b   :  { %v9289_v27 = vadd.f32 %v2145_v24, %v2057_v50  ;;  %v8088_v50 = vld [vmem:[%s12078_s0 + $0x110] sm:$0xf0] }
 0x11c   :  { %v2194_v16 = vpop.f32.mrf.mxu2  ;;  %v2018_v46 = vpop.f32.mrf.mxu0  ;;  %v9330_v49 = vor.u32 %v8088_v50, %v6544_v61  ;;  %v8090_v61 = vld [vmem:[%s12078_s0 + $0x124] sm:$0xf]  ;;  %v6558_v50 = vld [vmem:[%s12078_s0 + $0x13c] sm:$0xf0] }
 0x11d   :  { %v9291_v59 = vadd.f32 %v2194_v16, %v2106_v34  ;;  %v2019_v38 = vadd.f32 %v2018_v46, %v8934_v43  ;;  %v2107_v39 = vpop.f32.mrf.mxu1  ;;  %v8087_v34 = vld [vmem:[%s12078_s0 + $0x108] sm:$0xf0] }
 0x11e   :  { %12434 = vst [vmem:[#allocation70_spill] sm:$0xff] %v9330_v49 }
 0x11f   :  { %v2108_v25 = vadd.f32 %v2107_v39, %v2019_v38  ;;  %v9322_v38 = vor.u32 %v8083_v60, %v6530_v13  ;;  %v9324_v39 = vor.u32 %v8087_v34, %v6536_v41  ;;  %v6922_v60 = vld [vmem:[#allocation2 + $0x90] sm:$0xf0] }
 0x121   :  { %12431 = vst [vmem:[#allocation67_spill] sm:$0xff] %v9322_v38 }
 0x122   :  { %v2147_v24 = vpop.f32.mrf.mxu3  ;;  %12432 = vst [vmem:[#allocation68_spill] sm:$0xff] %v9324_v39 }
 0x123   :  { %v9320_v16 = vadd.f32 %v2147_v24, %v2059_v6  ;;  %v8091_v24 = vld [vmem:[%s12078_s0 + $0x12c] sm:$0xf] }
 0x124   :  { %v2196_v46 = vpop.f32.mrf.mxu2  ;;  %v2021_v17 = vpop.f32.mrf.mxu0 }
 0x125   :  { %v9326_v29 = vadd.f32 %v2196_v46, %v2108_v25  ;;  %v2022_v19 = vadd.f32 %v2021_v17, %v8934_v43  ;;  %v2110_v18 = vpop.f32.mrf.mxu1  ;;  %v8182_v25 = vld [vmem:[#allocation2 + $0x84] sm:$0xf]  ;;  %v6566_v46 = vld [vmem:[%s12078_s0 + $0x144] sm:$0xf0] }
 0x126   :  { %v6925_v13 = vor.u32 %v8182_v25, %v6922_v60  ;;  %v6572_v25 = vld [vmem:[%s12078_s0 + $0x130] sm:$0xf]  ;;  %v8095_v60 = vld [vmem:[%s12078_s0 + $0x148] sm:$0xf0] }
 0x127   :  { %v2111_v14 = vadd.f32 %v2110_v18, %v2022_v19  ;;  %2267 = vmatmul.bf16.gmra.mxu3 %v9322_v38  ;;  %2356 = vmatmul.bf16.gmra.mxu0 %v9324_v39  ;;  %v9379_v39 = vor.u32 %v8095_v60, %v6572_v25  ;;  %v6594_v25 = vld [vmem:[%s12078_s0 + $0x17c] sm:$0xf0]  ;;  %v6600_v60 = vld [vmem:[%s12078_s0 + $0x168] sm:$0xf] }
 0x128   :  { %2445 = vmatmul.bf16.gmra.mxu1 %v9328_v42  ;;  %2598 = vmatpush.bf16.msra.mxu3 %v6925_v13  ;;  %v9377_v42 = vor.u32 %v8091_v24, %v6566_v46  ;;  %v6586_v24 = vld [vmem:[%s12078_s0 + $0x174] sm:$0xf0]  ;;  %v8098_v46 = vld [vmem:[%s12078_s0 + $0x164] sm:$0xf] }
 0x129   :  { %7642 = vmatmul.msk.bf16.gmra.mxu2 %vm1923_vm0, %v9330_v49  ;;  %12440 = vst [vmem:[#allocation76_spill] sm:$0xff] %v9379_v39 }
 0x12a   :  { %v2219_v41 = vpop.f32.mrf.mxu3  ;;  %12439 = vst [vmem:[#allocation75_spill] sm:$0xff] %v9377_v42 }
 0x12b   :  { %v9339_v40 = vadd.f32 %v2219_v41, %v9136_v32  ;;  %v6564_v32 = vld [vmem:[%s12078_s0 + $0x128] sm:$0xf] }
 0x12c   :  { %v2199_v34 = vpop.f32.mrf.mxu2  ;;  %v2023_v18 = vpop.f32.mrf.mxu0 }
 0x12d   :  { %12435 = vst [vmem:[#allocation71_spill] sm:$0xff] %v9339_v40  ;;  %v9341_v17 = vadd.f32 %v2199_v34, %v2111_v14  ;;  %v2024_v19 = vadd.f32 %v2023_v18, %v8934_v43  ;;  %v2112_v6 = vpop.f32.mrf.mxu1  ;;  %v8094_v14 = vld [vmem:[%s12078_s0 + $0x140] sm:$0xf0]  ;;  %v9371_v18 = vor.u32 %v8090_v61, %v6558_v50 }
 0x12f   :  { %v2113_v8 = vadd.f32 %v2112_v6, %v2024_v19  ;;  %12437 = vst [vmem:[#allocation73_spill] sm:$0xff] %v9371_v18  ;;  %v9373_v19 = vor.u32 %v8094_v14, %v6564_v32  ;;  %v8097_v14 = vld [vmem:[%s12078_s0 + $0x15c] sm:$0xf] }
 0x131   :  { %12438 = vst [vmem:[#allocation74_spill] sm:$0xff] %v9373_v19 }
 0x132   :  { %v2221_v13 = vpop.f32.mrf.mxu3 }
 0x133   :  { %v9369_v34 = vadd.f32 %v2221_v13, %v9167_v37  ;;  %v8102_v13 = vld [vmem:[%s12078_s0 + $0x180] sm:$0xf0] }
 0x134   :  { %v2201_v41 = vpop.f32.mrf.mxu2  ;;  %v2026_v49 = vpop.f32.mrf.mxu0 }
 0x135   :  { %12436 = vst [vmem:[#allocation72_spill] sm:$0xff] %v9369_v34  ;;  %v9375_v6 = vadd.f32 %v2201_v41, %v2113_v8  ;;  %v2027_v40 = vadd.f32 %v2026_v49, %v8934_v43  ;;  %v2115_v38 = vpop.f32.mrf.mxu1 }
 0x137   :  { %v2116_v3 = vadd.f32 %v2115_v38, %v2027_v40  ;;  %2272 = vmatmul.bf16.gmra.mxu3 %v9371_v18  ;;  %2361 = vmatmul.bf16.gmra.mxu0 %v9373_v19  ;;  %v9428_v19 = vor.u32 %v8102_v13, %v6600_v60  ;;  %v8104_v60 = vld [vmem:[%s12078_s0 + $0x194] sm:$0xf]  ;;  %v6614_v13 = vld [vmem:[%s12078_s0 + $0x1ac] sm:$0xf0] }
 0x138   :  { %2450 = vmatmul.bf16.gmra.mxu1 %v9377_v42  ;;  %v9426_v42 = vor.u32 %v8098_v46, %v6594_v25 }
 0x139   :  { %7643 = vmatmul.msk.bf16.gmra.mxu2 %vm1923_vm0, %v9379_v39  ;;  %12446 = vst [vmem:[#allocation82_spill] sm:$0xff] %v9428_v19 }
 0x13a   :  { %v2224_v37 = vpop.f32.mrf.mxu3  ;;  %12445 = vst [vmem:[#allocation81_spill] sm:$0xff] %v9426_v42 }
 0x13b   :  { %v9388_v61 = vadd.f32 %v2224_v37, %v9187_v63  ;;  %v6592_v63 = vld [vmem:[%s12078_s0 + $0x160] sm:$0xf] }
 0x13c   :  { %v2204_v8 = vpop.f32.mrf.mxu2  ;;  %v2028_v32 = vpop.f32.mrf.mxu0 }
 0x13d   :  { %12441 = vst [vmem:[#allocation77_spill] sm:$0xff] %v9388_v61  ;;  %v9390_v50 = vadd.f32 %v2204_v8, %v2116_v3  ;;  %v2029_v49 = vadd.f32 %v2028_v32, %v8934_v43  ;;  %v2117_v38 = vpop.f32.mrf.mxu1  ;;  %v8101_v3 = vld [vmem:[%s12078_s0 + $0x178] sm:$0xf0]  ;;  %v9420_v32 = vor.u32 %v8097_v14, %v6586_v24 }
 0x13f   :  { %v2118_v40 = vadd.f32 %v2117_v38, %v2029_v49  ;;  %12443 = vst [vmem:[#allocation79_spill] sm:$0xff] %v9420_v32  ;;  %v9422_v49 = vor.u32 %v8101_v3, %v6592_v63 }
 0x141   :  { %12444 = vst [vmem:[#allocation80_spill] sm:$0xff] %v9422_v49 }
 0x142   :  { %v2226_v41 = vpop.f32.mrf.mxu3 }
 0x143   :  { %v9418_v8 = vadd.f32 %v2226_v41, %v9218_v62  ;;  %v8178_v62 = vld [vmem:[#allocation2 + $0x64] sm:$0xf]  ;;  %v8105_v41 = vld [vmem:[%s12078_s0 + $0x19c] sm:$0xf] }
 0x144   :  { %v2206_v37 = vpop.f32.mrf.mxu2  ;;  %v2031_v39 = vpop.f32.mrf.mxu0 }
 0x145   :  { %12442 = vst [vmem:[#allocation78_spill] sm:$0xff] %v9418_v8  ;;  %v9424_v38 = vadd.f32 %v2206_v37, %v2118_v40  ;;  %v2032_v61 = vadd.f32 %v2031_v39, %v8934_v43  ;;  %v2120_v18 = vpop.f32.mrf.mxu1  ;;  %v6906_v40 = vld [vmem:[#allocation2 + $0x70] sm:$0xf0]  ;;  %v6622_v37 = vld [vmem:[%s12078_s0 + $0x1b4] sm:$0xf0] }
 0x146   :  { %v6909_v14 = vor.u32 %v8178_v62, %v6906_v40  ;;  %v6628_v62 = vld [vmem:[%s12078_s0 + $0x1a0] sm:$0xf]  ;;  %v8109_v40 = vld [vmem:[%s12078_s0 + $0x1b8] sm:$0xf0] }
 0x147   :  { %v2121_v34 = vadd.f32 %v2120_v18, %v2032_v61  ;;  %2277 = vmatmul.bf16.gmra.mxu3 %v9420_v32  ;;  %2366 = vmatmul.bf16.gmra.mxu0 %v9422_v49  ;;  %v9477_v49 = vor.u32 %v8109_v40, %v6628_v62  ;;  %v7226_v62 = vld [vmem:[#allocation2 + $0x2f0] sm:$0xf0] }
 0x148   :  { %2455 = vmatmul.bf16.gmra.mxu1 %v9426_v42  ;;  %2599 = vmatpush.bf16.msra.mxu3 %v6909_v14  ;;  %v9475_v42 = vor.u32 %v8105_v41, %v6622_v37  ;;  %v8258_v41 = vld [vmem:[#allocation2 + $0x2e4] sm:$0xf] }
 0x149   :  { %7644 = vmatmul.msk.bf16.gmra.mxu2 %vm1923_vm0, %v9428_v19  ;;  %12451 = vst [vmem:[#allocation87_spill] sm:$0xff] %v9477_v49 }
 0x14a   :  { %v2229_v24 = vpop.f32.mrf.mxu3  ;;  %12450 = vst [vmem:[#allocation86_spill] sm:$0xff] %v9475_v42 }
 0x14b   :  { %v9437_v3 = vadd.f32 %v2229_v24, %v9238_v10  ;;  %v6620_v10 = vld [vmem:[%s12078_s0 + $0x198] sm:$0xf] }
 0x14c   :  { %v2209_v63 = vpop.f32.mrf.mxu2  ;;  %v2033_v18 = vpop.f32.mrf.mxu0 }
 0x14d   :  { %12447 = vst [vmem:[#allocation83_spill] sm:$0xff] %v9437_v3  ;;  %v9439_v39 = vadd.f32 %v2209_v63, %v2121_v34  ;;  %v2034_v61 = vadd.f32 %v2033_v18, %v8934_v43  ;;  %v2122_v46 = vpop.f32.mrf.mxu1  ;;  %v8108_v34 = vld [vmem:[%s12078_s0 + $0x1b0] sm:$0xf0]  ;;  %v9469_v18 = vor.u32 %v8104_v60, %v6614_v13 }
 0x14f   :  { %v2123_v25 = vadd.f32 %v2122_v46, %v2034_v61  ;;  %12448 = vst [vmem:[#allocation84_spill] sm:$0xff] %v9469_v18  ;;  %v9471_v61 = vor.u32 %v8108_v34, %v6620_v10  ;;  %v7098_v34 = vld [vmem:[#allocation2 + $0x1f0] sm:$0xf0] }
 0x151   :  { %12449 = vst [vmem:[#allocation85_spill] sm:$0xff] %v9471_v61 }
 0x152   :  { %v2231_v14 = vpop.f32.mrf.mxu3 }
 0x153   :  { %v9467_v63 = vadd.f32 %v2231_v14, %v9269_v7  ;;  %v8111_v14 = vld [vmem:[%s12078_s0 + $0x1cc] sm:$0xf] }
 0x154   :  { %v2211_v24 = vpop.f32.mrf.mxu2  ;;  %v2036_v19 = vpop.f32.mrf.mxu0 }
 0x155   :  { %v9473_v46 = vadd.f32 %v2211_v24, %v2123_v25  ;;  %v2037_v3 = vadd.f32 %v2036_v19, %v8934_v43  ;;  %v2125_v32 = vpop.f32.mrf.mxu1  ;;  %v8115_v24 = vld [vmem:[%s12078_s0 + $0x1e8] sm:$0xf0] }
 0x157   :  { %v2126_v8 = vadd.f32 %v2125_v32, %v2037_v3  ;;  %2282 = vmatmul.bf16.gmra.mxu3 %v9469_v18  ;;  %2371 = vmatmul.bf16.gmra.mxu0 %v9471_v61  ;;  %v8226_v3 = vld [vmem:[#allocation2 + $0x1e4] sm:$0xf] }
 0x158   :  { %2460 = vmatmul.bf16.gmra.mxu1 %v9475_v42  ;;  %v7101_v37 = vor.u32 %v8226_v3, %v7098_v34 }
 0x159   :  { %7645 = vmatmul.msk.bf16.gmra.mxu2 %vm1923_vm0, %v9477_v49 }
 0x15a   :  { %v2234_v7 = vpop.f32.mrf.mxu3  ;;  %2684 = vmatpush.bf16.msra.mxu0 %v7101_v37 }
 0x15b   :  { %v9486_v60 = vadd.f32 %v2234_v7, %v9289_v27  ;;  %v6642_v27 = vld [vmem:[%s12078_s0 + $0x1e4] sm:$0xf0]  ;;  %v8112_v7 = vld [vmem:[%s12078_s0 + $0x1d4] sm:$0xf] }
 0x15c   :  { %v2214_v25 = vpop.f32.mrf.mxu2  ;;  %v2038_v10 = vpop.f32.mrf.mxu0 }
 0x15d   :  { %12452 = vst [vmem:[#allocation88_spill] sm:$0xff] %v9486_v60  ;;  %v9488_v13 = vadd.f32 %v2214_v25, %v2126_v8  ;;  %v2039_v19 = vadd.f32 %v2038_v10, %v8934_v43  ;;  %v2127_v32 = vpop.f32.mrf.mxu1  ;;  %v7229_v8 = vor.u32 %v8258_v41, %v7226_v62  ;;  %v6648_v43 = vld [vmem:[%s12078_s0 + $0x1d0] sm:$0xf]  ;;  %v6656_v10 = vld [vmem:[%s12078_s0 + $0x1d8] sm:$0xf]  ;;  %v9518_v41 = vor.u32 %v8111_v14, %v6642_v27 }
 0x15e   :  { %v6650_v25 = vld [vmem:[%s12078_s0 + $0x1ec] sm:$0xf0]  ;;  %v9520_v37 = vor.u32 %v8115_v24, %v6648_v43  ;;  %v8174_v27 = vld [vmem:[#allocation2 + $0x44] sm:$0xf] }
 0x15f   :  { %v2128_v40 = vadd.f32 %v2127_v32, %v2039_v19  ;;  %v8116_v19 = vld [vmem:[%s12078_s0 + $0x1f0] sm:$0xf0]  ;;  %2773 = vmatpush.bf16.msra.mxu1 %v7229_v8  ;;  %12454 = vst [vmem:[#allocation90_spill] sm:$0xff] %v9518_v41  ;;  %v9524_v42 = vor.u32 %v8112_v7, %v6650_v25 }
 0x160   :  { %12455 = vst [vmem:[#allocation91_spill] sm:$0xff] %v9520_v37  ;;  %v9526_v61 = vor.u32 %v8116_v19, %v6656_v10  ;;  %v6890_v8 = vld [vmem:[#allocation2 + $0x50] sm:$0xf0]  ;;  %v8118_v19 = vld [vmem:[%s12078_s0 + $0x204] sm:$0xf] }
 0x161   :  { %12456 = vst [vmem:[#allocation92_spill] sm:$0xff] %v9524_v42  ;;  %v6893_v24 = vor.u32 %v8174_v27, %v6890_v8  ;;  %v8123_v27 = vld [vmem:[%s12078_s0 + $0x228] sm:$0xf0] }
 0x162   :  { %v2236_v32 = vpop.f32.mrf.mxu3  ;;  %12457 = vst [vmem:[#allocation93_spill] sm:$0xff] %v9526_v61 }
 0x163   :  { %v9516_v34 = vadd.f32 %v2236_v32, %v9320_v16  ;;  %2600 = vmatpush.bf16.msra.mxu3 %v6893_v24  ;;  %v6670_v32 = vld [vmem:[%s12078_s0 + $0x21c] sm:$0xf0] }
 0x164   :  { %v2216_v3 = vpop.f32.mrf.mxu2  ;;  %v2337_v49 = vpop.f32.mrf.mxu0 }
 0x165   :  { %12453 = vst [vmem:[#allocation89_spill] sm:$0xff] %v9516_v34  ;;  %v9522_v62 = vadd.f32 %v2216_v3, %v2128_v40  ;;  %v2426_v60 = vpop.f32.mrf.mxu1  ;;  %v8122_v3 = vld [vmem:[%s12078_s0 + $0x220] sm:$0xf0] }
 0x167   :  { %2287 = vmatmul.bf16.gmra.mxu3 %v9518_v41  ;;  %2376 = vmatmul.bf16.gmra.mxu0 %v9520_v37 }
 0x168   :  { %2465 = vmatmul.bf16.gmra.mxu1 %v9524_v42 }
 0x169   :  { %7646 = vmatmul.msk.bf16.gmra.mxu2 %vm1923_vm0, %v9526_v61  ;;  %v9559_v61 = vor.u32 %v8118_v19, %v6670_v32 }
 0x16a   :  { %v2248_v16 = vpop.f32.mrf.mxu3 }
 0x16b   :  { %v2249_v14 = vadd.f32 %v2248_v16, %v8951_v12  ;;  %v6676_v12 = vld [vmem:[%s12078_s0 + $0x208] sm:$0xf]  ;;  %12458 = vst [vmem:[#allocation94_spill] sm:$0xff] %v9559_v61 }
 0x16c   :  { %v2515_v40 = vpop.f32.mrf.mxu2  ;;  %v2339_v43 = vpop.f32.mrf.mxu0  ;;  %v6678_v16 = vld [vmem:[%s12078_s0 + $0x224] sm:$0xf0]  ;;  %v9561_v42 = vor.u32 %v8122_v3, %v6676_v12 }
 0x16d   :  { %v2338_v7 = vadd.f32 %v2337_v49, %v2249_v14  ;;  %v2428_v25 = vpop.f32.mrf.mxu1  ;;  %v8119_v49 = vld [vmem:[%s12078_s0 + $0x20c] sm:$0xf]  ;;  %v6684_v14 = vld [vmem:[%s12078_s0 + $0x210] sm:$0xf] }
 0x16e   :  { %12459 = vst [vmem:[#allocation95_spill] sm:$0xff] %v9561_v42  ;;  %v9565_v37 = vor.u32 %v8123_v27, %v6684_v14  ;;  %v7210_v27 = vld [vmem:[#allocation2 + $0x2d0] sm:$0xf0] }
 0x16f   :  { %v2427_v10 = vadd.f32 %v2426_v60, %v2338_v7 }
 0x170   :  { %12461 = vst [vmem:[#allocation97_spill] sm:$0xff] %v9565_v37 }
 0x171   :  { %v2516_v60 = vadd.f32 %v2515_v40, %v2427_v10  ;;  %v9563_v10 = vor.u32 %v8119_v49, %v6678_v16  ;;  %v8222_v16 = vld [vmem:[#allocation2 + $0x1c4] sm:$0xf] }
 0x172   :  { %v2250_v8 = vpop.f32.mrf.mxu3 }
 0x173   :  { %v2251_v24 = vadd.f32 %v2250_v8, %v8984_v30  ;;  %12460 = vst [vmem:[#allocation96_spill] sm:$0xff] %v9563_v10  ;;  %v4464_v32 = vmax.f32 %v2516_v60, 0.0  ;;  %v6704_v60 = vld [vmem:[%s12078_s0 + $0x240] sm:$0xf] }
 0x174   :  { %v2517_v7 = vpop.f32.mrf.mxu2  ;;  %v2342_v40 = vpop.f32.mrf.mxu0 }
 0x175   :  { %v2340_v41 = vadd.f32 %v2339_v43, %v2251_v24  ;;  %v2431_v34 = vpop.f32.mrf.mxu1  ;;  %v7082_v43 = vld [vmem:[#allocation2 + $0x1d0] sm:$0xf0] }
 0x177   :  { %v2429_v18 = vadd.f32 %v2428_v25, %v2340_v41  ;;  %2292 = vmatmul.bf16.gmra.mxu3 %v9559_v61  ;;  %2381 = vmatmul.bf16.gmra.mxu0 %v9561_v42  ;;  %v7085_v41 = vor.u32 %v8222_v16, %v7082_v43  ;;  %v8254_v25 = vld [vmem:[#allocation2 + $0x2c4] sm:$0xf] }
 0x178   :  { %2470 = vmatmul.bf16.gmra.mxu1 %v9563_v10  ;;  %v7213_v42 = vor.u32 %v8254_v25, %v7210_v27 }
 0x179   :  { %7647 = vmatmul.msk.bf16.gmra.mxu2 %vm1923_vm0, %v9565_v37  ;;  %v2518_v30 = vadd.f32 %v2517_v7, %v2429_v18  ;;  %2685 = vmatpush.bf16.msra.mxu0 %v7085_v41  ;;  %v8125_v18 = vld [vmem:[%s12078_s0 + $0x23c] sm:$0xf] }
 0x17a   :  { %v2253_v19 = vpop.f32.mrf.mxu3  ;;  %2774 = vmatpush.bf16.msra.mxu1 %v7213_v42  ;;  %v8129_v7 = vld [vmem:[%s12078_s0 + $0x258] sm:$0xf0]  ;;  %v6712_v42 = vld [vmem:[%s12078_s0 + $0x248] sm:$0xf] }
 0x17b   :  { %v4468_v12 = vmax.f32 %v2518_v30, 0.0  ;;  %v2254_v3 = vadd.f32 %v2253_v19, %v8997_v26  ;;  %v6698_v26 = vld [vmem:[%s12078_s0 + $0x254] sm:$0xf0]  ;;  %v6706_v30 = vld [vmem:[%s12078_s0 + $0x25c] sm:$0xf0]  ;;  %v9602_v43 = vor.u32 %v8129_v7, %v6704_v60 }
 0x17c   :  { %v2520_v49 = vpop.f32.mrf.mxu2  ;;  %v2344_v14 = vpop.f32.mrf.mxu0  ;;  %v8130_v19 = vld [vmem:[%s12078_s0 + $0x260] sm:$0xf0]  ;;  %v9600_v16 = vor.u32 %v8125_v18, %v6698_v26 }
 0x17d   :  { %v9573_v8 = vpack.c.bf16 %v4468_v12, %v4464_v32  ;;  %v2343_v24 = vadd.f32 %v2342_v40, %v2254_v3  ;;  %v2433_v10 = vpop.f32.mrf.mxu1  ;;  %12464 = vst [vmem:[#allocation100_spill] sm:$0xff] %v9602_v43  ;;  %v9606_v41 = vor.u32 %v8130_v19, %v6712_v42 }
 0x17e   :  { %12463 = vst [vmem:[#allocation99_spill] sm:$0xff] %v9600_v16 }
 0x17f   :  { %12462 = vst [vmem:[#allocation98_spill] sm:$0xff] %v9573_v8  ;;  %v2432_v37 = vadd.f32 %v2431_v34, %v2343_v24  ;;  %v8126_v34 = vld [vmem:[%s12078_s0 + $0x244] sm:$0xf] }
 0x180   :  { %12466 = vst [vmem:[#allocation102_spill] sm:$0xff] %v9606_v41 }
 0x181   :  { %v2521_v40 = vadd.f32 %v2520_v49, %v2432_v37  ;;  %v9604_v49 = vor.u32 %v8126_v34, %v6706_v30  ;;  %v8170_v30 = vld [vmem:[#allocation2 + $0x24] sm:$0xf] }
 0x182   :  { %v2255_v32 = vpop.f32.mrf.mxu3 }
 0x183   :  { %v2256_v12 = vadd.f32 %v2255_v32, %v9030_v15  ;;  %12465 = vst [vmem:[#allocation101_spill] sm:$0xff] %v9604_v49  ;;  %v4472_v26 = vmax.f32 %v2521_v40, 0.0  ;;  %v6726_v40 = vld [vmem:[%s12078_s0 + $0x28c] sm:$0xf0] }
 0x184   :  { %v2522_v3 = vpop.f32.mrf.mxu2  ;;  %v2347_v37 = vpop.f32.mrf.mxu0 }
 0x185   :  { %v2345_v25 = vadd.f32 %v2344_v14, %v2256_v12  ;;  %v2436_v27 = vpop.f32.mrf.mxu1  ;;  %v6874_v14 = vld [vmem:[#allocation2 + $0x30] sm:$0xf0] }
 0x187   :  { %v2434_v24 = vadd.f32 %v2433_v10, %v2345_v25  ;;  %2297 = vmatmul.bf16.gmra.mxu3 %v9600_v16  ;;  %2386 = vmatmul.bf16.gmra.mxu0 %v9602_v43  ;;  %v6877_v10 = vor.u32 %v8170_v30, %v6874_v14 }
 0x188   :  { %2475 = vmatmul.bf16.gmra.mxu1 %v9604_v49 }
 0x189   :  { %7648 = vmatmul.msk.bf16.gmra.mxu2 %vm1923_vm0, %v9606_v41  ;;  %v2523_v15 = vadd.f32 %v2522_v3, %v2434_v24  ;;  %2601 = vmatpush.bf16.msra.mxu3 %v6877_v10  ;;  %v8132_v3 = vld [vmem:[%s12078_s0 + $0x274] sm:$0xf] }
 0x18a   :  { %v2258_v18 = vpop.f32.mrf.mxu3  ;;  %v9641_v14 = vor.u32 %v8132_v3, %v6726_v40 }
 0x18b   :  { %v4476_v60 = vmax.f32 %v2523_v15, 0.0  ;;  %v2259_v7 = vadd.f32 %v2258_v18, %v9043_v56  ;;  %v6732_v56 = vld [vmem:[%s12078_s0 + $0x278] sm:$0xf]  ;;  %v6740_v18 = vld [vmem:[%s12078_s0 + $0x280] sm:$0xf] }
 0x18c   :  { %v2525_v34 = vpop.f32.mrf.mxu2  ;;  %v2349_v42 = vpop.f32.mrf.mxu0  ;;  %v6734_v15 = vld [vmem:[%s12078_s0 + $0x294] sm:$0xf0]  ;;  %12468 = vst [vmem:[#allocation104_spill] sm:$0xff] %v9641_v14 }
 0x18d   :  { %v2348_v19 = vadd.f32 %v2347_v37, %v2259_v7  ;;  %v2438_v32 = vpop.f32.mrf.mxu1  ;;  %v9614_v12 = vpack.c.bf16 %v4476_v60, %v4472_v26  ;;  %v8136_v37 = vld [vmem:[%s12078_s0 + $0x290] sm:$0xf0]  ;;  %v8137_v26 = vld [vmem:[%s12078_s0 + $0x298] sm:$0xf0] }
 0x18e   :  { %v9643_v10 = vor.u32 %v8136_v37, %v6732_v56 }
 0x18f   :  { %12467 = vst [vmem:[#allocation103_spill] sm:$0xff] %v9614_v12  ;;  %v2437_v25 = vadd.f32 %v2436_v27, %v2348_v19  ;;  %v8133_v27 = vld [vmem:[%s12078_s0 + $0x27c] sm:$0xf] }
 0x190   :  { %12469 = vst [vmem:[#allocation105_spill] sm:$0xff] %v9643_v10  ;;  %v9645_v19 = vor.u32 %v8133_v27, %v6734_v15  ;;  %v8218_v15 = vld [vmem:[#allocation2 + $0x1a4] sm:$0xf] }
 0x191   :  { %v2526_v24 = vadd.f32 %v2525_v34, %v2437_v25  ;;  %v9647_v25 = vor.u32 %v8137_v26, %v6740_v18  ;;  %v7194_v26 = vld [vmem:[#allocation2 + $0x2b0] sm:$0xf0] }
 0x192   :  { %v2260_v60 = vpop.f32.mrf.mxu3  ;;  %12470 = vst [vmem:[#allocation106_spill] sm:$0xff] %v9645_v19 }
 0x193   :  { %v2261_v7 = vadd.f32 %v2260_v60, %v9076_v5  ;;  %12471 = vst [vmem:[#allocation107_spill] sm:$0xff] %v9647_v25  ;;  %v4480_v40 = vmax.f32 %v2526_v24, 0.0  ;;  %v6760_v24 = vld [vmem:[%s12078_s0 + $0x2b0] sm:$0xf] }
 0x194   :  { %v2527_v30 = vpop.f32.mrf.mxu2  ;;  %v2352_v34 = vpop.f32.mrf.mxu0 }
 0x195   :  { %v2350_v12 = vadd.f32 %v2349_v42, %v2261_v7  ;;  %v2441_v8 = vpop.f32.mrf.mxu1  ;;  %v7066_v42 = vld [vmem:[#allocation2 + $0x1b0] sm:$0xf0] }
 0x197   :  { %v2439_v41 = vadd.f32 %v2438_v32, %v2350_v12  ;;  %2302 = vmatmul.bf16.gmra.mxu3 %v9641_v14  ;;  %2391 = vmatmul.bf16.gmra.mxu0 %v9643_v10  ;;  %v7069_v32 = vor.u32 %v8218_v15, %v7066_v42  ;;  %v8250_v12 = vld [vmem:[#allocation2 + $0x2a4] sm:$0xf]  ;;  %v7306_v14 = vld [vmem:[#allocation2 + $0x390] sm:$0xf0] }
 0x198   :  { %2480 = vmatmul.bf16.gmra.mxu1 %v9645_v19  ;;  %v7197_v10 = vor.u32 %v8250_v12, %v7194_v26 }
 0x199   :  { %7649 = vmatmul.msk.bf16.gmra.mxu2 %vm1923_vm0, %v9647_v25  ;;  %v2528_v5 = vadd.f32 %v2527_v30, %v2439_v41  ;;  %2686 = vmatpush.bf16.msra.mxu0 %v7069_v32  ;;  %v8139_v41 = vld [vmem:[%s12078_s0 + $0x2ac] sm:$0xf] }
 0x19a   :  { %v2263_v3 = vpop.f32.mrf.mxu3  ;;  %2775 = vmatpush.bf16.msra.mxu1 %v7197_v10  ;;  %v8143_v30 = vld [vmem:[%s12078_s0 + $0x2c8] sm:$0xf0]  ;;  %v6768_v10 = vld [vmem:[%s12078_s0 + $0x2b8] sm:$0xf] }
 0x19b   :  { %v4484_v56 = vmax.f32 %v2528_v5, 0.0  ;;  %v2264_v37 = vadd.f32 %v2263_v3, %v9089_v28  ;;  %v6754_v28 = vld [vmem:[%s12078_s0 + $0x2c4] sm:$0xf0]  ;;  %v6762_v5 = vld [vmem:[%s12078_s0 + $0x2cc] sm:$0xf0]  ;;  %v9684_v42 = vor.u32 %v8143_v30, %v6760_v24 }
 0x19c   :  { %v2530_v27 = vpop.f32.mrf.mxu2  ;;  %v2354_v18 = vpop.f32.mrf.mxu0  ;;  %v8144_v3 = vld [vmem:[%s12078_s0 + $0x2d0] sm:$0xf0]  ;;  %v9682_v15 = vor.u32 %v8139_v41, %v6754_v28  ;;  %v8286_v30 = vld [vmem:[#allocation2 + $0x3c4] sm:$0xf] }
 0x19d   :  { %v2353_v60 = vadd.f32 %v2352_v34, %v2264_v37  ;;  %v2443_v7 = vpop.f32.mrf.mxu1  ;;  %v9655_v19 = vpack.c.bf16 %v4484_v56, %v4480_v40  ;;  %12474 = vst [vmem:[#allocation110_spill] sm:$0xff] %v9684_v42  ;;  %v9688_v32 = vor.u32 %v8144_v3, %v6768_v10  ;;  %v8166_v3 = vld [vmem:[#allocation2 + $0x4] sm:$0xf] }
 0x19e   :  { %12473 = vst [vmem:[#allocation109_spill] sm:$0xff] %v9682_v15 }
 0x19f   :  { %12472 = vst [vmem:[#allocation108_spill] sm:$0xff] %v9655_v19  ;;  %v2442_v25 = vadd.f32 %v2441_v8, %v2353_v60  ;;  %v8140_v8 = vld [vmem:[%s12078_s0 + $0x2b4] sm:$0xf]  ;;  %v8290_v19 = vld [vmem:[#allocation2 + $0x3e4] sm:$0xf] }
 0x1a0   :  { %12476 = vst [vmem:[#allocation112_spill] sm:$0xff] %v9688_v32 }
 0x1a1   :  { %v2531_v34 = vadd.f32 %v2530_v27, %v2442_v25  ;;  %v9686_v27 = vor.u32 %v8140_v8, %v6762_v5  ;;  %v7338_v8 = vld [vmem:[#allocation2 + $0x3d0] sm:$0xf0] }
 0x1a2   :  { %v2265_v40 = vpop.f32.mrf.mxu3 }
 0x1a3   :  { %v2266_v56 = vadd.f32 %v2265_v40, %v9122_v11  ;;  %12475 = vst [vmem:[#allocation111_spill] sm:$0xff] %v9686_v27  ;;  %v7354_v11 = vld [vmem:[#allocation2 + $0x3f0] sm:$0xf0]  ;;  %v4488_v5 = vmax.f32 %v2531_v34, 0.0  ;;  %v8146_v34 = vld [vmem:[%s12078_s0 + $0x2e4] sm:$0xf] }
 0x1a4   :  { %v2532_v37 = vpop.f32.mrf.mxu2  ;;  %v2357_v25 = vpop.f32.mrf.mxu0  ;;  %v7357_v28 = vor.u32 %v8290_v19, %v7354_v11  ;;  %v6858_v40 = vld [vmem:[#allocation2 + $0x10] sm:$0xf0]  ;;  %v8282_v19 = vld [vmem:[#allocation2 + $0x3a4] sm:$0xf] }
 0x1a5   :  { %v2355_v12 = vadd.f32 %v2354_v18, %v2266_v56  ;;  %v2446_v26 = vpop.f32.mrf.mxu1  ;;  %v7341_v56 = vor.u32 %v8286_v30, %v7338_v8  ;;  %v8214_v8 = vld [vmem:[#allocation2 + $0x184] sm:$0xf] }
 0x1a6   :  { %2862 = vmatpush.bf16.msra.mxu2 %v7357_v28  ;;  %v6796_v28 = vld [vmem:[%s12078_s0 + $0x2f0] sm:$0xf] }
 0x1a7   :  { %v2444_v60 = vadd.f32 %v2443_v7, %v2355_v12  ;;  %2307 = vmatmul.bf16.gmra.mxu3 %v9682_v15  ;;  %2396 = vmatmul.bf16.gmra.mxu0 %v9684_v42 }
 0x1a8   :  { %2485 = vmatmul.bf16.gmra.mxu1 %v9686_v27  ;;  %v6861_v27 = vor.u32 %v8166_v3, %v6858_v40 }
 0x1a9   :  { %7650 = vmatmul.msk.bf16.gmra.mxu2 %vm1923_vm0, %v9688_v32  ;;  %v2533_v41 = vadd.f32 %v2532_v37, %v2444_v60  ;;  %v7322_v37 = vld [vmem:[#allocation2 + $0x3b0] sm:$0xf0] }
 0x1aa   :  { %v2268_v24 = vpop.f32.mrf.mxu3  ;;  %2602 = vmatpush.bf16.msra.mxu3 %v6861_v27  ;;  %2863 = vmatpush.bf16.msra.mxu2 %v7341_v56  ;;  %v7325_v11 = vor.u32 %v8282_v19, %v7322_v37  ;;  %v8150_v27 = vld [vmem:[%s12078_s0 + $0x300] sm:$0xf0]  ;;  %v7178_v19 = vld [vmem:[#allocation2 + $0x290] sm:$0xf0] }
 0x1ab   :  { %v4492_v18 = vmax.f32 %v2533_v41, 0.0  ;;  %v2269_v7 = vadd.f32 %v2268_v24, %v9138_v1  ;;  %v6782_v1 = vld [vmem:[%s12078_s0 + $0x2fc] sm:$0xf0]  ;;  %v6790_v41 = vld [vmem:[%s12078_s0 + $0x304] sm:$0xf0] }
 0x1ac   :  { %v2535_v10 = vpop.f32.mrf.mxu2  ;;  %v2359_v12 = vpop.f32.mrf.mxu0  ;;  %v8151_v24 = vld [vmem:[%s12078_s0 + $0x308] sm:$0xf0]  ;;  %v9725_v3 = vor.u32 %v8146_v34, %v6782_v1  ;;  %v8278_v37 = vld [vmem:[#allocation2 + $0x384] sm:$0xf] }
 0x1ad   :  { %v2358_v42 = vadd.f32 %v2357_v25, %v2269_v7  ;;  %v2448_v49 = vpop.f32.mrf.mxu1  ;;  %v9696_v32 = vpack.c.bf16 %v4492_v18, %v4488_v5  ;;  %v6788_v25 = vld [vmem:[%s12078_s0 + $0x2e8] sm:$0xf]  ;;  %v7050_v5 = vld [vmem:[#allocation2 + $0x190] sm:$0xf0]  ;;  %v8246_v18 = vld [vmem:[#allocation2 + $0x284] sm:$0xf]  ;;  %v9731_v43 = vor.u32 %v8151_v24, %v6796_v28 }
 0x1ae   :  { %12478 = vst [vmem:[#allocation114_spill] sm:$0xff] %v9725_v3  ;;  %v9727_v40 = vor.u32 %v8150_v27, %v6788_v25  ;;  %2864 = vmatpush.bf16.msra.mxu2 %v7325_v11  ;;  %v7053_v56 = vor.u32 %v8214_v8, %v7050_v5  ;;  %v7181_v15 = vor.u32 %v8246_v18, %v7178_v19  ;;  %v8210_v1 = vld [vmem:[#allocation2 + $0x164] sm:$0xf]  ;;  %v7034_v11 = vld [vmem:[#allocation2 + $0x170] sm:$0xf0] }
 0x1af   :  { %12477 = vst [vmem:[#allocation113_spill] sm:$0xff] %v9696_v32  ;;  %v2447_v60 = vadd.f32 %v2446_v26, %v2358_v42  ;;  %v8147_v42 = vld [vmem:[%s12078_s0 + $0x2ec] sm:$0xf]  ;;  %v8242_v25 = vld [vmem:[#allocation2 + $0x264] sm:$0xf] }
 0x1b0   :  { %12479 = vst [vmem:[#allocation115_spill] sm:$0xff] %v9727_v40  ;;  %v9729_v32 = vor.u32 %v8147_v42, %v6790_v41  ;;  %2687 = vmatpush.bf16.msra.mxu0 %v7053_v56  ;;  %2776 = vmatpush.bf16.msra.mxu1 %v7181_v15  ;;  %v7162_v27 = vld [vmem:[#allocation2 + $0x270] sm:$0xf0]  ;;  %v8206_v28 = vld [vmem:[#allocation2 + $0x144] sm:$0xf] }
 0x1b1   :  { %v9713_v26 = vadd.f32 %v2535_v10, %v2447_v60  ;;  %12481 = vst [vmem:[#allocation117_spill] sm:$0xff] %v9731_v43  ;;  %v7165_v41 = vor.u32 %v8242_v25, %v7162_v27  ;;  %v7290_v15 = vld [vmem:[#allocation2 + $0x370] sm:$0xf0]  ;;  %v8270_v19 = vld [vmem:[#allocation2 + $0x344] sm:$0xf] }
 0x1b2   :  { %v2270_v30 = vpop.f32.mrf.mxu3  ;;  %12480 = vst [vmem:[#allocation116_spill] sm:$0xff] %v9729_v32  ;;  %v7018_v24 = vld [vmem:[#allocation2 + $0x150] sm:$0xf0] }
 0x1b3   :  { %v2271_v7 = vadd.f32 %v2270_v30, %v9173_v9  ;;  %v7309_v9 = vor.u32 %v8278_v37, %v7306_v14  ;;  %v8274_v14 = vld [vmem:[#allocation2 + $0x364] sm:$0xf]  ;;  %v4496_v8 = vmax.f32 %v9713_v26, 0.0  ;;  %v7021_v56 = vor.u32 %v8206_v28, %v7018_v24  ;;  %v8153_v26 = vld [vmem:[%s12078_s0 + $0x31c] sm:$0xf] }
 0x1b4   :  { %v2537_v10 = vpop.f32.mrf.mxu2  ;;  %v2362_v60 = vpop.f32.mrf.mxu0  ;;  %v8238_v30 = vld [vmem:[#allocation2 + $0x244] sm:$0xf]  ;;  %2777 = vmatpush.bf16.msra.mxu1 %v7165_v41  ;;  %v6816_v28 = vld [vmem:[%s12078_s0 + $0x320] sm:$0xf]  ;;  %v8157_v24 = vld [vmem:[%s12078_s0 + $0x338] sm:$0xf0] }
 0x1b5   :  { %v2360_v16 = vadd.f32 %v2359_v12, %v2271_v7  ;;  %v2451_v61 = vpop.f32.mrf.mxu1  ;;  %2865 = vmatpush.bf16.msra.mxu2 %v7309_v9  ;;  %v7037_v12 = vor.u32 %v8210_v1, %v7034_v11  ;;  %v8234_v41 = vld [vmem:[#allocation2 + $0x224] sm:$0xf] }
 0x1b7   :  { %v2449_v34 = vadd.f32 %v2448_v49, %v2360_v16  ;;  %2312 = vmatmul.bf16.gmra.mxu3 %v9725_v3  ;;  %2401 = vmatmul.bf16.gmra.mxu0 %v9727_v40  ;;  %v7293_v49 = vor.u32 %v8274_v14, %v7290_v15  ;;  %v7130_v15 = vld [vmem:[#allocation2 + $0x230] sm:$0xf0] }
 0x1b8   :  { %2490 = vmatmul.bf16.gmra.mxu1 %v9729_v32  ;;  %2688 = vmatpush.bf16.msra.mxu0 %v7037_v12  ;;  %v7002_v12 = vld [vmem:[#allocation2 + $0x130] sm:$0xf0] }
 0x1b9   :  { %7651 = vmatmul.msk.bf16.gmra.mxu2 %vm1923_vm0, %v9731_v43  ;;  %v2538_v42 = vadd.f32 %v2537_v10, %v2449_v34  ;;  %v7146_v10 = vld [vmem:[#allocation2 + $0x250] sm:$0xf0] }
 0x1ba   :  { %v2273_v16 = vpop.f32.mrf.mxu3  ;;  %v7149_v9 = vor.u32 %v8238_v30, %v7146_v10  ;;  %v7274_v34 = vld [vmem:[#allocation2 + $0x350] sm:$0xf0]  ;;  %2866 = vmatpush.bf16.msra.mxu2 %v7293_v49  ;;  %v8154_v30 = vld [vmem:[%s12078_s0 + $0x324] sm:$0xf] }
 0x1bb   :  { %v4500_v5 = vmax.f32 %v2538_v42, 0.0  ;;  %v2274_v18 = vadd.f32 %v2273_v16, %v9189_v4  ;;  %v7277_v25 = vor.u32 %v8270_v19, %v7274_v34  ;;  %v6810_v4 = vld [vmem:[%s12078_s0 + $0x334] sm:$0xf0]  ;;  %v8202_v42 = vld [vmem:[#allocation2 + $0x124] sm:$0xf] }
 0x1bc   :  { %v2540_v7 = vpop.f32.mrf.mxu2  ;;  %v2364_v37 = vpop.f32.mrf.mxu0  ;;  %2689 = vmatpush.bf16.msra.mxu0 %v7021_v56  ;;  %2778 = vmatpush.bf16.msra.mxu1 %v7149_v9  ;;  %v8266_v16 = vld [vmem:[#allocation2 + $0x324] sm:$0xf]  ;;  %v7258_v49 = vld [vmem:[#allocation2 + $0x330] sm:$0xf0] }
 0x1bd   :  { %v2363_v1 = vadd.f32 %v2362_v60, %v2274_v18  ;;  %v2453_v11 = vpop.f32.mrf.mxu1  ;;  %v9740_v27 = vpack.c.bf16 %v4500_v5, %v4496_v8  ;;  %v7005_v60 = vor.u32 %v8202_v42, %v7002_v12  ;;  %v7133_v8 = vor.u32 %v8234_v41, %v7130_v15  ;;  %v6818_v5 = vld [vmem:[%s12078_s0 + $0x33c] sm:$0xf0]  ;;  %v6824_v18 = vld [vmem:[%s12078_s0 + $0x328] sm:$0xf]  ;;  %v8158_v56 = vld [vmem:[%s12078_s0 + $0x340] sm:$0xf0] }
 0x1be   :  { %2867 = vmatpush.bf16.msra.mxu2 %v7277_v25  ;;  %v7261_v10 = vor.u32 %v8266_v16, %v7258_v49  ;;  %v8198_v9 = vld [vmem:[#allocation2 + $0x104] sm:$0xf]  ;;  %v6986_v34 = vld [vmem:[#allocation2 + $0x110] sm:$0xf0]  ;;  %v9767_v12 = vor.u32 %v8153_v26, %v6810_v4  ;;  %v9769_v41 = vor.u32 %v8157_v24, %v6816_v28  ;;  %v9771_v43 = vor.u32 %v8154_v30, %v6818_v5 }
 0x1bf   :  { %12482 = vst [vmem:[#allocation118_spill] sm:$0xff] %v9740_v27  ;;  %v2452_v14 = vadd.f32 %v2451_v61, %v2363_v1  ;;  %v8230_v1 = vld [vmem:[#allocation2 + $0x204] sm:$0xf]  ;;  %v9773_v25 = vor.u32 %v8158_v56, %v6824_v18  ;;  %v7242_v16 = vld [vmem:[#allocation2 + $0x310] sm:$0xf0]  ;;  %v6989_v40 = vor.u32 %v8198_v9, %v6986_v34 }
 0x1c0   :  { %12483 = vst [vmem:[#allocation119_spill] sm:$0xff] %v9767_v12  ;;  %2690 = vmatpush.bf16.msra.mxu0 %v7005_v60  ;;  %2779 = vmatpush.bf16.msra.mxu1 %v7133_v8  ;;  %v8262_v15 = vld [vmem:[#allocation2 + $0x304] sm:$0xf]  ;;  %v7482_v8 = vld [vmem:[#allocation2 + $0x4f0] sm:$0xf0] }
 0x1c1   :  { %v2541_v61 = vadd.f32 %v2540_v7, %v2452_v14  ;;  %12484 = vst [vmem:[#allocation120_spill] sm:$0xff] %v9769_v41  ;;  %v7114_v14 = vld [vmem:[#allocation2 + $0x210] sm:$0xf0] }
 0x1c2   :  { %v2275_v19 = vpop.f32.mrf.mxu3  ;;  %12485 = vst [vmem:[#allocation121_spill] sm:$0xff] %v9771_v43  ;;  %2868 = vmatpush.bf16.msra.mxu2 %v7261_v10 }
 0x1c3   :  { %v2276_v7 = vadd.f32 %v2275_v19, %v9224_v35  ;;  %12486 = vst [vmem:[#allocation122_spill] sm:$0xff] %v9773_v25  ;;  %v7117_v35 = vor.u32 %v8230_v1, %v7114_v14  ;;  %v7245_v19 = vor.u32 %v8262_v15, %v7242_v16  ;;  %v8165_v14 = vld [vmem:[%s12078_s0 + $0x378] sm:$0xf0] }
 0x1c4   :  { %v2542_v42 = vpop.f32.mrf.mxu2  ;;  %v2367_v27 = vpop.f32.mrf.mxu0  ;;  %2691 = vmatpush.bf16.msra.mxu0 %v6989_v40  ;;  %v8160_v40 = vld [vmem:[%s12078_s0 + $0x354] sm:$0xf] }
 0x1c5   :  { %v2365_v49 = vadd.f32 %v2364_v37, %v2276_v7  ;;  %v2456_v32 = vpop.f32.mrf.mxu1  ;;  %2780 = vmatpush.bf16.msra.mxu1 %v7117_v35  ;;  %v4504_v37 = vmax.f32 %v2541_v61, 0.0  ;;  %v6838_v61 = vld [vmem:[%s12078_s0 + $0x36c] sm:$0xf0]  ;;  %v6846_v7 = vld [vmem:[%s12078_s0 + $0x374] sm:$0xf0] }
 0x1c6   :  { %2869 = vmatpush.bf16.msra.mxu2 %v7245_v19  ;;  %v9808_v35 = vor.u32 %v8160_v40, %v6838_v61 }
 0x1c7   :  { %v2454_v26 = vadd.f32 %v2453_v11, %v2365_v49  ;;  %2317 = vmatmul.bf16.gmra.mxu3 %v9767_v12  ;;  %2406 = vmatmul.bf16.gmra.mxu0 %v9769_v41  ;;  %v8322_v11 = vld [vmem:[#allocation2 + $0x4e4] sm:$0xf] }
 0x1c8   :  { %2495 = vmatmul.bf16.gmra.mxu1 %v9771_v43  ;;  %v7485_v18 = vor.u32 %v8322_v11, %v7482_v8  ;;  %12488 = vst [vmem:[#allocation124_spill] sm:$0xff] %v9808_v35 }
 0x1c9   :  { %7652 = vmatmul.msk.bf16.gmra.mxu2 %vm1923_vm0, %v9773_v25  ;;  %v2543_v4 = vadd.f32 %v2542_v42, %v2454_v26  ;;  %v6852_v42 = vld [vmem:[%s12078_s0 + $0x360] sm:$0xf] }
 0x1ca   :  { %v2278_v60 = vpop.f32.mrf.mxu3  ;;  %2951 = vmatpush.bf16.msrb.mxu3 %v7485_v18 }
 0x1cb   :  { %v4508_v28 = vmax.f32 %v2543_v4, 0.0  ;;  %v2279_v24 = vadd.f32 %v2278_v60, %v9240_v53  ;;  %v6844_v53 = vld [vmem:[%s12078_s0 + $0x358] sm:$0xf]  ;;  %v9814_v60 = vor.u32 %v8165_v14, %v6852_v42 }
 0x1cc   :  { %v2545_v30 = vpop.f32.mrf.mxu2  ;;  %v2369_v5 = vpop.f32.mrf.mxu0 }
 0x1cd   :  { %v2368_v56 = vadd.f32 %v2367_v27, %v2279_v24  ;;  %v2458_v10 = vpop.f32.mrf.mxu1  ;;  %v9781_v9 = vpack.c.bf16 %v4508_v28, %v4504_v37  ;;  %v8164_v27 = vld [vmem:[%s12078_s0 + $0x370] sm:$0xf0]  ;;  %12491 = vst [vmem:[#allocation127_spill] sm:$0xff] %v9814_v60 }
 0x1ce   :  { %v9810_v19 = vor.u32 %v8164_v27, %v6844_v53 }
 0x1cf   :  { %12487 = vst [vmem:[#allocation123_spill] sm:$0xff] %v9781_v9  ;;  %v2457_v34 = vadd.f32 %v2456_v32, %v2368_v56  ;;  %v8161_v32 = vld [vmem:[%s12078_s0 + $0x35c] sm:$0xf] }
 0x1d0   :  { %12489 = vst [vmem:[#allocation125_spill] sm:$0xff] %v9810_v19  ;;  %v9812_v4 = vor.u32 %v8161_v32, %v6846_v7 }
 0x1d1   :  { %v2546_v1 = vadd.f32 %v2545_v30, %v2457_v34 }
 0x1d2   :  { %v2280_v15 = vpop.f32.mrf.mxu3  ;;  %12490 = vst [vmem:[#allocation126_spill] sm:$0xff] %v9812_v4 }
 0x1d3   :  { %v2281_v16 = vadd.f32 %v2280_v15, %v9275_v44  ;;  %v4512_v11 = vmax.f32 %v2546_v1, 0.0 }
 0x1d4   :  { %v2547_v49 = vpop.f32.mrf.mxu2  ;;  %v2372_v26 = vpop.f32.mrf.mxu0 }
 0x1d5   :  { %v2370_v37 = vadd.f32 %v2369_v5, %v2281_v16  ;;  %v2461_v28 = vpop.f32.mrf.mxu1 }
 0x1d7   :  { %v2459_v24 = vadd.f32 %v2458_v10, %v2370_v37  ;;  %2322 = vmatmul.bf16.gmra.mxu3 %v9808_v35  ;;  %2411 = vmatmul.bf16.gmra.mxu0 %v9810_v19 }
 0x1d8   :  { %2500 = vmatmul.bf16.gmra.mxu1 %v9812_v4 }
 0x1d9   :  { %7653 = vmatmul.msk.bf16.gmra.mxu2 %vm1923_vm0, %v9814_v60  ;;  %v2548_v44 = vadd.f32 %v2547_v49, %v2459_v24  ;;  %v7466_v24 = vld [vmem:[#allocation2 + $0x4d0] sm:$0xf0] }
 0x1da   :  { %v2283_v30 = vpop.f32.mrf.mxu3 }
 0x1db   :  { %v4516_v8 = vmax.f32 %v2548_v44, 0.0  ;;  %v2284_v18 = vadd.f32 %v2283_v30, %v9291_v59 }
 0x1dc   :  { %v2550_v56 = vpop.f32.mrf.mxu2  ;;  %v2374_v34 = vpop.f32.mrf.mxu0 }
 0x1dd   :  { %v2373_v5 = vadd.f32 %v2372_v26, %v2284_v18  ;;  %v2463_v40 = vpop.f32.mrf.mxu1  ;;  %v9822_v10 = vpack.c.bf16 %v4516_v8, %v4512_v11 }
 0x1df   :  { %12492 = vst [vmem:[#allocation128_spill] sm:$0xff] %v9822_v10  ;;  %v2462_v61 = vadd.f32 %v2461_v28, %v2373_v5  ;;  %v8318_v28 = vld [vmem:[#allocation2 + $0x4c4] sm:$0xf] }
 0x1e0   :  { %v7469_v30 = vor.u32 %v8318_v28, %v7466_v24 }
 0x1e1   :  { %v2551_v53 = vadd.f32 %v2550_v56, %v2462_v61 }
 0x1e2   :  { %v2285_v27 = vpop.f32.mrf.mxu3  ;;  %2952 = vmatpush.bf16.msrb.mxu3 %v7469_v30 }
 0x1e3   :  { %v2286_v32 = vadd.f32 %v2285_v27, %v9326_v29  ;;  %v4520_v49 = vmax.f32 %v2551_v53, 0.0 }
 0x1e4   :  { %v2552_v7 = vpop.f32.mrf.mxu2  ;;  %v2377_v42 = vpop.f32.mrf.mxu0 }
 0x1e5   :  { %v2375_v14 = vadd.f32 %v2374_v34, %v2286_v32  ;;  %v2466_v15 = vpop.f32.mrf.mxu1 }
 0x1e7   :  { %v2464_v16 = vadd.f32 %v2463_v40, %v2375_v14  ;;  %2603 = vmatmul.bf16.vlgmr.msra.gmra.mxu3 %v8628_v20  ;;  %2692 = vmatmul.bf16.vlgmr.msra.gmra.mxu0 %v8632_v22 }
 0x1e8   :  { %2781 = vmatmul.bf16.vlgmr.msra.gmra.mxu1 %v8634_v23 }
 0x1e9   :  { %2870 = vmatmul.bf16.vlgmr.msra.gmra.mxu2 %v9118_v54  ;;  %v2553_v59 = vadd.f32 %v2552_v7, %v2464_v16 }
 0x1ea   :  { %v2288_v1 = vpop.f32.mrf.mxu3 }
 0x1eb   :  { %v4524_v26 = vmax.f32 %v2553_v59, 0.0  ;;  %v2289_v37 = vadd.f32 %v2288_v1, %v9341_v17 }
 0x1ec   :  { %v2555_v29 = vpop.f32.mrf.mxu2  ;;  %v2379_v44 = vpop.f32.mrf.mxu0 }
 0x1ed   :  { %v2378_v11 = vadd.f32 %v2377_v42, %v2289_v37  ;;  %v2468_v8 = vpop.f32.mrf.mxu1  ;;  %v9830_v18 = vpack.c.bf16 %v4524_v26, %v4520_v49 }
 0x1ef   :  { %12493 = vst [vmem:[#allocation129_spill] sm:$0xff] %v9830_v18  ;;  %v2467_v56 = vadd.f32 %v2466_v15, %v2378_v11  ;;  %v12516_v18 = vld [vmem:[#allocation33_spill] sm:$0xff] }
 0x1f1   :  { %v2556_v34 = vadd.f32 %v2555_v29, %v2467_v56 }
 0x1f2   :  { %v2290_v5 = vpop.f32.mrf.mxu3 }
 0x1f3   :  { %v2291_v40 = vadd.f32 %v2290_v5, %v9375_v6  ;;  %v4528_v14 = vmax.f32 %v2556_v34, 0.0 }
 0x1f4   :  { %v2557_v61 = vpop.f32.mrf.mxu2  ;;  %v2382_v53 = vpop.f32.mrf.mxu0 }
 0x1f5   :  { %v2380_v27 = vadd.f32 %v2379_v44, %v2291_v40  ;;  %v2471_v32 = vpop.f32.mrf.mxu1 }
 0x1f7   :  { %v2469_v17 = vadd.f32 %v2468_v8, %v2380_v27  ;;  %2608 = vmatmul.bf16.gmra.mxu3 %v8669_v31  ;;  %2697 = vmatmul.bf16.gmra.mxu0 %v8673_v33  ;;  %v7450_v27 = vld [vmem:[#allocation2 + $0x4b0] sm:$0xf0] }
 0x1f8   :  { %2786 = vmatmul.bf16.gmra.mxu1 %v8675_v36  ;;  %v12555_v36 = vld [vmem:[#allocation56_spill] sm:$0xff] }
 0x1f9   :  { %2875 = vmatmul.bf16.gmra.mxu2 %v9169_v52  ;;  %v2558_v7 = vadd.f32 %v2557_v61, %v2469_v17 }
 0x1fa   :  { %v2293_v42 = vpop.f32.mrf.mxu3 }
 0x1fb   :  { %v4532_v15 = vmax.f32 %v2558_v7, 0.0  ;;  %v2294_v16 = vadd.f32 %v2293_v42, %v9390_v50 }
 0x1fc   :  { %v2560_v6 = vpop.f32.mrf.mxu2  ;;  %v2384_v59 = vpop.f32.mrf.mxu0 }
 0x1fd   :  { %v2383_v1 = vadd.f32 %v2382_v53, %v2294_v16  ;;  %v2473_v49 = vpop.f32.mrf.mxu1  ;;  %v9838_v26 = vpack.c.bf16 %v4532_v15, %v4528_v14  ;;  %v8314_v53 = vld [vmem:[#allocation2 + $0x4a4] sm:$0xf] }
 0x1fe   :  { %v7453_v17 = vor.u32 %v8314_v53, %v7450_v27 }
 0x1ff   :  { %12494 = vst [vmem:[#allocation130_spill] sm:$0xff] %v9838_v26  ;;  %v2472_v37 = vadd.f32 %v2471_v32, %v2383_v1 }
 0x200   :  { %2953 = vmatpush.bf16.msrb.mxu3 %v7453_v17 }
 0x201   :  { %v2561_v29 = vadd.f32 %v2560_v6, %v2472_v37 }
 0x202   :  { %v2295_v28 = vpop.f32.mrf.mxu3 }
 0x203   :  { %v2296_v24 = vadd.f32 %v2295_v28, %v9424_v38  ;;  %v4536_v5 = vmax.f32 %v2561_v29, 0.0 }
 0x204   :  { %v2562_v44 = vpop.f32.mrf.mxu2  ;;  %v2387_v30 = vpop.f32.mrf.mxu0 }
 0x205   :  { %v2385_v11 = vadd.f32 %v2384_v59, %v2296_v24  ;;  %v2476_v8 = vpop.f32.mrf.mxu1 }
 0x207   :  { %v2474_v56 = vadd.f32 %v2473_v49, %v2385_v11  ;;  %2613 = vmatmul.bf16.gmra.mxu3 %v8707_v45  ;;  %2702 = vmatmul.bf16.gmra.mxu0 %v8712_v47 }
 0x208   :  { %2791 = vmatmul.bf16.gmra.mxu1 %v8714_v48 }
 0x209   :  { %2880 = vmatmul.bf16.gmra.mxu2 %v9220_v51  ;;  %v2563_v50 = vadd.f32 %v2562_v44, %v2474_v56  ;;  %v6864_v51 = vld [vmem:[#allocation2 + $0x8] sm:$0xf] }
 0x20a   :  { %v2298_v34 = vpop.f32.mrf.mxu3 }
 0x20b   :  { %v4540_v40 = vmax.f32 %v2563_v50, 0.0  ;;  %v2299_v61 = vadd.f32 %v2298_v34, %v9439_v39 }
 0x20c   :  { %v2565_v38 = vpop.f32.mrf.mxu2  ;;  %v2389_v32 = vpop.f32.mrf.mxu0 }
 0x20d   :  { %v2388_v7 = vadd.f32 %v2387_v30, %v2299_v61  ;;  %v2478_v42 = vpop.f32.mrf.mxu1  ;;  %v9846_v14 = vpack.c.bf16 %v4540_v40, %v4536_v5 }
 0x20f   :  { %12495 = vst [vmem:[#allocation131_spill] sm:$0xff] %v9846_v14  ;;  %v2477_v15 = vadd.f32 %v2476_v8, %v2388_v7 }
 0x211   :  { %v2566_v16 = vadd.f32 %v2565_v38, %v2477_v15 }
 0x212   :  { %v2300_v6 = vpop.f32.mrf.mxu3 }
 0x213   :  { %v2301_v59 = vadd.f32 %v2300_v6, %v9473_v46  ;;  %v4544_v44 = vmax.f32 %v2566_v16, 0.0 }
 0x214   :  { %v2567_v1 = vpop.f32.mrf.mxu2  ;;  %v2392_v49 = vpop.f32.mrf.mxu0 }
 0x215   :  { %v2390_v37 = vadd.f32 %v2389_v32, %v2301_v59  ;;  %v2481_v29 = vpop.f32.mrf.mxu1 }
 0x217   :  { %v2479_v39 = vadd.f32 %v2478_v42, %v2390_v37  ;;  %2618 = vmatmul.bf16.gmra.mxu3 %v8747_v55  ;;  %2707 = vmatmul.bf16.gmra.mxu0 %v8751_v57  ;;  %v12498_v42 = vld [vmem:[#allocation67_spill] sm:$0xff]  ;;  %v8310_v37 = vld [vmem:[#allocation2 + $0x484] sm:$0xf] }
 0x218   :  { %2796 = vmatmul.bf16.gmra.mxu1 %v8753_v58  ;;  %v8181_v58 = vld [vmem:[#allocation2 + $0x74] sm:$0xf0] }
 0x219   :  { %2885 = vmatmul.bf16.gmra.mxu2 %v9271_v21  ;;  %v2568_v28 = vadd.f32 %v2567_v1, %v2479_v39  ;;  %v12499_v1 = vld [vmem:[#allocation71_spill] sm:$0xff] }
 0x21a   :  { %v2303_v24 = vpop.f32.mrf.mxu3 }
 0x21b   :  { %v4548_v30 = vmax.f32 %v2568_v28, 0.0  ;;  %v2304_v11 = vadd.f32 %v2303_v24, %v9488_v13  ;;  %v12497_v13 = vld [vmem:[#allocation22_spill] sm:$0xff] }
 0x21c   :  { %v2570_v46 = vpop.f32.mrf.mxu2  ;;  %v2394_v8 = vpop.f32.mrf.mxu0 }
 0x21d   :  { %v2393_v56 = vadd.f32 %v2392_v49, %v2304_v11  ;;  %v2483_v50 = vpop.f32.mrf.mxu1  ;;  %v9854_v34 = vpack.c.bf16 %v4548_v30, %v4544_v44 }
 0x21f   :  { %12496 = vst [vmem:[#allocation132_spill] sm:$0xff] %v9854_v34  ;;  %v2482_v5 = vadd.f32 %v2481_v29, %v2393_v56  ;;  %v7434_v29 = vld [vmem:[#allocation2 + $0x490] sm:$0xf0]  ;;  %v12501_v56 = vld [vmem:[#allocation72_spill] sm:$0xff] }
 0x220   :  { %v7437_v28 = vor.u32 %v8310_v37, %v7434_v29 }
 0x221   :  { %v2571_v40 = vadd.f32 %v2570_v46, %v2482_v5 }
 0x222   :  { %v2305_v61 = vpop.f32.mrf.mxu3  ;;  %2954 = vmatpush.bf16.msrb.mxu3 %v7437_v28 }
 0x223   :  { %v2306_v38 = vadd.f32 %v2305_v61, %v9522_v62  ;;  %v4552_v6 = vmax.f32 %v2571_v40, 0.0 }
 0x224   :  { %v2572_v53 = vpop.f32.mrf.mxu2  ;;  %v2397_v27 = vpop.f32.mrf.mxu0 }
 0x225   :  { %v2395_v32 = vadd.f32 %v2394_v8, %v2306_v38  ;;  %v2486_v17 = vpop.f32.mrf.mxu1 }
 0x227   :  { %v2484_v7 = vadd.f32 %v2483_v50, %v2395_v32  ;;  %2623 = vmatmul.bf16.gmra.mxu3 %v8787_v0  ;;  %2712 = vmatmul.bf16.gmra.mxu0 %v8791_v2  ;;  %v12502_v32 = vld [vmem:[#allocation23_spill] sm:$0xff]  ;;  %v6928_v2 = vld [vmem:[#allocation2 + $0x88] sm:$0xf] }
 0x228   :  { %2801 = vmatmul.bf16.gmra.mxu1 %v12497_v13 }
 0x229   :  { %2890 = vmatmul.bf16.gmra.mxu2 %v12498_v42  ;;  %v2573_v15 = vadd.f32 %v2572_v53, %v2484_v7  ;;  %v12503_v7 = vld [vmem:[#allocation25_spill] sm:$0xff] }
 0x22a   :  { %v2308_v16 = vpop.f32.mrf.mxu3 }
 0x22b   :  { %v4556_v59 = vmax.f32 %v2573_v15, 0.0  ;;  %v2309_v49 = vadd.f32 %v2308_v16, %v12499_v1  ;;  %v12504_v15 = vld [vmem:[#allocation26_spill] sm:$0xff]  ;;  %v12506_v1 = vld [vmem:[#allocation77_spill] sm:$0xff] }
 0x22c   :  { %v2575_v62 = vpop.f32.mrf.mxu2  ;;  %v2399_v39 = vpop.f32.mrf.mxu0 }
 0x22d   :  { %v2398_v24 = vadd.f32 %v2397_v27, %v2309_v49  ;;  %v2488_v44 = vpop.f32.mrf.mxu1  ;;  %v9862_v30 = vpack.c.bf16 %v4556_v59, %v4552_v6  ;;  %v12505_v27 = vld [vmem:[#allocation73_spill] sm:$0xff] }
 0x22f   :  { %12500 = vst [vmem:[#allocation71_spill] sm:$0xff] %v9862_v30  ;;  %v2487_v11 = vadd.f32 %v2486_v17, %v2398_v24 }
 0x231   :  { %v2576_v46 = vadd.f32 %v2575_v62, %v2487_v11 }
 0x232   :  { %v2310_v8 = vpop.f32.mrf.mxu3 }
 0x233   :  { %v2311_v50 = vadd.f32 %v2310_v8, %v12501_v56  ;;  %v4560_v17 = vmax.f32 %v2576_v46, 0.0  ;;  %v12508_v8 = vld [vmem:[#allocation78_spill] sm:$0xff]  ;;  %v12509_v46 = vld [vmem:[#allocation27_spill] sm:$0xff] }
 0x234   :  { %v2577_v5 = vpop.f32.mrf.mxu2  ;;  %v2402_v40 = vpop.f32.mrf.mxu0 }
 0x235   :  { %v2400_v61 = vadd.f32 %v2399_v39, %v2311_v50  ;;  %v2491_v38 = vpop.f32.mrf.mxu1 }
 0x237   :  { %v2489_v53 = vadd.f32 %v2488_v44, %v2400_v61  ;;  %2628 = vmatmul.bf16.gmra.mxu3 %v12502_v32  ;;  %2717 = vmatmul.bf16.gmra.mxu0 %v12503_v7  ;;  %v8197_v7 = vld [vmem:[#allocation2 + $0xf4] sm:$0xf0] }
 0x238   :  { %2806 = vmatmul.bf16.gmra.mxu1 %v12504_v15  ;;  %v6976_v15 = vld [vmem:[#allocation2 + $0xe8] sm:$0xf] }
 0x239   :  { %2895 = vmatmul.bf16.gmra.mxu2 %v12505_v27  ;;  %v2578_v16 = vadd.f32 %v2577_v5, %v2489_v53 }
 0x23a   :  { %v2313_v6 = vpop.f32.mrf.mxu3 }
 0x23b   :  { %v4564_v59 = vmax.f32 %v2578_v16, 0.0  ;;  %v2314_v49 = vadd.f32 %v2313_v6, %v12506_v1  ;;  %v12510_v16 = vld [vmem:[#allocation29_spill] sm:$0xff]  ;;  %v12511_v6 = vld [vmem:[#allocation30_spill] sm:$0xff] }
 0x23c   :  { %v2580_v62 = vpop.f32.mrf.mxu2  ;;  %v2404_v37 = vpop.f32.mrf.mxu0 }
 0x23d   :  { %v2403_v29 = vadd.f32 %v2402_v40, %v2314_v49  ;;  %v2493_v39 = vpop.f32.mrf.mxu1  ;;  %v9870_v28 = vpack.c.bf16 %v4564_v59, %v4560_v17  ;;  %v12512_v40 = vld [vmem:[#allocation79_spill] sm:$0xff] }
 0x23e   :  { %v12513_v49 = vld [vmem:[#allocation83_spill] sm:$0xff] }
 0x23f   :  { %12507 = vst [vmem:[#allocation72_spill] sm:$0xff] %v9870_v28  ;;  %v2492_v24 = vadd.f32 %v2491_v38, %v2403_v29 }
 0x241   :  { %v2581_v44 = vadd.f32 %v2580_v62, %v2492_v24  ;;  %v8306_v24 = vld [vmem:[#allocation2 + $0x464] sm:$0xf] }
 0x242   :  { %v2315_v11 = vpop.f32.mrf.mxu3 }
 0x243   :  { %v2316_v56 = vadd.f32 %v2315_v11, %v12508_v8  ;;  %v4568_v38 = vmax.f32 %v2581_v44, 0.0  ;;  %v7418_v11 = vld [vmem:[#allocation2 + $0x470] sm:$0xf0] }
 0x244   :  { %v2582_v50 = vpop.f32.mrf.mxu2  ;;  %v2407_v61 = vpop.f32.mrf.mxu0  ;;  %v7421_v8 = vor.u32 %v8306_v24, %v7418_v11  ;;  %v12517_v24 = vld [vmem:[#allocation34_spill] sm:$0xff] }
 0x245   :  { %v2405_v30 = vadd.f32 %v2404_v37, %v2316_v56  ;;  %v2496_v5 = vpop.f32.mrf.mxu1 }
 0x246   :  { %2955 = vmatpush.bf16.msrb.mxu3 %v7421_v8 }
 0x247   :  { %v2494_v53 = vadd.f32 %v2493_v39, %v2405_v30  ;;  %2633 = vmatmul.bf16.gmra.mxu3 %v12509_v46  ;;  %2722 = vmatmul.bf16.gmra.mxu0 %v12510_v16  ;;  %v12535_v16 = vld [vmem:[#allocation47_spill] sm:$0xff] }
 0x248   :  { %2811 = vmatmul.bf16.gmra.mxu1 %v12511_v6 }
 0x249   :  { %2900 = vmatmul.bf16.gmra.mxu2 %v12512_v40  ;;  %v2583_v17 = vadd.f32 %v2582_v50, %v2494_v53 }
 0x24a   :  { %v2318_v59 = vpop.f32.mrf.mxu3 }
 0x24b   :  { %v4572_v1 = vmax.f32 %v2583_v17, 0.0  ;;  %v2319_v62 = vadd.f32 %v2318_v59, %v12513_v49  ;;  %v12515_v49 = vld [vmem:[#allocation31_spill] sm:$0xff] }
 0x24c   :  { %v2585_v29 = vpop.f32.mrf.mxu2  ;;  %v2409_v37 = vpop.f32.mrf.mxu0 }
 0x24d   :  { %v2408_v30 = vadd.f32 %v2407_v61, %v2319_v62  ;;  %v2498_v39 = vpop.f32.mrf.mxu1  ;;  %v9878_v56 = vpack.c.bf16 %v4572_v1, %v4568_v38  ;;  %v12518_v61 = vld [vmem:[#allocation84_spill] sm:$0xff]  ;;  %v8354_v1 = vld [vmem:[#allocation2 + $0x5e4] sm:$0xf] }
 0x24f   :  { %12514 = vst [vmem:[#allocation77_spill] sm:$0xff] %v9878_v56  ;;  %v2497_v28 = vadd.f32 %v2496_v5, %v2408_v30  ;;  %v7610_v5 = vld [vmem:[#allocation2 + $0x5f0] sm:$0xf0] }
 0x251   :  { %v2586_v34 = vadd.f32 %v2585_v29, %v2497_v28  ;;  %v8358_v28 = vld [vmem:[#allocation2 + $0x604] sm:$0xf]  ;;  %v7613_v29 = vor.u32 %v8354_v1, %v7610_v5 }
 0x252   :  { %v2320_v14 = vpop.f32.mrf.mxu3 }
 0x253   :  { %v2321_v50 = vadd.f32 %v2320_v14, %v9467_v63  ;;  %v7626_v63 = vld [vmem:[#allocation2 + $0x610] sm:$0xf0]  ;;  %v4576_v14 = vmax.f32 %v2586_v34, 0.0  ;;  %3040 = vmatpush.bf16.msrb.mxu0 %v7613_v29 }
 0x254   :  { %v2587_v53 = vpop.f32.mrf.mxu2  ;;  %v2412_v44 = vpop.f32.mrf.mxu0 }
 0x255   :  { %v2410_v17 = vadd.f32 %v2409_v37, %v2321_v50  ;;  %v2501_v26 = vpop.f32.mrf.mxu1  ;;  %v12519_v37 = vld [vmem:[#allocation88_spill] sm:$0xff] }
 0x257   :  { %v2499_v59 = vadd.f32 %v2498_v39, %v2410_v17  ;;  %2638 = vmatmul.bf16.gmra.mxu3 %v12515_v49  ;;  %2727 = vmatmul.bf16.gmra.mxu0 %v12516_v18  ;;  %v7629_v39 = vor.u32 %v8358_v28, %v7626_v63  ;;  %v12523_v28 = vld [vmem:[#allocation37_spill] sm:$0xff]  ;;  %v12525_v63 = vld [vmem:[#allocation90_spill] sm:$0xff] }
 0x258   :  { %2816 = vmatmul.bf16.gmra.mxu1 %v12517_v24 }
 0x259   :  { %2905 = vmatmul.bf16.gmra.mxu2 %v12518_v61  ;;  %v2588_v38 = vadd.f32 %v2587_v53, %v2499_v59  ;;  %3136 = vmatpush.bf16.msrb.mxu1 %v7629_v39  ;;  %v12521_v61 = vld [vmem:[#allocation89_spill] sm:$0xff] }
 0x25a   :  { %v2323_v62 = vpop.f32.mrf.mxu3 }
 0x25b   :  { %v4580_v11 = vmax.f32 %v2588_v38, 0.0  ;;  %v2324_v8 = vadd.f32 %v2323_v62, %v12519_v37  ;;  %v12522_v62 = vld [vmem:[#allocation35_spill] sm:$0xff] }
 0x25c   :  { %v2590_v30 = vpop.f32.mrf.mxu2  ;;  %v2414_v50 = vpop.f32.mrf.mxu0 }
 0x25d   :  { %v2413_v17 = vadd.f32 %v2412_v44, %v2324_v8  ;;  %v2503_v56 = vpop.f32.mrf.mxu1  ;;  %v9886_v10 = vpack.c.bf16 %v4580_v11, %v4576_v14  ;;  %v8479_v44 = vld [vmem:[%s12080_s2] sm:$0xf]  ;;  %v7402_v14 = vld [vmem:[#allocation2 + $0x450] sm:$0xf0] }
 0x25e   :  { %v9894_v29 = vperm.slane %v8479_v44, 1 }
 0x25f   :  { %12520 = vst [vmem:[#allocation78_spill] sm:$0xff] %v9886_v10  ;;  %v2502_v53 = vadd.f32 %v2501_v26, %v2413_v17  ;;  %v12524_v26 = vld [vmem:[#allocation38_spill] sm:$0xff] }
 0x261   :  { %v2591_v59 = vadd.f32 %v2590_v30, %v2502_v53 }
 0x262   :  { %v2325_v9 = vpop.f32.mrf.mxu3 }
 0x263   :  { %v2326_v24 = vadd.f32 %v2325_v9, %v12521_v61  ;;  %v8302_v61 = vld [vmem:[#allocation2 + $0x444] sm:$0xf] }
 0x264   :  { %v2592_v1 = vpop.f32.mrf.mxu2  ;;  %v2693_v5 = vpop.f32.mrf.mxu0  ;;  %v7405_v11 = vor.u32 %v8302_v61, %v7402_v14  ;;  %v12527_v14 = vld [vmem:[#allocation39_spill] sm:$0xff] }
 0x265   :  { %v2415_v34 = vadd.f32 %v2414_v50, %v2326_v24  ;;  %v2782_v38 = vpop.f32.mrf.mxu1 }
 0x266   :  { %2956 = vmatpush.bf16.msrb.mxu3 %v7405_v11  ;;  %v12529_v11 = vld [vmem:[#allocation42_spill] sm:$0xff] }
 0x267   :  { %v2504_v18 = vadd.f32 %v2503_v56, %v2415_v34  ;;  %2643 = vmatmul.bf16.gmra.mxu3 %v12522_v62  ;;  %2732 = vmatmul.bf16.gmra.mxu0 %v12523_v28  ;;  %v4584_v56 = vmax.f32 %v2591_v59, 0.0  ;;  %v12531_v28 = vld [vmem:[#allocation43_spill] sm:$0xff] }
 0x268   :  { %2821 = vmatmul.bf16.gmra.mxu1 %v12524_v26 }
 0x269   :  { %2910 = vmatmul.bf16.gmra.mxu2 %v12525_v63  ;;  %v2593_v9 = vadd.f32 %v2592_v1, %v2504_v18 }
 0x26a   :  { %v2604_v24 = vpop.f32.mrf.mxu3 }
 0x26b   :  { %v4588_v37 = vmax.f32 %v2593_v9, 0.0  ;;  %v2605_v8 = vadd.f32 %v2604_v24, %v9894_v29  ;;  %v12528_v24 = vld [vmem:[#allocation41_spill] sm:$0xff] }
 0x26c   :  { %v2871_v30 = vpop.f32.mrf.mxu2  ;;  %v2695_v39 = vpop.f32.mrf.mxu0 }
 0x26d   :  { %v2694_v50 = vadd.f32 %v2693_v5, %v2605_v8  ;;  %v2784_v17 = vpop.f32.mrf.mxu1  ;;  %v9899_v53 = vpack.c.bf16 %v4588_v37, %v4584_v56  ;;  %v12530_v5 = vld [vmem:[#allocation94_spill] sm:$0xff]  ;;  %v7594_v37 = vld [vmem:[#allocation2 + $0x5d0] sm:$0xf0] }
 0x26f   :  { %12526 = vst [vmem:[#allocation83_spill] sm:$0xff] %v9899_v53  ;;  %v2783_v34 = vadd.f32 %v2782_v38, %v2694_v50  ;;  %v8350_v38 = vld [vmem:[#allocation2 + $0x5c4] sm:$0xf] }
 0x271   :  { %v9901_v44 = vadd.f32 %v2871_v30, %v2783_v34  ;;  %v7597_v30 = vor.u32 %v8350_v38, %v7594_v37  ;;  %v12532_v38 = vld [vmem:[#allocation45_spill] sm:$0xff]  ;;  %v12533_v37 = vld [vmem:[#allocation46_spill] sm:$0xff] }
 0x272   :  { %v2606_v10 = vpop.f32.mrf.mxu3 }
 0x273   :  { %v2607_v18 = vadd.f32 %v2606_v10, %v9894_v29  ;;  %3041 = vmatpush.bf16.msrb.mxu0 %v7597_v30  ;;  %v7386_v30 = vld [vmem:[#allocation2 + $0x430] sm:$0xf0] }
 0x274   :  { %v2873_v1 = vpop.f32.mrf.mxu2  ;;  %v2698_v63 = vpop.f32.mrf.mxu0 }
 0x275   :  { %v2696_v61 = vadd.f32 %v2695_v39, %v2607_v18  ;;  %v2787_v59 = vpop.f32.mrf.mxu1 }
 0x277   :  { %v2785_v9 = vadd.f32 %v2784_v17, %v2696_v61  ;;  %2648 = vmatmul.bf16.gmra.mxu3 %v12527_v14  ;;  %2737 = vmatmul.bf16.gmra.mxu0 %v12528_v24 }
 0x278   :  { %2826 = vmatmul.bf16.gmra.mxu1 %v12529_v11 }
 0x279   :  { %2915 = vmatmul.bf16.gmra.mxu2 %v12530_v5  ;;  %v9908_v56 = vadd.f32 %v2873_v1, %v2785_v9 }
 0x27a   :  { %v2609_v8 = vpop.f32.mrf.mxu3 }
 0x27b   :  { %v2610_v10 = vadd.f32 %v2609_v8, %v9894_v29  ;;  %v12534_v8 = vld [vmem:[#allocation99_spill] sm:$0xff] }
 0x27c   :  { %v2876_v50 = vpop.f32.mrf.mxu2  ;;  %v2700_v39 = vpop.f32.mrf.mxu0 }
 0x27d   :  { %v2699_v17 = vadd.f32 %v2698_v63, %v2610_v10  ;;  %v2789_v34 = vpop.f32.mrf.mxu1 }
 0x27f   :  { %v2788_v18 = vadd.f32 %v2787_v59, %v2699_v17  ;;  %v8298_v59 = vld [vmem:[#allocation2 + $0x424] sm:$0xf] }
 0x281   :  { %v9911_v61 = vadd.f32 %v2876_v50, %v2788_v18  ;;  %v7389_v50 = vor.u32 %v8298_v59, %v7386_v30  ;;  %v12536_v59 = vld [vmem:[#allocation49_spill] sm:$0xff]  ;;  %v12537_v30 = vld [vmem:[#allocation50_spill] sm:$0xff] }
 0x282   :  { %v2611_v53 = vpop.f32.mrf.mxu3 }
 0x283   :  { %v2612_v11 = vadd.f32 %v2611_v53, %v9894_v29  ;;  %2957 = vmatpush.bf16.msrb.mxu3 %v7389_v50  ;;  %v7578_v50 = vld [vmem:[#allocation2 + $0x5b0] sm:$0xf0] }
 0x284   :  { %v2878_v5 = vpop.f32.mrf.mxu2  ;;  %v2703_v1 = vpop.f32.mrf.mxu0 }
 0x285   :  { %v2701_v9 = vadd.f32 %v2700_v39, %v2612_v11  ;;  %v2792_v24 = vpop.f32.mrf.mxu1 }
 0x287   :  { %v2790_v26 = vadd.f32 %v2789_v34, %v2701_v9  ;;  %2653 = vmatmul.bf16.gmra.mxu3 %v12531_v28  ;;  %2742 = vmatmul.bf16.gmra.mxu0 %v12532_v38 }
 0x288   :  { %2831 = vmatmul.bf16.gmra.mxu1 %v12533_v37 }
 0x289   :  { %2920 = vmatmul.bf16.gmra.mxu2 %v12534_v8  ;;  %v9918_v63 = vadd.f32 %v2878_v5, %v2790_v26 }
 0x28a   :  { %v2614_v10 = vpop.f32.mrf.mxu3 }
 0x28b   :  { %v2615_v53 = vadd.f32 %v2614_v10, %v9894_v29  ;;  %v12538_v10 = vld [vmem:[#allocation104_spill] sm:$0xff] }
 0x28c   :  { %v2881_v17 = vpop.f32.mrf.mxu2  ;;  %v2705_v11 = vpop.f32.mrf.mxu0 }
 0x28d   :  { %v2704_v39 = vadd.f32 %v2703_v1, %v2615_v53  ;;  %v2794_v34 = vpop.f32.mrf.mxu1 }
 0x28f   :  { %v2793_v18 = vadd.f32 %v2792_v24, %v2704_v39  ;;  %v8346_v24 = vld [vmem:[#allocation2 + $0x5a4] sm:$0xf] }
 0x291   :  { %v9921_v9 = vadd.f32 %v2881_v17, %v2793_v18  ;;  %v7581_v17 = vor.u32 %v8346_v24, %v7578_v50  ;;  %v12539_v50 = vld [vmem:[#allocation6_spill] sm:$0xff] }
 0x292   :  { %v2616_v38 = vpop.f32.mrf.mxu3 }
 0x293   :  { %v2617_v37 = vadd.f32 %v2616_v38, %v9894_v29  ;;  %3042 = vmatpush.bf16.msrb.mxu0 %v7581_v17  ;;  %v6977_v17 = vor.u32 %v8197_v7, %v6976_v15 }
 0x294   :  { %v2883_v8 = vpop.f32.mrf.mxu2  ;;  %v2708_v26 = vpop.f32.mrf.mxu0 }
 0x295   :  { %v2706_v5 = vadd.f32 %v2705_v11, %v2617_v37  ;;  %v2797_v40 = vpop.f32.mrf.mxu1  ;;  %3218 = vmatpush.bf16.msrb.mxu2 %v6977_v17 }
 0x297   :  { %v2795_v6 = vadd.f32 %v2794_v34, %v2706_v5  ;;  %2658 = vmatmul.bf16.gmra.mxu3 %v12535_v16  ;;  %2747 = vmatmul.bf16.gmra.mxu0 %v12536_v59 }
 0x298   :  { %2836 = vmatmul.bf16.gmra.mxu1 %v12537_v30 }
 0x299   :  { %2925 = vmatmul.bf16.gmra.mxu2 %v12538_v10  ;;  %v9928_v1 = vadd.f32 %v2883_v8, %v2795_v6 }
 0x29a   :  { %v2619_v53 = vpop.f32.mrf.mxu3 }
 0x29b   :  { %v2620_v38 = vadd.f32 %v2619_v53, %v9894_v29  ;;  %v12540_v53 = vld [vmem:[#allocation20_spill] sm:$0xff] }
 0x29c   :  { %v2886_v39 = vpop.f32.mrf.mxu2  ;;  %v2710_v37 = vpop.f32.mrf.mxu0 }
 0x29d   :  { %v2709_v11 = vadd.f32 %v2708_v26, %v2620_v38  ;;  %v2799_v34 = vpop.f32.mrf.mxu1  ;;  %v12541_v26 = vld [vmem:[#allocation36_spill] sm:$0xff] }
 0x29f   :  { %v2798_v18 = vadd.f32 %v2797_v40, %v2709_v11  ;;  %v12542_v40 = vld [vmem:[#allocation109_spill] sm:$0xff] }
 0x2a1   :  { %v9931_v5 = vadd.f32 %v2886_v39, %v2798_v18  ;;  %v8294_v39 = vld [vmem:[#allocation2 + $0x404] sm:$0xf]  ;;  %v8193_v18 = vld [vmem:[#allocation2 + $0xd4] sm:$0xf0] }
 0x2a2   :  { %v2621_v59 = vpop.f32.mrf.mxu3 }
 0x2a3   :  { %v2622_v30 = vadd.f32 %v2621_v59, %v9894_v29  ;;  %v7370_v59 = vld [vmem:[#allocation2 + $0x410] sm:$0xf0] }
 0x2a4   :  { %v2888_v10 = vpop.f32.mrf.mxu2  ;;  %v2713_v6 = vpop.f32.mrf.mxu0 }
 0x2a5   :  { %v2711_v8 = vadd.f32 %v2710_v37, %v2622_v30  ;;  %v2802_v27 = vpop.f32.mrf.mxu1  ;;  %v7373_v30 = vor.u32 %v8294_v39, %v7370_v59  ;;  %v6960_v37 = vld [vmem:[#allocation2 + $0xc8] sm:$0xf]  ;;  %v8342_v39 = vld [vmem:[#allocation2 + $0x584] sm:$0xf]  ;;  %v7562_v59 = vld [vmem:[#allocation2 + $0x590] sm:$0xf0] }
 0x2a6   :  { %v6961_v42 = vor.u32 %v8193_v18, %v6960_v37  ;;  %v7565_v37 = vor.u32 %v8342_v39, %v7562_v59  ;;  %v8185_v18 = vld [vmem:[#allocation2 + $0x94] sm:$0xf0]  ;;  %v8334_v59 = vld [vmem:[#allocation2 + $0x544] sm:$0xf] }
 0x2a7   :  { %v2800_v24 = vadd.f32 %v2799_v34, %v2711_v8  ;;  %2663 = vmatmul.bf16.gmra.mxu3 %v12539_v50  ;;  %2752 = vmatmul.bf16.gmra.mxu0 %v12540_v53 }
 0x2a8   :  { %2841 = vmatmul.bf16.gmra.mxu1 %v12541_v26  ;;  %2958 = vmatpush.bf16.msrb.mxu3 %v7373_v30  ;;  %v6944_v26 = vld [vmem:[#allocation2 + $0xa8] sm:$0xf] }
 0x2a9   :  { %2930 = vmatmul.bf16.gmra.mxu2 %v12542_v40  ;;  %v9938_v38 = vadd.f32 %v2888_v10, %v2800_v24  ;;  %v8189_v40 = vld [vmem:[#allocation2 + $0xb4] sm:$0xf0]  ;;  %3043 = vmatpush.bf16.msrb.mxu0 %v7565_v37  ;;  %v6896_v37 = vld [vmem:[#allocation2 + $0x48] sm:$0xf] }
 0x2aa   :  { %v2624_v11 = vpop.f32.mrf.mxu3  ;;  %3219 = vmatpush.bf16.msrb.mxu2 %v6961_v42  ;;  %v6945_v24 = vor.u32 %v8189_v40, %v6944_v26  ;;  %v7546_v26 = vld [vmem:[#allocation2 + $0x570] sm:$0xf0]  ;;  %v6912_v40 = vld [vmem:[#allocation2 + $0x68] sm:$0xf] }
 0x2ab   :  { %v2625_v34 = vadd.f32 %v2624_v11, %v9894_v29  ;;  %v6913_v39 = vor.u32 %v8181_v58, %v6912_v40  ;;  %v8330_v58 = vld [vmem:[#allocation2 + $0x524] sm:$0xf]  ;;  %v6880_v40 = vld [vmem:[#allocation2 + $0x28] sm:$0xf] }
 0x2ac   :  { %v2891_v8 = vpop.f32.mrf.mxu2  ;;  %v2715_v13 = vpop.f32.mrf.mxu0 }
 0x2ad   :  { %v2714_v7 = vadd.f32 %v2713_v6, %v2625_v34  ;;  %v2804_v15 = vpop.f32.mrf.mxu1  ;;  %v6929_v6 = vor.u32 %v8185_v18, %v6928_v2 }
 0x2ae   :  { %3220 = vmatpush.bf16.msrb.mxu2 %v6945_v24 }
 0x2af   :  { %v2803_v10 = vadd.f32 %v2802_v27, %v2714_v7  ;;  %v8338_v27 = vld [vmem:[#allocation2 + $0x564] sm:$0xf] }
 0x2b0   :  { %v12543_v7 = vld [vmem:[#allocation9_spill] sm:$0xff]  ;;  %v7549_v24 = vor.u32 %v8338_v27, %v7546_v26 }
 0x2b1   :  { %v9941_v53 = vadd.f32 %v2891_v8, %v2803_v10  ;;  %v12544_v10 = vld [vmem:[#allocation24_spill] sm:$0xff] }
 0x2b2   :  { %v2626_v17 = vpop.f32.mrf.mxu3  ;;  %3221 = vmatpush.bf16.msrb.mxu2 %v6929_v6  ;;  %3044 = vmatpush.bf16.msrb.mxu0 %v7549_v24 }
 0x2b3   :  { %v2627_v11 = vadd.f32 %v2626_v17, %v9894_v29  ;;  %v12545_v17 = vld [vmem:[#allocation40_spill] sm:$0xff] }
 0x2b4   :  { %v2893_v21 = vpop.f32.mrf.mxu2  ;;  %v2718_v30 = vpop.f32.mrf.mxu0 }
 0x2b5   :  { %v2716_v34 = vadd.f32 %v2715_v13, %v2627_v11  ;;  %v2807_v42 = vpop.f32.mrf.mxu1  ;;  %v7530_v11 = vld [vmem:[#allocation2 + $0x550] sm:$0xf0] }
 0x2b6   :  { %3222 = vmatpush.bf16.msrb.mxu2 %v6913_v39  ;;  %v7533_v6 = vor.u32 %v8334_v59, %v7530_v11  ;;  %v8173_v39 = vld [vmem:[#allocation2 + $0x34] sm:$0xf0]  ;;  %v8326_v59 = vld [vmem:[#allocation2 + $0x504] sm:$0xf]  ;;  %v7498_v11 = vld [vmem:[#allocation2 + $0x510] sm:$0xf0] }
 0x2b7   :  { %v2805_v8 = vadd.f32 %v2804_v15, %v2716_v34  ;;  %2668 = vmatmul.bf16.gmra.mxu3 %v12543_v7  ;;  %2757 = vmatmul.bf16.gmra.mxu0 %v12544_v10  ;;  %v8177_v34 = vld [vmem:[#allocation2 + $0x54] sm:$0xf0] }
 0x2b8   :  { %2846 = vmatmul.bf16.gmra.mxu1 %v12545_v17  ;;  %v6897_v26 = vor.u32 %v8177_v34, %v6896_v37  ;;  %3045 = vmatpush.bf16.msrb.mxu0 %v7533_v6  ;;  %v8169_v6 = vld [vmem:[#allocation2 + $0x14] sm:$0xf0] }
 0x2b9   :  { %2935 = vmatmul.bf16.gmra.mxu2 %v9725_v3  ;;  %v9948_v2 = vadd.f32 %v2893_v21, %v2805_v8  ;;  %v7514_v21 = vld [vmem:[#allocation2 + $0x530] sm:$0xf0]  ;;  %v6881_v3 = vor.u32 %v8173_v39, %v6880_v40  ;;  %v7104_v40 = vld [vmem:[#allocation2 + $0x1e8] sm:$0xf] }
 0x2ba   :  { %v2629_v13 = vpop.f32.mrf.mxu3  ;;  %3223 = vmatpush.bf16.msrb.mxu2 %v6897_v26  ;;  %v7517_v24 = vor.u32 %v8330_v58, %v7514_v21  ;;  %v6865_v26 = vor.u32 %v8169_v6, %v6864_v51  ;;  %v12547_v58 = vld [vmem:[#allocation28_spill] sm:$0xff] }
 0x2bb   :  { %v2630_v15 = vadd.f32 %v2629_v13, %v9894_v29 }
 0x2bc   :  { %v2896_v18 = vpop.f32.mrf.mxu2  ;;  %v2720_v27 = vpop.f32.mrf.mxu0  ;;  %3046 = vmatpush.bf16.msrb.mxu0 %v7517_v24 }
 0x2bd   :  { %v2719_v10 = vadd.f32 %v2718_v30, %v2630_v15  ;;  %v2809_v17 = vpop.f32.mrf.mxu1  ;;  %v7501_v15 = vor.u32 %v8326_v59, %v7498_v11 }
 0x2be   :  { %3224 = vmatpush.bf16.msrb.mxu2 %v6881_v3  ;;  %v12548_v3 = vld [vmem:[#allocation44_spill] sm:$0xff] }
 0x2bf   :  { %v2808_v8 = vadd.f32 %v2807_v42, %v2719_v10 }
 0x2c0   :  { %3047 = vmatpush.bf16.msrb.mxu0 %v7501_v15 }
 0x2c1   :  { %v9951_v57 = vadd.f32 %v2896_v18, %v2808_v8  ;;  %v12546_v18 = vld [vmem:[#allocation12_spill] sm:$0xff] }
 0x2c2   :  { %v2631_v13 = vpop.f32.mrf.mxu3  ;;  %3225 = vmatpush.bf16.msrb.mxu2 %v6865_v26  ;;  %v8229_v8 = vld [vmem:[#allocation2 + $0x1f4] sm:$0xf0] }
 0x2c3   :  { %v2632_v30 = vadd.f32 %v2631_v13, %v9894_v29  ;;  %v7105_v39 = vor.u32 %v8229_v8, %v7104_v40  ;;  %v12550_v40 = vld [vmem:[#allocation32_spill] sm:$0xff] }
 0x2c4   :  { %v2898_v37 = vpop.f32.mrf.mxu2  ;;  %v2723_v34 = vpop.f32.mrf.mxu0  ;;  %v12551_v8 = vld [vmem:[#allocation48_spill] sm:$0xff] }
 0x2c5   :  { %v2721_v48 = vadd.f32 %v2720_v27, %v2632_v30  ;;  %v2812_v42 = vpop.f32.mrf.mxu1  ;;  %3307 = vmatpush.bf16.msra.mxu3 %v7105_v39 }
 0x2c7   :  { %v2810_v10 = vadd.f32 %v2809_v17, %v2721_v48  ;;  %2673 = vmatmul.bf16.gmra.mxu3 %v12546_v18  ;;  %2762 = vmatmul.bf16.gmra.mxu0 %v12547_v58 }
 0x2c8   :  { %2851 = vmatmul.bf16.gmra.mxu1 %v12548_v3  ;;  %v12549_v3 = vld [vmem:[#allocation16_spill] sm:$0xff] }
 0x2c9   :  { %2940 = vmatmul.bf16.gmra.mxu2 %v9767_v12  ;;  %v9958_v21 = vadd.f32 %v2898_v37, %v2810_v10 }
 0x2ca   :  { %v2634_v24 = vpop.f32.mrf.mxu3 }
 0x2cb   :  { %v2635_v51 = vadd.f32 %v2634_v24, %v9894_v29 }
 0x2cc   :  { %v2901_v27 = vpop.f32.mrf.mxu2  ;;  %v2725_v13 = vpop.f32.mrf.mxu0 }
 0x2cd   :  { %v2724_v48 = vadd.f32 %v2723_v34, %v2635_v51  ;;  %v2814_v17 = vpop.f32.mrf.mxu1 }
 0x2cf   :  { %v2813_v59 = vadd.f32 %v2812_v42, %v2724_v48 }
 0x2d1   :  { %v9961_v11 = vadd.f32 %v2901_v27, %v2813_v59 }
 0x2d2   :  { %v2636_v30 = vpop.f32.mrf.mxu3 }
 0x2d3   :  { %v2637_v15 = vadd.f32 %v2636_v30, %v9894_v29 }
 0x2d4   :  { %v2903_v6 = vpop.f32.mrf.mxu2  ;;  %v2728_v37 = vpop.f32.mrf.mxu0 }
 0x2d5   :  { %v2726_v26 = vadd.f32 %v2725_v13, %v2637_v15  ;;  %v2817_v10 = vpop.f32.mrf.mxu1 }
 0x2d7   :  { %v2815_v12 = vadd.f32 %v2814_v17, %v2726_v26  ;;  %2678 = vmatmul.bf16.gmra.mxu3 %v12549_v3  ;;  %2767 = vmatmul.bf16.gmra.mxu0 %v12550_v40 }
 0x2d8   :  { %2856 = vmatmul.bf16.gmra.mxu1 %v12551_v8 }
 0x2d9   :  { %2945 = vmatmul.bf16.gmra.mxu2 %v9808_v35  ;;  %v9968_v34 = vadd.f32 %v2903_v6, %v2815_v12  ;;  %v12552_v12 = vld [vmem:[#allocation52_spill] sm:$0xff]  ;;  %v12553_v6 = vld [vmem:[#allocation53_spill] sm:$0xff] }
 0x2da   :  { %v2639_v42 = vpop.f32.mrf.mxu3 }
 0x2db   :  { %v2640_v24 = vadd.f32 %v2639_v42, %v9894_v29  ;;  %v12554_v42 = vld [vmem:[#allocation54_spill] sm:$0xff] }
 0x2dc   :  { %v2906_v39 = vpop.f32.mrf.mxu2  ;;  %v2730_v51 = vpop.f32.mrf.mxu0 }
 0x2dd   :  { %v2729_v27 = vadd.f32 %v2728_v37, %v2640_v24  ;;  %v2819_v48 = vpop.f32.mrf.mxu1  ;;  %v8225_v24 = vld [vmem:[#allocation2 + $0x1d4] sm:$0xf0] }
 0x2df   :  { %v2818_v13 = vadd.f32 %v2817_v10, %v2729_v27  ;;  %v7088_v10 = vld [vmem:[#allocation2 + $0x1c8] sm:$0xf] }
 0x2e0   :  { %v7089_v27 = vor.u32 %v8225_v24, %v7088_v10  ;;  %v12556_v10 = vld [vmem:[#allocation57_spill] sm:$0xff]  ;;  %v12557_v24 = vld [vmem:[#allocation58_spill] sm:$0xff] }
 0x2e1   :  { %v9971_v59 = vadd.f32 %v2906_v39, %v2818_v13 }
 0x2e2   :  { %v2641_v17 = vpop.f32.mrf.mxu3  ;;  %3308 = vmatpush.bf16.msra.mxu3 %v7089_v27 }
 0x2e3   :  { %v2642_v30 = vadd.f32 %v2641_v17, %v9894_v29 }
 0x2e4   :  { %v2908_v15 = vpop.f32.mrf.mxu2  ;;  %v2733_v26 = vpop.f32.mrf.mxu0 }
 0x2e5   :  { %v2731_v8 = vadd.f32 %v2730_v51, %v2642_v30  ;;  %v2822_v40 = vpop.f32.mrf.mxu1 }
 0x2e7   :  { %v2820_v35 = vadd.f32 %v2819_v48, %v2731_v8  ;;  %2959 = vmatmul.bf16.vlgmr.msrb.gmra.mxu3 %v12552_v12  ;;  %3048 = vmatmul.bf16.vlgmr.msrb.gmra.mxu0 %v12553_v6 }
 0x2e8   :  { %7654 = vmatmul.msk.bf16.vlgmr.msrb.gmra.mxu1 %vm1923_vm0, %v12554_v42 }
 0x2e9   :  { %3226 = vmatmul.bf16.vlgmr.msrb.gmra.mxu2 %v8628_v20  ;;  %v9979_v37 = vadd.f32 %v2908_v15, %v2820_v35 }
 0x2ea   :  { %v2644_v39 = vpop.f32.mrf.mxu3 }
 0x2eb   :  { %v2645_v13 = vadd.f32 %v2644_v39, %v9894_v29 }
 0x2ec   :  { %v2911_v51 = vpop.f32.mrf.mxu2  ;;  %v2735_v17 = vpop.f32.mrf.mxu0 }
 0x2ed   :  { %v2734_v8 = vadd.f32 %v2733_v26, %v2645_v13  ;;  %v2824_v48 = vpop.f32.mrf.mxu1 }
 0x2ef   :  { %v2823_v30 = vadd.f32 %v2822_v40, %v2734_v8 }
 0x2f1   :  { %v9982_v6 = vadd.f32 %v2911_v51, %v2823_v30 }
 0x2f2   :  { %v2646_v58 = vpop.f32.mrf.mxu3 }
 0x2f3   :  { %v2647_v42 = vadd.f32 %v2646_v58, %v9894_v29 }
 0x2f4   :  { %v2913_v20 = vpop.f32.mrf.mxu2  ;;  %v2738_v35 = vpop.f32.mrf.mxu0 }
 0x2f5   :  { %v2736_v15 = vadd.f32 %v2735_v17, %v2647_v42  ;;  %v2827_v47 = vpop.f32.mrf.mxu1 }
 0x2f7   :  { %v2825_v52 = vadd.f32 %v2824_v48, %v2736_v15  ;;  %2964 = vmatmul.bf16.gmra.mxu3 %v12555_v36  ;;  %3053 = vmatmul.bf16.gmra.mxu0 %v12556_v10  ;;  %v12563_v36 = vld [vmem:[#allocation64_spill] sm:$0xff] }
 0x2f8   :  { %7655 = vmatmul.msk.bf16.gmra.mxu1 %vm1923_vm0, %v12557_v24 }
 0x2f9   :  { %3231 = vmatmul.bf16.gmra.mxu2 %v8669_v31  ;;  %v9990_v40 = vadd.f32 %v2913_v20, %v2825_v52  ;;  %v12559_v20 = vld [vmem:[#allocation60_spill] sm:$0xff]  ;;  %v12560_v52 = vld [vmem:[#allocation61_spill] sm:$0xff] }
 0x2fa   :  { %v2649_v26 = vpop.f32.mrf.mxu3 }
 0x2fb   :  { %v2650_v39 = vadd.f32 %v2649_v26, %v9894_v29  ;;  %v12561_v26 = vld [vmem:[#allocation62_spill] sm:$0xff] }
 0x2fc   :  { %v2916_v58 = vpop.f32.mrf.mxu2  ;;  %v2740_v27 = vpop.f32.mrf.mxu0 }
 0x2fd   :  { %v2739_v13 = vadd.f32 %v2738_v35, %v2650_v39  ;;  %v2829_v42 = vpop.f32.mrf.mxu1  ;;  %v7072_v35 = vld [vmem:[#allocation2 + $0x1a8] sm:$0xf]  ;;  %v8221_v39 = vld [vmem:[#allocation2 + $0x1b4] sm:$0xf0] }
 0x2ff   :  { %v2828_v51 = vadd.f32 %v2827_v47, %v2739_v13  ;;  %v7073_v13 = vor.u32 %v8221_v39, %v7072_v35  ;;  %v12564_v35 = vld [vmem:[#allocation65_spill] sm:$0xff]  ;;  %v12565_v39 = vld [vmem:[#allocation66_spill] sm:$0xff] }
 0x301   :  { %v9993_v17 = vadd.f32 %v2916_v58, %v2828_v51  ;;  %3309 = vmatpush.bf16.msra.mxu3 %v7073_v13 }
 0x302   :  { %v2651_v8 = vpop.f32.mrf.mxu3 }
 0x303   :  { %12558 = vst [vmem:[#allocation88_spill] sm:$0xff] %v9993_v17  ;;  %v2652_v48 = vadd.f32 %v2651_v8, %v9894_v29 }
 0x304   :  { %v2918_v30 = vpop.f32.mrf.mxu2  ;;  %v2743_v15 = vpop.f32.mrf.mxu0 }
 0x305   :  { %v2741_v24 = vadd.f32 %v2740_v27, %v2652_v48  ;;  %v2832_v10 = vpop.f32.mrf.mxu1 }
 0x307   :  { %v2830_v31 = vadd.f32 %v2829_v42, %v2741_v24  ;;  %2969 = vmatmul.bf16.gmra.mxu3 %v12559_v20  ;;  %3058 = vmatmul.bf16.gmra.mxu0 %v12560_v52 }
 0x308   :  { %7656 = vmatmul.msk.bf16.gmra.mxu1 %vm1923_vm0, %v12561_v26 }
 0x309   :  { %3236 = vmatmul.bf16.gmra.mxu2 %v8707_v45  ;;  %v10001_v47 = vadd.f32 %v2918_v30, %v2830_v31 }
 0x30a   :  { %v2654_v58 = vpop.f32.mrf.mxu3 }
 0x30b   :  { %12562 = vst [vmem:[#allocation89_spill] sm:$0xff] %v10001_v47  ;;  %v2655_v51 = vadd.f32 %v2654_v58, %v9894_v29 }
 0x30c   :  { %v2921_v27 = vpop.f32.mrf.mxu2  ;;  %v2745_v8 = vpop.f32.mrf.mxu0 }
 0x30d   :  { %v2744_v24 = vadd.f32 %v2743_v15, %v2655_v51  ;;  %v2834_v42 = vpop.f32.mrf.mxu1 }
 0x30f   :  { %v2833_v48 = vadd.f32 %v2832_v10, %v2744_v24 }
 0x311   :  { %v10004_v52 = vadd.f32 %v2921_v27, %v2833_v48 }
 0x312   :  { %v2656_v20 = vpop.f32.mrf.mxu3 }
 0x313   :  { %v2657_v26 = vadd.f32 %v2656_v20, %v9894_v29 }
 0x314   :  { %v2923_v45 = vpop.f32.mrf.mxu2  ;;  %v2748_v31 = vpop.f32.mrf.mxu0 }
 0x315   :  { %v2746_v30 = vadd.f32 %v2745_v8, %v2657_v26  ;;  %v2837_v47 = vpop.f32.mrf.mxu1 }
 0x317   :  { %v2835_v17 = vadd.f32 %v2834_v42, %v2746_v30  ;;  %2974 = vmatmul.bf16.gmra.mxu3 %v12563_v36  ;;  %3063 = vmatmul.bf16.gmra.mxu0 %v12564_v35  ;;  %v12571_v36 = vld [vmem:[#allocation74_spill] sm:$0xff] }
 0x318   :  { %7657 = vmatmul.msk.bf16.gmra.mxu1 %vm1923_vm0, %v12565_v39 }
 0x319   :  { %3241 = vmatmul.bf16.gmra.mxu2 %v8747_v55  ;;  %v10012_v10 = vadd.f32 %v2923_v45, %v2835_v17  ;;  %v12567_v45 = vld [vmem:[#allocation68_spill] sm:$0xff]  ;;  %v12568_v17 = vld [vmem:[#allocation69_spill] sm:$0xff] }
 0x31a   :  { %v2659_v15 = vpop.f32.mrf.mxu3 }
 0x31b   :  { %v2660_v58 = vadd.f32 %v2659_v15, %v9894_v29  ;;  %v12569_v15 = vld [vmem:[#allocation70_spill] sm:$0xff] }
 0x31c   :  { %v2926_v20 = vpop.f32.mrf.mxu2  ;;  %v2750_v13 = vpop.f32.mrf.mxu0 }
 0x31d   :  { %v2749_v51 = vadd.f32 %v2748_v31, %v2660_v58  ;;  %v2839_v26 = vpop.f32.mrf.mxu1  ;;  %v7056_v31 = vld [vmem:[#allocation2 + $0x188] sm:$0xf]  ;;  %v8217_v58 = vld [vmem:[#allocation2 + $0x194] sm:$0xf0] }
 0x31f   :  { %v2838_v27 = vadd.f32 %v2837_v47, %v2749_v51  ;;  %v7057_v51 = vor.u32 %v8217_v58, %v7056_v31  ;;  %v12572_v31 = vld [vmem:[#allocation75_spill] sm:$0xff]  ;;  %v12573_v58 = vld [vmem:[#allocation76_spill] sm:$0xff] }
 0x321   :  { %v10015_v8 = vadd.f32 %v2926_v20, %v2838_v27  ;;  %3310 = vmatpush.bf16.msra.mxu3 %v7057_v51 }
 0x322   :  { %v2661_v24 = vpop.f32.mrf.mxu3 }
 0x323   :  { %12566 = vst [vmem:[#allocation133_spill] sm:$0xff] %v10015_v8  ;;  %v2662_v42 = vadd.f32 %v2661_v24, %v9894_v29 }
 0x324   :  { %v2928_v48 = vpop.f32.mrf.mxu2  ;;  %v2753_v30 = vpop.f32.mrf.mxu0 }
 0x325   :  { %v2751_v39 = vadd.f32 %v2750_v13, %v2662_v42  ;;  %v2842_v35 = vpop.f32.mrf.mxu1 }
 0x327   :  { %v2840_v55 = vadd.f32 %v2839_v26, %v2751_v39  ;;  %2979 = vmatmul.bf16.gmra.mxu3 %v12567_v45  ;;  %3068 = vmatmul.bf16.gmra.mxu0 %v12568_v17 }
 0x328   :  { %7658 = vmatmul.msk.bf16.gmra.mxu1 %vm1923_vm0, %v12569_v15 }
 0x329   :  { %3246 = vmatmul.bf16.gmra.mxu2 %v8787_v0  ;;  %v10023_v47 = vadd.f32 %v2928_v48, %v2840_v55 }
 0x32a   :  { %v2664_v20 = vpop.f32.mrf.mxu3 }
 0x32b   :  { %12570 = vst [vmem:[#allocation134_spill] sm:$0xff] %v10023_v47  ;;  %v2665_v27 = vadd.f32 %v2664_v20, %v9894_v29 }
 0x32c   :  { %v2931_v13 = vpop.f32.mrf.mxu2  ;;  %v2755_v24 = vpop.f32.mrf.mxu0 }
 0x32d   :  { %v2754_v39 = vadd.f32 %v2753_v30, %v2665_v27  ;;  %v2844_v26 = vpop.f32.mrf.mxu1 }
 0x32f   :  { %v2843_v42 = vadd.f32 %v2842_v35, %v2754_v39 }
 0x331   :  { %v10026_v17 = vadd.f32 %v2931_v13, %v2843_v42 }
 0x332   :  { %v2666_v45 = vpop.f32.mrf.mxu3 }
 0x333   :  { %v2667_v15 = vadd.f32 %v2666_v45, %v9894_v29 }
 0x334   :  { %v2933_v0 = vpop.f32.mrf.mxu2  ;;  %v2758_v55 = vpop.f32.mrf.mxu0 }
 0x335   :  { %v2756_v48 = vadd.f32 %v2755_v24, %v2667_v15  ;;  %v2847_v47 = vpop.f32.mrf.mxu1 }
 0x337   :  { %v2845_v8 = vadd.f32 %v2844_v26, %v2756_v48  ;;  %2984 = vmatmul.bf16.gmra.mxu3 %v12571_v36  ;;  %3073 = vmatmul.bf16.gmra.mxu0 %v12572_v31  ;;  %v12581_v36 = vld [vmem:[#allocation85_spill] sm:$0xff] }
 0x338   :  { %7659 = vmatmul.msk.bf16.gmra.mxu1 %vm1923_vm0, %v12573_v58 }
 0x339   :  { %3251 = vmatmul.bf16.gmra.mxu2 %v12502_v32  ;;  %v10034_v35 = vadd.f32 %v2933_v0, %v2845_v8  ;;  %v12576_v0 = vld [vmem:[#allocation80_spill] sm:$0xff]  ;;  %v12577_v8 = vld [vmem:[#allocation81_spill] sm:$0xff] }
 0x33a   :  { %v2669_v30 = vpop.f32.mrf.mxu3 }
 0x33b   :  { %12574 = vst [vmem:[#allocation135_spill] sm:$0xff] %v10034_v35  ;;  %v2670_v20 = vadd.f32 %v2669_v30, %v9894_v29  ;;  %v12578_v30 = vld [vmem:[#allocation82_spill] sm:$0xff]  ;;  %v12585_v35 = vld [vmem:[#allocation91_spill] sm:$0xff] }
 0x33c   :  { %v2936_v45 = vpop.f32.mrf.mxu2  ;;  %v2760_v51 = vpop.f32.mrf.mxu0 }
 0x33d   :  { %v2759_v27 = vadd.f32 %v2758_v55, %v2670_v20  ;;  %v2849_v15 = vpop.f32.mrf.mxu1  ;;  %v7040_v55 = vld [vmem:[#allocation2 + $0x168] sm:$0xf]  ;;  %v8213_v20 = vld [vmem:[#allocation2 + $0x174] sm:$0xf0] }
 0x33f   :  { %v2848_v13 = vadd.f32 %v2847_v47, %v2759_v27  ;;  %v7041_v27 = vor.u32 %v8213_v20, %v7040_v55  ;;  %v12582_v55 = vld [vmem:[#allocation86_spill] sm:$0xff]  ;;  %v12583_v20 = vld [vmem:[#allocation87_spill] sm:$0xff] }
 0x341   :  { %v10037_v24 = vadd.f32 %v2936_v45, %v2848_v13  ;;  %3311 = vmatpush.bf16.msra.mxu3 %v7041_v27  ;;  %v7232_v27 = vld [vmem:[#allocation2 + $0x2e8] sm:$0xf] }
 0x342   :  { %v2671_v39 = vpop.f32.mrf.mxu3 }
 0x343   :  { %12575 = vst [vmem:[#allocation136_spill] sm:$0xff] %v10037_v24  ;;  %v2672_v26 = vadd.f32 %v2671_v39, %v9894_v29 }
 0x344   :  { %v2938_v42 = vpop.f32.mrf.mxu2  ;;  %v2763_v48 = vpop.f32.mrf.mxu0 }
 0x345   :  { %v2761_v58 = vadd.f32 %v2760_v51, %v2672_v26  ;;  %v2852_v31 = vpop.f32.mrf.mxu1 }
 0x347   :  { %v2850_v32 = vadd.f32 %v2849_v15, %v2761_v58  ;;  %2989 = vmatmul.bf16.gmra.mxu3 %v12576_v0  ;;  %3078 = vmatmul.bf16.gmra.mxu0 %v12577_v8 }
 0x348   :  { %7660 = vmatmul.msk.bf16.gmra.mxu1 %vm1923_vm0, %v12578_v30 }
 0x349   :  { %3256 = vmatmul.bf16.gmra.mxu2 %v12509_v46  ;;  %v10045_v47 = vadd.f32 %v2938_v42, %v2850_v32 }
 0x34a   :  { %v2674_v45 = vpop.f32.mrf.mxu3 }
 0x34b   :  { %12579 = vst [vmem:[#allocation137_spill] sm:$0xff] %v10045_v47  ;;  %v2675_v13 = vadd.f32 %v2674_v45, %v9894_v29 }
 0x34c   :  { %v2941_v51 = vpop.f32.mrf.mxu2  ;;  %v2765_v39 = vpop.f32.mrf.mxu0 }
 0x34d   :  { %v2764_v58 = vadd.f32 %v2763_v48, %v2675_v13  ;;  %v2854_v15 = vpop.f32.mrf.mxu1  ;;  %v8261_v13 = vld [vmem:[#allocation2 + $0x2f4] sm:$0xf0] }
 0x34f   :  { %v2853_v26 = vadd.f32 %v2852_v31, %v2764_v58  ;;  %v8293_v58 = vld [vmem:[#allocation2 + $0x3f4] sm:$0xf0] }
 0x351   :  { %v10048_v8 = vadd.f32 %v2941_v51, %v2853_v26 }
 0x352   :  { %v2676_v0 = vpop.f32.mrf.mxu3 }
 0x353   :  { %12580 = vst [vmem:[#allocation138_spill] sm:$0xff] %v10048_v8  ;;  %v2677_v30 = vadd.f32 %v2676_v0, %v9894_v29 }
 0x354   :  { %v2943_v46 = vpop.f32.mrf.mxu2  ;;  %v2768_v32 = vpop.f32.mrf.mxu0 }
 0x355   :  { %v2766_v42 = vadd.f32 %v2765_v39, %v2677_v30  ;;  %v2857_v47 = vpop.f32.mrf.mxu1  ;;  %v7360_v30 = vld [vmem:[#allocation2 + $0x3e8] sm:$0xf]  ;;  %v7233_v39 = vor.u32 %v8261_v13, %v7232_v27  ;;  %v12586_v27 = vld [vmem:[#allocation92_spill] sm:$0xff] }
 0x357   :  { %v2855_v24 = vadd.f32 %v2854_v15, %v2766_v42  ;;  %2994 = vmatmul.bf16.gmra.mxu3 %v12581_v36  ;;  %3083 = vmatmul.bf16.gmra.mxu0 %v12582_v55  ;;  %v7361_v42 = vor.u32 %v8293_v58, %v7360_v30 }
 0x358   :  { %7661 = vmatmul.msk.bf16.gmra.mxu1 %vm1923_vm0, %v12583_v20  ;;  %3396 = vmatpush.bf16.msra.mxu0 %v7233_v39 }
 0x359   :  { %3261 = vmatmul.bf16.gmra.mxu2 %v12515_v49  ;;  %v10056_v31 = vadd.f32 %v2943_v46, %v2855_v24  ;;  %3485 = vmatpush.bf16.msra.mxu1 %v7361_v42 }
 0x35a   :  { %v2679_v48 = vpop.f32.mrf.mxu3 }
 0x35b   :  { %12584 = vst [vmem:[#allocation139_spill] sm:$0xff] %v10056_v31  ;;  %v2680_v45 = vadd.f32 %v2679_v48, %v9894_v29 }
 0x35c   :  { %v2946_v0 = vpop.f32.mrf.mxu2  ;;  %v2770_v51 = vpop.f32.mrf.mxu0 }
 0x35d   :  { %v2769_v15 = vadd.f32 %v2768_v32, %v2680_v45  ;;  %v2859_v26 = vpop.f32.mrf.mxu1  ;;  %v12587_v32 = vld [vmem:[#allocation93_spill] sm:$0xff] }
 0x35f   :  { %v2858_v55 = vadd.f32 %v2857_v47, %v2769_v15  ;;  %v7024_v47 = vld [vmem:[#allocation2 + $0x148] sm:$0xf] }
 0x361   :  { %v10059_v20 = vadd.f32 %v2946_v0, %v2858_v55  ;;  %v8209_v55 = vld [vmem:[#allocation2 + $0x154] sm:$0xf0] }
 0x362   :  { %v2681_v46 = vpop.f32.mrf.mxu3  ;;  %v7025_v0 = vor.u32 %v8209_v55, %v7024_v47  ;;  %v12588_v47 = vld [vmem:[#allocation95_spill] sm:$0xff]  ;;  %v12589_v55 = vld [vmem:[#allocation96_spill] sm:$0xff] }
 0x363   :  { %v2682_v24 = vadd.f32 %v2681_v46, %v9894_v29 }
 0x364   :  { %v2948_v49 = vpop.f32.mrf.mxu2  ;;  %v3049_v48 = vpop.f32.mrf.mxu0  ;;  %3312 = vmatpush.bf16.msra.mxu3 %v7025_v0  ;;  %v7344_v0 = vld [vmem:[#allocation2 + $0x3c8] sm:$0xf] }
 0x365   :  { %v2771_v36 = vadd.f32 %v2770_v51, %v2682_v24  ;;  %v3138_v31 = vpop.f32.mrf.mxu1 }
 0x367   :  { %v2860_v8 = vadd.f32 %v2859_v26, %v2771_v36  ;;  %2999 = vmatmul.bf16.gmra.mxu3 %v12585_v35  ;;  %3088 = vmatmul.bf16.gmra.mxu0 %v12586_v27  ;;  %v12600_v27 = vld [vmem:[#allocation110_spill] sm:$0xff] }
 0x368   :  { %7662 = vmatmul.msk.bf16.gmra.mxu1 %vm1923_vm0, %v12587_v32 }
 0x369   :  { %3266 = vmatmul.bf16.gmra.mxu2 %v12522_v62  ;;  %v10067_v45 = vadd.f32 %v2948_v49, %v2860_v8 }
 0x36a   :  { %v2960_v29 = vpop.f32.mrf.mxu3 }
 0x36b   :  { %v2961_v13 = vadd.f32 %v2960_v29, %v9901_v44  ;;  %v12590_v44 = vld [vmem:[#allocation97_spill] sm:$0xff] }
 0x36c   :  { %v10070_v30 = vpop.f32.mrf.mxu2  ;;  %v3051_v36 = vpop.f32.mrf.mxu0 }
 0x36d   :  { %v3050_v51 = vadd.f32 %v3049_v48, %v2961_v13  ;;  %v3140_v39 = vpop.f32.mrf.mxu1  ;;  %v7216_v48 = vld [vmem:[#allocation2 + $0x2c8] sm:$0xf] }
 0x36f   :  { %v3139_v58 = vadd.f32 %v3138_v31, %v3050_v51  ;;  %v8257_v31 = vld [vmem:[#allocation2 + $0x2d4] sm:$0xf0] }
 0x370   :  { %v7217_v13 = vor.u32 %v8257_v31, %v7216_v48  ;;  %v8289_v51 = vld [vmem:[#allocation2 + $0x3d4] sm:$0xf0] }
 0x371   :  { %v4465_v29 = vmax.f32 %v3139_v58, 0.0 }
 0x372   :  { %v2962_v15 = vpop.f32.mrf.mxu3  ;;  %3397 = vmatpush.bf16.msra.mxu0 %v7217_v13 }
 0x373   :  { %v2963_v26 = vadd.f32 %v2962_v15, %v9908_v56 }
 0x374   :  { %v10073_v42 = vpop.f32.mrf.mxu2  ;;  %v3054_v46 = vpop.f32.mrf.mxu0 }
 0x375   :  { %v3052_v24 = vadd.f32 %v3051_v36, %v2963_v26  ;;  %v3143_v49 = vpop.f32.mrf.mxu1  ;;  %v7345_v36 = vor.u32 %v8289_v51, %v7344_v0  ;;  %v12594_v51 = vld [vmem:[#allocation102_spill] sm:$0xff] }
 0x377   :  { %v3141_v8 = vadd.f32 %v3140_v39, %v3052_v24  ;;  %3004 = vmatmul.bf16.gmra.mxu3 %v12588_v47  ;;  %3093 = vmatmul.bf16.gmra.mxu0 %v12589_v55 }
 0x378   :  { %7663 = vmatmul.msk.bf16.gmra.mxu1 %vm1923_vm0, %v12590_v44 }
 0x379   :  { %3271 = vmatmul.bf16.gmra.mxu2 %v12527_v14  ;;  %v4469_v56 = vmax.f32 %v3141_v8, 0.0  ;;  %3486 = vmatpush.bf16.msra.mxu1 %v7345_v36 }
 0x37a   :  { %v2965_v15 = vpop.f32.mrf.mxu3 }
 0x37b   :  { %v10080_v26 = vpack.c.bf16 %v4469_v56, %v4465_v29  ;;  %v2966_v39 = vadd.f32 %v2965_v15, %v9911_v61  ;;  %v12592_v56 = vld [vmem:[#allocation100_spill] sm:$0xff]  ;;  %v12593_v61 = vld [vmem:[#allocation101_spill] sm:$0xff] }
 0x37c   :  { %v10083_v24 = vpop.f32.mrf.mxu2  ;;  %v3056_v55 = vpop.f32.mrf.mxu0 }
 0x37d   :  { %12591 = vst [vmem:[#allocation140_spill] sm:$0xff] %v10080_v26  ;;  %v3055_v44 = vadd.f32 %v3054_v46, %v2966_v39  ;;  %v3145_v14 = vpop.f32.mrf.mxu1  ;;  %v7008_v46 = vld [vmem:[#allocation2 + $0x128] sm:$0xf] }
 0x37f   :  { %v3144_v62 = vadd.f32 %v3143_v49, %v3055_v44  ;;  %v8205_v49 = vld [vmem:[#allocation2 + $0x134] sm:$0xf0] }
 0x380   :  { %v7009_v13 = vor.u32 %v8205_v49, %v7008_v46 }
 0x381   :  { %v4473_v44 = vmax.f32 %v3144_v62, 0.0 }
 0x382   :  { %v2967_v32 = vpop.f32.mrf.mxu3  ;;  %3313 = vmatpush.bf16.msra.mxu3 %v7009_v13  ;;  %v12598_v13 = vld [vmem:[#allocation107_spill] sm:$0xff] }
 0x383   :  { %v2968_v58 = vadd.f32 %v2967_v32, %v9918_v63 }
 0x384   :  { %v10086_v8 = vpop.f32.mrf.mxu2  ;;  %v3059_v48 = vpop.f32.mrf.mxu0 }
 0x385   :  { %v3057_v31 = vadd.f32 %v3056_v55, %v2968_v58  ;;  %v3148_v0 = vpop.f32.mrf.mxu1 }
 0x387   :  { %v3146_v29 = vadd.f32 %v3145_v14, %v3057_v31  ;;  %3009 = vmatmul.bf16.gmra.mxu3 %v12592_v56  ;;  %3098 = vmatmul.bf16.gmra.mxu0 %v12593_v61  ;;  %v12596_v61 = vld [vmem:[#allocation105_spill] sm:$0xff] }
 0x388   :  { %7664 = vmatmul.msk.bf16.gmra.mxu1 %vm1923_vm0, %v12594_v51 }
 0x389   :  { %3276 = vmatmul.bf16.gmra.mxu2 %v12531_v28  ;;  %v4477_v63 = vmax.f32 %v3146_v29, 0.0 }
 0x38a   :  { %v2970_v32 = vpop.f32.mrf.mxu3 }
 0x38b   :  { %v2971_v15 = vadd.f32 %v2970_v32, %v9921_v9  ;;  %v10096_v14 = vpack.c.bf16 %v4477_v63, %v4473_v44  ;;  %v12597_v9 = vld [vmem:[#allocation106_spill] sm:$0xff] }
 0x38c   :  { %v10094_v55 = vpop.f32.mrf.mxu2  ;;  %v3061_v36 = vpop.f32.mrf.mxu0  ;;  %v7328_v44 = vld [vmem:[#allocation2 + $0x3a8] sm:$0xf] }
 0x38d   :  { %12595 = vst [vmem:[#allocation141_spill] sm:$0xff] %v10096_v14  ;;  %v3060_v39 = vadd.f32 %v3059_v48, %v2971_v15  ;;  %v3150_v58 = vpop.f32.mrf.mxu1  ;;  %v7200_v48 = vld [vmem:[#allocation2 + $0x2a8] sm:$0xf] }
 0x38f   :  { %v3149_v31 = vadd.f32 %v3148_v0, %v3060_v39  ;;  %v8253_v0 = vld [vmem:[#allocation2 + $0x2b4] sm:$0xf0] }
 0x391   :  { %v4481_v63 = vmax.f32 %v3149_v31, 0.0 }
 0x392   :  { %v2972_v26 = vpop.f32.mrf.mxu3 }
 0x393   :  { %v2973_v28 = vadd.f32 %v2972_v26, %v9928_v1  ;;  %v7201_v1 = vor.u32 %v8253_v0, %v7200_v48  ;;  %v8285_v26 = vld [vmem:[#allocation2 + $0x3b4] sm:$0xf0] }
 0x394   :  { %v10099_v51 = vpop.f32.mrf.mxu2  ;;  %v3064_v62 = vpop.f32.mrf.mxu0 }
 0x395   :  { %v3062_v46 = vadd.f32 %v3061_v36, %v2973_v28  ;;  %v3153_v29 = vpop.f32.mrf.mxu1  ;;  %v7329_v28 = vor.u32 %v8285_v26, %v7328_v44  ;;  %3398 = vmatpush.bf16.msra.mxu0 %v7201_v1  ;;  %v7488_v26 = vld [vmem:[#allocation2 + $0x4e8] sm:$0xf] }
 0x397   :  { %v3151_v49 = vadd.f32 %v3150_v58, %v3062_v46  ;;  %3014 = vmatmul.bf16.gmra.mxu3 %v12596_v61  ;;  %3103 = vmatmul.bf16.gmra.mxu0 %v12597_v9 }
 0x398   :  { %7665 = vmatmul.msk.bf16.gmra.mxu1 %vm1923_vm0, %v12598_v13 }
 0x399   :  { %3281 = vmatmul.bf16.gmra.mxu2 %v12535_v16  ;;  %v4485_v32 = vmax.f32 %v3151_v49, 0.0  ;;  %3487 = vmatpush.bf16.msra.mxu1 %v7329_v28 }
 0x39a   :  { %v2975_v15 = vpop.f32.mrf.mxu3 }
 0x39b   :  { %v2976_v36 = vadd.f32 %v2975_v15, %v9931_v5  ;;  %v10109_v58 = vpack.c.bf16 %v4485_v32, %v4481_v63  ;;  %v8325_v5 = vld [vmem:[#allocation2 + $0x4f4] sm:$0xf0]  ;;  %v12601_v63 = vld [vmem:[#allocation111_spill] sm:$0xff] }
 0x39c   :  { %v10107_v39 = vpop.f32.mrf.mxu2  ;;  %v3066_v46 = vpop.f32.mrf.mxu0  ;;  %v7489_v1 = vor.u32 %v8325_v5, %v7488_v26  ;;  %v12602_v32 = vld [vmem:[#allocation112_spill] sm:$0xff] }
 0x39d   :  { %12599 = vst [vmem:[#allocation142_spill] sm:$0xff] %v10109_v58  ;;  %v3065_v14 = vadd.f32 %v3064_v62, %v2976_v36  ;;  %v3155_v16 = vpop.f32.mrf.mxu1  ;;  %v7472_v36 = vld [vmem:[#allocation2 + $0x4c8] sm:$0xf] }
 0x39e   :  { %3574 = vmatpush.bf16.msra.mxu2 %v7489_v1 }
 0x39f   :  { %v3154_v13 = vadd.f32 %v3153_v29, %v3065_v14  ;;  %v6992_v14 = vld [vmem:[#allocation2 + $0x108] sm:$0xf] }
 0x3a1   :  { %v4489_v62 = vmax.f32 %v3154_v13, 0.0  ;;  %v8317_v13 = vld [vmem:[#allocation2 + $0x4b4] sm:$0xf0] }
 0x3a2   :  { %v2977_v9 = vpop.f32.mrf.mxu3 }
 0x3a3   :  { %v2978_v31 = vadd.f32 %v2977_v9, %v9938_v38  ;;  %v8201_v38 = vld [vmem:[#allocation2 + $0x114] sm:$0xf0] }
 0x3a4   :  { %v10112_v48 = vpop.f32.mrf.mxu2  ;;  %v3069_v49 = vpop.f32.mrf.mxu0  ;;  %v6993_v29 = vor.u32 %v8201_v38, %v6992_v14  ;;  %v7184_v38 = vld [vmem:[#allocation2 + $0x288] sm:$0xf] }
 0x3a5   :  { %v3067_v0 = vadd.f32 %v3066_v46, %v2978_v31  ;;  %v3158_v44 = vpop.f32.mrf.mxu1  ;;  %v8321_v46 = vld [vmem:[#allocation2 + $0x4d4] sm:$0xf0] }
 0x3a6   :  { %3314 = vmatpush.bf16.msra.mxu3 %v6993_v29 }
 0x3a7   :  { %v3156_v15 = vadd.f32 %v3155_v16, %v3067_v0  ;;  %3019 = vmatmul.bf16.gmra.mxu3 %v12600_v27  ;;  %3108 = vmatmul.bf16.gmra.mxu0 %v12601_v63  ;;  %v7473_v0 = vor.u32 %v8321_v46, %v7472_v36  ;;  %v8249_v63 = vld [vmem:[#allocation2 + $0x294] sm:$0xf0]  ;;  %v7312_v27 = vld [vmem:[#allocation2 + $0x388] sm:$0xf] }
 0x3a8   :  { %7666 = vmatmul.msk.bf16.gmra.mxu1 %vm1923_vm0, %v12602_v32  ;;  %v7456_v32 = vld [vmem:[#allocation2 + $0x4a8] sm:$0xf]  ;;  %v7185_v29 = vor.u32 %v8249_v63, %v7184_v38  ;;  %v8313_v36 = vld [vmem:[#allocation2 + $0x494] sm:$0xf0] }
 0x3a9   :  { %3286 = vmatmul.bf16.gmra.mxu2 %v12539_v50  ;;  %v4493_v9 = vmax.f32 %v3156_v15, 0.0  ;;  %v7457_v1 = vor.u32 %v8317_v13, %v7456_v32  ;;  %v7296_v32 = vld [vmem:[#allocation2 + $0x368] sm:$0xf] }
 0x3aa   :  { %v2980_v28 = vpop.f32.mrf.mxu3  ;;  %3575 = vmatpush.bf16.msra.mxu2 %v7473_v0  ;;  %3399 = vmatpush.bf16.msra.mxu0 %v7185_v29  ;;  %v7424_v38 = vld [vmem:[#allocation2 + $0x468] sm:$0xf] }
 0x3ab   :  { %v2981_v16 = vadd.f32 %v2980_v28, %v9941_v53  ;;  %v10122_v26 = vpack.c.bf16 %v4493_v9, %v4489_v62  ;;  %v8281_v62 = vld [vmem:[#allocation2 + $0x394] sm:$0xf0]  ;;  %v7440_v9 = vld [vmem:[#allocation2 + $0x488] sm:$0xf] }
 0x3ac   :  { %v10120_v31 = vpop.f32.mrf.mxu2  ;;  %v3071_v5 = vpop.f32.mrf.mxu0  ;;  %v7313_v46 = vor.u32 %v8281_v62, %v7312_v27 }
 0x3ad   :  { %12603 = vst [vmem:[#allocation143_spill] sm:$0xff] %v10120_v31  ;;  %v3070_v58 = vadd.f32 %v3069_v49, %v2981_v16  ;;  %v3160_v50 = vpop.f32.mrf.mxu1  ;;  %v7441_v16 = vor.u32 %v8313_v36, %v7440_v9  ;;  %v12608_v31 = vld [vmem:[#allocation117_spill] sm:$0xff]  ;;  %v8241_v9 = vld [vmem:[#allocation2 + $0x254] sm:$0xf0]  ;;  %v7280_v36 = vld [vmem:[#allocation2 + $0x348] sm:$0xf] }
 0x3ae   :  { %12604 = vst [vmem:[#allocation144_spill] sm:$0xff] %v10122_v26  ;;  %3576 = vmatpush.bf16.msra.mxu2 %v7457_v1  ;;  %3488 = vmatpush.bf16.msra.mxu1 %v7313_v46  ;;  %v12606_v1 = vld [vmem:[#allocation115_spill] sm:$0xff] }
 0x3af   :  { %v3159_v14 = vadd.f32 %v3158_v44, %v3070_v58  ;;  %v7168_v58 = vld [vmem:[#allocation2 + $0x268] sm:$0xf]  ;;  %v8245_v44 = vld [vmem:[#allocation2 + $0x274] sm:$0xf0] }
 0x3b0   :  { %v7169_v63 = vor.u32 %v8245_v44, %v7168_v58  ;;  %v8273_v58 = vld [vmem:[#allocation2 + $0x354] sm:$0xf0]  ;;  %v7408_v44 = vld [vmem:[#allocation2 + $0x448] sm:$0xf] }
 0x3b2   :  { %v2982_v15 = vpop.f32.mrf.mxu3  ;;  %3577 = vmatpush.bf16.msra.mxu2 %v7441_v16  ;;  %3400 = vmatpush.bf16.msra.mxu0 %v7169_v63 }
 0x3b3   :  { %v2983_v53 = vadd.f32 %v2982_v15, %v9948_v2  ;;  %v12607_v2 = vld [vmem:[#allocation116_spill] sm:$0xff] }
 0x3b4   :  { %v10125_v28 = vpop.f32.mrf.mxu2  ;;  %v3074_v49 = vpop.f32.mrf.mxu0  ;;  %v8277_v15 = vld [vmem:[#allocation2 + $0x374] sm:$0xf0] }
 0x3b5   :  { %12605 = vst [vmem:[#allocation145_spill] sm:$0xff] %v10125_v28  ;;  %v3072_v0 = vadd.f32 %v3071_v5, %v2983_v53  ;;  %v3163_v26 = vpop.f32.mrf.mxu1  ;;  %v8309_v28 = vld [vmem:[#allocation2 + $0x474] sm:$0xf0]  ;;  %v7297_v27 = vor.u32 %v8277_v15, %v7296_v32  ;;  %v4497_v53 = vmax.f32 %v3159_v14, 0.0  ;;  %v7281_v14 = vor.u32 %v8273_v58, %v7280_v36  ;;  %v7136_v15 = vld [vmem:[#allocation2 + $0x228] sm:$0xf] }
 0x3b6   :  { %v7425_v5 = vor.u32 %v8309_v28, %v7424_v38  ;;  %v8237_v38 = vld [vmem:[#allocation2 + $0x234] sm:$0xf0] }
 0x3b7   :  { %v3161_v13 = vadd.f32 %v3160_v50, %v3072_v0  ;;  %3024 = vmatmul.bf16.gmra.mxu3 %v12606_v1  ;;  %3113 = vmatmul.bf16.gmra.mxu0 %v12607_v2  ;;  %v7152_v50 = vld [vmem:[#allocation2 + $0x248] sm:$0xf]  ;;  %v8265_v58 = vld [vmem:[#allocation2 + $0x314] sm:$0xf0] }
 0x3b8   :  { %7667 = vmatmul.msk.bf16.gmra.mxu1 %vm1923_vm0, %v12608_v31  ;;  %3578 = vmatpush.bf16.msra.mxu2 %v7425_v5  ;;  %v7153_v0 = vor.u32 %v8241_v9, %v7152_v50  ;;  %v8305_v31 = vld [vmem:[#allocation2 + $0x454] sm:$0xf0]  ;;  %v7137_v5 = vor.u32 %v8237_v38, %v7136_v15  ;;  %v7392_v50 = vld [vmem:[#allocation2 + $0x428] sm:$0xf] }
 0x3b9   :  { %3291 = vmatmul.bf16.gmra.mxu2 %v12543_v7  ;;  %v4501_v29 = vmax.f32 %v3161_v13, 0.0  ;;  %3489 = vmatpush.bf16.msra.mxu1 %v7297_v27  ;;  %v7409_v32 = vor.u32 %v8305_v31, %v7408_v44  ;;  %v7264_v27 = vld [vmem:[#allocation2 + $0x328] sm:$0xf]  ;;  %v8301_v9 = vld [vmem:[#allocation2 + $0x434] sm:$0xf0] }
 0x3ba   :  { %v2985_v62 = vpop.f32.mrf.mxu3  ;;  %3401 = vmatpush.bf16.msra.mxu0 %v7153_v0  ;;  %v7393_v1 = vor.u32 %v8301_v9, %v7392_v50  ;;  %v7120_v31 = vld [vmem:[#allocation2 + $0x208] sm:$0xf]  ;;  %v8297_v44 = vld [vmem:[#allocation2 + $0x414] sm:$0xf0] }
 0x3bb   :  { %v2986_v46 = vadd.f32 %v2985_v62, %v9951_v57  ;;  %v10135_v7 = vpack.c.bf16 %v4501_v29, %v4497_v53  ;;  %v8269_v62 = vld [vmem:[#allocation2 + $0x334] sm:$0xf0]  ;;  %v7248_v29 = vld [vmem:[#allocation2 + $0x308] sm:$0xf] }
 0x3bc   :  { %v10133_v16 = vpop.f32.mrf.mxu2  ;;  %v3076_v28 = vpop.f32.mrf.mxu0  ;;  %3579 = vmatpush.bf16.msra.mxu2 %v7409_v32  ;;  %v7265_v2 = vor.u32 %v8269_v62, %v7264_v27  ;;  %v7249_v32 = vor.u32 %v8265_v58, %v7248_v29 }
 0x3bd   :  { %12609 = vst [vmem:[#allocation146_spill] sm:$0xff] %v10135_v7  ;;  %v3075_v13 = vadd.f32 %v3074_v49, %v2986_v46  ;;  %v3165_v63 = vpop.f32.mrf.mxu1  ;;  %3490 = vmatpush.bf16.msra.mxu1 %v7281_v14  ;;  %v8233_v49 = vld [vmem:[#allocation2 + $0x214] sm:$0xf0] }
 0x3be   :  { %3402 = vmatpush.bf16.msra.mxu0 %v7137_v5  ;;  %v7121_v0 = vor.u32 %v8233_v49, %v7120_v31 }
 0x3bf   :  { %v3164_v57 = vadd.f32 %v3163_v26, %v3075_v13  ;;  %v7376_v26 = vld [vmem:[#allocation2 + $0x408] sm:$0xf] }
 0x3c0   :  { %3580 = vmatpush.bf16.msra.mxu2 %v7393_v1  ;;  %v7377_v13 = vor.u32 %v8297_v44, %v7376_v26 }
 0x3c1   :  { %3491 = vmatpush.bf16.msra.mxu1 %v7265_v2  ;;  %v8357_v2 = vld [vmem:[#allocation2 + $0x5f4] sm:$0xf0]  ;;  %v4505_v27 = vmax.f32 %v3164_v57, 0.0 }
 0x3c2   :  { %v2987_v53 = vpop.f32.mrf.mxu3  ;;  %3403 = vmatpush.bf16.msra.mxu0 %v7121_v0 }
 0x3c3   :  { %v2988_v36 = vadd.f32 %v2987_v53, %v9958_v21  ;;  %v7616_v21 = vld [vmem:[#allocation2 + $0x5e8] sm:$0xf] }
 0x3c4   :  { %v10138_v46 = vpop.f32.mrf.mxu2  ;;  %v3079_v14 = vpop.f32.mrf.mxu0  ;;  %3581 = vmatpush.bf16.msra.mxu2 %v7377_v13  ;;  %v7617_v5 = vor.u32 %v8357_v2, %v7616_v21 }
 0x3c5   :  { %v3077_v15 = vadd.f32 %v3076_v28, %v2988_v36  ;;  %v3168_v38 = vpop.f32.mrf.mxu1  ;;  %3492 = vmatpush.bf16.msra.mxu1 %v7249_v32 }
 0x3c6   :  { %3663 = vmatpush.bf16.msrb.mxu3 %v7617_v5 }
 0x3c7   :  { %v3166_v1 = vadd.f32 %v3165_v63, %v3077_v15  ;;  %3029 = vmatmul.bf16.gmra.mxu3 %v9769_v41  ;;  %3118 = vmatmul.bf16.gmra.mxu0 %v9771_v43  ;;  %v12651_v43 = vld [vmem:[#allocation33_spill] sm:$0xff] }
 0x3c8   :  { %7668 = vmatmul.msk.bf16.gmra.mxu1 %vm1923_vm0, %v9773_v25 }
 0x3c9   :  { %3296 = vmatmul.bf16.gmra.mxu2 %v12546_v18  ;;  %v4509_v62 = vmax.f32 %v3166_v1, 0.0  ;;  %v12650_v18 = vld [vmem:[#allocation139_spill] sm:$0xff] }
 0x3ca   :  { %v2990_v28 = vpop.f32.mrf.mxu3 }
 0x3cb   :  { %v2991_v50 = vadd.f32 %v2990_v28, %v9961_v11  ;;  %v10148_v63 = vpack.c.bf16 %v4509_v62, %v4505_v27 }
 0x3cc   :  { %v10146_v9 = vpop.f32.mrf.mxu2  ;;  %v3081_v53 = vpop.f32.mrf.mxu0 }
 0x3cd   :  { %12610 = vst [vmem:[#allocation147_spill] sm:$0xff] %v10148_v63  ;;  %v3080_v31 = vadd.f32 %v3079_v14, %v2991_v50  ;;  %v3170_v49 = vpop.f32.mrf.mxu1  ;;  %v12619_v63 = vld [vmem:[#allocation13_spill] sm:$0xff] }
 0x3cf   :  { %v3169_v29 = vadd.f32 %v3168_v38, %v3080_v31 }
 0x3d1   :  { %v4513_v11 = vmax.f32 %v3169_v29, 0.0  ;;  %v8353_v29 = vld [vmem:[#allocation2 + $0x5d4] sm:$0xf0] }
 0x3d2   :  { %v2992_v36 = vpop.f32.mrf.mxu3 }
 0x3d3   :  { %v2993_v0 = vadd.f32 %v2992_v36, %v9968_v34 }
 0x3d4   :  { %v10151_v58 = vpop.f32.mrf.mxu2  ;;  %v3084_v57 = vpop.f32.mrf.mxu0 }
 0x3d5   :  { %v3082_v26 = vadd.f32 %v3081_v53, %v2993_v0  ;;  %v3173_v44 = vpop.f32.mrf.mxu1 }
 0x3d7   :  { %v3171_v32 = vadd.f32 %v3170_v49, %v3082_v26  ;;  %3034 = vmatmul.bf16.gmra.mxu3 %v9810_v19  ;;  %3123 = vmatmul.bf16.gmra.mxu0 %v9812_v4 }
 0x3d8   :  { %7669 = vmatmul.msk.bf16.gmra.mxu1 %vm1923_vm0, %v9814_v60  ;;  %v12644_v60 = vld [vmem:[#allocation29_spill] sm:$0xff] }
 0x3d9   :  { %3301 = vmatmul.bf16.gmra.mxu2 %v12549_v3  ;;  %v4517_v14 = vmax.f32 %v3171_v32, 0.0 }
 0x3da   :  { %v2995_v13 = vpop.f32.mrf.mxu3 }
 0x3db   :  { %v2996_v34 = vadd.f32 %v2995_v13, %v9971_v59  ;;  %v10161_v38 = vpack.c.bf16 %v4517_v14, %v4513_v11  ;;  %v7600_v59 = vld [vmem:[#allocation2 + $0x5c8] sm:$0xf] }
 0x3dc   :  { %v10159_v15 = vpop.f32.mrf.mxu2  ;;  %v3086_v1 = vpop.f32.mrf.mxu0  ;;  %v7601_v0 = vor.u32 %v8353_v29, %v7600_v59  ;;  %v12615_v59 = vld [vmem:[#allocation56_spill] sm:$0xff] }
 0x3dd   :  { %12611 = vst [vmem:[#allocation148_spill] sm:$0xff] %v10161_v38  ;;  %v3085_v21 = vadd.f32 %v3084_v57, %v2996_v34  ;;  %v3175_v2 = vpop.f32.mrf.mxu1 }
 0x3de   :  { %3664 = vmatpush.bf16.msrb.mxu3 %v7601_v0 }
 0x3df   :  { %v3174_v27 = vadd.f32 %v3173_v44, %v3085_v21 }
 0x3e1   :  { %v4521_v36 = vmax.f32 %v3174_v27, 0.0 }
 0x3e2   :  { %v2997_v5 = vpop.f32.mrf.mxu3 }
 0x3e3   :  { %v2998_v62 = vadd.f32 %v2997_v5, %v9979_v37 }
 0x3e4   :  { %v10164_v28 = vpop.f32.mrf.mxu2  ;;  %v3089_v50 = vpop.f32.mrf.mxu0 }
 0x3e5   :  { %v3087_v53 = vadd.f32 %v3086_v1, %v2998_v62  ;;  %v3178_v31 = vpop.f32.mrf.mxu1 }
 0x3e7   :  { %v3176_v49 = vadd.f32 %v3175_v2, %v3087_v53  ;;  %3315 = vmatmul.bf16.vlgmr.msra.gmra.mxu3 %v8632_v22  ;;  %3404 = vmatmul.bf16.vlgmr.msra.gmra.mxu0 %v8634_v23  ;;  %v12637_v23 = vld [vmem:[#allocation25_spill] sm:$0xff] }
 0x3e8   :  { %3493 = vmatmul.bf16.vlgmr.msra.gmra.mxu1 %v9118_v54 }
 0x3e9   :  { %3582 = vmatmul.bf16.vlgmr.msra.gmra.mxu2 %v12552_v12  ;;  %v4525_v57 = vmax.f32 %v3176_v49, 0.0  ;;  %v12614_v49 = vld [vmem:[#allocation55_spill] sm:$0xff] }
 0x3ea   :  { %v3000_v37 = vpop.f32.mrf.mxu3  ;;  %v12636_v12 = vld [vmem:[#allocation135_spill] sm:$0xff] }
 0x3eb   :  { %v3001_v26 = vadd.f32 %v3000_v37, %v9982_v6  ;;  %v10173_v32 = vpack.c.bf16 %v4525_v57, %v4521_v36  ;;  %v12613_v6 = vld [vmem:[#allocation10_spill] sm:$0xff]  ;;  %v12616_v36 = vld [vmem:[#allocation88_spill] sm:$0xff] }
 0x3ec   :  { %v10171_v44 = vpop.f32.mrf.mxu2  ;;  %v3091_v11 = vpop.f32.mrf.mxu0 }
 0x3ed   :  { %12612 = vst [vmem:[#allocation149_spill] sm:$0xff] %v10173_v32  ;;  %v3090_v14 = vadd.f32 %v3089_v50, %v3001_v26  ;;  %v3180_v13 = vpop.f32.mrf.mxu1 }
 0x3ef   :  { %v3179_v34 = vadd.f32 %v3178_v31, %v3090_v14 }
 0x3f1   :  { %v4529_v50 = vmax.f32 %v3179_v34, 0.0 }
 0x3f2   :  { %v3002_v1 = vpop.f32.mrf.mxu3 }
 0x3f3   :  { %v3003_v21 = vadd.f32 %v3002_v1, %v9990_v40  ;;  %v12618_v1 = vld [vmem:[#allocation89_spill] sm:$0xff] }
 0x3f4   :  { %v10176_v2 = vpop.f32.mrf.mxu2  ;;  %v3094_v27 = vpop.f32.mrf.mxu0 }
 0x3f5   :  { %v3092_v5 = vadd.f32 %v3091_v11, %v3003_v21  ;;  %v3183_v62 = vpop.f32.mrf.mxu1 }
 0x3f7   :  { %v3181_v53 = vadd.f32 %v3180_v13, %v3092_v5  ;;  %3320 = vmatmul.bf16.gmra.mxu3 %v8673_v33  ;;  %3409 = vmatmul.bf16.gmra.mxu0 %v12613_v6  ;;  %v12631_v6 = vld [vmem:[#allocation21_spill] sm:$0xff] }
 0x3f8   :  { %3498 = vmatmul.bf16.gmra.mxu1 %v12614_v49 }
 0x3f9   :  { %3587 = vmatmul.bf16.gmra.mxu2 %v12615_v59  ;;  %v4533_v29 = vmax.f32 %v3181_v53, 0.0  ;;  %v12624_v59 = vld [vmem:[#allocation17_spill] sm:$0xff] }
 0x3fa   :  { %v3005_v31 = vpop.f32.mrf.mxu3 }
 0x3fb   :  { %v3006_v0 = vadd.f32 %v3005_v31, %v12616_v36  ;;  %v10185_v57 = vpack.c.bf16 %v4533_v29, %v4529_v50  ;;  %v12620_v31 = vld [vmem:[#allocation14_spill] sm:$0xff]  ;;  %v12621_v36 = vld [vmem:[#allocation59_spill] sm:$0xff]  ;;  %v12622_v50 = vld [vmem:[#allocation60_spill] sm:$0xff] }
 0x3fc   :  { %v10183_v40 = vpop.f32.mrf.mxu2  ;;  %v3096_v37 = vpop.f32.mrf.mxu0  ;;  %v8349_v29 = vld [vmem:[#allocation2 + $0x5b4] sm:$0xf0] }
 0x3fd   :  { %12617 = vst [vmem:[#allocation88_spill] sm:$0xff] %v10185_v57  ;;  %v3095_v26 = vadd.f32 %v3094_v27, %v3006_v0  ;;  %v3185_v11 = vpop.f32.mrf.mxu1  ;;  %v7584_v27 = vld [vmem:[#allocation2 + $0x5a8] sm:$0xf] }
 0x3fe   :  { %v7585_v0 = vor.u32 %v8349_v29, %v7584_v27 }
 0x3ff   :  { %v3184_v14 = vadd.f32 %v3183_v62, %v3095_v26 }
 0x400   :  { %3665 = vmatpush.bf16.msrb.mxu3 %v7585_v0  ;;  %v12626_v0 = vld [vmem:[#allocation63_spill] sm:$0xff] }
 0x401   :  { %v4537_v62 = vmax.f32 %v3184_v14, 0.0 }
 0x402   :  { %v3007_v13 = vpop.f32.mrf.mxu3 }
 0x403   :  { %v3008_v21 = vadd.f32 %v3007_v13, %v12618_v1 }
 0x404   :  { %v10188_v5 = vpop.f32.mrf.mxu2  ;;  %v3099_v32 = vpop.f32.mrf.mxu0 }
 0x405   :  { %v3097_v38 = vadd.f32 %v3096_v37, %v3008_v21  ;;  %v3188_v34 = vpop.f32.mrf.mxu1 }
 0x407   :  { %v3186_v53 = vadd.f32 %v3185_v11, %v3097_v38  ;;  %3325 = vmatmul.bf16.gmra.mxu3 %v12619_v63  ;;  %3414 = vmatmul.bf16.gmra.mxu0 %v12620_v31 }
 0x408   :  { %3503 = vmatmul.bf16.gmra.mxu1 %v12621_v36 }
 0x409   :  { %3592 = vmatmul.bf16.gmra.mxu2 %v12622_v50  ;;  %v4541_v26 = vmax.f32 %v3186_v53, 0.0 }
 0x40a   :  { %v3010_v13 = vpop.f32.mrf.mxu3 }
 0x40b   :  { %v3011_v1 = vadd.f32 %v3010_v13, %v10004_v52  ;;  %v10197_v38 = vpack.c.bf16 %v4541_v26, %v4537_v62  ;;  %v12625_v52 = vld [vmem:[#allocation18_spill] sm:$0xff]  ;;  %v12627_v62 = vld [vmem:[#allocation64_spill] sm:$0xff]  ;;  %v12628_v13 = vld [vmem:[#allocation133_spill] sm:$0xff] }
 0x40c   :  { %v10195_v57 = vpop.f32.mrf.mxu2  ;;  %v3101_v37 = vpop.f32.mrf.mxu0 }
 0x40d   :  { %12623 = vst [vmem:[#allocation89_spill] sm:$0xff] %v10197_v38  ;;  %v3100_v11 = vadd.f32 %v3099_v32, %v3011_v1  ;;  %v3190_v21 = vpop.f32.mrf.mxu1  ;;  %v12630_v38 = vld [vmem:[#allocation134_spill] sm:$0xff] }
 0x40f   :  { %v3189_v7 = vadd.f32 %v3188_v34, %v3100_v11 }
 0x411   :  { %v4545_v32 = vmax.f32 %v3189_v7, 0.0 }
 0x412   :  { %v3012_v36 = vpop.f32.mrf.mxu3 }
 0x413   :  { %v3013_v50 = vadd.f32 %v3012_v36, %v10012_v10 }
 0x414   :  { %v10200_v31 = vpop.f32.mrf.mxu2  ;;  %v3104_v14 = vpop.f32.mrf.mxu0 }
 0x415   :  { %v3102_v27 = vadd.f32 %v3101_v37, %v3013_v50  ;;  %v3193_v53 = vpop.f32.mrf.mxu1 }
 0x417   :  { %v3191_v29 = vadd.f32 %v3190_v21, %v3102_v27  ;;  %3330 = vmatmul.bf16.gmra.mxu3 %v12624_v59  ;;  %3419 = vmatmul.bf16.gmra.mxu0 %v12625_v52 }
 0x418   :  { %3508 = vmatmul.bf16.gmra.mxu1 %v12626_v0 }
 0x419   :  { %3597 = vmatmul.bf16.gmra.mxu2 %v12627_v62  ;;  %v4549_v26 = vmax.f32 %v3191_v29, 0.0 }
 0x41a   :  { %v3015_v34 = vpop.f32.mrf.mxu3 }
 0x41b   :  { %v3016_v1 = vadd.f32 %v3015_v34, %v12628_v13  ;;  %v10209_v36 = vpack.c.bf16 %v4549_v26, %v4545_v32  ;;  %v12632_v34 = vld [vmem:[#allocation22_spill] sm:$0xff]  ;;  %v12633_v13 = vld [vmem:[#allocation67_spill] sm:$0xff]  ;;  %v12634_v32 = vld [vmem:[#allocation68_spill] sm:$0xff] }
 0x41c   :  { %v10207_v10 = vpop.f32.mrf.mxu2  ;;  %v3106_v50 = vpop.f32.mrf.mxu0  ;;  %v8345_v26 = vld [vmem:[#allocation2 + $0x594] sm:$0xf0] }
 0x41d   :  { %12629 = vst [vmem:[#allocation13_spill] sm:$0xff] %v10209_v36  ;;  %v3105_v37 = vadd.f32 %v3104_v14, %v3016_v1  ;;  %v3195_v11 = vpop.f32.mrf.mxu1  ;;  %v7568_v14 = vld [vmem:[#allocation2 + $0x588] sm:$0xf] }
 0x41e   :  { %v7569_v1 = vor.u32 %v8345_v26, %v7568_v14 }
 0x41f   :  { %v3194_v21 = vadd.f32 %v3193_v53, %v3105_v37 }
 0x420   :  { %3666 = vmatpush.bf16.msrb.mxu3 %v7569_v1  ;;  %v12639_v1 = vld [vmem:[#allocation73_spill] sm:$0xff] }
 0x421   :  { %v4553_v53 = vmax.f32 %v3194_v21, 0.0 }
 0x422   :  { %v3017_v27 = vpop.f32.mrf.mxu3 }
 0x423   :  { %v3018_v52 = vadd.f32 %v3017_v27, %v12630_v38 }
 0x424   :  { %v10212_v49 = vpop.f32.mrf.mxu2  ;;  %v3109_v0 = vpop.f32.mrf.mxu0 }
 0x425   :  { %v3107_v62 = vadd.f32 %v3106_v50, %v3018_v52  ;;  %v3198_v7 = vpop.f32.mrf.mxu1 }
 0x427   :  { %v3196_v29 = vadd.f32 %v3195_v11, %v3107_v62  ;;  %3335 = vmatmul.bf16.gmra.mxu3 %v12631_v6  ;;  %3424 = vmatmul.bf16.gmra.mxu0 %v12632_v34 }
 0x428   :  { %3513 = vmatmul.bf16.gmra.mxu1 %v12633_v13 }
 0x429   :  { %3602 = vmatmul.bf16.gmra.mxu2 %v12634_v32  ;;  %v4557_v37 = vmax.f32 %v3196_v29, 0.0 }
 0x42a   :  { %v3020_v38 = vpop.f32.mrf.mxu3 }
 0x42b   :  { %v3021_v27 = vadd.f32 %v3020_v38, %v10026_v17  ;;  %v10221_v52 = vpack.c.bf16 %v4557_v37, %v4553_v53  ;;  %v12638_v17 = vld [vmem:[#allocation26_spill] sm:$0xff]  ;;  %v12641_v38 = vld [vmem:[#allocation136_spill] sm:$0xff] }
 0x42c   :  { %v10219_v36 = vpop.f32.mrf.mxu2  ;;  %v3111_v62 = vpop.f32.mrf.mxu0  ;;  %v12640_v53 = vld [vmem:[#allocation74_spill] sm:$0xff] }
 0x42d   :  { %12635 = vst [vmem:[#allocation17_spill] sm:$0xff] %v10221_v52  ;;  %v3110_v50 = vadd.f32 %v3109_v0, %v3021_v27  ;;  %v3200_v11 = vpop.f32.mrf.mxu1  ;;  %v12643_v52 = vld [vmem:[#allocation137_spill] sm:$0xff] }
 0x42f   :  { %v3199_v34 = vadd.f32 %v3198_v7, %v3110_v50 }
 0x431   :  { %v4561_v0 = vmax.f32 %v3199_v34, 0.0 }
 0x432   :  { %v3022_v13 = vpop.f32.mrf.mxu3 }
 0x433   :  { %v3023_v32 = vadd.f32 %v3022_v13, %v12636_v12 }
 0x434   :  { %v10224_v54 = vpop.f32.mrf.mxu2  ;;  %v3114_v21 = vpop.f32.mrf.mxu0 }
 0x435   :  { %v3112_v14 = vadd.f32 %v3111_v62, %v3023_v32  ;;  %v3203_v29 = vpop.f32.mrf.mxu1 }
 0x437   :  { %v3201_v26 = vadd.f32 %v3200_v11, %v3112_v14  ;;  %3340 = vmatmul.bf16.gmra.mxu3 %v12637_v23  ;;  %3429 = vmatmul.bf16.gmra.mxu0 %v12638_v17 }
 0x438   :  { %3518 = vmatmul.bf16.gmra.mxu1 %v12639_v1 }
 0x439   :  { %3607 = vmatmul.bf16.gmra.mxu2 %v12640_v53  ;;  %v4565_v37 = vmax.f32 %v3201_v26, 0.0 }
 0x43a   :  { %v3025_v7 = vpop.f32.mrf.mxu3 }
 0x43b   :  { %v3026_v27 = vadd.f32 %v3025_v7, %v12641_v38  ;;  %v10233_v13 = vpack.c.bf16 %v4565_v37, %v4561_v0  ;;  %v12645_v7 = vld [vmem:[#allocation30_spill] sm:$0xff]  ;;  %v12646_v38 = vld [vmem:[#allocation79_spill] sm:$0xff]  ;;  %v12647_v0 = vld [vmem:[#allocation80_spill] sm:$0xff] }
 0x43c   :  { %v10231_v12 = vpop.f32.mrf.mxu2  ;;  %v3116_v32 = vpop.f32.mrf.mxu0  ;;  %v8341_v37 = vld [vmem:[#allocation2 + $0x574] sm:$0xf0] }
 0x43d   :  { %12642 = vst [vmem:[#allocation133_spill] sm:$0xff] %v10233_v13  ;;  %v3115_v62 = vadd.f32 %v3114_v21, %v3026_v27  ;;  %v3205_v50 = vpop.f32.mrf.mxu1  ;;  %v7552_v21 = vld [vmem:[#allocation2 + $0x568] sm:$0xf] }
 0x43e   :  { %v7553_v27 = vor.u32 %v8341_v37, %v7552_v21 }
 0x43f   :  { %v3204_v11 = vadd.f32 %v3203_v29, %v3115_v62 }
 0x440   :  { %3667 = vmatpush.bf16.msrb.mxu3 %v7553_v27  ;;  %v12653_v27 = vld [vmem:[#allocation84_spill] sm:$0xff] }
 0x441   :  { %v4569_v29 = vmax.f32 %v3204_v11, 0.0 }
 0x442   :  { %v3027_v14 = vpop.f32.mrf.mxu3 }
 0x443   :  { %v3028_v17 = vadd.f32 %v3027_v14, %v12643_v52  ;;  %v12648_v14 = vld [vmem:[#allocation138_spill] sm:$0xff] }
 0x444   :  { %v10236_v3 = vpop.f32.mrf.mxu2  ;;  %v3119_v1 = vpop.f32.mrf.mxu0 }
 0x445   :  { %v3117_v53 = vadd.f32 %v3116_v32, %v3028_v17  ;;  %v3208_v34 = vpop.f32.mrf.mxu1 }
 0x447   :  { %v3206_v26 = vadd.f32 %v3205_v50, %v3117_v53  ;;  %3345 = vmatmul.bf16.gmra.mxu3 %v12644_v60  ;;  %3434 = vmatmul.bf16.gmra.mxu0 %v12645_v7 }
 0x448   :  { %3523 = vmatmul.bf16.gmra.mxu1 %v12646_v38 }
 0x449   :  { %3612 = vmatmul.bf16.gmra.mxu2 %v12647_v0  ;;  %v4573_v62 = vmax.f32 %v3206_v26, 0.0 }
 0x44a   :  { %v3030_v52 = vpop.f32.mrf.mxu3 }
 0x44b   :  { %v3031_v13 = vadd.f32 %v3030_v52, %v12648_v14  ;;  %v10245_v17 = vpack.c.bf16 %v4573_v62, %v4569_v29  ;;  %v12652_v52 = vld [vmem:[#allocation34_spill] sm:$0xff]  ;;  %v12654_v29 = vld [vmem:[#allocation85_spill] sm:$0xff] }
 0x44c   :  { %v10243_v4 = vpop.f32.mrf.mxu2  ;;  %v3121_v53 = vpop.f32.mrf.mxu0 }
 0x44d   :  { %12649 = vst [vmem:[#allocation134_spill] sm:$0xff] %v10245_v17  ;;  %v3120_v32 = vadd.f32 %v3119_v1, %v3031_v13  ;;  %v3210_v50 = vpop.f32.mrf.mxu1  ;;  %v7632_v1 = vld [vmem:[#allocation2 + $0x608] sm:$0xf]  ;;  %v8361_v13 = vld [vmem:[#allocation2 + $0x614] sm:$0xf0] }
 0x44f   :  { %v3209_v7 = vadd.f32 %v3208_v34, %v3120_v32  ;;  %v8195_v34 = vld [vmem:[#allocation2 + $0xec] sm:$0xf] }
 0x451   :  { %v4577_v62 = vmax.f32 %v3209_v7, 0.0  ;;  %v10262_v7 = vld [vmem:[%s12080_s2] sm:$0xf] }
 0x452   :  { %v3032_v38 = vpop.f32.mrf.mxu3  ;;  %12656 = vst [vmem:[#allocation135_spill] sm:$0xff] %v10262_v7 }
 0x453   :  { %v3033_v0 = vadd.f32 %v3032_v38, %v12650_v18  ;;  %v7633_v18 = vor.u32 %v8361_v13, %v7632_v1  ;;  %v6978_v38 = vld [vmem:[#allocation2 + $0xf8] sm:$0xf0] }
 0x454   :  { %v10248_v25 = vpop.f32.mrf.mxu2  ;;  %v3124_v11 = vpop.f32.mrf.mxu0 }
 0x455   :  { %v3122_v21 = vadd.f32 %v3121_v53, %v3033_v0  ;;  %v3213_v26 = vpop.f32.mrf.mxu1  ;;  %3759 = vmatpush.bf16.msrb.mxu0 %v7633_v18  ;;  %v12660_v18 = vld [vmem:[#allocation90_spill] sm:$0xff] }
 0x457   :  { %v3211_v37 = vadd.f32 %v3210_v50, %v3122_v21  ;;  %3350 = vmatmul.bf16.gmra.mxu3 %v12651_v43  ;;  %3439 = vmatmul.bf16.gmra.mxu0 %v12652_v52  ;;  %v6981_v50 = vor.u32 %v8195_v34, %v6978_v38 }
 0x458   :  { %3528 = vmatmul.bf16.gmra.mxu1 %v12653_v27 }
 0x459   :  { %3617 = vmatmul.bf16.gmra.mxu2 %v12654_v29  ;;  %v4581_v32 = vmax.f32 %v3211_v37, 0.0  ;;  %3841 = vmatpush.bf16.msrb.mxu1 %v6981_v50  ;;  %v10265_v37 = vperm.slane %v10262_v7, 2 }
 0x45a   :  { %v3035_v14 = vpop.f32.mrf.mxu3 }
 0x45b   :  { %v3036_v0 = vadd.f32 %v3035_v14, %v10059_v20  ;;  %v10257_v17 = vpack.c.bf16 %v4581_v32, %v4577_v62  ;;  %v12659_v14 = vld [vmem:[#allocation38_spill] sm:$0xff] }
 0x45c   :  { %v10255_v53 = vpop.f32.mrf.mxu2  ;;  %v3126_v21 = vpop.f32.mrf.mxu0  ;;  %v7536_v32 = vld [vmem:[#allocation2 + $0x548] sm:$0xf] }
 0x45d   :  { %12655 = vst [vmem:[#allocation21_spill] sm:$0xff] %v10257_v17  ;;  %v3125_v27 = vadd.f32 %v3124_v11, %v3036_v0  ;;  %v3215_v52 = vpop.f32.mrf.mxu1  ;;  %v3228_v11 = vadd.f32 %v10070_v30, %v10265_v37 }
 0x45f   :  { %v3214_v29 = vadd.f32 %v3213_v26, %v3125_v27  ;;  %v12658_v27 = vld [vmem:[#allocation37_spill] sm:$0xff] }
 0x461   :  { %v4585_v38 = vmax.f32 %v3214_v29, 0.0 }
 0x462   :  { %v3037_v43 = vpop.f32.mrf.mxu3 }
 0x463   :  { %v3038_v20 = vadd.f32 %v3037_v43, %v10067_v45  ;;  %v8337_v43 = vld [vmem:[#allocation2 + $0x554] sm:$0xf0] }
 0x464   :  { %v10268_v1 = vpop.f32.mrf.mxu2  ;;  %v3405_v13 = vpop.f32.mrf.mxu0  ;;  %v7537_v50 = vor.u32 %v8337_v43, %v7536_v32  ;;  %v12662_v43 = vld [vmem:[#allocation41_spill] sm:$0xff] }
 0x465   :  { %12657 = vst [vmem:[#allocation25_spill] sm:$0xff] %v10268_v1  ;;  %v3127_v34 = vadd.f32 %v3126_v21, %v3038_v20  ;;  %v3494_v62 = vpop.f32.mrf.mxu1 }
 0x466   :  { %3668 = vmatpush.bf16.msrb.mxu3 %v7537_v50 }
 0x467   :  { %v3216_v26 = vadd.f32 %v3215_v52, %v3127_v34  ;;  %3355 = vmatmul.bf16.gmra.mxu3 %v12658_v27  ;;  %3444 = vmatmul.bf16.gmra.mxu0 %v12659_v14 }
 0x468   :  { %3533 = vmatmul.bf16.gmra.mxu1 %v12660_v18  ;;  %v3230_v18 = vadd.f32 %v10073_v42, %v10265_v37 }
 0x469   :  { %3622 = vmatmul.bf16.gmra.mxu2 %v12585_v35  ;;  %v4589_v45 = vmax.f32 %v3216_v26, 0.0 }
 0x46a   :  { %v3316_v0 = vpop.f32.mrf.mxu3 }
 0x46b   :  { %v3317_v21 = vadd.f32 %v3316_v0, %v3228_v11  ;;  %v10276_v17 = vpack.c.bf16 %v4589_v45, %v4585_v38  ;;  %v3233_v11 = vadd.f32 %v10083_v24, %v10265_v37 }
 0x46c   :  { %v3583_v20 = vpop.f32.mrf.mxu2  ;;  %v3407_v30 = vpop.f32.mrf.mxu0 }
 0x46d   :  { %12661 = vst [vmem:[#allocation136_spill] sm:$0xff] %v10276_v17  ;;  %v3406_v52 = vadd.f32 %v3405_v13, %v3317_v21  ;;  %v3496_v34 = vpop.f32.mrf.mxu1  ;;  %v12663_v13 = vld [vmem:[#allocation42_spill] sm:$0xff] }
 0x46f   :  { %v3495_v27 = vadd.f32 %v3494_v62, %v3406_v52  ;;  %v12664_v62 = vld [vmem:[#allocation94_spill] sm:$0xff] }
 0x471   :  { %v10280_v14 = vadd.f32 %v3583_v20, %v3495_v27  ;;  %v8191_v27 = vld [vmem:[#allocation2 + $0xcc] sm:$0xf] }
 0x472   :  { %v3318_v29 = vpop.f32.mrf.mxu3 }
 0x473   :  { %v3319_v35 = vadd.f32 %v3318_v29, %v3230_v18  ;;  %v6962_v18 = vld [vmem:[#allocation2 + $0xd8] sm:$0xf0] }
 0x474   :  { %v3585_v7 = vpop.f32.mrf.mxu2  ;;  %v3410_v26 = vpop.f32.mrf.mxu0  ;;  %v6965_v0 = vor.u32 %v8191_v27, %v6962_v18  ;;  %v12665_v18 = vld [vmem:[#allocation45_spill] sm:$0xff] }
 0x475   :  { %v3408_v1 = vadd.f32 %v3407_v30, %v3319_v35  ;;  %v3499_v32 = vpop.f32.mrf.mxu1  ;;  %v3235_v30 = vadd.f32 %v10086_v8, %v10265_v37 }
 0x476   :  { %3842 = vmatpush.bf16.msrb.mxu1 %v6965_v0  ;;  %v8333_v0 = vld [vmem:[#allocation2 + $0x534] sm:$0xf0] }
 0x477   :  { %v3497_v38 = vadd.f32 %v3496_v34, %v3408_v1  ;;  %3360 = vmatmul.bf16.gmra.mxu3 %v12662_v43  ;;  %3449 = vmatmul.bf16.gmra.mxu0 %v12663_v13 }
 0x478   :  { %3538 = vmatmul.bf16.gmra.mxu1 %v12664_v62  ;;  %v8227_v62 = vld [vmem:[#allocation2 + $0x1ec] sm:$0xf] }
 0x479   :  { %3627 = vmatmul.bf16.gmra.mxu2 %v12588_v47  ;;  %v10288_v42 = vadd.f32 %v3585_v7, %v3497_v38 }
 0x47a   :  { %v3321_v45 = vpop.f32.mrf.mxu3 }
 0x47b   :  { %v3322_v35 = vadd.f32 %v3321_v45, %v3233_v11  ;;  %v3238_v11 = vadd.f32 %v10094_v55, %v10265_v37  ;;  %v7520_v45 = vld [vmem:[#allocation2 + $0x528] sm:$0xf] }
 0x47c   :  { %v3588_v50 = vpop.f32.mrf.mxu2  ;;  %v3412_v21 = vpop.f32.mrf.mxu0 }
 0x47d   :  { %v3411_v24 = vadd.f32 %v3410_v26, %v3322_v35  ;;  %v3501_v1 = vpop.f32.mrf.mxu1  ;;  %v12666_v26 = vld [vmem:[#allocation46_spill] sm:$0xff] }
 0x47f   :  { %v3500_v20 = vadd.f32 %v3499_v32, %v3411_v24  ;;  %v12667_v32 = vld [vmem:[#allocation99_spill] sm:$0xff] }
 0x481   :  { %v10292_v52 = vadd.f32 %v3588_v50, %v3500_v20  ;;  %v7521_v50 = vor.u32 %v8333_v0, %v7520_v45  ;;  %v12668_v0 = vld [vmem:[#allocation49_spill] sm:$0xff] }
 0x482   :  { %v3323_v34 = vpop.f32.mrf.mxu3 }
 0x483   :  { %v3324_v29 = vadd.f32 %v3323_v34, %v3235_v30  ;;  %3669 = vmatpush.bf16.msrb.mxu3 %v7521_v50  ;;  %v3240_v30 = vadd.f32 %v10099_v51, %v10265_v37  ;;  %v6946_v50 = vld [vmem:[#allocation2 + $0xb8] sm:$0xf0] }
 0x484   :  { %v3590_v7 = vpop.f32.mrf.mxu2  ;;  %v3415_v38 = vpop.f32.mrf.mxu0 }
 0x485   :  { %v3413_v17 = vadd.f32 %v3412_v21, %v3324_v29  ;;  %v3504_v47 = vpop.f32.mrf.mxu1 }
 0x487   :  { %v3502_v27 = vadd.f32 %v3501_v1, %v3413_v17  ;;  %3365 = vmatmul.bf16.gmra.mxu3 %v12665_v18  ;;  %3454 = vmatmul.bf16.gmra.mxu0 %v12666_v26 }
 0x488   :  { %3543 = vmatmul.bf16.gmra.mxu1 %v12667_v32 }
 0x489   :  { %3632 = vmatmul.bf16.gmra.mxu2 %v12592_v56  ;;  %v10300_v8 = vadd.f32 %v3590_v7, %v3502_v27 }
 0x48a   :  { %v3326_v35 = vpop.f32.mrf.mxu3 }
 0x48b   :  { %v3327_v21 = vadd.f32 %v3326_v35, %v3238_v11  ;;  %v3243_v11 = vadd.f32 %v10107_v39, %v10265_v37  ;;  %v8187_v35 = vld [vmem:[#allocation2 + $0xac] sm:$0xf] }
 0x48c   :  { %v3593_v24 = vpop.f32.mrf.mxu2  ;;  %v3417_v20 = vpop.f32.mrf.mxu0 }
 0x48d   :  { %v3416_v55 = vadd.f32 %v3415_v38, %v3327_v21  ;;  %v3506_v17 = vpop.f32.mrf.mxu1  ;;  %v12669_v38 = vld [vmem:[#allocation50_spill] sm:$0xff] }
 0x48f   :  { %v3505_v1 = vadd.f32 %v3504_v47, %v3416_v55  ;;  %v12670_v47 = vld [vmem:[#allocation104_spill] sm:$0xff] }
 0x491   :  { %v10304_v34 = vadd.f32 %v3593_v24, %v3505_v1  ;;  %v6949_v24 = vor.u32 %v8187_v35, %v6946_v50  ;;  %v3245_v1 = vadd.f32 %v10112_v48, %v10265_v37  ;;  %v7106_v35 = vld [vmem:[#allocation2 + $0x1f8] sm:$0xf0]  ;;  %v12675_v48 = vld [vmem:[#allocation109_spill] sm:$0xff] }
 0x492   :  { %v3328_v29 = vpop.f32.mrf.mxu3 }
 0x493   :  { %v3329_v56 = vadd.f32 %v3328_v29, %v3240_v30  ;;  %3843 = vmatpush.bf16.msrb.mxu1 %v6949_v24  ;;  %v7109_v24 = vor.u32 %v8227_v62, %v7106_v35  ;;  %v8219_v35 = vld [vmem:[#allocation2 + $0x1ac] sm:$0xf] }
 0x494   :  { %v3595_v7 = vpop.f32.mrf.mxu2  ;;  %v3420_v27 = vpop.f32.mrf.mxu0 }
 0x495   :  { %v3418_v32 = vadd.f32 %v3417_v20, %v3329_v56  ;;  %v3509_v26 = vpop.f32.mrf.mxu1  ;;  %3930 = vmatpush.bf16.msrb.mxu2 %v7109_v24 }
 0x497   :  { %v3507_v45 = vadd.f32 %v3506_v17, %v3418_v32  ;;  %3370 = vmatmul.bf16.gmra.mxu3 %v12668_v0  ;;  %3459 = vmatmul.bf16.gmra.mxu0 %v12669_v38 }
 0x498   :  { %3548 = vmatmul.bf16.gmra.mxu1 %v12670_v47 }
 0x499   :  { %3637 = vmatmul.bf16.gmra.mxu2 %v12596_v61  ;;  %v10312_v51 = vadd.f32 %v3595_v7, %v3507_v45 }
 0x49a   :  { %v3331_v21 = vpop.f32.mrf.mxu3 }
 0x49b   :  { %v3332_v56 = vadd.f32 %v3331_v21, %v3243_v11  ;;  %v12672_v11 = vld [vmem:[#allocation143_spill] sm:$0xff] }
 0x49c   :  { %v3598_v20 = vpop.f32.mrf.mxu2  ;;  %v3422_v55 = vpop.f32.mrf.mxu0  ;;  %v3248_v50 = vadd.f32 %v12672_v11, %v10265_v37 }
 0x49d   :  { %v3421_v39 = vadd.f32 %v3420_v27, %v3332_v56  ;;  %v3511_v32 = vpop.f32.mrf.mxu1  ;;  %v12673_v27 = vld [vmem:[#allocation20_spill] sm:$0xff]  ;;  %v12676_v56 = vld [vmem:[#allocation110_spill] sm:$0xff] }
 0x49f   :  { %v3510_v17 = vadd.f32 %v3509_v26, %v3421_v39  ;;  %v12674_v26 = vld [vmem:[#allocation36_spill] sm:$0xff]  ;;  %v7504_v39 = vld [vmem:[#allocation2 + $0x508] sm:$0xf] }
 0x4a1   :  { %v10316_v30 = vadd.f32 %v3598_v20, %v3510_v17 }
 0x4a2   :  { %v3333_v29 = vpop.f32.mrf.mxu3 }
 0x4a3   :  { %12671 = vst [vmem:[#allocation137_spill] sm:$0xff] %v10316_v30  ;;  %v3334_v61 = vadd.f32 %v3333_v29, %v3245_v1  ;;  %v8223_v1 = vld [vmem:[#allocation2 + $0x1cc] sm:$0xf]  ;;  %v7090_v29 = vld [vmem:[#allocation2 + $0x1d8] sm:$0xf0] }
 0x4a4   :  { %v3600_v7 = vpop.f32.mrf.mxu2  ;;  %v3425_v45 = vpop.f32.mrf.mxu0 }
 0x4a5   :  { %v3423_v47 = vadd.f32 %v3422_v55, %v3334_v61  ;;  %v3514_v38 = vpop.f32.mrf.mxu1  ;;  %v8329_v61 = vld [vmem:[#allocation2 + $0x514] sm:$0xf0] }
 0x4a6   :  { %v7505_v17 = vor.u32 %v8329_v61, %v7504_v39  ;;  %v8183_v61 = vld [vmem:[#allocation2 + $0x8c] sm:$0xf] }
 0x4a7   :  { %v3512_v21 = vadd.f32 %v3511_v32, %v3423_v47  ;;  %3375 = vmatmul.bf16.gmra.mxu3 %v12673_v27  ;;  %3464 = vmatmul.bf16.gmra.mxu0 %v12674_v26  ;;  %v7093_v32 = vor.u32 %v8223_v1, %v7090_v29 }
 0x4a8   :  { %3553 = vmatmul.bf16.gmra.mxu1 %v12675_v48  ;;  %3670 = vmatpush.bf16.msrb.mxu3 %v7505_v17  ;;  %v7074_v48 = vld [vmem:[#allocation2 + $0x1b8] sm:$0xf0] }
 0x4a9   :  { %3642 = vmatmul.bf16.gmra.mxu2 %v12676_v56  ;;  %v10324_v20 = vadd.f32 %v3600_v7, %v3512_v21  ;;  %v7077_v7 = vor.u32 %v8219_v35, %v7074_v48  ;;  %v12678_v21 = vld [vmem:[#allocation145_spill] sm:$0xff]  ;;  %v8211_v48 = vld [vmem:[#allocation2 + $0x16c] sm:$0xf]  ;;  %v12679_v35 = vld [vmem:[#allocation24_spill] sm:$0xff] }
 0x4aa   :  { %v3336_v55 = vpop.f32.mrf.mxu3  ;;  %3931 = vmatpush.bf16.msrb.mxu2 %v7093_v32  ;;  %v3250_v27 = vadd.f32 %v12678_v21, %v10265_v37  ;;  %v7042_v21 = vld [vmem:[#allocation2 + $0x178] sm:$0xf0] }
 0x4ab   :  { %12677 = vst [vmem:[#allocation29_spill] sm:$0xff] %v10324_v20  ;;  %v3337_v11 = vadd.f32 %v3336_v55, %v3248_v50  ;;  %v6930_v50 = vld [vmem:[#allocation2 + $0x98] sm:$0xf0]  ;;  %v8215_v55 = vld [vmem:[#allocation2 + $0x18c] sm:$0xf] }
 0x4ac   :  { %v3603_v47 = vpop.f32.mrf.mxu2  ;;  %v3427_v13 = vpop.f32.mrf.mxu0  ;;  %v6933_v17 = vor.u32 %v8183_v61, %v6930_v50  ;;  %v12682_v61 = vld [vmem:[#allocation115_spill] sm:$0xff] }
 0x4ad   :  { %v3426_v26 = vadd.f32 %v3425_v45, %v3337_v11  ;;  %v3516_v62 = vpop.f32.mrf.mxu1  ;;  %v7058_v45 = vld [vmem:[#allocation2 + $0x198] sm:$0xf0] }
 0x4ae   :  { %3932 = vmatpush.bf16.msrb.mxu2 %v7077_v7  ;;  %v7061_v32 = vor.u32 %v8215_v55, %v7058_v45  ;;  %3844 = vmatpush.bf16.msrb.mxu1 %v6933_v17  ;;  %v12680_v7 = vld [vmem:[#allocation40_spill] sm:$0xff] }
 0x4af   :  { %v3515_v56 = vadd.f32 %v3514_v38, %v3426_v26  ;;  %v8179_v38 = vld [vmem:[#allocation2 + $0x6c] sm:$0xf]  ;;  %v6914_v26 = vld [vmem:[#allocation2 + $0x78] sm:$0xf0] }
 0x4b0   :  { %v6898_v17 = vld [vmem:[#allocation2 + $0x58] sm:$0xf0] }
 0x4b1   :  { %v10328_v24 = vadd.f32 %v3603_v47, %v3515_v56  ;;  %v3253_v56 = vadd.f32 %v10133_v16, %v10265_v37  ;;  %v8207_v16 = vld [vmem:[#allocation2 + $0x14c] sm:$0xf] }
 0x4b2   :  { %v3338_v39 = vpop.f32.mrf.mxu3  ;;  %3933 = vmatpush.bf16.msrb.mxu2 %v7061_v32  ;;  %v7026_v32 = vld [vmem:[#allocation2 + $0x158] sm:$0xf0] }
 0x4b3   :  { %v3339_v1 = vadd.f32 %v3338_v39, %v3250_v27  ;;  %v6917_v27 = vor.u32 %v8179_v38, %v6914_v26  ;;  %v12681_v39 = vld [vmem:[#allocation114_spill] sm:$0xff]  ;;  %v7029_v38 = vor.u32 %v8207_v16, %v7026_v32  ;;  %v6994_v32 = vld [vmem:[#allocation2 + $0x118] sm:$0xf0] }
 0x4b4   :  { %v3605_v29 = vpop.f32.mrf.mxu2  ;;  %v3430_v11 = vpop.f32.mrf.mxu0 }
 0x4b5   :  { %v3428_v20 = vadd.f32 %v3427_v13, %v3339_v1  ;;  %v3519_v30 = vpop.f32.mrf.mxu1  ;;  %v7045_v13 = vor.u32 %v8211_v48, %v7042_v21  ;;  %3845 = vmatpush.bf16.msrb.mxu1 %v6917_v27  ;;  %v8175_v1 = vld [vmem:[#allocation2 + $0x4c] sm:$0xf]  ;;  %v6882_v48 = vld [vmem:[#allocation2 + $0x38] sm:$0xf0] }
 0x4b6   :  { %v6901_v45 = vor.u32 %v8175_v1, %v6898_v17  ;;  %v7010_v21 = vld [vmem:[#allocation2 + $0x138] sm:$0xf0]  ;;  %v8167_v1 = vld [vmem:[#allocation2 + $0xc] sm:$0xf] }
 0x4b7   :  { %v3517_v47 = vadd.f32 %v3516_v62, %v3428_v20  ;;  %3380 = vmatmul.bf16.gmra.mxu3 %v12679_v35  ;;  %3469 = vmatmul.bf16.gmra.mxu0 %v12680_v7  ;;  %v8199_v17 = vld [vmem:[#allocation2 + $0x10c] sm:$0xf] }
 0x4b8   :  { %3558 = vmatmul.bf16.gmra.mxu1 %v12681_v39  ;;  %3934 = vmatpush.bf16.msrb.mxu2 %v7045_v13  ;;  %v3255_v39 = vadd.f32 %v10138_v46, %v10265_v37  ;;  %v3258_v46 = vadd.f32 %v10146_v9, %v10265_v37 }
 0x4b9   :  { %3647 = vmatmul.bf16.gmra.mxu2 %v12682_v61  ;;  %v10336_v50 = vadd.f32 %v3605_v29, %v3517_v47  ;;  %3846 = vmatpush.bf16.msrb.mxu1 %v6901_v45  ;;  %v8171_v61 = vld [vmem:[#allocation2 + $0x2c] sm:$0xf] }
 0x4ba   :  { %v3341_v55 = vpop.f32.mrf.mxu3  ;;  %v8203_v29 = vld [vmem:[#allocation2 + $0x12c] sm:$0xf]  ;;  %v6885_v27 = vor.u32 %v8171_v61, %v6882_v48  ;;  %v12683_v48 = vld [vmem:[#allocation28_spill] sm:$0xff] }
 0x4bb   :  { %v3342_v20 = vadd.f32 %v3341_v55, %v3253_v56  ;;  %v7013_v13 = vor.u32 %v8203_v29, %v7010_v21  ;;  %v12684_v29 = vld [vmem:[#allocation44_spill] sm:$0xff] }
 0x4bc   :  { %v3608_v62 = vpop.f32.mrf.mxu2  ;;  %v3432_v7 = vpop.f32.mrf.mxu0  ;;  %3935 = vmatpush.bf16.msrb.mxu2 %v7029_v38  ;;  %v7234_v21 = vld [vmem:[#allocation2 + $0x2f8] sm:$0xf0] }
 0x4bd   :  { %v3431_v26 = vadd.f32 %v3430_v11, %v3342_v20  ;;  %v3521_v35 = vpop.f32.mrf.mxu1  ;;  %3847 = vmatpush.bf16.msrb.mxu1 %v6885_v27  ;;  %v6866_v11 = vld [vmem:[#allocation2 + $0x18] sm:$0xf0]  ;;  %v8259_v27 = vld [vmem:[#allocation2 + $0x2ec] sm:$0xf] }
 0x4be   :  { %v6869_v45 = vor.u32 %v8167_v1, %v6866_v11 }
 0x4bf   :  { %v3520_v47 = vadd.f32 %v3519_v30, %v3431_v26  ;;  %v6997_v30 = vor.u32 %v8199_v17, %v6994_v32 }
 0x4c0   :  { %3936 = vmatpush.bf16.msrb.mxu2 %v7013_v13  ;;  %v7237_v13 = vor.u32 %v8259_v27, %v7234_v21  ;;  %v12686_v21 = vld [vmem:[#allocation32_spill] sm:$0xff] }
 0x4c1   :  { %v10340_v56 = vadd.f32 %v3608_v62, %v3520_v47  ;;  %3848 = vmatpush.bf16.msrb.mxu1 %v6869_v45  ;;  %v12685_v47 = vld [vmem:[#allocation119_spill] sm:$0xff] }
 0x4c2   :  { %v3343_v55 = vpop.f32.mrf.mxu3  ;;  %4019 = vmatpush.bf16.msra.mxu3 %v7237_v13 }
 0x4c3   :  { %v3344_v16 = vadd.f32 %v3343_v55, %v3255_v39 }
 0x4c4   :  { %v3610_v20 = vpop.f32.mrf.mxu2  ;;  %v3435_v38 = vpop.f32.mrf.mxu0  ;;  %3937 = vmatpush.bf16.msrb.mxu2 %v6997_v30 }
 0x4c5   :  { %v3433_v61 = vadd.f32 %v3432_v7, %v3344_v16  ;;  %v3524_v26 = vpop.f32.mrf.mxu1  ;;  %v3260_v16 = vadd.f32 %v10151_v58, %v10265_v37 }
 0x4c7   :  { %v3522_v62 = vadd.f32 %v3521_v35, %v3433_v61  ;;  %3385 = vmatmul.bf16.gmra.mxu3 %v12683_v48  ;;  %3474 = vmatmul.bf16.gmra.mxu0 %v12684_v29 }
 0x4c8   :  { %3563 = vmatmul.bf16.gmra.mxu1 %v12685_v47 }
 0x4c9   :  { %3652 = vmatmul.bf16.gmra.mxu2 %v9769_v41  ;;  %v10348_v39 = vadd.f32 %v3610_v20, %v3522_v62 }
 0x4ca   :  { %v3346_v7 = vpop.f32.mrf.mxu3 }
 0x4cb   :  { %v3347_v55 = vadd.f32 %v3346_v7, %v3258_v46  ;;  %v3263_v46 = vadd.f32 %v10159_v15, %v10265_v37  ;;  %v3265_v15 = vadd.f32 %v10164_v28, %v10265_v37 }
 0x4cc   :  { %v3613_v1 = vpop.f32.mrf.mxu2  ;;  %v3437_v11 = vpop.f32.mrf.mxu0 }
 0x4cd   :  { %v3436_v9 = vadd.f32 %v3435_v38, %v3347_v55  ;;  %v3526_v35 = vpop.f32.mrf.mxu1  ;;  %v12687_v38 = vld [vmem:[#allocation48_spill] sm:$0xff] }
 0x4cf   :  { %v3525_v17 = vadd.f32 %v3524_v26, %v3436_v9  ;;  %v12688_v26 = vld [vmem:[#allocation124_spill] sm:$0xff] }
 0x4d1   :  { %v10352_v45 = vadd.f32 %v3613_v1, %v3525_v17 }
 0x4d2   :  { %v3348_v32 = vpop.f32.mrf.mxu3 }
 0x4d3   :  { %v3349_v30 = vadd.f32 %v3348_v32, %v3260_v16 }
 0x4d4   :  { %v3615_v20 = vpop.f32.mrf.mxu2  ;;  %v3440_v61 = vpop.f32.mrf.mxu0 }
 0x4d5   :  { %v3438_v62 = vadd.f32 %v3437_v11, %v3349_v30  ;;  %v3529_v41 = vpop.f32.mrf.mxu1 }
 0x4d7   :  { %v3527_v27 = vadd.f32 %v3526_v35, %v3438_v62  ;;  %3390 = vmatmul.bf16.gmra.mxu3 %v12686_v21  ;;  %3479 = vmatmul.bf16.gmra.mxu0 %v12687_v38 }
 0x4d8   :  { %3568 = vmatmul.bf16.gmra.mxu1 %v12688_v26 }
 0x4d9   :  { %3657 = vmatmul.bf16.gmra.mxu2 %v9810_v19  ;;  %v10360_v58 = vadd.f32 %v3615_v20, %v3527_v27  ;;  %v3268_v20 = vadd.f32 %v10171_v44, %v10265_v37  ;;  %v12689_v27 = vld [vmem:[#allocation53_spill] sm:$0xff] }
 0x4da   :  { %v3351_v7 = vpop.f32.mrf.mxu3 }
 0x4db   :  { %v3352_v13 = vadd.f32 %v3351_v7, %v3263_v46  ;;  %v8255_v7 = vld [vmem:[#allocation2 + $0x2cc] sm:$0xf] }
 0x4dc   :  { %v3618_v55 = vpop.f32.mrf.mxu2  ;;  %v3442_v1 = vpop.f32.mrf.mxu0 }
 0x4dd   :  { %v3441_v11 = vadd.f32 %v3440_v61, %v3352_v13  ;;  %v3531_v9 = vpop.f32.mrf.mxu1  ;;  %v12690_v61 = vld [vmem:[#allocation54_spill] sm:$0xff]  ;;  %v7218_v13 = vld [vmem:[#allocation2 + $0x2d8] sm:$0xf0] }
 0x4df   :  { %v3530_v17 = vadd.f32 %v3529_v41, %v3441_v11  ;;  %v12691_v41 = vld [vmem:[#allocation5_spill] sm:$0xff] }
 0x4e1   :  { %v10364_v35 = vadd.f32 %v3618_v55, %v3530_v17 }
 0x4e2   :  { %v3353_v16 = vpop.f32.mrf.mxu3 }
 0x4e3   :  { %v3354_v32 = vadd.f32 %v3353_v16, %v3265_v15  ;;  %v3270_v16 = vadd.f32 %v10176_v2, %v10265_v37 }
 0x4e4   :  { %v3620_v30 = vpop.f32.mrf.mxu2  ;;  %v3445_v62 = vpop.f32.mrf.mxu0 }
 0x4e5   :  { %v3443_v26 = vadd.f32 %v3442_v1, %v3354_v32  ;;  %v3534_v19 = vpop.f32.mrf.mxu1  ;;  %v7221_v1 = vor.u32 %v8255_v7, %v7218_v13  ;;  %v12692_v13 = vld [vmem:[#allocation57_spill] sm:$0xff] }
 0x4e7   :  { %v3532_v46 = vadd.f32 %v3531_v9, %v3443_v26  ;;  %3671 = vmatmul.bf16.vlgmr.msrb.gmra.mxu3 %v12689_v27  ;;  %7670 = vmatmul.msk.bf16.vlgmr.msrb.gmra.mxu0 %vm1923_vm0, %v12690_v61 }
 0x4e8   :  { %3849 = vmatmul.bf16.vlgmr.msrb.gmra.mxu1 %v12691_v41  ;;  %4020 = vmatpush.bf16.msra.mxu3 %v7221_v1 }
 0x4e9   :  { %3938 = vmatmul.bf16.vlgmr.msrb.gmra.mxu2 %v8632_v22  ;;  %v10373_v28 = vadd.f32 %v3620_v30, %v3532_v46 }
 0x4ea   :  { %v3356_v55 = vpop.f32.mrf.mxu3 }
 0x4eb   :  { %v3357_v11 = vadd.f32 %v3356_v55, %v3268_v20  ;;  %v3273_v20 = vadd.f32 %v10183_v40, %v10265_v37  ;;  %v3275_v40 = vadd.f32 %v10188_v5, %v10265_v37 }
 0x4ec   :  { %v3623_v17 = vpop.f32.mrf.mxu2  ;;  %v3447_v15 = vpop.f32.mrf.mxu0 }
 0x4ed   :  { %v3446_v44 = vadd.f32 %v3445_v62, %v3357_v11  ;;  %v3536_v26 = vpop.f32.mrf.mxu1  ;;  %v12693_v62 = vld [vmem:[#allocation58_spill] sm:$0xff] }
 0x4ef   :  { %v3535_v9 = vadd.f32 %v3534_v19, %v3446_v44  ;;  %v12694_v19 = vld [vmem:[#allocation8_spill] sm:$0xff] }
 0x4f1   :  { %v10377_v32 = vadd.f32 %v3623_v17, %v3535_v9 }
 0x4f2   :  { %v3358_v41 = vpop.f32.mrf.mxu3 }
 0x4f3   :  { %v3359_v22 = vadd.f32 %v3358_v41, %v3270_v16 }
 0x4f4   :  { %v3625_v30 = vpop.f32.mrf.mxu2  ;;  %v3450_v46 = vpop.f32.mrf.mxu0 }
 0x4f5   :  { %v3448_v61 = vadd.f32 %v3447_v15, %v3359_v22  ;;  %v3539_v38 = vpop.f32.mrf.mxu1 }
 0x4f7   :  { %v3537_v7 = vadd.f32 %v3536_v26, %v3448_v61  ;;  %3676 = vmatmul.bf16.gmra.mxu3 %v12692_v13  ;;  %7671 = vmatmul.msk.bf16.gmra.mxu0 %vm1923_vm0, %v12693_v62 }
 0x4f8   :  { %3854 = vmatmul.bf16.gmra.mxu1 %v12694_v19 }
 0x4f9   :  { %3943 = vmatmul.bf16.gmra.mxu2 %v8673_v33  ;;  %v10386_v2 = vadd.f32 %v3625_v30, %v3537_v7  ;;  %v3278_v30 = vadd.f32 %v10195_v57, %v10265_v37  ;;  %v12695_v7 = vld [vmem:[#allocation61_spill] sm:$0xff] }
 0x4fa   :  { %v3361_v55 = vpop.f32.mrf.mxu3 }
 0x4fb   :  { %v3362_v1 = vadd.f32 %v3361_v55, %v3273_v20  ;;  %v8251_v55 = vld [vmem:[#allocation2 + $0x2ac] sm:$0xf] }
 0x4fc   :  { %v3628_v11 = vpop.f32.mrf.mxu2  ;;  %v3452_v17 = vpop.f32.mrf.mxu0 }
 0x4fd   :  { %v3451_v15 = vadd.f32 %v3450_v46, %v3362_v1  ;;  %v3541_v44 = vpop.f32.mrf.mxu1  ;;  %v12696_v46 = vld [vmem:[#allocation62_spill] sm:$0xff]  ;;  %v7202_v1 = vld [vmem:[#allocation2 + $0x2b8] sm:$0xf0] }
 0x4ff   :  { %v3540_v9 = vadd.f32 %v3539_v38, %v3451_v15  ;;  %v12697_v38 = vld [vmem:[#allocation11_spill] sm:$0xff] }
 0x501   :  { %v10390_v61 = vadd.f32 %v3628_v11, %v3540_v9 }
 0x502   :  { %v3363_v26 = vpop.f32.mrf.mxu3 }
 0x503   :  { %v3364_v16 = vadd.f32 %v3363_v26, %v3275_v40 }
 0x504   :  { %v3630_v41 = vpop.f32.mrf.mxu2  ;;  %v3455_v22 = vpop.f32.mrf.mxu0 }
 0x505   :  { %v3453_v19 = vadd.f32 %v3452_v17, %v3364_v16  ;;  %v3544_v33 = vpop.f32.mrf.mxu1  ;;  %v7205_v17 = vor.u32 %v8251_v55, %v7202_v1  ;;  %v3280_v16 = vadd.f32 %v10200_v31, %v10265_v37  ;;  %v12698_v1 = vld [vmem:[#allocation65_spill] sm:$0xff] }
 0x507   :  { %v3542_v20 = vadd.f32 %v3541_v44, %v3453_v19  ;;  %3681 = vmatmul.bf16.gmra.mxu3 %v12695_v7  ;;  %7672 = vmatmul.msk.bf16.gmra.mxu0 %vm1923_vm0, %v12696_v46 }
 0x508   :  { %3859 = vmatmul.bf16.gmra.mxu1 %v12697_v38  ;;  %4021 = vmatpush.bf16.msra.mxu3 %v7205_v17 }
 0x509   :  { %3948 = vmatmul.bf16.gmra.mxu2 %v12619_v63  ;;  %v10399_v5 = vadd.f32 %v3630_v41, %v3542_v20 }
 0x50a   :  { %v3366_v11 = vpop.f32.mrf.mxu3 }
 0x50b   :  { %v3367_v15 = vadd.f32 %v3366_v11, %v3278_v30  ;;  %v3283_v30 = vadd.f32 %v10207_v10, %v10265_v37  ;;  %v3285_v10 = vadd.f32 %v10212_v49, %v10265_v37 }
 0x50c   :  { %v3633_v9 = vpop.f32.mrf.mxu2  ;;  %v3457_v40 = vpop.f32.mrf.mxu0 }
 0x50d   :  { %v3456_v57 = vadd.f32 %v3455_v22, %v3367_v15  ;;  %v3546_v44 = vpop.f32.mrf.mxu1  ;;  %v12699_v22 = vld [vmem:[#allocation66_spill] sm:$0xff] }
 0x50f   :  { %v3545_v26 = vadd.f32 %v3544_v33, %v3456_v57  ;;  %v12700_v33 = vld [vmem:[#allocation15_spill] sm:$0xff] }
 0x511   :  { %v10403_v19 = vadd.f32 %v3633_v9, %v3545_v26 }
 0x512   :  { %v3368_v38 = vpop.f32.mrf.mxu3 }
 0x513   :  { %v3369_v63 = vadd.f32 %v3368_v38, %v3280_v16 }
 0x514   :  { %v3635_v41 = vpop.f32.mrf.mxu2  ;;  %v3460_v20 = vpop.f32.mrf.mxu0 }
 0x515   :  { %v3458_v46 = vadd.f32 %v3457_v40, %v3369_v63  ;;  %v3549_v62 = vpop.f32.mrf.mxu1 }
 0x517   :  { %v3547_v55 = vadd.f32 %v3546_v44, %v3458_v46  ;;  %3686 = vmatmul.bf16.gmra.mxu3 %v12698_v1  ;;  %7673 = vmatmul.msk.bf16.gmra.mxu0 %vm1923_vm0, %v12699_v22 }
 0x518   :  { %3864 = vmatmul.bf16.gmra.mxu1 %v12700_v33 }
 0x519   :  { %3953 = vmatmul.bf16.gmra.mxu2 %v12624_v59  ;;  %v10412_v31 = vadd.f32 %v3635_v41, %v3547_v55  ;;  %v3288_v41 = vadd.f32 %v10219_v36, %v10265_v37  ;;  %v12701_v55 = vld [vmem:[#allocation69_spill] sm:$0xff] }
 0x51a   :  { %v3371_v11 = vpop.f32.mrf.mxu3 }
 0x51b   :  { %v3372_v17 = vadd.f32 %v3371_v11, %v3283_v30  ;;  %v8247_v11 = vld [vmem:[#allocation2 + $0x28c] sm:$0xf] }
 0x51c   :  { %v3638_v15 = vpop.f32.mrf.mxu2  ;;  %v3462_v9 = vpop.f32.mrf.mxu0 }
 0x51d   :  { %v3461_v40 = vadd.f32 %v3460_v20, %v3372_v17  ;;  %v3551_v57 = vpop.f32.mrf.mxu1  ;;  %v12702_v20 = vld [vmem:[#allocation70_spill] sm:$0xff]  ;;  %v7186_v17 = vld [vmem:[#allocation2 + $0x298] sm:$0xf0] }
 0x51f   :  { %v3550_v26 = vadd.f32 %v3549_v62, %v3461_v40  ;;  %v12703_v62 = vld [vmem:[#allocation19_spill] sm:$0xff] }
 0x521   :  { %v10416_v46 = vadd.f32 %v3638_v15, %v3550_v26 }
 0x522   :  { %v3373_v44 = vpop.f32.mrf.mxu3 }
 0x523   :  { %v3374_v16 = vadd.f32 %v3373_v44, %v3285_v10 }
 0x524   :  { %v3640_v38 = vpop.f32.mrf.mxu2  ;;  %v3465_v63 = vpop.f32.mrf.mxu0 }
 0x525   :  { %v3463_v33 = vadd.f32 %v3462_v9, %v3374_v16  ;;  %v3554_v59 = vpop.f32.mrf.mxu1  ;;  %v7189_v9 = vor.u32 %v8247_v11, %v7186_v17  ;;  %v3290_v16 = vadd.f32 %v10224_v54, %v10265_v37  ;;  %v12704_v17 = vld [vmem:[#allocation75_spill] sm:$0xff] }
 0x527   :  { %v3552_v30 = vadd.f32 %v3551_v57, %v3463_v33  ;;  %3691 = vmatmul.bf16.gmra.mxu3 %v12701_v55  ;;  %7674 = vmatmul.msk.bf16.gmra.mxu0 %vm1923_vm0, %v12702_v20 }
 0x528   :  { %3869 = vmatmul.bf16.gmra.mxu1 %v12703_v62  ;;  %4022 = vmatpush.bf16.msra.mxu3 %v7189_v9 }
 0x529   :  { %3958 = vmatmul.bf16.gmra.mxu2 %v12631_v6  ;;  %v10425_v49 = vadd.f32 %v3640_v38, %v3552_v30 }
 0x52a   :  { %v3376_v15 = vpop.f32.mrf.mxu3 }
 0x52b   :  { %v3377_v40 = vadd.f32 %v3376_v15, %v3288_v41  ;;  %v3293_v41 = vadd.f32 %v10231_v12, %v10265_v37  ;;  %v3295_v12 = vadd.f32 %v10236_v3, %v10265_v37 }
 0x52c   :  { %v3643_v26 = vpop.f32.mrf.mxu2  ;;  %v3467_v10 = vpop.f32.mrf.mxu0 }
 0x52d   :  { %v3466_v36 = vadd.f32 %v3465_v63, %v3377_v40  ;;  %v3556_v57 = vpop.f32.mrf.mxu1  ;;  %v12705_v63 = vld [vmem:[#allocation76_spill] sm:$0xff] }
 0x52f   :  { %v3555_v44 = vadd.f32 %v3554_v59, %v3466_v36  ;;  %v12706_v59 = vld [vmem:[#allocation23_spill] sm:$0xff] }
 0x531   :  { %v10429_v33 = vadd.f32 %v3643_v26, %v3555_v44 }
 0x532   :  { %v3378_v62 = vpop.f32.mrf.mxu3 }
 0x533   :  { %v3379_v6 = vadd.f32 %v3378_v62, %v3290_v16 }
 0x534   :  { %v3645_v38 = vpop.f32.mrf.mxu2  ;;  %v3470_v30 = vpop.f32.mrf.mxu0 }
 0x535   :  { %v3468_v20 = vadd.f32 %v3467_v10, %v3379_v6  ;;  %v3559_v22 = vpop.f32.mrf.mxu1 }
 0x537   :  { %v3557_v11 = vadd.f32 %v3556_v57, %v3468_v20  ;;  %3696 = vmatmul.bf16.gmra.mxu3 %v12704_v17  ;;  %7675 = vmatmul.msk.bf16.gmra.mxu0 %vm1923_vm0, %v12705_v63 }
 0x538   :  { %3874 = vmatmul.bf16.gmra.mxu1 %v12706_v59 }
 0x539   :  { %3963 = vmatmul.bf16.gmra.mxu2 %v12637_v23  ;;  %v10438_v54 = vadd.f32 %v3645_v38, %v3557_v11  ;;  %v3298_v38 = vadd.f32 %v10243_v4, %v10265_v37  ;;  %v12707_v11 = vld [vmem:[#allocation81_spill] sm:$0xff] }
 0x53a   :  { %v3381_v15 = vpop.f32.mrf.mxu3 }
 0x53b   :  { %v3382_v9 = vadd.f32 %v3381_v15, %v3293_v41  ;;  %v8243_v15 = vld [vmem:[#allocation2 + $0x26c] sm:$0xf] }
 0x53c   :  { %v3648_v40 = vpop.f32.mrf.mxu2  ;;  %v3472_v26 = vpop.f32.mrf.mxu0 }
 0x53d   :  { %v3471_v10 = vadd.f32 %v3470_v30, %v3382_v9  ;;  %v3561_v36 = vpop.f32.mrf.mxu1  ;;  %v12708_v30 = vld [vmem:[#allocation82_spill] sm:$0xff]  ;;  %v7170_v9 = vld [vmem:[#allocation2 + $0x278] sm:$0xf0] }
 0x53f   :  { %v3560_v44 = vadd.f32 %v3559_v22, %v3471_v10  ;;  %v12709_v22 = vld [vmem:[#allocation27_spill] sm:$0xff] }
 0x541   :  { %v10442_v20 = vadd.f32 %v3648_v40, %v3560_v44 }
 0x542   :  { %v3383_v57 = vpop.f32.mrf.mxu3 }
 0x543   :  { %v3384_v16 = vadd.f32 %v3383_v57, %v3295_v12 }
 0x544   :  { %v3650_v62 = vpop.f32.mrf.mxu2  ;;  %v3475_v6 = vpop.f32.mrf.mxu0 }
 0x545   :  { %v3473_v59 = vadd.f32 %v3472_v26, %v3384_v16  ;;  %v3564_v23 = vpop.f32.mrf.mxu1  ;;  %v7173_v26 = vor.u32 %v8243_v15, %v7170_v9  ;;  %v3300_v16 = vadd.f32 %v10248_v25, %v10265_v37  ;;  %v12710_v9 = vld [vmem:[#allocation86_spill] sm:$0xff]  ;;  %v12713_v25 = vld [vmem:[#allocation33_spill] sm:$0xff] }
 0x547   :  { %v3562_v41 = vadd.f32 %v3561_v36, %v3473_v59  ;;  %3701 = vmatmul.bf16.gmra.mxu3 %v12707_v11  ;;  %7676 = vmatmul.msk.bf16.gmra.mxu0 %vm1923_vm0, %v12708_v30 }
 0x548   :  { %3879 = vmatmul.bf16.gmra.mxu1 %v12709_v22  ;;  %4023 = vmatpush.bf16.msra.mxu3 %v7173_v26  ;;  %v8291_v26 = vld [vmem:[#allocation2 + $0x3ec] sm:$0xf] }
 0x549   :  { %3968 = vmatmul.bf16.gmra.mxu2 %v12644_v60  ;;  %v10451_v3 = vadd.f32 %v3650_v62, %v3562_v41 }
 0x54a   :  { %v3386_v40 = vpop.f32.mrf.mxu3 }
 0x54b   :  { %v3387_v10 = vadd.f32 %v3386_v40, %v3298_v38  ;;  %v3303_v38 = vadd.f32 %v10255_v53, %v10265_v37 }
 0x54c   :  { %v3653_v44 = vpop.f32.mrf.mxu2  ;;  %v3477_v12 = vpop.f32.mrf.mxu0 }
 0x54d   :  { %v3476_v4 = vadd.f32 %v3475_v6, %v3387_v10  ;;  %v3566_v36 = vpop.f32.mrf.mxu1  ;;  %v12711_v6 = vld [vmem:[#allocation87_spill] sm:$0xff]  ;;  %v7362_v10 = vld [vmem:[#allocation2 + $0x3f8] sm:$0xf0] }
 0x54f   :  { %v3565_v57 = vadd.f32 %v3564_v23, %v3476_v4  ;;  %v12712_v23 = vld [vmem:[#allocation31_spill] sm:$0xff]  ;;  %v7365_v4 = vor.u32 %v8291_v26, %v7362_v10 }
 0x550   :  { %v12715_v26 = vld [vmem:[#allocation135_spill] sm:$0xff] }
 0x551   :  { %v10455_v59 = vadd.f32 %v3653_v44, %v3565_v57  ;;  %v8323_v44 = vld [vmem:[#allocation2 + $0x4ec] sm:$0xf]  ;;  %v7490_v57 = vld [vmem:[#allocation2 + $0x4f8] sm:$0xf0]  ;;  %4108 = vmatpush.bf16.msra.mxu0 %v7365_v4  ;;  %v10471_v10 = vperm.slane %v12715_v26, 3 }
 0x552   :  { %v3388_v22 = vpop.f32.mrf.mxu3  ;;  %v12716_v4 = vld [vmem:[#allocation92_spill] sm:$0xff] }
 0x553   :  { %v3389_v60 = vadd.f32 %v3388_v22, %v3300_v16 }
 0x554   :  { %v3655_v62 = vpop.f32.mrf.mxu2  ;;  %v3480_v41 = vpop.f32.mrf.mxu0 }
 0x555   :  { %v3478_v30 = vadd.f32 %v3477_v12, %v3389_v60  ;;  %v3569_v63 = vpop.f32.mrf.mxu1 }
 0x557   :  { %v3567_v15 = vadd.f32 %v3566_v36, %v3478_v30  ;;  %3706 = vmatmul.bf16.gmra.mxu3 %v12710_v9  ;;  %7677 = vmatmul.msk.bf16.gmra.mxu0 %vm1923_vm0, %v12711_v6  ;;  %v7493_v30 = vor.u32 %v8323_v44, %v7490_v57  ;;  %v8239_v57 = vld [vmem:[#allocation2 + $0x24c] sm:$0xf] }
 0x558   :  { %3884 = vmatmul.bf16.gmra.mxu1 %v12712_v23  ;;  %v12714_v23 = vld [vmem:[#allocation25_spill] sm:$0xff] }
 0x559   :  { %3973 = vmatmul.bf16.gmra.mxu2 %v12713_v25  ;;  %v10464_v40 = vadd.f32 %v3655_v62, %v3567_v15  ;;  %4197 = vmatpush.bf16.msra.mxu1 %v7493_v30  ;;  %v3305_v25 = vadd.f32 %v12714_v23, %v10265_v37  ;;  %v12718_v37 = vld [vmem:[#allocation35_spill] sm:$0xff] }
 0x55a   :  { %v3391_v12 = vpop.f32.mrf.mxu3 }
 0x55b   :  { %v3392_v16 = vadd.f32 %v3391_v12, %v3303_v38 }
 0x55c   :  { %v3658_v53 = vpop.f32.mrf.mxu2  ;;  %v3482_v36 = vpop.f32.mrf.mxu0 }
 0x55d   :  { %v3481_v22 = vadd.f32 %v3480_v41, %v3392_v16  ;;  %v3571_v60 = vpop.f32.mrf.mxu1  ;;  %v12717_v41 = vld [vmem:[#allocation93_spill] sm:$0xff]  ;;  %v7154_v16 = vld [vmem:[#allocation2 + $0x258] sm:$0xf0] }
 0x55e   :  { %v7157_v30 = vor.u32 %v8239_v57, %v7154_v16 }
 0x55f   :  { %v3570_v6 = vadd.f32 %v3569_v63, %v3481_v22 }
 0x560   :  { %4024 = vmatpush.bf16.msra.mxu3 %v7157_v30  ;;  %v12722_v30 = vld [vmem:[#allocation39_spill] sm:$0xff] }
 0x561   :  { %v10468_v62 = vadd.f32 %v3658_v53, %v3570_v6  ;;  %v12719_v6 = vld [vmem:[#allocation37_spill] sm:$0xff] }
 0x562   :  { %v3393_v15 = vpop.f32.mrf.mxu3 }
 0x563   :  { %v3394_v47 = vadd.f32 %v3393_v15, %v3305_v25 }
 0x564   :  { %v3660_v29 = vpop.f32.mrf.mxu2  ;;  %v3761_v9 = vpop.f32.mrf.mxu0 }
 0x565   :  { %v3483_v38 = vadd.f32 %v3482_v36, %v3394_v47  ;;  %v3850_v44 = vpop.f32.mrf.mxu1 }
 0x566   :  { %v3851_v63 = vadd.f32 %v3850_v44, %v10471_v10 }
 0x567   :  { %v3572_v12 = vadd.f32 %v3571_v60, %v3483_v38  ;;  %3711 = vmatmul.bf16.gmra.mxu3 %v12716_v4  ;;  %7678 = vmatmul.msk.bf16.gmra.mxu0 %vm1923_vm0, %v12717_v41 }
 0x568   :  { %3889 = vmatmul.bf16.gmra.mxu1 %v12718_v37 }
 0x569   :  { %3978 = vmatmul.bf16.gmra.mxu2 %v12719_v6  ;;  %v10479_v53 = vadd.f32 %v3660_v29, %v3572_v12 }
 0x56a   :  { %v3672_v22 = vpop.f32.mrf.mxu3 }
 0x56b   :  { %v3673_v47 = vadd.f32 %v3672_v22, %v10280_v14  ;;  %v12720_v22 = vld [vmem:[#allocation96_spill] sm:$0xff] }
 0x56c   :  { %v3939_v36 = vpop.f32.mrf.mxu2  ;;  %v3763_v23 = vpop.f32.mrf.mxu0 }
 0x56d   :  { %v10482_v60 = vadd.f32 %v3939_v36, %v3851_v63  ;;  %v3762_v25 = vadd.f32 %v3761_v9, %v3673_v47  ;;  %v3852_v15 = vpop.f32.mrf.mxu1  ;;  %v12721_v63 = vld [vmem:[#allocation97_spill] sm:$0xff]  ;;  %v7346_v47 = vld [vmem:[#allocation2 + $0x3d8] sm:$0xf0]  ;;  %v8319_v36 = vld [vmem:[#allocation2 + $0x4cc] sm:$0xf] }
 0x56e   :  { %v3853_v26 = vadd.f32 %v3852_v15, %v10471_v10 }
 0x56f   :  { %v4466_v16 = vmax.f32 %v3762_v25, 0.0 }
 0x572   :  { %v3674_v38 = vpop.f32.mrf.mxu3 }
 0x573   :  { %v3675_v44 = vadd.f32 %v3674_v38, %v10288_v42  ;;  %v8287_v42 = vld [vmem:[#allocation2 + $0x3cc] sm:$0xf] }
 0x574   :  { %v3941_v37 = vpop.f32.mrf.mxu2  ;;  %v3766_v29 = vpop.f32.mrf.mxu0 }
 0x575   :  { %v10486_v6 = vadd.f32 %v3941_v37, %v3853_v26  ;;  %v3764_v12 = vadd.f32 %v3763_v23, %v3675_v44  ;;  %v3855_v57 = vpop.f32.mrf.mxu1  ;;  %v7349_v23 = vor.u32 %v8287_v42, %v7346_v47  ;;  %v7474_v26 = vld [vmem:[#allocation2 + $0x4d8] sm:$0xf0] }
 0x576   :  { %v3856_v9 = vadd.f32 %v3855_v57, %v10471_v10  ;;  %v7477_v38 = vor.u32 %v8319_v36, %v7474_v26 }
 0x577   :  { %v4470_v14 = vmax.f32 %v3764_v12, 0.0  ;;  %3716 = vmatmul.bf16.gmra.mxu3 %v12720_v22  ;;  %7679 = vmatmul.msk.bf16.gmra.mxu0 %vm1923_vm0, %v12721_v63 }
 0x578   :  { %3894 = vmatmul.bf16.gmra.mxu1 %v12722_v30  ;;  %4109 = vmatpush.bf16.msra.mxu0 %v7349_v23  ;;  %v12724_v23 = vld [vmem:[#allocation101_spill] sm:$0xff] }
 0x579   :  { %3983 = vmatmul.bf16.gmra.mxu2 %v12662_v43  ;;  %v10494_v15 = vpack.c.bf16 %v4470_v14, %v4466_v16  ;;  %4198 = vmatpush.bf16.msra.mxu1 %v7477_v38  ;;  %v12726_v38 = vld [vmem:[#allocation43_spill] sm:$0xff] }
 0x57a   :  { %v3677_v25 = vpop.f32.mrf.mxu3 }
 0x57b   :  { %12723 = vst [vmem:[#allocation138_spill] sm:$0xff] %v10494_v15  ;;  %v3678_v44 = vadd.f32 %v3677_v25, %v10292_v52 }
 0x57c   :  { %v3944_v37 = vpop.f32.mrf.mxu2  ;;  %v3768_v57 = vpop.f32.mrf.mxu0 }
 0x57d   :  { %v10497_v12 = vadd.f32 %v3944_v37, %v3856_v9  ;;  %v3767_v30 = vadd.f32 %v3766_v29, %v3678_v44  ;;  %v3857_v63 = vpop.f32.mrf.mxu1  ;;  %v12725_v9 = vld [vmem:[#allocation102_spill] sm:$0xff] }
 0x57e   :  { %v3858_v43 = vadd.f32 %v3857_v63, %v10471_v10 }
 0x57f   :  { %v4474_v52 = vmax.f32 %v3767_v30, 0.0 }
 0x582   :  { %v3679_v41 = vpop.f32.mrf.mxu3 }
 0x583   :  { %v3680_v16 = vadd.f32 %v3679_v41, %v10300_v8  ;;  %v8235_v8 = vld [vmem:[#allocation2 + $0x22c] sm:$0xf]  ;;  %v7138_v41 = vld [vmem:[#allocation2 + $0x238] sm:$0xf0] }
 0x584   :  { %v3946_v14 = vpop.f32.mrf.mxu2  ;;  %v3771_v47 = vpop.f32.mrf.mxu0  ;;  %v7141_v63 = vor.u32 %v8235_v8, %v7138_v41 }
 0x585   :  { %v10501_v42 = vadd.f32 %v3946_v14, %v3858_v43  ;;  %v3769_v36 = vadd.f32 %v3768_v57, %v3680_v16  ;;  %v3860_v26 = vpop.f32.mrf.mxu1 }
 0x586   :  { %v3861_v29 = vadd.f32 %v3860_v26, %v10471_v10  ;;  %4025 = vmatpush.bf16.msra.mxu3 %v7141_v63  ;;  %v12731_v63 = vld [vmem:[#allocation47_spill] sm:$0xff] }
 0x587   :  { %v4478_v25 = vmax.f32 %v3769_v36, 0.0  ;;  %3721 = vmatmul.bf16.gmra.mxu3 %v12724_v23  ;;  %7680 = vmatmul.msk.bf16.gmra.mxu0 %vm1923_vm0, %v12725_v9 }
 0x588   :  { %3899 = vmatmul.bf16.gmra.mxu1 %v12726_v38 }
 0x589   :  { %3988 = vmatmul.bf16.gmra.mxu2 %v12665_v18  ;;  %v10509_v44 = vpack.c.bf16 %v4478_v25, %v4474_v52 }
 0x58a   :  { %v3682_v37 = vpop.f32.mrf.mxu3 }
 0x58b   :  { %12727 = vst [vmem:[#allocation139_spill] sm:$0xff] %v10509_v44  ;;  %v3683_v57 = vadd.f32 %v3682_v37, %v10304_v34  ;;  %v12729_v37 = vld [vmem:[#allocation106_spill] sm:$0xff] }
 0x58c   :  { %v3949_v30 = vpop.f32.mrf.mxu2  ;;  %v3773_v16 = vpop.f32.mrf.mxu0 }
 0x58d   :  { %v10512_v43 = vadd.f32 %v3949_v30, %v3861_v29  ;;  %v3772_v14 = vadd.f32 %v3771_v47, %v3683_v57  ;;  %v3862_v36 = vpop.f32.mrf.mxu1  ;;  %v12730_v29 = vld [vmem:[#allocation107_spill] sm:$0xff]  ;;  %v7330_v57 = vld [vmem:[#allocation2 + $0x3b8] sm:$0xf0] }
 0x58e   :  { %v3863_v26 = vadd.f32 %v3862_v36, %v10471_v10  ;;  %v7458_v36 = vld [vmem:[#allocation2 + $0x4b8] sm:$0xf0] }
 0x58f   :  { %v4482_v41 = vmax.f32 %v3772_v14, 0.0 }
 0x592   :  { %v3684_v38 = vpop.f32.mrf.mxu3 }
 0x593   :  { %v3685_v18 = vadd.f32 %v3684_v38, %v10312_v51  ;;  %v8283_v51 = vld [vmem:[#allocation2 + $0x3ac] sm:$0xf]  ;;  %v12733_v38 = vld [vmem:[#allocation137_spill] sm:$0xff] }
 0x594   :  { %v3951_v9 = vpop.f32.mrf.mxu2  ;;  %v3776_v52 = vpop.f32.mrf.mxu0  ;;  %v7333_v30 = vor.u32 %v8283_v51, %v7330_v57 }
 0x595   :  { %v10516_v15 = vadd.f32 %v3951_v9, %v3863_v26  ;;  %v3774_v25 = vadd.f32 %v3773_v16, %v3685_v18  ;;  %v3865_v8 = vpop.f32.mrf.mxu1  ;;  %v8315_v9 = vld [vmem:[#allocation2 + $0x4ac] sm:$0xf] }
 0x596   :  { %v3866_v47 = vadd.f32 %v3865_v8, %v10471_v10  ;;  %v7461_v26 = vor.u32 %v8315_v9, %v7458_v36  ;;  %4110 = vmatpush.bf16.msra.mxu0 %v7333_v30 }
 0x597   :  { %12728 = vst [vmem:[#allocation41_spill] sm:$0xff] %v10516_v15  ;;  %v4486_v34 = vmax.f32 %v3774_v25, 0.0  ;;  %3726 = vmatmul.bf16.gmra.mxu3 %v12729_v37  ;;  %7681 = vmatmul.msk.bf16.gmra.mxu0 %vm1923_vm0, %v12730_v29  ;;  %v12735_v15 = vld [vmem:[#allocation29_spill] sm:$0xff] }
 0x598   :  { %3904 = vmatmul.bf16.gmra.mxu1 %v12731_v63 }
 0x599   :  { %3993 = vmatmul.bf16.gmra.mxu2 %v12668_v0  ;;  %v10524_v16 = vpack.c.bf16 %v4486_v34, %v4482_v41  ;;  %4199 = vmatpush.bf16.msra.mxu1 %v7461_v26  ;;  %v12738_v26 = vld [vmem:[#allocation112_spill] sm:$0xff] }
 0x59a   :  { %v3687_v14 = vpop.f32.mrf.mxu3 }
 0x59b   :  { %12732 = vst [vmem:[#allocation45_spill] sm:$0xff] %v10524_v16  ;;  %v3688_v18 = vadd.f32 %v3687_v14, %v12733_v38  ;;  %v8355_v14 = vld [vmem:[#allocation2 + $0x5ec] sm:$0xf]  ;;  %v7618_v38 = vld [vmem:[#allocation2 + $0x5f8] sm:$0xf0] }
 0x59c   :  { %v3954_v25 = vpop.f32.mrf.mxu2  ;;  %v3778_v8 = vpop.f32.mrf.mxu0 }
 0x59d   :  { %v10527_v29 = vadd.f32 %v3954_v25, %v3866_v47  ;;  %v3777_v63 = vadd.f32 %v3776_v52, %v3688_v18  ;;  %v3867_v44 = vpop.f32.mrf.mxu1  ;;  %v12737_v25 = vld [vmem:[#allocation111_spill] sm:$0xff]  ;;  %v7621_v52 = vor.u32 %v8355_v14, %v7618_v38  ;;  %v12739_v18 = vld [vmem:[#allocation6_spill] sm:$0xff] }
 0x59e   :  { %v3868_v0 = vadd.f32 %v3867_v44, %v10471_v10 }
 0x59f   :  { %12734 = vst [vmem:[#allocation49_spill] sm:$0xff] %v10527_v29  ;;  %v4490_v30 = vmax.f32 %v3777_v63, 0.0  ;;  %4286 = vmatpush.bf16.msra.mxu2 %v7621_v52  ;;  %v8279_v52 = vld [vmem:[#allocation2 + $0x38c] sm:$0xf] }
 0x5a2   :  { %v3689_v37 = vpop.f32.mrf.mxu3 }
 0x5a3   :  { %v3690_v51 = vadd.f32 %v3689_v37, %v12735_v15  ;;  %v12740_v15 = vld [vmem:[#allocation20_spill] sm:$0xff]  ;;  %v8231_v37 = vld [vmem:[#allocation2 + $0x20c] sm:$0xf] }
 0x5a4   :  { %v3956_v57 = vpop.f32.mrf.mxu2  ;;  %v3781_v34 = vpop.f32.mrf.mxu0 }
 0x5a5   :  { %v10531_v41 = vadd.f32 %v3956_v57, %v3868_v0  ;;  %v3779_v9 = vadd.f32 %v3778_v8, %v3690_v51  ;;  %v3870_v36 = vpop.f32.mrf.mxu1  ;;  %v7122_v0 = vld [vmem:[#allocation2 + $0x218] sm:$0xf0]  ;;  %v8351_v57 = vld [vmem:[#allocation2 + $0x5cc] sm:$0xf] }
 0x5a6   :  { %v3871_v44 = vadd.f32 %v3870_v36, %v10471_v10  ;;  %v7125_v8 = vor.u32 %v8231_v37, %v7122_v0  ;;  %v7314_v0 = vld [vmem:[#allocation2 + $0x398] sm:$0xf0] }
 0x5a7   :  { %12736 = vst [vmem:[#allocation143_spill] sm:$0xff] %v10531_v41  ;;  %v4494_v47 = vmax.f32 %v3779_v9, 0.0  ;;  %3731 = vmatmul.bf16.gmra.mxu3 %v12737_v25  ;;  %7682 = vmatmul.msk.bf16.gmra.mxu0 %vm1923_vm0, %v12738_v26  ;;  %v7602_v9 = vld [vmem:[#allocation2 + $0x5d8] sm:$0xf0] }
 0x5a8   :  { %3909 = vmatmul.bf16.gmra.mxu1 %v12739_v18  ;;  %4026 = vmatpush.bf16.msra.mxu3 %v7125_v8  ;;  %v7605_v14 = vor.u32 %v8351_v57, %v7602_v9  ;;  %v7586_v41 = vld [vmem:[#allocation2 + $0x5b8] sm:$0xf0] }
 0x5a9   :  { %3998 = vmatmul.bf16.gmra.mxu2 %v12740_v15  ;;  %v10539_v51 = vpack.c.bf16 %v4494_v47, %v4490_v30  ;;  %v8347_v15 = vld [vmem:[#allocation2 + $0x5ac] sm:$0xf]  ;;  %v7570_v57 = vld [vmem:[#allocation2 + $0x598] sm:$0xf0] }
 0x5aa   :  { %v3692_v63 = vpop.f32.mrf.mxu3  ;;  %4287 = vmatpush.bf16.msra.mxu2 %v7605_v14  ;;  %v7589_v37 = vor.u32 %v8347_v15, %v7586_v41 }
 0x5ab   :  { %12741 = vst [vmem:[#allocation145_spill] sm:$0xff] %v10539_v51  ;;  %v3693_v16 = vadd.f32 %v3692_v63, %v10328_v24  ;;  %v8311_v51 = vld [vmem:[#allocation2 + $0x48c] sm:$0xf]  ;;  %v7317_v63 = vor.u32 %v8279_v52, %v7314_v0  ;;  %v12744_v52 = vld [vmem:[#allocation117_spill] sm:$0xff]  ;;  %v7426_v0 = vld [vmem:[#allocation2 + $0x478] sm:$0xf0] }
 0x5ac   :  { %v3959_v25 = vpop.f32.mrf.mxu2  ;;  %v3783_v36 = vpop.f32.mrf.mxu0 }
 0x5ad   :  { %v10542_v38 = vadd.f32 %v3959_v25, %v3871_v44  ;;  %v3782_v18 = vadd.f32 %v3781_v34, %v3693_v16  ;;  %v3872_v26 = vpop.f32.mrf.mxu1  ;;  %v7442_v25 = vld [vmem:[#allocation2 + $0x498] sm:$0xf0]  ;;  %v8343_v44 = vld [vmem:[#allocation2 + $0x58c] sm:$0xf]  ;;  %4111 = vmatpush.bf16.msra.mxu0 %v7317_v63 }
 0x5ae   :  { %v3873_v30 = vadd.f32 %v3872_v26, %v10471_v10  ;;  %4288 = vmatpush.bf16.msra.mxu2 %v7589_v37  ;;  %v7445_v9 = vor.u32 %v8311_v51, %v7442_v25  ;;  %v7573_v14 = vor.u32 %v8343_v44, %v7570_v57  ;;  %v8275_v26 = vld [vmem:[#allocation2 + $0x36c] sm:$0xf]  ;;  %v7298_v37 = vld [vmem:[#allocation2 + $0x378] sm:$0xf0] }
 0x5af   :  { %12742 = vst [vmem:[#allocation28_spill] sm:$0xff] %v10542_v38  ;;  %v8307_v38 = vld [vmem:[#allocation2 + $0x46c] sm:$0xf]  ;;  %v4498_v29 = vmax.f32 %v3782_v18, 0.0  ;;  %v7554_v25 = vld [vmem:[#allocation2 + $0x578] sm:$0xf0] }
 0x5b0   :  { %4200 = vmatpush.bf16.msra.mxu1 %v7445_v9  ;;  %v7429_v63 = vor.u32 %v8307_v38, %v7426_v0  ;;  %v8271_v9 = vld [vmem:[#allocation2 + $0x34c] sm:$0xf] }
 0x5b2   :  { %v3694_v47 = vpop.f32.mrf.mxu3  ;;  %4289 = vmatpush.bf16.msra.mxu2 %v7573_v14  ;;  %v7282_v14 = vld [vmem:[#allocation2 + $0x358] sm:$0xf0] }
 0x5b3   :  { %v3695_v24 = vadd.f32 %v3694_v47, %v10336_v50  ;;  %v12743_v47 = vld [vmem:[#allocation116_spill] sm:$0xff] }
 0x5b4   :  { %v3961_v8 = vpop.f32.mrf.mxu2  ;;  %v3786_v34 = vpop.f32.mrf.mxu0  ;;  %4201 = vmatpush.bf16.msra.mxu1 %v7429_v63  ;;  %v7266_v63 = vld [vmem:[#allocation2 + $0x338] sm:$0xf0] }
 0x5b5   :  { %v10546_v16 = vadd.f32 %v3961_v8, %v3873_v30  ;;  %v3784_v41 = vadd.f32 %v3783_v36, %v3695_v24  ;;  %v3875_v15 = vpop.f32.mrf.mxu1  ;;  %v7301_v30 = vor.u32 %v8275_v26, %v7298_v37  ;;  %v8339_v8 = vld [vmem:[#allocation2 + $0x56c] sm:$0xf]  ;;  %v12745_v36 = vld [vmem:[#allocation9_spill] sm:$0xff]  ;;  %v12746_v24 = vld [vmem:[#allocation24_spill] sm:$0xff] }
 0x5b6   :  { %v3876_v51 = vadd.f32 %v3875_v15, %v10471_v10  ;;  %v7557_v44 = vor.u32 %v8339_v8, %v7554_v25  ;;  %v7285_v15 = vor.u32 %v8271_v9, %v7282_v14  ;;  %v8267_v8 = vld [vmem:[#allocation2 + $0x32c] sm:$0xf] }
 0x5b7   :  { %v4502_v50 = vmax.f32 %v3784_v41, 0.0  ;;  %3736 = vmatmul.bf16.gmra.mxu3 %v12743_v47  ;;  %7683 = vmatmul.msk.bf16.gmra.mxu0 %vm1923_vm0, %v12744_v52  ;;  %v8303_v41 = vld [vmem:[#allocation2 + $0x44c] sm:$0xf]  ;;  %v7410_v52 = vld [vmem:[#allocation2 + $0x458] sm:$0xf0] }
 0x5b8   :  { %3914 = vmatmul.bf16.gmra.mxu1 %v12745_v36  ;;  %4112 = vmatpush.bf16.msra.mxu0 %v7301_v30  ;;  %v8335_v36 = vld [vmem:[#allocation2 + $0x54c] sm:$0xf]  ;;  %v7538_v47 = vld [vmem:[#allocation2 + $0x558] sm:$0xf0]  ;;  %v7413_v30 = vor.u32 %v8303_v41, %v7410_v52 }
 0x5b9   :  { %4003 = vmatmul.bf16.gmra.mxu2 %v12746_v24  ;;  %v10554_v18 = vpack.c.bf16 %v4502_v50, %v4498_v29  ;;  %v7541_v0 = vor.u32 %v8335_v36, %v7538_v47  ;;  %v8299_v25 = vld [vmem:[#allocation2 + $0x42c] sm:$0xf]  ;;  %v7378_v36 = vld [vmem:[#allocation2 + $0x418] sm:$0xf0] }
 0x5ba   :  { %v3697_v57 = vpop.f32.mrf.mxu3  ;;  %4290 = vmatpush.bf16.msra.mxu2 %v7557_v44  ;;  %4202 = vmatpush.bf16.msra.mxu1 %v7413_v30  ;;  %v8331_v44 = vld [vmem:[#allocation2 + $0x52c] sm:$0xf] }
 0x5bb   :  { %12747 = vst [vmem:[#allocation32_spill] sm:$0xff] %v10554_v18  ;;  %v3698_v26 = vadd.f32 %v3697_v57, %v10340_v56  ;;  %v7269_v56 = vor.u32 %v8267_v8, %v7266_v63  ;;  %v7394_v57 = vld [vmem:[#allocation2 + $0x438] sm:$0xf0]  ;;  %v8263_v47 = vld [vmem:[#allocation2 + $0x30c] sm:$0xf] }
 0x5bc   :  { %v3964_v37 = vpop.f32.mrf.mxu2  ;;  %v3788_v38 = vpop.f32.mrf.mxu0  ;;  %4113 = vmatpush.bf16.msra.mxu0 %v7285_v15  ;;  %v7397_v14 = vor.u32 %v8299_v25, %v7394_v57  ;;  %v7522_v18 = vld [vmem:[#allocation2 + $0x538] sm:$0xf0]  ;;  %v8295_v52 = vld [vmem:[#allocation2 + $0x40c] sm:$0xf] }
 0x5bd   :  { %v10557_v24 = vadd.f32 %v3964_v37, %v3876_v51  ;;  %v3787_v29 = vadd.f32 %v3786_v34, %v3698_v26  ;;  %v3877_v50 = vpop.f32.mrf.mxu1  ;;  %v7525_v51 = vor.u32 %v8331_v44, %v7522_v18  ;;  %v7250_v34 = vld [vmem:[#allocation2 + $0x318] sm:$0xf0]  ;;  %v8327_v30 = vld [vmem:[#allocation2 + $0x50c] sm:$0xf]  ;;  %v7381_v63 = vor.u32 %v8295_v52, %v7378_v36 }
 0x5be   :  { %4291 = vmatpush.bf16.msra.mxu2 %v7541_v0  ;;  %v3878_v9 = vadd.f32 %v3877_v50, %v10471_v10  ;;  %4203 = vmatpush.bf16.msra.mxu1 %v7397_v14  ;;  %v7253_v15 = vor.u32 %v8263_v47, %v7250_v34  ;;  %v7506_v0 = vld [vmem:[#allocation2 + $0x518] sm:$0xf0]  ;;  %v12748_v14 = vld [vmem:[#allocation121_spill] sm:$0xff] }
 0x5bf   :  { %v7509_v18 = vor.u32 %v8327_v30, %v7506_v0  ;;  %v4506_v57 = vmax.f32 %v3787_v29, 0.0  ;;  %v7634_v47 = vld [vmem:[#allocation2 + $0x618] sm:$0xf0] }
 0x5c0   :  { %4114 = vmatpush.bf16.msra.mxu0 %v7269_v56 }
 0x5c2   :  { %v3699_v37 = vpop.f32.mrf.mxu3  ;;  %4292 = vmatpush.bf16.msra.mxu2 %v7525_v51  ;;  %4204 = vmatpush.bf16.msra.mxu1 %v7381_v63 }
 0x5c3   :  { %v3700_v41 = vadd.f32 %v3699_v37, %v10348_v39  ;;  %v12749_v39 = vld [vmem:[#allocation122_spill] sm:$0xff]  ;;  %v12750_v37 = vld [vmem:[#allocation12_spill] sm:$0xff] }
 0x5c4   :  { %v3966_v26 = vpop.f32.mrf.mxu2  ;;  %v3791_v50 = vpop.f32.mrf.mxu0  ;;  %4115 = vmatpush.bf16.msra.mxu0 %v7253_v15 }
 0x5c5   :  { %v10561_v8 = vadd.f32 %v3966_v26, %v3878_v9  ;;  %v3789_v25 = vadd.f32 %v3788_v38, %v3700_v41  ;;  %v3880_v56 = vpop.f32.mrf.mxu1  ;;  %v8359_v9 = vld [vmem:[#allocation2 + $0x60c] sm:$0xf] }
 0x5c6   :  { %v3881_v51 = vadd.f32 %v3880_v56, %v10471_v10  ;;  %4293 = vmatpush.bf16.msra.mxu2 %v7509_v18  ;;  %v7637_v38 = vor.u32 %v8359_v9, %v7634_v47  ;;  %v12751_v9 = vld [vmem:[#allocation126_spill] sm:$0xff]  ;;  %v12753_v47 = vld [vmem:[#allocation16_spill] sm:$0xff] }
 0x5c7   :  { %v4510_v44 = vmax.f32 %v3789_v25, 0.0  ;;  %3741 = vmatmul.bf16.gmra.mxu3 %v12748_v14  ;;  %7684 = vmatmul.msk.bf16.gmra.mxu0 %vm1923_vm0, %v12749_v39 }
 0x5c8   :  { %3919 = vmatmul.bf16.gmra.mxu1 %v12750_v37  ;;  %4382 = vmatpush.bf16.msrb.mxu3 %v7637_v38 }
 0x5c9   :  { %4008 = vmatmul.bf16.gmra.mxu2 %v12683_v48  ;;  %v10569_v34 = vpack.c.bf16 %v4510_v44, %v4506_v57 }
 0x5ca   :  { %v3702_v52 = vpop.f32.mrf.mxu3 }
 0x5cb   :  { %v3703_v29 = vadd.f32 %v3702_v52, %v10352_v45 }
 0x5cc   :  { %v3969_v41 = vpop.f32.mrf.mxu2  ;;  %v3793_v15 = vpop.f32.mrf.mxu0 }
 0x5cd   :  { %v10572_v26 = vadd.f32 %v3969_v41, %v3881_v51  ;;  %v3792_v36 = vadd.f32 %v3791_v50, %v3703_v29  ;;  %v3882_v30 = vpop.f32.mrf.mxu1  ;;  %v12752_v51 = vld [vmem:[#allocation127_spill] sm:$0xff] }
 0x5ce   :  { %v3883_v0 = vadd.f32 %v3882_v30, %v10471_v10 }
 0x5cf   :  { %v4514_v37 = vmax.f32 %v3792_v36, 0.0 }
 0x5d2   :  { %v3704_v63 = vpop.f32.mrf.mxu3 }
 0x5d3   :  { %v3705_v48 = vadd.f32 %v3704_v63, %v10360_v58 }
 0x5d4   :  { %v3971_v25 = vpop.f32.mrf.mxu2  ;;  %v3796_v18 = vpop.f32.mrf.mxu0 }
 0x5d5   :  { %v10576_v56 = vadd.f32 %v3971_v25, %v3883_v0  ;;  %v3794_v57 = vadd.f32 %v3793_v15, %v3705_v48  ;;  %v3885_v44 = vpop.f32.mrf.mxu1 }
 0x5d6   :  { %v3886_v50 = vadd.f32 %v3885_v44, %v10471_v10 }
 0x5d7   :  { %v4518_v45 = vmax.f32 %v3794_v57, 0.0  ;;  %3746 = vmatmul.bf16.gmra.mxu3 %v12751_v9  ;;  %7685 = vmatmul.msk.bf16.gmra.mxu0 %vm1923_vm0, %v12752_v51 }
 0x5d8   :  { %3924 = vmatmul.bf16.gmra.mxu1 %v12753_v47 }
 0x5d9   :  { %4013 = vmatmul.bf16.gmra.mxu2 %v12686_v21  ;;  %v10584_v58 = vpack.c.bf16 %v4518_v45, %v4514_v37 }
 0x5da   :  { %v3707_v38 = vpop.f32.mrf.mxu3 }
 0x5db   :  { %12754 = vst [vmem:[#allocation53_spill] sm:$0xff] %v10584_v58  ;;  %v3708_v52 = vadd.f32 %v3707_v38, %v10364_v35  ;;  %v12755_v35 = vld [vmem:[#allocation7_spill] sm:$0xff]  ;;  %v12757_v38 = vld [vmem:[#allocation52_spill] sm:$0xff] }
 0x5dc   :  { %v3974_v29 = vpop.f32.mrf.mxu2  ;;  %v3798_v15 = vpop.f32.mrf.mxu0 }
 0x5dd   :  { %v10587_v41 = vadd.f32 %v3974_v29, %v3886_v50  ;;  %v3797_v36 = vadd.f32 %v3796_v18, %v3708_v52  ;;  %v3887_v30 = vpop.f32.mrf.mxu1  ;;  %v12756_v50 = vld [vmem:[#allocation51_spill] sm:$0xff] }
 0x5de   :  { %v3888_v0 = vadd.f32 %v3887_v30, %v10471_v10 }
 0x5df   :  { %v4522_v45 = vmax.f32 %v3797_v36, 0.0 }
 0x5e2   :  { %v3709_v63 = vpop.f32.mrf.mxu3 }
 0x5e3   :  { %v3710_v48 = vadd.f32 %v3709_v63, %v10373_v28 }
 0x5e4   :  { %v3976_v25 = vpop.f32.mrf.mxu2  ;;  %v3801_v21 = vpop.f32.mrf.mxu0 }
 0x5e5   :  { %v10591_v57 = vadd.f32 %v3976_v25, %v3888_v0  ;;  %v3799_v44 = vadd.f32 %v3798_v15, %v3710_v48  ;;  %v3890_v37 = vpop.f32.mrf.mxu1 }
 0x5e6   :  { %v3891_v18 = vadd.f32 %v3890_v37, %v10471_v10 }
 0x5e7   :  { %v4526_v47 = vmax.f32 %v3799_v44, 0.0  ;;  %4027 = vmatmul.bf16.vlgmr.msra.gmra.mxu3 %v12755_v35  ;;  %4116 = vmatmul.bf16.vlgmr.msra.gmra.mxu0 %v12756_v50 }
 0x5e8   :  { %4205 = vmatmul.bf16.vlgmr.msra.gmra.mxu1 %v12757_v38 }
 0x5e9   :  { %4294 = vmatmul.bf16.vlgmr.msra.gmra.mxu2 %v12689_v27  ;;  %v10598_v52 = vpack.c.bf16 %v4526_v47, %v4522_v45 }
 0x5ea   :  { %v3712_v28 = vpop.f32.mrf.mxu3 }
 0x5eb   :  { %v3713_v29 = vadd.f32 %v3712_v28, %v10377_v32  ;;  %v12758_v32 = vld [vmem:[#allocation10_spill] sm:$0xff]  ;;  %v12760_v28 = vld [vmem:[#allocation56_spill] sm:$0xff] }
 0x5ec   :  { %v3979_v30 = vpop.f32.mrf.mxu2  ;;  %v3803_v36 = vpop.f32.mrf.mxu0 }
 0x5ed   :  { %v10601_v15 = vadd.f32 %v3979_v30, %v3891_v18  ;;  %v3802_v0 = vadd.f32 %v3801_v21, %v3713_v29  ;;  %v3892_v63 = vpop.f32.mrf.mxu1  ;;  %v12759_v18 = vld [vmem:[#allocation55_spill] sm:$0xff] }
 0x5ee   :  { %v3893_v48 = vadd.f32 %v3892_v63, %v10471_v10 }
 0x5ef   :  { %v4530_v50 = vmax.f32 %v3802_v0, 0.0 }
 0x5f2   :  { %v3714_v25 = vpop.f32.mrf.mxu3 }
 0x5f3   :  { %v3715_v44 = vadd.f32 %v3714_v25, %v10386_v2 }
 0x5f4   :  { %v3981_v37 = vpop.f32.mrf.mxu2  ;;  %v3806_v27 = vpop.f32.mrf.mxu0 }
 0x5f5   :  { %v10605_v35 = vadd.f32 %v3981_v37, %v3893_v48  ;;  %v3804_v45 = vadd.f32 %v3803_v36, %v3715_v44  ;;  %v3895_v47 = vpop.f32.mrf.mxu1 }
 0x5f6   :  { %v3896_v21 = vadd.f32 %v3895_v47, %v10471_v10 }
 0x5f7   :  { %v4534_v38 = vmax.f32 %v3804_v45, 0.0  ;;  %4032 = vmatmul.bf16.gmra.mxu3 %v12758_v32  ;;  %4121 = vmatmul.bf16.gmra.mxu0 %v12759_v18 }
 0x5f8   :  { %4210 = vmatmul.bf16.gmra.mxu1 %v12760_v28 }
 0x5f9   :  { %4299 = vmatmul.bf16.gmra.mxu2 %v12692_v13  ;;  %v10612_v29 = vpack.c.bf16 %v4534_v38, %v4530_v50 }
 0x5fa   :  { %v3717_v2 = vpop.f32.mrf.mxu3 }
 0x5fb   :  { %12761 = vst [vmem:[#allocation5_spill] sm:$0xff] %v10612_v29  ;;  %v3718_v30 = vadd.f32 %v3717_v2, %v10390_v61  ;;  %v12762_v61 = vld [vmem:[#allocation14_spill] sm:$0xff]  ;;  %v12764_v2 = vld [vmem:[#allocation60_spill] sm:$0xff] }
 0x5fc   :  { %v3984_v63 = vpop.f32.mrf.mxu2  ;;  %v3808_v0 = vpop.f32.mrf.mxu0 }
 0x5fd   :  { %v10615_v36 = vadd.f32 %v3984_v63, %v3896_v21  ;;  %v3807_v48 = vadd.f32 %v3806_v27, %v3718_v30  ;;  %v3897_v25 = vpop.f32.mrf.mxu1  ;;  %v12763_v21 = vld [vmem:[#allocation59_spill] sm:$0xff] }
 0x5fe   :  { %v3898_v44 = vadd.f32 %v3897_v25, %v10471_v10 }
 0x5ff   :  { %v4538_v18 = vmax.f32 %v3807_v48, 0.0 }
 0x602   :  { %v3719_v37 = vpop.f32.mrf.mxu3 }
 0x603   :  { %v3720_v45 = vadd.f32 %v3719_v37, %v10399_v5 }
 0x604   :  { %v3986_v47 = vpop.f32.mrf.mxu2  ;;  %v3811_v13 = vpop.f32.mrf.mxu0 }
 0x605   :  { %v10619_v32 = vadd.f32 %v3986_v47, %v3898_v44  ;;  %v3809_v50 = vadd.f32 %v3808_v0, %v3720_v45  ;;  %v3900_v38 = vpop.f32.mrf.mxu1 }
 0x606   :  { %v3901_v27 = vadd.f32 %v3900_v38, %v10471_v10 }
 0x607   :  { %v4542_v28 = vmax.f32 %v3809_v50, 0.0  ;;  %4037 = vmatmul.bf16.gmra.mxu3 %v12762_v61  ;;  %4126 = vmatmul.bf16.gmra.mxu0 %v12763_v21 }
 0x608   :  { %4215 = vmatmul.bf16.gmra.mxu1 %v12764_v2 }
 0x609   :  { %4304 = vmatmul.bf16.gmra.mxu2 %v12695_v7  ;;  %v10626_v30 = vpack.c.bf16 %v4542_v28, %v4538_v18 }
 0x60a   :  { %v3722_v5 = vpop.f32.mrf.mxu3 }
 0x60b   :  { %12765 = vst [vmem:[#allocation57_spill] sm:$0xff] %v10626_v30  ;;  %v3723_v63 = vadd.f32 %v3722_v5, %v10403_v19  ;;  %v12766_v19 = vld [vmem:[#allocation18_spill] sm:$0xff]  ;;  %v12768_v5 = vld [vmem:[#allocation64_spill] sm:$0xff] }
 0x60c   :  { %v3989_v25 = vpop.f32.mrf.mxu2  ;;  %v3813_v48 = vpop.f32.mrf.mxu0 }
 0x60d   :  { %v10629_v0 = vadd.f32 %v3989_v25, %v3901_v27  ;;  %v3812_v44 = vadd.f32 %v3811_v13, %v3723_v63  ;;  %v3902_v37 = vpop.f32.mrf.mxu1  ;;  %v12767_v27 = vld [vmem:[#allocation63_spill] sm:$0xff] }
 0x60e   :  { %v3903_v45 = vadd.f32 %v3902_v37, %v10471_v10 }
 0x60f   :  { %v4546_v21 = vmax.f32 %v3812_v44, 0.0 }
 0x612   :  { %v3724_v47 = vpop.f32.mrf.mxu3 }
 0x613   :  { %v3725_v50 = vadd.f32 %v3724_v47, %v10412_v31 }
 0x614   :  { %v3991_v38 = vpop.f32.mrf.mxu2  ;;  %v3816_v7 = vpop.f32.mrf.mxu0 }
 0x615   :  { %v10633_v61 = vadd.f32 %v3991_v38, %v3903_v45  ;;  %v3814_v18 = vadd.f32 %v3813_v48, %v3725_v50  ;;  %v3905_v28 = vpop.f32.mrf.mxu1 }
 0x616   :  { %v3906_v13 = vadd.f32 %v3905_v28, %v10471_v10 }
 0x617   :  { %v4550_v2 = vmax.f32 %v3814_v18, 0.0  ;;  %4042 = vmatmul.bf16.gmra.mxu3 %v12766_v19  ;;  %4131 = vmatmul.bf16.gmra.mxu0 %v12767_v27 }
 0x618   :  { %4220 = vmatmul.bf16.gmra.mxu1 %v12768_v5 }
 0x619   :  { %4309 = vmatmul.bf16.gmra.mxu2 %v12698_v1  ;;  %v10640_v63 = vpack.c.bf16 %v4550_v2, %v4546_v21 }
 0x61a   :  { %v3727_v31 = vpop.f32.mrf.mxu3 }
 0x61b   :  { %12769 = vst [vmem:[#allocation8_spill] sm:$0xff] %v10640_v63  ;;  %v3728_v25 = vadd.f32 %v3727_v31, %v10416_v46  ;;  %v12770_v46 = vld [vmem:[#allocation22_spill] sm:$0xff]  ;;  %v12772_v31 = vld [vmem:[#allocation68_spill] sm:$0xff] }
 0x61c   :  { %v3994_v37 = vpop.f32.mrf.mxu2  ;;  %v3818_v44 = vpop.f32.mrf.mxu0 }
 0x61d   :  { %v10643_v48 = vadd.f32 %v3994_v37, %v3906_v13  ;;  %v3817_v45 = vadd.f32 %v3816_v7, %v3728_v25  ;;  %v3907_v47 = vpop.f32.mrf.mxu1  ;;  %v12771_v13 = vld [vmem:[#allocation67_spill] sm:$0xff] }
 0x61e   :  { %v3908_v50 = vadd.f32 %v3907_v47, %v10471_v10 }
 0x61f   :  { %v4554_v27 = vmax.f32 %v3817_v45, 0.0 }
 0x622   :  { %v3729_v38 = vpop.f32.mrf.mxu3 }
 0x623   :  { %v3730_v18 = vadd.f32 %v3729_v38, %v10425_v49 }
 0x624   :  { %v3996_v28 = vpop.f32.mrf.mxu2  ;;  %v3821_v1 = vpop.f32.mrf.mxu0 }
 0x625   :  { %v10647_v19 = vadd.f32 %v3996_v28, %v3908_v50  ;;  %v3819_v21 = vadd.f32 %v3818_v44, %v3730_v18  ;;  %v3910_v2 = vpop.f32.mrf.mxu1 }
 0x626   :  { %v3911_v7 = vadd.f32 %v3910_v2, %v10471_v10 }
 0x627   :  { %v4558_v5 = vmax.f32 %v3819_v21, 0.0  ;;  %4047 = vmatmul.bf16.gmra.mxu3 %v12770_v46  ;;  %4136 = vmatmul.bf16.gmra.mxu0 %v12771_v13 }
 0x628   :  { %4225 = vmatmul.bf16.gmra.mxu1 %v12772_v31 }
 0x629   :  { %4314 = vmatmul.bf16.gmra.mxu2 %v12701_v55  ;;  %v10654_v25 = vpack.c.bf16 %v4558_v5, %v4554_v27 }
 0x62a   :  { %v3732_v49 = vpop.f32.mrf.mxu3 }
 0x62b   :  { %12773 = vst [vmem:[#allocation61_spill] sm:$0xff] %v10654_v25  ;;  %v3733_v37 = vadd.f32 %v3732_v49, %v10429_v33  ;;  %v12774_v33 = vld [vmem:[#allocation26_spill] sm:$0xff] }
 0x62c   :  { %v3999_v47 = vpop.f32.mrf.mxu2  ;;  %v3823_v45 = vpop.f32.mrf.mxu0  ;;  %v12776_v49 = vld [vmem:[#allocation74_spill] sm:$0xff] }
 0x62d   :  { %v10657_v44 = vadd.f32 %v3999_v47, %v3911_v7  ;;  %v3822_v50 = vadd.f32 %v3821_v1, %v3733_v37  ;;  %v3912_v38 = vpop.f32.mrf.mxu1  ;;  %v12775_v7 = vld [vmem:[#allocation73_spill] sm:$0xff] }
 0x62e   :  { %v3913_v18 = vadd.f32 %v3912_v38, %v10471_v10 }
 0x62f   :  { %v4562_v13 = vmax.f32 %v3822_v50, 0.0 }
 0x632   :  { %v3734_v28 = vpop.f32.mrf.mxu3 }
 0x633   :  { %v3735_v21 = vadd.f32 %v3734_v28, %v10438_v54 }
 0x634   :  { %v4001_v2 = vpop.f32.mrf.mxu2  ;;  %v3826_v55 = vpop.f32.mrf.mxu0 }
 0x635   :  { %v10661_v46 = vadd.f32 %v4001_v2, %v3913_v18  ;;  %v3824_v27 = vadd.f32 %v3823_v45, %v3735_v21  ;;  %v3915_v5 = vpop.f32.mrf.mxu1 }
 0x636   :  { %v3916_v1 = vadd.f32 %v3915_v5, %v10471_v10 }
 0x637   :  { %v4566_v31 = vmax.f32 %v3824_v27, 0.0  ;;  %4052 = vmatmul.bf16.gmra.mxu3 %v12774_v33  ;;  %4141 = vmatmul.bf16.gmra.mxu0 %v12775_v7 }
 0x638   :  { %4230 = vmatmul.bf16.gmra.mxu1 %v12776_v49 }
 0x639   :  { %4319 = vmatmul.bf16.gmra.mxu2 %v12704_v17  ;;  %v10668_v37 = vpack.c.bf16 %v4566_v31, %v4562_v13 }
 0x63a   :  { %v3737_v54 = vpop.f32.mrf.mxu3 }
 0x63b   :  { %12777 = vst [vmem:[#allocation11_spill] sm:$0xff] %v10668_v37  ;;  %v3738_v47 = vadd.f32 %v3737_v54, %v10442_v20  ;;  %v12778_v20 = vld [vmem:[#allocation30_spill] sm:$0xff]  ;;  %v12780_v54 = vld [vmem:[#allocation80_spill] sm:$0xff] }
 0x63c   :  { %v4004_v38 = vpop.f32.mrf.mxu2  ;;  %v3828_v50 = vpop.f32.mrf.mxu0 }
 0x63d   :  { %v10671_v45 = vadd.f32 %v4004_v38, %v3916_v1  ;;  %v3827_v18 = vadd.f32 %v3826_v55, %v3738_v47  ;;  %v3917_v28 = vpop.f32.mrf.mxu1  ;;  %v12779_v1 = vld [vmem:[#allocation79_spill] sm:$0xff] }
 0x63e   :  { %v3918_v21 = vadd.f32 %v3917_v28, %v10471_v10 }
 0x63f   :  { %v4570_v7 = vmax.f32 %v3827_v18, 0.0 }
 0x642   :  { %v3739_v2 = vpop.f32.mrf.mxu3 }
 0x643   :  { %v3740_v27 = vadd.f32 %v3739_v2, %v10451_v3 }
 0x644   :  { %v4006_v5 = vpop.f32.mrf.mxu2  ;;  %v3831_v17 = vpop.f32.mrf.mxu0 }
 0x645   :  { %v10675_v33 = vadd.f32 %v4006_v5, %v3918_v21  ;;  %v3829_v13 = vadd.f32 %v3828_v50, %v3740_v27  ;;  %v3920_v31 = vpop.f32.mrf.mxu1 }
 0x646   :  { %v3921_v55 = vadd.f32 %v3920_v31, %v10471_v10 }
 0x647   :  { %v4574_v49 = vmax.f32 %v3829_v13, 0.0  ;;  %4057 = vmatmul.bf16.gmra.mxu3 %v12778_v20  ;;  %4146 = vmatmul.bf16.gmra.mxu0 %v12779_v1 }
 0x648   :  { %4235 = vmatmul.bf16.gmra.mxu1 %v12780_v54 }
 0x649   :  { %4324 = vmatmul.bf16.gmra.mxu2 %v12707_v11  ;;  %v10682_v47 = vpack.c.bf16 %v4574_v49, %v4570_v7 }
 0x64a   :  { %v3742_v3 = vpop.f32.mrf.mxu3 }
 0x64b   :  { %12781 = vst [vmem:[#allocation65_spill] sm:$0xff] %v10682_v47  ;;  %v3743_v38 = vadd.f32 %v3742_v3, %v10455_v59  ;;  %v12782_v59 = vld [vmem:[#allocation34_spill] sm:$0xff]  ;;  %v12784_v3 = vld [vmem:[#allocation85_spill] sm:$0xff] }
 0x64c   :  { %v4009_v28 = vpop.f32.mrf.mxu2  ;;  %v3833_v18 = vpop.f32.mrf.mxu0 }
 0x64d   :  { %v10685_v50 = vadd.f32 %v4009_v28, %v3921_v55  ;;  %v3832_v21 = vadd.f32 %v3831_v17, %v3743_v38  ;;  %v3922_v2 = vpop.f32.mrf.mxu1  ;;  %v12783_v55 = vld [vmem:[#allocation84_spill] sm:$0xff]  ;;  %v12785_v38 = vld [vmem:[#allocation86_spill] sm:$0xff] }
 0x64e   :  { %v3923_v27 = vadd.f32 %v3922_v2, %v10471_v10  ;;  %v8377_v28 = vld [vmem:[%s12081_s3 + $0x74] sm:$0xf0] }
 0x64f   :  { %v4578_v1 = vmax.f32 %v3832_v21, 0.0 }
 0x652   :  { %v3744_v5 = vpop.f32.mrf.mxu3 }
 0x653   :  { %v3745_v13 = vadd.f32 %v3744_v5, %v10464_v40  ;;  %v7760_v40 = vld [vmem:[%s12081_s3 + $0x70] sm:$0xf]  ;;  %v8393_v5 = vld [vmem:[%s12081_s3 + $0xf4] sm:$0xf0] }
 0x654   :  { %v4011_v31 = vpop.f32.mrf.mxu2  ;;  %v3836_v11 = vpop.f32.mrf.mxu0 }
 0x655   :  { %v10689_v20 = vadd.f32 %v4011_v31, %v3923_v27  ;;  %v3834_v7 = vadd.f32 %v3833_v18, %v3745_v13  ;;  %v3925_v49 = vpop.f32.mrf.mxu1  ;;  %v7824_v18 = vld [vmem:[%s12081_s3 + $0xf0] sm:$0xf]  ;;  %v7761_v27 = vor.u32 %v8377_v28, %v7760_v40 }
 0x656   :  { %v3926_v17 = vadd.f32 %v3925_v49, %v10471_v10 }
 0x657   :  { %v4582_v54 = vmax.f32 %v3834_v7, 0.0  ;;  %4062 = vmatmul.bf16.gmra.mxu3 %v12782_v59  ;;  %4151 = vmatmul.bf16.gmra.mxu0 %v12783_v55  ;;  %v7825_v7 = vor.u32 %v8393_v5, %v7824_v18  ;;  %v12788_v5 = vld [vmem:[#allocation90_spill] sm:$0xff] }
 0x658   :  { %4240 = vmatmul.bf16.gmra.mxu1 %v12784_v3  ;;  %5046 = vmatpush.bf16.msrb.mxu0 %v7761_v27 }
 0x659   :  { %4329 = vmatmul.bf16.gmra.mxu2 %v12785_v38  ;;  %v10705_v21 = vpack.c.bf16 %v4582_v54, %v4578_v1  ;;  %5135 = vmatpush.bf16.msrb.mxu1 %v7825_v7 }
 0x65a   :  { %v3747_v2 = vpop.f32.mrf.mxu3 }
 0x65b   :  { %12786 = vst [vmem:[#allocation15_spill] sm:$0xff] %v10705_v21  ;;  %v3748_v13 = vadd.f32 %v3747_v2, %v10468_v62 }
 0x65c   :  { %v4014_v31 = vpop.f32.mrf.mxu2  ;;  %v3838_v59 = vpop.f32.mrf.mxu0 }
 0x65d   :  { %v10711_v49 = vadd.f32 %v4014_v31, %v3926_v17  ;;  %v3837_v55 = vadd.f32 %v3836_v11, %v3748_v13  ;;  %v3927_v3 = vpop.f32.mrf.mxu1  ;;  %v12787_v17 = vld [vmem:[#allocation38_spill] sm:$0xff]  ;;  %v12789_v11 = vld [vmem:[#allocation91_spill] sm:$0xff] }
 0x65e   :  { %v3928_v1 = vadd.f32 %v3927_v3, %v10471_v10 }
 0x65f   :  { %v4586_v2 = vmax.f32 %v3837_v55, 0.0 }
 0x662   :  { %v3749_v54 = vpop.f32.mrf.mxu3 }
 0x663   :  { %v3750_v38 = vadd.f32 %v3749_v54, %v10479_v53 }
 0x664   :  { %v4016_v40 = vpop.f32.mrf.mxu2  ;;  %v4117_v51 = vpop.f32.mrf.mxu0 }
 0x665   :  { %v10715_v28 = vadd.f32 %v4016_v40, %v3928_v1  ;;  %v3839_v21 = vadd.f32 %v3838_v59, %v3750_v38  ;;  %v4206_v62 = vpop.f32.mrf.mxu1 }
 0x667   :  { %v4590_v18 = vmax.f32 %v3839_v21, 0.0  ;;  %4067 = vmatmul.bf16.gmra.mxu3 %v12787_v17  ;;  %4156 = vmatmul.bf16.gmra.mxu0 %v12788_v5  ;;  %v7816_v5 = vld [vmem:[%s12081_s3 + $0xe0] sm:$0xf] }
 0x668   :  { %4245 = vmatmul.bf16.gmra.mxu1 %v12789_v11 }
 0x669   :  { %4334 = vmatmul.bf16.gmra.mxu2 %v12716_v4  ;;  %v10721_v10 = vpack.c.bf16 %v4590_v18, %v4586_v2  ;;  %v12791_v2 = vld [vmem:[#allocation42_spill] sm:$0xff] }
 0x66a   :  { %v4028_v27 = vpop.f32.mrf.mxu3  ;;  %v12792_v18 = vld [vmem:[#allocation94_spill] sm:$0xff] }
 0x66b   :  { %12790 = vst [vmem:[#allocation69_spill] sm:$0xff] %v10721_v10  ;;  %v4029_v53 = vadd.f32 %v4028_v27, %v10482_v60  ;;  %v12793_v60 = vld [vmem:[#allocation95_spill] sm:$0xff]  ;;  %v12816_v10 = vld [vmem:[#allocation48_spill] sm:$0xff] }
 0x66c   :  { %v4295_v13 = vpop.f32.mrf.mxu2  ;;  %v4119_v31 = vpop.f32.mrf.mxu0 }
 0x66d   :  { %v4118_v7 = vadd.f32 %v4117_v51, %v4029_v53  ;;  %v4208_v59 = vpop.f32.mrf.mxu1 }
 0x66f   :  { %v4207_v3 = vadd.f32 %v4206_v62, %v4118_v7  ;;  %v7752_v62 = vld [vmem:[%s12081_s3 + $0x60] sm:$0xf] }
 0x671   :  { %v10724_v55 = vadd.f32 %v4295_v13, %v4207_v3 }
 0x672   :  { %v4030_v21 = vpop.f32.mrf.mxu3 }
 0x673   :  { %v4031_v1 = vadd.f32 %v4030_v21, %v10486_v6  ;;  %v8375_v6 = vld [vmem:[%s12081_s3 + $0x64] sm:$0xf0] }
 0x674   :  { %v4297_v54 = vpop.f32.mrf.mxu2  ;;  %v4122_v38 = vpop.f32.mrf.mxu0  ;;  %v7753_v27 = vor.u32 %v8375_v6, %v7752_v62  ;;  %v12794_v6 = vld [vmem:[#allocation46_spill] sm:$0xff] }
 0x675   :  { %v4120_v40 = vadd.f32 %v4119_v31, %v4031_v1  ;;  %v4211_v17 = vpop.f32.mrf.mxu1 }
 0x676   :  { %5047 = vmatpush.bf16.msrb.mxu0 %v7753_v27 }
 0x677   :  { %v4209_v4 = vadd.f32 %v4208_v59, %v4120_v40  ;;  %4072 = vmatmul.bf16.gmra.mxu3 %v12791_v2  ;;  %4161 = vmatmul.bf16.gmra.mxu0 %v12792_v18 }
 0x678   :  { %4250 = vmatmul.bf16.gmra.mxu1 %v12793_v60 }
 0x679   :  { %4339 = vmatmul.bf16.gmra.mxu2 %v12720_v22  ;;  %v10731_v51 = vadd.f32 %v4297_v54, %v4209_v4  ;;  %v8391_v22 = vld [vmem:[%s12081_s3 + $0xe4] sm:$0xf0] }
 0x67a   :  { %v4033_v11 = vpop.f32.mrf.mxu3  ;;  %v7817_v31 = vor.u32 %v8391_v22, %v7816_v5  ;;  %v12796_v5 = vld [vmem:[#allocation100_spill] sm:$0xff] }
 0x67b   :  { %v4034_v53 = vadd.f32 %v4033_v11, %v10497_v12  ;;  %v12795_v12 = vld [vmem:[#allocation99_spill] sm:$0xff] }
 0x67c   :  { %v4300_v13 = vpop.f32.mrf.mxu2  ;;  %v4124_v7 = vpop.f32.mrf.mxu0  ;;  %5136 = vmatpush.bf16.msrb.mxu1 %v7817_v31 }
 0x67d   :  { %v4123_v59 = vadd.f32 %v4122_v38, %v4034_v53  ;;  %v4213_v3 = vpop.f32.mrf.mxu1 }
 0x67f   :  { %v4212_v21 = vadd.f32 %v4211_v17, %v4123_v59  ;;  %v12797_v59 = vld [vmem:[#allocation41_spill] sm:$0xff] }
 0x681   :  { %v10746_v1 = vadd.f32 %v4300_v13, %v4212_v21 }
 0x682   :  { %v4035_v54 = vpop.f32.mrf.mxu3 }
 0x683   :  { %v4036_v40 = vadd.f32 %v4035_v54, %v10501_v42 }
 0x684   :  { %v4302_v4 = vpop.f32.mrf.mxu2  ;;  %v4127_v2 = vpop.f32.mrf.mxu0 }
 0x685   :  { %v4125_v18 = vadd.f32 %v4124_v7, %v4036_v40  ;;  %v4216_v60 = vpop.f32.mrf.mxu1 }
 0x687   :  { %v4214_v62 = vadd.f32 %v4213_v3, %v4125_v18  ;;  %4077 = vmatmul.bf16.gmra.mxu3 %v12794_v6  ;;  %4166 = vmatmul.bf16.gmra.mxu0 %v12795_v12  ;;  %v12801_v6 = vld [vmem:[#allocation106_spill] sm:$0xff]  ;;  %v8373_v12 = vld [vmem:[%s12081_s3 + $0x54] sm:$0xf0] }
 0x688   :  { %4255 = vmatmul.bf16.gmra.mxu1 %v12796_v5  ;;  %v7808_v5 = vld [vmem:[%s12081_s3 + $0xd0] sm:$0xf] }
 0x689   :  { %4344 = vmatmul.bf16.gmra.mxu2 %v12724_v23  ;;  %v10753_v38 = vadd.f32 %v4302_v4, %v4214_v62  ;;  %v12798_v4 = vld [vmem:[#allocation50_spill] sm:$0xff]  ;;  %v12799_v62 = vld [vmem:[#allocation104_spill] sm:$0xff] }
 0x68a   :  { %v4038_v17 = vpop.f32.mrf.mxu3 }
 0x68b   :  { %v4039_v11 = vadd.f32 %v4038_v17, %v10512_v43  ;;  %v12800_v43 = vld [vmem:[#allocation105_spill] sm:$0xff] }
 0x68c   :  { %v4305_v27 = vpop.f32.mrf.mxu2  ;;  %v4129_v42 = vpop.f32.mrf.mxu0 }
 0x68d   :  { %v4128_v22 = vadd.f32 %v4127_v2, %v4039_v11  ;;  %v4218_v53 = vpop.f32.mrf.mxu1 }
 0x68f   :  { %v4217_v13 = vadd.f32 %v4216_v60, %v4128_v22  ;;  %v7744_v60 = vld [vmem:[%s12081_s3 + $0x50] sm:$0xf] }
 0x690   :  { %v7745_v11 = vor.u32 %v8373_v12, %v7744_v60 }
 0x691   :  { %v10756_v31 = vadd.f32 %v4305_v27, %v4217_v13  ;;  %v8389_v27 = vld [vmem:[%s12081_s3 + $0xd4] sm:$0xf0] }
 0x692   :  { %v4040_v7 = vpop.f32.mrf.mxu3  ;;  %v7809_v13 = vor.u32 %v8389_v27, %v7808_v5  ;;  %5048 = vmatpush.bf16.msrb.mxu0 %v7745_v11  ;;  %v12804_v11 = vld [vmem:[#allocation36_spill] sm:$0xff] }
 0x693   :  { %v4041_v3 = vadd.f32 %v4040_v7, %v12797_v59 }
 0x694   :  { %v4307_v21 = vpop.f32.mrf.mxu2  ;;  %v4132_v54 = vpop.f32.mrf.mxu0  ;;  %5137 = vmatpush.bf16.msrb.mxu1 %v7809_v13 }
 0x695   :  { %v4130_v40 = vadd.f32 %v4129_v42, %v4041_v3  ;;  %v4221_v18 = vpop.f32.mrf.mxu1  ;;  %v12802_v42 = vld [vmem:[#allocation49_spill] sm:$0xff] }
 0x697   :  { %v4219_v23 = vadd.f32 %v4218_v53, %v4130_v40  ;;  %4082 = vmatmul.bf16.gmra.mxu3 %v12798_v4  ;;  %4171 = vmatmul.bf16.gmra.mxu0 %v12799_v62  ;;  %v12803_v4 = vld [vmem:[#allocation143_spill] sm:$0xff] }
 0x698   :  { %4260 = vmatmul.bf16.gmra.mxu1 %v12800_v43 }
 0x699   :  { %4349 = vmatmul.bf16.gmra.mxu2 %v12801_v6  ;;  %v10763_v2 = vadd.f32 %v4307_v21, %v4219_v23 }
 0x69a   :  { %v4043_v17 = vpop.f32.mrf.mxu3 }
 0x69b   :  { %v4044_v22 = vadd.f32 %v4043_v17, %v12802_v42  ;;  %v7888_v17 = vld [vmem:[%s12081_s3 + $0x170] sm:$0xf]  ;;  %v12806_v42 = vld [vmem:[#allocation110_spill] sm:$0xff] }
 0x69c   :  { %v4310_v53 = vpop.f32.mrf.mxu2  ;;  %v4134_v7 = vpop.f32.mrf.mxu0 }
 0x69d   :  { %v4133_v59 = vadd.f32 %v4132_v54, %v4044_v22  ;;  %v4223_v3 = vpop.f32.mrf.mxu1  ;;  %v8409_v54 = vld [vmem:[%s12081_s3 + $0x174] sm:$0xf0]  ;;  %v12807_v22 = vld [vmem:[#allocation111_spill] sm:$0xff] }
 0x69e   :  { %v7889_v27 = vor.u32 %v8409_v54, %v7888_v17  ;;  %v8405_v54 = vld [vmem:[%s12081_s3 + $0x154] sm:$0xf0] }
 0x69f   :  { %v4222_v21 = vadd.f32 %v4221_v18, %v4133_v59  ;;  %v12805_v18 = vld [vmem:[#allocation109_spill] sm:$0xff]  ;;  %v8407_v59 = vld [vmem:[%s12081_s3 + $0x164] sm:$0xf0] }
 0x6a0   :  { %5224 = vmatpush.bf16.msrb.mxu2 %v7889_v27 }
 0x6a1   :  { %v10778_v40 = vadd.f32 %v4310_v53, %v4222_v21 }
 0x6a2   :  { %v4045_v23 = vpop.f32.mrf.mxu3 }
 0x6a3   :  { %v4046_v62 = vadd.f32 %v4045_v23, %v12803_v4 }
 0x6a4   :  { %v4312_v43 = vpop.f32.mrf.mxu2  ;;  %v4137_v6 = vpop.f32.mrf.mxu0 }
 0x6a5   :  { %v4135_v60 = vadd.f32 %v4134_v7, %v4046_v62  ;;  %v4226_v12 = vpop.f32.mrf.mxu1  ;;  %v7880_v7 = vld [vmem:[%s12081_s3 + $0x160] sm:$0xf] }
 0x6a6   :  { %v7881_v4 = vor.u32 %v8407_v59, %v7880_v7  ;;  %v8387_v59 = vld [vmem:[%s12081_s3 + $0xc4] sm:$0xf0] }
 0x6a7   :  { %v4224_v5 = vadd.f32 %v4223_v3, %v4135_v60  ;;  %4087 = vmatmul.bf16.gmra.mxu3 %v12804_v11  ;;  %4176 = vmatmul.bf16.gmra.mxu0 %v12805_v18  ;;  %v12808_v3 = vld [vmem:[#allocation28_spill] sm:$0xff] }
 0x6a8   :  { %4265 = vmatmul.bf16.gmra.mxu1 %v12806_v42  ;;  %5225 = vmatpush.bf16.msrb.mxu2 %v7881_v4  ;;  %v8371_v42 = vld [vmem:[%s12081_s3 + $0x44] sm:$0xf0] }
 0x6a9   :  { %4354 = vmatmul.bf16.gmra.mxu2 %v12807_v22  ;;  %v10791_v53 = vadd.f32 %v4312_v43, %v4224_v5  ;;  %v7872_v43 = vld [vmem:[%s12081_s3 + $0x150] sm:$0xf]  ;;  %v7800_v22 = vld [vmem:[%s12081_s3 + $0xc0] sm:$0xf] }
 0x6aa   :  { %v4048_v13 = vpop.f32.mrf.mxu3  ;;  %v7873_v11 = vor.u32 %v8405_v54, %v7872_v43  ;;  %v7801_v4 = vor.u32 %v8387_v59, %v7800_v22  ;;  %v8385_v22 = vld [vmem:[%s12081_s3 + $0xb4] sm:$0xf0]  ;;  %v12811_v59 = vld [vmem:[#allocation115_spill] sm:$0xff] }
 0x6ab   :  { %v4049_v21 = vadd.f32 %v4048_v13, %v12808_v3  ;;  %v7864_v3 = vld [vmem:[%s12081_s3 + $0x140] sm:$0xf] }
 0x6ac   :  { %v4315_v23 = vpop.f32.mrf.mxu2  ;;  %v4139_v62 = vpop.f32.mrf.mxu0  ;;  %5226 = vmatpush.bf16.msrb.mxu2 %v7873_v11  ;;  %5138 = vmatpush.bf16.msrb.mxu1 %v7801_v4  ;;  %v7792_v11 = vld [vmem:[%s12081_s3 + $0xb0] sm:$0xf] }
 0x6ad   :  { %v4138_v60 = vadd.f32 %v4137_v6, %v4049_v21  ;;  %v4228_v17 = vpop.f32.mrf.mxu1  ;;  %v7736_v6 = vld [vmem:[%s12081_s3 + $0x40] sm:$0xf]  ;;  %v8403_v21 = vld [vmem:[%s12081_s3 + $0x144] sm:$0xf0] }
 0x6ae   :  { %v7737_v7 = vor.u32 %v8371_v42, %v7736_v6  ;;  %v12809_v6 = vld [vmem:[#allocation40_spill] sm:$0xff] }
 0x6af   :  { %v4227_v5 = vadd.f32 %v4226_v12, %v4138_v60  ;;  %v7865_v60 = vor.u32 %v8403_v21, %v7864_v3  ;;  %v7793_v3 = vor.u32 %v8385_v22, %v7792_v11 }
 0x6b0   :  { %5049 = vmatpush.bf16.msrb.mxu0 %v7737_v7  ;;  %v8401_v7 = vld [vmem:[%s12081_s3 + $0x134] sm:$0xf0] }
 0x6b1   :  { %v10806_v18 = vadd.f32 %v4315_v23, %v4227_v5  ;;  %5227 = vmatpush.bf16.msrb.mxu2 %v7865_v60  ;;  %v8369_v5 = vld [vmem:[%s12081_s3 + $0x34] sm:$0xf0]  ;;  %5139 = vmatpush.bf16.msrb.mxu1 %v7793_v3 }
 0x6b2   :  { %v4050_v27 = vpop.f32.mrf.mxu3  ;;  %v8365_v3 = vld [vmem:[%s12081_s3 + $0x14] sm:$0xf0] }
 0x6b3   :  { %v4051_v13 = vadd.f32 %v4050_v27, %v10546_v16  ;;  %v7728_v16 = vld [vmem:[%s12081_s3 + $0x30] sm:$0xf] }
 0x6b4   :  { %v4317_v12 = vpop.f32.mrf.mxu2  ;;  %v4142_v23 = vpop.f32.mrf.mxu0  ;;  %v7729_v42 = vor.u32 %v8369_v5, %v7728_v16  ;;  %v8367_v16 = vld [vmem:[%s12081_s3 + $0x24] sm:$0xf0]  ;;  %v7784_v5 = vld [vmem:[%s12081_s3 + $0xa0] sm:$0xf] }
 0x6b5   :  { %v4140_v43 = vadd.f32 %v4139_v62, %v4051_v13  ;;  %v4231_v54 = vpop.f32.mrf.mxu1  ;;  %v12810_v62 = vld [vmem:[#allocation114_spill] sm:$0xff]  ;;  %v7856_v13 = vld [vmem:[%s12081_s3 + $0x130] sm:$0xf] }
 0x6b6   :  { %v7857_v21 = vor.u32 %v8401_v7, %v7856_v13  ;;  %5050 = vmatpush.bf16.msrb.mxu0 %v7729_v42  ;;  %v8399_v42 = vld [vmem:[%s12081_s3 + $0x124] sm:$0xf0] }
 0x6b7   :  { %v4229_v27 = vadd.f32 %v4228_v17, %v4140_v43  ;;  %4092 = vmatmul.bf16.gmra.mxu3 %v12809_v6  ;;  %4181 = vmatmul.bf16.gmra.mxu0 %v12810_v62  ;;  %v12812_v17 = vld [vmem:[#allocation116_spill] sm:$0xff]  ;;  %v7720_v43 = vld [vmem:[%s12081_s3 + $0x20] sm:$0xf]  ;;  %v8383_v6 = vld [vmem:[%s12081_s3 + $0xa4] sm:$0xf0] }
 0x6b8   :  { %4270 = vmatmul.bf16.gmra.mxu1 %v12811_v59  ;;  %5228 = vmatpush.bf16.msrb.mxu2 %v7857_v21  ;;  %v7848_v62 = vld [vmem:[%s12081_s3 + $0x120] sm:$0xf]  ;;  %v7785_v13 = vor.u32 %v8383_v6, %v7784_v5  ;;  %v7776_v21 = vld [vmem:[%s12081_s3 + $0x90] sm:$0xf]  ;;  %v8397_v5 = vld [vmem:[%s12081_s3 + $0x114] sm:$0xf0] }
 0x6b9   :  { %4359 = vmatmul.bf16.gmra.mxu2 %v12812_v17  ;;  %v10849_v4 = vadd.f32 %v4317_v12, %v4229_v27  ;;  %v7721_v27 = vor.u32 %v8367_v16, %v7720_v43  ;;  %v7849_v7 = vor.u32 %v8399_v42, %v7848_v62  ;;  %v7840_v16 = vld [vmem:[%s12081_s3 + $0x110] sm:$0xf]  ;;  %v8363_v42 = vld [vmem:[%s12081_s3 + $0x4] sm:$0xf0] }
 0x6ba   :  { %v4053_v60 = vpop.f32.mrf.mxu3  ;;  %5140 = vmatpush.bf16.msrb.mxu1 %v7785_v13  ;;  %v7768_v13 = vld [vmem:[%s12081_s3 + $0x80] sm:$0xf] }
 0x6bb   :  { %v4054_v11 = vadd.f32 %v4053_v60, %v10557_v24  ;;  %5051 = vmatpush.bf16.msrb.mxu0 %v7721_v27  ;;  %v7712_v24 = vld [vmem:[%s12081_s3 + $0x10] sm:$0xf]  ;;  %v7841_v27 = vor.u32 %v8397_v5, %v7840_v16 }
 0x6bc   :  { %v4320_v12 = vpop.f32.mrf.mxu2  ;;  %v4144_v22 = vpop.f32.mrf.mxu0  ;;  %5229 = vmatpush.bf16.msrb.mxu2 %v7849_v7  ;;  %v7713_v43 = vor.u32 %v8365_v3, %v7712_v24  ;;  %v8379_v24 = vld [vmem:[%s12081_s3 + $0x84] sm:$0xf0]  ;;  %v7832_v3 = vld [vmem:[%s12081_s3 + $0x100] sm:$0xf] }
 0x6bd   :  { %v4143_v59 = vadd.f32 %v4142_v23, %v4054_v11  ;;  %v4233_v17 = vpop.f32.mrf.mxu1  ;;  %v8381_v23 = vld [vmem:[%s12081_s3 + $0x94] sm:$0xf0] }
 0x6be   :  { %v7777_v11 = vor.u32 %v8381_v23, %v7776_v21  ;;  %v8395_v21 = vld [vmem:[%s12081_s3 + $0x104] sm:$0xf0] }
 0x6bf   :  { %v4232_v60 = vadd.f32 %v4231_v54, %v4143_v59  ;;  %5052 = vmatpush.bf16.msrb.mxu0 %v7713_v43  ;;  %v7704_v54 = vld [vmem:[%s12081_s3] sm:$0xf]  ;;  %v7769_v43 = vor.u32 %v8379_v24, %v7768_v13  ;;  %v7833_v23 = vor.u32 %v8395_v21, %v7832_v3 }
 0x6c0   :  { %5141 = vmatpush.bf16.msrb.mxu1 %v7777_v11  ;;  %5230 = vmatpush.bf16.msrb.mxu2 %v7841_v27  ;;  %v7705_v59 = vor.u32 %v8363_v42, %v7704_v54  ;;  %v12813_v11 = vld [vmem:[#allocation44_spill] sm:$0xff]  ;;  %v12814_v27 = vld [vmem:[#allocation119_spill] sm:$0xff] }
 0x6c1   :  { %v10888_v6 = vadd.f32 %v4320_v12, %v4232_v60  ;;  %v7952_v42 = vld [vmem:[%s12081_s3 + $0x1f0] sm:$0xf] }
 0x6c2   :  { %v4055_v62 = vpop.f32.mrf.mxu3 }
 0x6c3   :  { %v4056_v7 = vadd.f32 %v4055_v62, %v10561_v8  ;;  %5053 = vmatpush.bf16.msrb.mxu0 %v7705_v59  ;;  %v12815_v62 = vld [vmem:[#allocation120_spill] sm:$0xff] }
 0x6c4   :  { %v4322_v12 = vpop.f32.mrf.mxu2  ;;  %v4147_v60 = vpop.f32.mrf.mxu0  ;;  %5142 = vmatpush.bf16.msrb.mxu1 %v7769_v43  ;;  %5231 = vmatpush.bf16.msrb.mxu2 %v7833_v23 }
 0x6c5   :  { %v4145_v16 = vadd.f32 %v4144_v22, %v4056_v7  ;;  %v4236_v5 = vpop.f32.mrf.mxu1  ;;  %v8425_v22 = vld [vmem:[%s12081_s3 + $0x1f4] sm:$0xf0] }
 0x6c7   :  { %v4234_v8 = vadd.f32 %v4233_v17, %v4145_v16  ;;  %4097 = vmatmul.bf16.gmra.mxu3 %v12813_v11  ;;  %4186 = vmatmul.bf16.gmra.mxu0 %v12814_v27  ;;  %v7953_v17 = vor.u32 %v8425_v22, %v7952_v42  ;;  %v12817_v42 = vld [vmem:[#allocation124_spill] sm:$0xff] }
 0x6c8   :  { %4275 = vmatmul.bf16.gmra.mxu1 %v12815_v62 }
 0x6c9   :  { %4364 = vmatmul.bf16.gmra.mxu2 %v12748_v14  ;;  %v10913_v54 = vadd.f32 %v4322_v12, %v4234_v8  ;;  %5313 = vmatpush.bf16.msra.mxu3 %v7953_v17 }
 0x6ca   :  { %v4058_v13 = vpop.f32.mrf.mxu3 }
 0x6cb   :  { %v4059_v7 = vadd.f32 %v4058_v13, %v10572_v26  ;;  %v12818_v26 = vld [vmem:[#allocation125_spill] sm:$0xff] }
 0x6cc   :  { %v4325_v59 = vpop.f32.mrf.mxu2  ;;  %v4149_v24 = vpop.f32.mrf.mxu0 }
 0x6cd   :  { %v4148_v3 = vadd.f32 %v4147_v60, %v4059_v7  ;;  %v4238_v21 = vpop.f32.mrf.mxu1 }
 0x6cf   :  { %v4237_v14 = vadd.f32 %v4236_v5, %v4148_v3 }
 0x6d1   :  { %v10922_v12 = vadd.f32 %v4325_v59, %v4237_v14 }
 0x6d2   :  { %v4060_v43 = vpop.f32.mrf.mxu3 }
 0x6d3   :  { %v4061_v23 = vadd.f32 %v4060_v43, %v10576_v56 }
 0x6d4   :  { %v4327_v16 = vpop.f32.mrf.mxu2  ;;  %v4152_v8 = vpop.f32.mrf.mxu0 }
 0x6d5   :  { %v4150_v11 = vadd.f32 %v4149_v24, %v4061_v23  ;;  %v4241_v27 = vpop.f32.mrf.mxu1 }
 0x6d7   :  { %v4239_v62 = vadd.f32 %v4238_v21, %v4150_v11  ;;  %4102 = vmatmul.bf16.gmra.mxu3 %v12816_v10  ;;  %4191 = vmatmul.bf16.gmra.mxu0 %v12817_v42  ;;  %v12820_v11 = vld [vmem:[#allocation98_spill] sm:$0xff] }
 0x6d8   :  { %4280 = vmatmul.bf16.gmra.mxu1 %v12818_v26 }
 0x6d9   :  { %4369 = vmatmul.bf16.gmra.mxu2 %v12751_v9  ;;  %v10929_v60 = vadd.f32 %v4327_v16, %v4239_v62  ;;  %v12819_v16 = vld [vmem:[#allocation54_spill] sm:$0xff] }
 0x6da   :  { %v4063_v5 = vpop.f32.mrf.mxu3  ;;  %v8423_v62 = vld [vmem:[%s12081_s3 + $0x1e4] sm:$0xf0] }
 0x6db   :  { %v4064_v22 = vadd.f32 %v4063_v5, %v10587_v41  ;;  %v12821_v41 = vld [vmem:[#allocation140_spill] sm:$0xff] }
 0x6dc   :  { %v4330_v13 = vpop.f32.mrf.mxu2  ;;  %v4154_v56 = vpop.f32.mrf.mxu0 }
 0x6dd   :  { %v4153_v17 = vadd.f32 %v4152_v8, %v4064_v22  ;;  %v4243_v7 = vpop.f32.mrf.mxu1  ;;  %v12822_v8 = vld [vmem:[#allocation138_spill] sm:$0xff] }
 0x6df   :  { %v4242_v59 = vadd.f32 %v4241_v27, %v4153_v17 }
 0x6e1   :  { %v10932_v24 = vadd.f32 %v4330_v13, %v4242_v59 }
 0x6e2   :  { %v4065_v3 = vpop.f32.mrf.mxu3 }
 0x6e3   :  { %v4066_v10 = vadd.f32 %v4065_v3, %v10591_v57  ;;  %v7944_v57 = vld [vmem:[%s12081_s3 + $0x1e0] sm:$0xf] }
 0x6e4   :  { %v4332_v21 = vpop.f32.mrf.mxu2  ;;  %v4157_v14 = vpop.f32.mrf.mxu0  ;;  %v7945_v26 = vor.u32 %v8423_v62, %v7944_v57  ;;  %v12825_v57 = vld [vmem:[#allocation141_spill] sm:$0xff] }
 0x6e5   :  { %v4155_v43 = vadd.f32 %v4154_v56, %v4066_v10  ;;  %v4246_v23 = vpop.f32.mrf.mxu1 }
 0x6e6   :  { %5314 = vmatpush.bf16.msra.mxu3 %v7945_v26 }
 0x6e7   :  { %v4244_v9 = vadd.f32 %v4243_v7, %v4155_v43  ;;  %7686 = vmatmul.msk.bf16.vlgmr.msrb.gmra.mxu3 %vm1923_vm0, %v12819_v16  ;;  %5054 = vmatmul.bf16.vlgmr.msrb.gmra.mxu0 %v12820_v11 }
 0x6e8   :  { %5143 = vmatmul.bf16.vlgmr.msrb.gmra.mxu1 %v12821_v41  ;;  %v12823_v41 = vld [vmem:[#allocation58_spill] sm:$0xff] }
 0x6e9   :  { %5232 = vmatmul.bf16.vlgmr.msrb.gmra.mxu2 %v12822_v8  ;;  %v10940_v27 = vadd.f32 %v4332_v21, %v4244_v9 }
 0x6ea   :  { %v4068_v42 = vpop.f32.mrf.mxu3 }
 0x6eb   :  { %v4069_v5 = vadd.f32 %v4068_v42, %v10601_v15  ;;  %v12824_v15 = vld [vmem:[#allocation103_spill] sm:$0xff] }
 0x6ec   :  { %v4335_v22 = vpop.f32.mrf.mxu2  ;;  %v4159_v13 = vpop.f32.mrf.mxu0 }
 0x6ed   :  { %v4158_v56 = vadd.f32 %v4157_v14, %v4069_v5  ;;  %v4248_v17 = vpop.f32.mrf.mxu1  ;;  %v12826_v14 = vld [vmem:[#allocation139_spill] sm:$0xff] }
 0x6ef   :  { %v4247_v7 = vadd.f32 %v4246_v23, %v4158_v56 }
 0x6f1   :  { %v10949_v59 = vadd.f32 %v4335_v22, %v4247_v7 }
 0x6f2   :  { %v4070_v3 = vpop.f32.mrf.mxu3 }
 0x6f3   :  { %v4071_v10 = vadd.f32 %v4070_v3, %v10605_v35 }
 0x6f4   :  { %v4337_v21 = vpop.f32.mrf.mxu2  ;;  %v4162_v43 = vpop.f32.mrf.mxu0 }
 0x6f5   :  { %v4160_v9 = vadd.f32 %v4159_v13, %v4071_v10  ;;  %v4251_v16 = vpop.f32.mrf.mxu1 }
 0x6f7   :  { %v4249_v8 = vadd.f32 %v4248_v17, %v4160_v9  ;;  %7687 = vmatmul.msk.bf16.gmra.mxu3 %vm1923_vm0, %v12823_v41  ;;  %5059 = vmatmul.bf16.gmra.mxu0 %v12824_v15 }
 0x6f8   :  { %5148 = vmatmul.bf16.gmra.mxu1 %v12825_v57 }
 0x6f9   :  { %5237 = vmatmul.bf16.gmra.mxu2 %v12826_v14  ;;  %v10957_v23 = vadd.f32 %v4337_v21, %v4249_v8  ;;  %v12828_v8 = vld [vmem:[#allocation62_spill] sm:$0xff]  ;;  %v12829_v21 = vld [vmem:[#allocation108_spill] sm:$0xff] }
 0x6fa   :  { %v4073_v62 = vpop.f32.mrf.mxu3 }
 0x6fb   :  { %v4074_v42 = vadd.f32 %v4073_v62, %v10615_v36  ;;  %v12830_v36 = vld [vmem:[#allocation142_spill] sm:$0xff]  ;;  %v8421_v62 = vld [vmem:[%s12081_s3 + $0x1d4] sm:$0xf0] }
 0x6fc   :  { %v4340_v35 = vpop.f32.mrf.mxu2  ;;  %v4164_v26 = vpop.f32.mrf.mxu0 }
 0x6fd   :  { %v4163_v5 = vadd.f32 %v4162_v43, %v4074_v42  ;;  %v4253_v22 = vpop.f32.mrf.mxu1  ;;  %v12831_v43 = vld [vmem:[#allocation45_spill] sm:$0xff] }
 0x6ff   :  { %v4252_v13 = vadd.f32 %v4251_v16, %v4163_v5 }
 0x701   :  { %v10960_v56 = vadd.f32 %v4340_v35, %v4252_v13 }
 0x702   :  { %v4075_v17 = vpop.f32.mrf.mxu3 }
 0x703   :  { %12827 = vst [vmem:[#allocation19_spill] sm:$0xff] %v10960_v56  ;;  %v4076_v41 = vadd.f32 %v4075_v17, %v10619_v32  ;;  %v7936_v32 = vld [vmem:[%s12081_s3 + $0x1d0] sm:$0xf]  ;;  %v12833_v56 = vld [vmem:[#allocation66_spill] sm:$0xff] }
 0x704   :  { %v4342_v7 = vpop.f32.mrf.mxu2  ;;  %v4167_v3 = vpop.f32.mrf.mxu0  ;;  %v7937_v35 = vor.u32 %v8421_v62, %v7936_v32  ;;  %v12835_v32 = vld [vmem:[#allocation144_spill] sm:$0xff] }
 0x705   :  { %v4165_v10 = vadd.f32 %v4164_v26, %v4076_v41  ;;  %v4256_v9 = vpop.f32.mrf.mxu1 }
 0x706   :  { %5315 = vmatpush.bf16.msra.mxu3 %v7937_v35 }
 0x707   :  { %v4254_v14 = vadd.f32 %v4253_v22, %v4165_v10  ;;  %7688 = vmatmul.msk.bf16.gmra.mxu3 %vm1923_vm0, %v12828_v8  ;;  %5064 = vmatmul.bf16.gmra.mxu0 %v12829_v21 }
 0x708   :  { %5153 = vmatmul.bf16.gmra.mxu1 %v12830_v36 }
 0x709   :  { %5242 = vmatmul.bf16.gmra.mxu2 %v12831_v43  ;;  %v10968_v16 = vadd.f32 %v4342_v7, %v4254_v14 }
 0x70a   :  { %v4078_v42 = vpop.f32.mrf.mxu3 }
 0x70b   :  { %12832 = vst [vmem:[#allocation75_spill] sm:$0xff] %v10968_v16  ;;  %v4079_v26 = vadd.f32 %v4078_v42, %v10629_v0  ;;  %v12834_v0 = vld [vmem:[#allocation113_spill] sm:$0xff] }
 0x70c   :  { %v4345_v5 = vpop.f32.mrf.mxu2  ;;  %v4169_v22 = vpop.f32.mrf.mxu0 }
 0x70d   :  { %v4168_v13 = vadd.f32 %v4167_v3, %v4079_v26  ;;  %v4258_v17 = vpop.f32.mrf.mxu1  ;;  %v12836_v3 = vld [vmem:[#allocation145_spill] sm:$0xff] }
 0x70f   :  { %v4257_v41 = vadd.f32 %v4256_v9, %v4168_v13 }
 0x711   :  { %v10977_v14 = vadd.f32 %v4345_v5, %v4257_v41 }
 0x712   :  { %v4080_v7 = vpop.f32.mrf.mxu3 }
 0x713   :  { %v4081_v10 = vadd.f32 %v4080_v7, %v10633_v61 }
 0x714   :  { %v4347_v8 = vpop.f32.mrf.mxu2  ;;  %v4172_v43 = vpop.f32.mrf.mxu0 }
 0x715   :  { %v4170_v36 = vadd.f32 %v4169_v22, %v4081_v10  ;;  %v4261_v21 = vpop.f32.mrf.mxu1 }
 0x717   :  { %v4259_v16 = vadd.f32 %v4258_v17, %v4170_v36  ;;  %7689 = vmatmul.msk.bf16.gmra.mxu3 %vm1923_vm0, %v12833_v56  ;;  %5069 = vmatmul.bf16.gmra.mxu0 %v12834_v0 }
 0x718   :  { %5158 = vmatmul.bf16.gmra.mxu1 %v12835_v32 }
 0x719   :  { %5247 = vmatmul.bf16.gmra.mxu2 %v12836_v3  ;;  %v10985_v9 = vadd.f32 %v4347_v8, %v4259_v16  ;;  %v12838_v16 = vld [vmem:[#allocation70_spill] sm:$0xff] }
 0x71a   :  { %v4083_v62 = vpop.f32.mrf.mxu3  ;;  %v12839_v8 = vld [vmem:[#allocation118_spill] sm:$0xff] }
 0x71b   :  { %v4084_v42 = vadd.f32 %v4083_v62, %v10643_v48  ;;  %v12840_v48 = vld [vmem:[#allocation146_spill] sm:$0xff] }
 0x71c   :  { %v4350_v61 = vpop.f32.mrf.mxu2  ;;  %v4174_v35 = vpop.f32.mrf.mxu0  ;;  %v8419_v62 = vld [vmem:[%s12081_s3 + $0x1c4] sm:$0xf0] }
 0x71d   :  { %v4173_v26 = vadd.f32 %v4172_v43, %v4084_v42  ;;  %v4263_v5 = vpop.f32.mrf.mxu1  ;;  %v12841_v43 = vld [vmem:[#allocation32_spill] sm:$0xff] }
 0x71f   :  { %v4262_v22 = vadd.f32 %v4261_v21, %v4173_v26 }
 0x721   :  { %v10988_v36 = vadd.f32 %v4350_v61, %v4262_v22 }
 0x722   :  { %v4085_v13 = vpop.f32.mrf.mxu3 }
 0x723   :  { %12837 = vst [vmem:[#allocation23_spill] sm:$0xff] %v10988_v36  ;;  %v4086_v56 = vadd.f32 %v4085_v13, %v10647_v19  ;;  %v7928_v19 = vld [vmem:[%s12081_s3 + $0x1c0] sm:$0xf]  ;;  %v12843_v36 = vld [vmem:[#allocation76_spill] sm:$0xff] }
 0x724   :  { %v4352_v17 = vpop.f32.mrf.mxu2  ;;  %v4177_v41 = vpop.f32.mrf.mxu0  ;;  %v7929_v61 = vor.u32 %v8419_v62, %v7928_v19  ;;  %v12845_v19 = vld [vmem:[#allocation147_spill] sm:$0xff] }
 0x725   :  { %v4175_v7 = vadd.f32 %v4174_v35, %v4086_v56  ;;  %v4266_v10 = vpop.f32.mrf.mxu1 }
 0x726   :  { %5316 = vmatpush.bf16.msra.mxu3 %v7929_v61 }
 0x727   :  { %v4264_v3 = vadd.f32 %v4263_v5, %v4175_v7  ;;  %7690 = vmatmul.msk.bf16.gmra.mxu3 %vm1923_vm0, %v12838_v16  ;;  %5074 = vmatmul.bf16.gmra.mxu0 %v12839_v8 }
 0x728   :  { %5163 = vmatmul.bf16.gmra.mxu1 %v12840_v48 }
 0x729   :  { %5252 = vmatmul.bf16.gmra.mxu2 %v12841_v43  ;;  %v10996_v21 = vadd.f32 %v4352_v17, %v4264_v3 }
 0x72a   :  { %v4088_v42 = vpop.f32.mrf.mxu3 }
 0x72b   :  { %12842 = vst [vmem:[#allocation81_spill] sm:$0xff] %v10996_v21  ;;  %v4089_v35 = vadd.f32 %v4088_v42, %v10657_v44  ;;  %v12844_v44 = vld [vmem:[#allocation123_spill] sm:$0xff] }
 0x72c   :  { %v4355_v26 = vpop.f32.mrf.mxu2  ;;  %v4179_v5 = vpop.f32.mrf.mxu0 }
 0x72d   :  { %v4178_v22 = vadd.f32 %v4177_v41, %v4089_v35  ;;  %v4268_v13 = vpop.f32.mrf.mxu1 }
 0x72f   :  { %v4267_v56 = vadd.f32 %v4266_v10, %v4178_v22 }
 0x731   :  { %v11005_v3 = vadd.f32 %v4355_v26, %v4267_v56 }
 0x732   :  { %v4090_v17 = vpop.f32.mrf.mxu3 }
 0x733   :  { %v4091_v7 = vadd.f32 %v4090_v17, %v10661_v46 }
 0x734   :  { %v4357_v16 = vpop.f32.mrf.mxu2  ;;  %v4182_v43 = vpop.f32.mrf.mxu0 }
 0x735   :  { %v4180_v48 = vadd.f32 %v4179_v5, %v4091_v7  ;;  %v4271_v8 = vpop.f32.mrf.mxu1 }
 0x737   :  { %v4269_v21 = vadd.f32 %v4268_v13, %v4180_v48  ;;  %7691 = vmatmul.msk.bf16.gmra.mxu3 %vm1923_vm0, %v12843_v36  ;;  %5079 = vmatmul.bf16.gmra.mxu0 %v12844_v44 }
 0x738   :  { %5168 = vmatmul.bf16.gmra.mxu1 %v12845_v19 }
 0x739   :  { %5257 = vmatmul.bf16.gmra.mxu2 %v10569_v34  ;;  %v11013_v41 = vadd.f32 %v4357_v16, %v4269_v21  ;;  %v12846_v21 = vld [vmem:[#allocation82_spill] sm:$0xff]  ;;  %v12847_v16 = vld [vmem:[#allocation128_spill] sm:$0xff] }
 0x73a   :  { %v4093_v10 = vpop.f32.mrf.mxu3 }
 0x73b   :  { %v4094_v62 = vadd.f32 %v4093_v10, %v10671_v45  ;;  %v12848_v45 = vld [vmem:[#allocation148_spill] sm:$0xff] }
 0x73c   :  { %v4360_v46 = vpop.f32.mrf.mxu2  ;;  %v4184_v42 = vpop.f32.mrf.mxu0 }
 0x73d   :  { %v4183_v61 = vadd.f32 %v4182_v43, %v4094_v62  ;;  %v4273_v35 = vpop.f32.mrf.mxu1  ;;  %v8417_v43 = vld [vmem:[%s12081_s3 + $0x1b4] sm:$0xf0] }
 0x73f   :  { %v4272_v26 = vadd.f32 %v4271_v8, %v4183_v61 }
 0x741   :  { %v11016_v48 = vadd.f32 %v4360_v46, %v4272_v26 }
 0x742   :  { %v4095_v5 = vpop.f32.mrf.mxu3 }
 0x743   :  { %v4096_v36 = vadd.f32 %v4095_v5, %v10675_v33  ;;  %v7920_v33 = vld [vmem:[%s12081_s3 + $0x1b0] sm:$0xf] }
 0x744   :  { %v4362_v22 = vpop.f32.mrf.mxu2  ;;  %v4187_v13 = vpop.f32.mrf.mxu0  ;;  %v7921_v62 = vor.u32 %v8417_v43, %v7920_v33  ;;  %v12852_v33 = vld [vmem:[#allocation149_spill] sm:$0xff]  ;;  %v7826_v43 = vld [vmem:[%s12081_s3 + $0xf8] sm:$0xf0] }
 0x745   :  { %v4185_v56 = vadd.f32 %v4184_v42, %v4096_v36  ;;  %v4276_v17 = vpop.f32.mrf.mxu1 }
 0x746   :  { %5317 = vmatpush.bf16.msra.mxu3 %v7921_v62 }
 0x747   :  { %v4274_v7 = vadd.f32 %v4273_v35, %v4185_v56  ;;  %7692 = vmatmul.msk.bf16.gmra.mxu3 %vm1923_vm0, %v12846_v21  ;;  %5084 = vmatmul.bf16.gmra.mxu0 %v12847_v16 }
 0x748   :  { %5173 = vmatmul.bf16.gmra.mxu1 %v12848_v45 }
 0x749   :  { %5262 = vmatmul.bf16.gmra.mxu2 %v10584_v58  ;;  %v11024_v8 = vadd.f32 %v4362_v22, %v4274_v7 }
 0x74a   :  { %v4098_v10 = vpop.f32.mrf.mxu3 }
 0x74b   :  { %12849 = vst [vmem:[#allocation27_spill] sm:$0xff] %v11024_v8  ;;  %v4099_v46 = vadd.f32 %v4098_v10, %v10685_v50  ;;  %v12850_v8 = vld [vmem:[#allocation87_spill] sm:$0xff]  ;;  %v12851_v50 = vld [vmem:[#allocation129_spill] sm:$0xff] }
 0x74c   :  { %v4365_v42 = vpop.f32.mrf.mxu2  ;;  %v4189_v61 = vpop.f32.mrf.mxu0 }
 0x74d   :  { %v4188_v35 = vadd.f32 %v4187_v13, %v4099_v46  ;;  %v4278_v26 = vpop.f32.mrf.mxu1  ;;  %v8376_v13 = vld [vmem:[%s12081_s3 + $0x74] sm:$0xf] }
 0x74f   :  { %v4277_v5 = vadd.f32 %v4276_v17, %v4188_v35 }
 0x751   :  { %v11033_v36 = vadd.f32 %v4365_v42, %v4277_v5 }
 0x752   :  { %v4100_v22 = vpop.f32.mrf.mxu3 }
 0x753   :  { %v4101_v56 = vadd.f32 %v4100_v22, %v10689_v20  ;;  %v7762_v20 = vld [vmem:[%s12081_s3 + $0x78] sm:$0xf0] }
 0x754   :  { %v4367_v7 = vpop.f32.mrf.mxu2  ;;  %v4192_v21 = vpop.f32.mrf.mxu0 }
 0x755   :  { %v4190_v58 = vadd.f32 %v4189_v61, %v4101_v56  ;;  %v4281_v45 = vpop.f32.mrf.mxu1 }
 0x757   :  { %v4279_v16 = vadd.f32 %v4278_v26, %v4190_v58  ;;  %7693 = vmatmul.msk.bf16.gmra.mxu3 %vm1923_vm0, %v12850_v8  ;;  %5089 = vmatmul.bf16.gmra.mxu0 %v12851_v50  ;;  %v8392_v58 = vld [vmem:[%s12081_s3 + $0xf4] sm:$0xf]  ;;  %v7765_v8 = vor.u32 %v8376_v13, %v7762_v20 }
 0x758   :  { %5178 = vmatmul.bf16.gmra.mxu1 %v12852_v33  ;;  %v7829_v62 = vor.u32 %v8392_v58, %v7826_v43 }
 0x759   :  { %5267 = vmatmul.bf16.gmra.mxu2 %v10598_v52  ;;  %v11050_v17 = vadd.f32 %v4367_v7, %v4279_v16  ;;  %5402 = vmatpush.bf16.msra.mxu0 %v7765_v8  ;;  %v11059_v16 = vld [vmem:[%s12082_s4] sm:$0x3] }
 0x75a   :  { %v4103_v10 = vpop.f32.mrf.mxu3  ;;  %5491 = vmatpush.bf16.msra.mxu1 %v7829_v62  ;;  %v11064_v56 = vperm.slane %v11059_v16, 0  ;;  %v12853_v62 = vld [vmem:[#allocation93_spill] sm:$0xff] }
 0x75b   :  { %v4104_v46 = vadd.f32 %v4103_v10, %v10711_v49 }
 0x75c   :  { %v4370_v42 = vpop.f32.mrf.mxu2  ;;  %v4194_v61 = vpop.f32.mrf.mxu0 }
 0x75d   :  { %v4193_v35 = vadd.f32 %v4192_v21, %v4104_v46  ;;  %v4283_v26 = vpop.f32.mrf.mxu1  ;;  %v12855_v46 = vld [vmem:[#allocation88_spill] sm:$0xff] }
 0x75f   :  { %v4282_v5 = vadd.f32 %v4281_v45, %v4193_v35  ;;  %v12854_v45 = vld [vmem:[#allocation130_spill] sm:$0xff] }
 0x761   :  { %v11061_v22 = vadd.f32 %v4370_v42, %v4282_v5  ;;  %v8415_v42 = vld [vmem:[%s12081_s3 + $0x1a4] sm:$0xf0] }
 0x762   :  { %v4105_v7 = vpop.f32.mrf.mxu3 }
 0x763   :  { %v4106_v49 = vadd.f32 %v4105_v7, %v10715_v28  ;;  %v7912_v28 = vld [vmem:[%s12081_s3 + $0x1a0] sm:$0xf] }
 0x764   :  { %v4372_v13 = vpop.f32.mrf.mxu2  ;;  %v5055_v20 = vpop.f32.mrf.mxu0  ;;  %v7913_v35 = vor.u32 %v8415_v42, %v7912_v28 }
 0x765   :  { %v4195_v58 = vadd.f32 %v4194_v61, %v4106_v49  ;;  %v5056_v21 = vadd.f32 %v5055_v20, %v11064_v56  ;;  %v5144_v8 = vpop.f32.mrf.mxu1 }
 0x766   :  { %5318 = vmatpush.bf16.msra.mxu3 %v7913_v35 }
 0x767   :  { %v4284_v43 = vadd.f32 %v4283_v26, %v4195_v58  ;;  %v5145_v10 = vadd.f32 %v5144_v8, %v5056_v21  ;;  %7694 = vmatmul.msk.bf16.gmra.mxu3 %vm1923_vm0, %v12853_v62  ;;  %5094 = vmatmul.bf16.gmra.mxu0 %v12854_v45 }
 0x768   :  { %5183 = vmatmul.bf16.gmra.mxu1 %v12855_v46 }
 0x769   :  { %5272 = vmatmul.bf16.gmra.mxu2 %v10612_v29  ;;  %v11079_v61 = vadd.f32 %v4372_v13, %v4284_v43 }
 0x76a   :  { %v4384_v26 = vpop.f32.mrf.mxu3 }
 0x76b   :  { %v4385_v5 = vadd.f32 %v4384_v26, %v10724_v55  ;;  %v12856_v26 = vld [vmem:[#allocation97_spill] sm:$0xff] }
 0x76c   :  { %v5233_v7 = vpop.f32.mrf.mxu2  ;;  %v5057_v20 = vpop.f32.mrf.mxu0 }
 0x76d   :  { %v11082_v49 = vadd.f32 %v5233_v7, %v5145_v10  ;;  %v5058_v58 = vadd.f32 %v5057_v20, %v11064_v56  ;;  %v5146_v21 = vpop.f32.mrf.mxu1  ;;  %v4467_v43 = vmax.f32 %v4385_v5, 0.0  ;;  %v12857_v7 = vld [vmem:[#allocation131_spill] sm:$0xff]  ;;  %v12858_v20 = vld [vmem:[#allocation89_spill] sm:$0xff] }
 0x76f   :  { %v5147_v8 = vadd.f32 %v5146_v21, %v5058_v58  ;;  %v7818_v58 = vld [vmem:[%s12081_s3 + $0xe8] sm:$0xf0] }
 0x772   :  { %v4386_v62 = vpop.f32.mrf.mxu3 }
 0x773   :  { %v4387_v29 = vadd.f32 %v4386_v62, %v10731_v51  ;;  %v8374_v51 = vld [vmem:[%s12081_s3 + $0x64] sm:$0xf] }
 0x774   :  { %v5235_v46 = vpop.f32.mrf.mxu2  ;;  %v5060_v13 = vpop.f32.mrf.mxu0 }
 0x775   :  { %v11086_v45 = vadd.f32 %v5235_v46, %v5147_v8  ;;  %v4471_v28 = vmax.f32 %v4387_v29, 0.0  ;;  %v5061_v55 = vadd.f32 %v5060_v13, %v11064_v56  ;;  %v5149_v42 = vpop.f32.mrf.mxu1  ;;  %v7754_v29 = vld [vmem:[%s12081_s3 + $0x68] sm:$0xf0]  ;;  %v8390_v46 = vld [vmem:[%s12081_s3 + $0xe4] sm:$0xf] }
 0x776   :  { %v7757_v5 = vor.u32 %v8374_v51, %v7754_v29  ;;  %v7821_v8 = vor.u32 %v8390_v46, %v7818_v58 }
 0x777   :  { %v11089_v35 = vpack.c.bf16 %v4471_v28, %v4467_v43  ;;  %v5150_v10 = vadd.f32 %v5149_v42, %v5061_v55  ;;  %7695 = vmatmul.msk.bf16.gmra.mxu3 %vm1923_vm0, %v12856_v26  ;;  %5099 = vmatmul.bf16.gmra.mxu0 %v12857_v7 }
 0x778   :  { %5188 = vmatmul.bf16.gmra.mxu1 %v12858_v20  ;;  %5403 = vmatpush.bf16.msra.mxu0 %v7757_v5 }
 0x779   :  { %5277 = vmatmul.bf16.gmra.mxu2 %v10626_v30  ;;  %5492 = vmatpush.bf16.msra.mxu1 %v7821_v8  ;;  %v12860_v8 = vld [vmem:[#allocation132_spill] sm:$0xff] }
 0x77a   :  { %v4389_v21 = vpop.f32.mrf.mxu3 }
 0x77b   :  { %v4390_v62 = vadd.f32 %v4389_v21, %v10746_v1  ;;  %v12859_v21 = vld [vmem:[#allocation102_spill] sm:$0xff] }
 0x77c   :  { %v5238_v13 = vpop.f32.mrf.mxu2  ;;  %v5062_v28 = vpop.f32.mrf.mxu0 }
 0x77d   :  { %v11109_v43 = vadd.f32 %v5238_v13, %v5150_v10  ;;  %v5063_v55 = vadd.f32 %v5062_v28, %v11064_v56  ;;  %v5151_v42 = vpop.f32.mrf.mxu1  ;;  %v4475_v46 = vmax.f32 %v4390_v62, 0.0  ;;  %v12862_v28 = vld [vmem:[#allocation13_spill] sm:$0xff] }
 0x77f   :  { %v5152_v26 = vadd.f32 %v5151_v42, %v5063_v55 }
 0x782   :  { %v4391_v30 = vpop.f32.mrf.mxu3 }
 0x783   :  { %v4392_v51 = vadd.f32 %v4391_v30, %v10753_v38  ;;  %v7904_v30 = vld [vmem:[%s12081_s3 + $0x190] sm:$0xf]  ;;  %v8413_v38 = vld [vmem:[%s12081_s3 + $0x194] sm:$0xf0] }
 0x784   :  { %v5240_v29 = vpop.f32.mrf.mxu2  ;;  %v5065_v7 = vpop.f32.mrf.mxu0 }
 0x785   :  { %v11113_v20 = vadd.f32 %v5240_v29, %v5152_v26  ;;  %v4479_v58 = vmax.f32 %v4392_v51, 0.0  ;;  %v5066_v1 = vadd.f32 %v5065_v7, %v11064_v56  ;;  %v5154_v5 = vpop.f32.mrf.mxu1  ;;  %v7905_v7 = vor.u32 %v8413_v38, %v7904_v30 }
 0x787   :  { %v5155_v10 = vadd.f32 %v5154_v5, %v5066_v1  ;;  %7696 = vmatmul.msk.bf16.gmra.mxu3 %vm1923_vm0, %v12859_v21  ;;  %5104 = vmatmul.bf16.gmra.mxu0 %v12860_v8  ;;  %v11119_v13 = vpack.c.bf16 %v4479_v58, %v4475_v46 }
 0x788   :  { %5193 = vmatmul.bf16.gmra.mxu1 %v12862_v28  ;;  %5319 = vmatpush.bf16.msra.mxu3 %v7905_v7 }
 0x789   :  { %12861 = vst [vmem:[#allocation31_spill] sm:$0xff] %v11119_v13  ;;  %5282 = vmatmul.bf16.gmra.mxu2 %v10640_v63 }
 0x78a   :  { %v4394_v62 = vpop.f32.mrf.mxu3 }
 0x78b   :  { %v4395_v55 = vadd.f32 %v4394_v62, %v10756_v31 }
 0x78c   :  { %v5243_v42 = vpop.f32.mrf.mxu2  ;;  %v5067_v51 = vpop.f32.mrf.mxu0 }
 0x78d   :  { %v11130_v26 = vadd.f32 %v5243_v42, %v5155_v10  ;;  %v5068_v29 = vadd.f32 %v5067_v51, %v11064_v56  ;;  %v5156_v46 = vpop.f32.mrf.mxu1  ;;  %v4483_v30 = vmax.f32 %v4395_v55, 0.0  ;;  %v12864_v10 = vld [vmem:[#allocation107_spill] sm:$0xff] }
 0x78e   :  { %v12865_v42 = vld [vmem:[#allocation71_spill] sm:$0xff] }
 0x78f   :  { %v5157_v58 = vadd.f32 %v5156_v46, %v5068_v29  ;;  %v12867_v29 = vld [vmem:[#allocation17_spill] sm:$0xff]  ;;  %v8388_v55 = vld [vmem:[%s12081_s3 + $0xd4] sm:$0xf] }
 0x792   :  { %v4396_v1 = vpop.f32.mrf.mxu3 }
 0x793   :  { %v4397_v5 = vadd.f32 %v4396_v1, %v10763_v2  ;;  %v8372_v2 = vld [vmem:[%s12081_s3 + $0x54] sm:$0xf] }
 0x794   :  { %v5245_v21 = vpop.f32.mrf.mxu2  ;;  %v5070_v28 = vpop.f32.mrf.mxu0 }
 0x795   :  { %v11134_v63 = vadd.f32 %v5245_v21, %v5157_v58  ;;  %v4487_v38 = vmax.f32 %v4397_v5, 0.0  ;;  %v5071_v31 = vadd.f32 %v5070_v28, %v11064_v56  ;;  %v5159_v62 = vpop.f32.mrf.mxu1  ;;  %v7746_v28 = vld [vmem:[%s12081_s3 + $0x58] sm:$0xf0] }
 0x796   :  { %v7749_v46 = vor.u32 %v8372_v2, %v7746_v28  ;;  %v7810_v58 = vld [vmem:[%s12081_s3 + $0xd8] sm:$0xf0] }
 0x797   :  { %12863 = vst [vmem:[#allocation33_spill] sm:$0xff] %v11134_v63  ;;  %v5160_v7 = vadd.f32 %v5159_v62, %v5071_v31  ;;  %7697 = vmatmul.msk.bf16.gmra.mxu3 %vm1923_vm0, %v12864_v10  ;;  %5109 = vmatmul.bf16.gmra.mxu0 %v12865_v42  ;;  %v11140_v51 = vpack.c.bf16 %v4487_v38, %v4483_v30 }
 0x798   :  { %5198 = vmatmul.bf16.gmra.mxu1 %v12867_v29  ;;  %v7813_v5 = vor.u32 %v8388_v55, %v7810_v58  ;;  %5404 = vmatpush.bf16.msra.mxu0 %v7749_v46 }
 0x799   :  { %12866 = vst [vmem:[#allocation25_spill] sm:$0xff] %v11140_v51  ;;  %5287 = vmatmul.bf16.gmra.mxu2 %v10654_v25 }
 0x79a   :  { %v4399_v1 = vpop.f32.mrf.mxu3  ;;  %5493 = vmatpush.bf16.msra.mxu1 %v7813_v5 }
 0x79b   :  { %v4400_v21 = vadd.f32 %v4399_v1, %v10778_v40  ;;  %v7890_v1 = vld [vmem:[%s12081_s3 + $0x178] sm:$0xf0] }
 0x79c   :  { %v5248_v30 = vpop.f32.mrf.mxu2  ;;  %v5072_v31 = vpop.f32.mrf.mxu0 }
 0x79d   :  { %v11157_v38 = vadd.f32 %v5248_v30, %v5160_v7  ;;  %v5073_v62 = vadd.f32 %v5072_v31, %v11064_v56  ;;  %v5161_v10 = vpop.f32.mrf.mxu1  ;;  %v4491_v55 = vmax.f32 %v4400_v21, 0.0  ;;  %v8408_v7 = vld [vmem:[%s12081_s3 + $0x174] sm:$0xf]  ;;  %v12868_v30 = vld [vmem:[#allocation112_spill] sm:$0xff]  ;;  %v12871_v21 = vld [vmem:[#allocation133_spill] sm:$0xff] }
 0x79e   :  { %v8411_v31 = vld [vmem:[%s12081_s3 + $0x184] sm:$0xf0] }
 0x79f   :  { %v5162_v25 = vadd.f32 %v5161_v10, %v5073_v62 }
 0x7a2   :  { %v4401_v29 = vpop.f32.mrf.mxu3 }
 0x7a3   :  { %v4402_v2 = vadd.f32 %v4401_v29, %v10791_v53  ;;  %v7893_v53 = vor.u32 %v8408_v7, %v7890_v1 }
 0x7a4   :  { %v5250_v28 = vpop.f32.mrf.mxu2  ;;  %v5075_v63 = vpop.f32.mrf.mxu0 }
 0x7a5   :  { %v11161_v42 = vadd.f32 %v5250_v28, %v5162_v25  ;;  %v4495_v58 = vmax.f32 %v4402_v2, 0.0  ;;  %v5076_v40 = vadd.f32 %v5075_v63, %v11064_v56  ;;  %v5164_v46 = vpop.f32.mrf.mxu1  ;;  %v12869_v25 = vld [vmem:[#allocation72_spill] sm:$0xff]  ;;  %v7896_v63 = vld [vmem:[%s12081_s3 + $0x180] sm:$0xf]  ;;  %5580 = vmatpush.bf16.msra.mxu2 %v7893_v53  ;;  %v8406_v2 = vld [vmem:[%s12081_s3 + $0x164] sm:$0xf] }
 0x7a6   :  { %v7897_v62 = vor.u32 %v8411_v31, %v7896_v63  ;;  %v7882_v28 = vld [vmem:[%s12081_s3 + $0x168] sm:$0xf0]  ;;  %v8404_v53 = vld [vmem:[%s12081_s3 + $0x154] sm:$0xf]  ;;  %v7874_v63 = vld [vmem:[%s12081_s3 + $0x158] sm:$0xf0] }
 0x7a7   :  { %v5165_v5 = vadd.f32 %v5164_v46, %v5076_v40  ;;  %7698 = vmatmul.msk.bf16.gmra.mxu3 %vm1923_vm0, %v12868_v30  ;;  %5114 = vmatmul.bf16.gmra.mxu0 %v12869_v25  ;;  %v11173_v29 = vpack.c.bf16 %v4495_v58, %v4491_v55  ;;  %v7885_v40 = vor.u32 %v8406_v2, %v7882_v28  ;;  %v8386_v2 = vld [vmem:[%s12081_s3 + $0xc4] sm:$0xf] }
 0x7a8   :  { %5203 = vmatmul.bf16.gmra.mxu1 %v12871_v21  ;;  %5320 = vmatpush.bf16.msra.mxu3 %v7897_v62 }
 0x7a9   :  { %12870 = vst [vmem:[#allocation135_spill] sm:$0xff] %v11173_v29  ;;  %5292 = vmatmul.bf16.gmra.mxu2 %v10668_v37  ;;  %v8368_v37 = vld [vmem:[%s12081_s3 + $0x34] sm:$0xf] }
 0x7aa   :  { %v4404_v10 = vpop.f32.mrf.mxu3  ;;  %5581 = vmatpush.bf16.msra.mxu2 %v7885_v40 }
 0x7ab   :  { %v4405_v55 = vadd.f32 %v4404_v10, %v10806_v18  ;;  %v7877_v18 = vor.u32 %v8404_v53, %v7874_v63  ;;  %v7738_v10 = vld [vmem:[%s12081_s3 + $0x48] sm:$0xf0] }
 0x7ac   :  { %v5253_v58 = vpop.f32.mrf.mxu2  ;;  %v5077_v7 = vpop.f32.mrf.mxu0 }
 0x7ad   :  { %v11190_v46 = vadd.f32 %v5253_v58, %v5165_v5  ;;  %v5078_v1 = vadd.f32 %v5077_v7, %v11064_v56  ;;  %v5166_v30 = vpop.f32.mrf.mxu1  ;;  %v8370_v5 = vld [vmem:[%s12081_s3 + $0x44] sm:$0xf]  ;;  %v7802_v7 = vld [vmem:[%s12081_s3 + $0xc8] sm:$0xf0] }
 0x7ae   :  { %5582 = vmatpush.bf16.msra.mxu2 %v7877_v18  ;;  %v7741_v40 = vor.u32 %v8370_v5, %v7738_v10  ;;  %v7805_v18 = vor.u32 %v8386_v2, %v7802_v7  ;;  %v8384_v2 = vld [vmem:[%s12081_s3 + $0xb4] sm:$0xf] }
 0x7af   :  { %12872 = vst [vmem:[#allocation92_spill] sm:$0xff] %v11190_v46  ;;  %v5167_v31 = vadd.f32 %v5166_v30, %v5078_v1  ;;  %v8402_v1 = vld [vmem:[%s12081_s3 + $0x144] sm:$0xf]  ;;  %v7866_v30 = vld [vmem:[%s12081_s3 + $0x148] sm:$0xf0] }
 0x7b0   :  { %v7869_v46 = vor.u32 %v8402_v1, %v7866_v30  ;;  %5405 = vmatpush.bf16.msra.mxu0 %v7741_v40  ;;  %5494 = vmatpush.bf16.msra.mxu1 %v7805_v18  ;;  %v8400_v7 = vld [vmem:[%s12081_s3 + $0x134] sm:$0xf]  ;;  %v7858_v1 = vld [vmem:[%s12081_s3 + $0x138] sm:$0xf0] }
 0x7b2   :  { %v4406_v62 = vpop.f32.mrf.mxu3  ;;  %5583 = vmatpush.bf16.msra.mxu2 %v7869_v46  ;;  %v7794_v46 = vld [vmem:[%s12081_s3 + $0xb8] sm:$0xf0] }
 0x7b3   :  { %v4407_v28 = vadd.f32 %v4406_v62, %v10849_v4  ;;  %v4499_v4 = vmax.f32 %v4405_v55, 0.0  ;;  %v7797_v18 = vor.u32 %v8384_v2, %v7794_v46  ;;  %v8398_v46 = vld [vmem:[%s12081_s3 + $0x124] sm:$0xf] }
 0x7b4   :  { %v5255_v58 = vpop.f32.mrf.mxu2  ;;  %v5080_v63 = vpop.f32.mrf.mxu0 }
 0x7b5   :  { %v11218_v53 = vadd.f32 %v5255_v58, %v5167_v31  ;;  %v4503_v62 = vmax.f32 %v4407_v28, 0.0  ;;  %v5081_v5 = vadd.f32 %v5080_v63, %v11064_v56  ;;  %v5169_v10 = vpop.f32.mrf.mxu1  ;;  %v7730_v31 = vld [vmem:[%s12081_s3 + $0x38] sm:$0xf0]  ;;  %v12874_v28 = vld [vmem:[#allocation117_spill] sm:$0xff]  ;;  %v12877_v63 = vld [vmem:[#allocation134_spill] sm:$0xff]  ;;  %5495 = vmatpush.bf16.msra.mxu1 %v7797_v18 }
 0x7b6   :  { %v12875_v58 = vld [vmem:[#allocation77_spill] sm:$0xff]  ;;  %v7733_v40 = vor.u32 %v8368_v37, %v7730_v31  ;;  %v7861_v37 = vor.u32 %v8400_v7, %v7858_v1  ;;  %v7722_v31 = vld [vmem:[%s12081_s3 + $0x28] sm:$0xf0] }
 0x7b7   :  { %12873 = vst [vmem:[#allocation35_spill] sm:$0xff] %v11218_v53  ;;  %v5170_v55 = vadd.f32 %v5169_v10, %v5081_v5  ;;  %7699 = vmatmul.msk.bf16.gmra.mxu3 %vm1923_vm0, %v12874_v28  ;;  %5119 = vmatmul.bf16.gmra.mxu0 %v12875_v58  ;;  %v11242_v30 = vpack.c.bf16 %v4503_v62, %v4499_v4  ;;  %v8366_v10 = vld [vmem:[%s12081_s3 + $0x24] sm:$0xf]  ;;  %v7850_v7 = vld [vmem:[%s12081_s3 + $0x128] sm:$0xf0] }
 0x7b8   :  { %5208 = vmatmul.bf16.gmra.mxu1 %v12877_v63  ;;  %5406 = vmatpush.bf16.msra.mxu0 %v7733_v40  ;;  %v8382_v4 = vld [vmem:[%s12081_s3 + $0xa4] sm:$0xf]  ;;  %v7725_v28 = vor.u32 %v8366_v10, %v7722_v31  ;;  %v7786_v40 = vld [vmem:[%s12081_s3 + $0xa8] sm:$0xf0]  ;;  %v8364_v10 = vld [vmem:[%s12081_s3 + $0x14] sm:$0xf] }
 0x7b9   :  { %12876 = vst [vmem:[#allocation37_spill] sm:$0xff] %v11242_v30  ;;  %5297 = vmatmul.bf16.gmra.mxu2 %v10682_v47  ;;  %v7853_v47 = vor.u32 %v8398_v46, %v7850_v7  ;;  %v7714_v31 = vld [vmem:[%s12081_s3 + $0x18] sm:$0xf0]  ;;  %v12879_v58 = vld [vmem:[#allocation78_spill] sm:$0xff] }
 0x7ba   :  { %v4409_v5 = vpop.f32.mrf.mxu3  ;;  %5584 = vmatpush.bf16.msra.mxu2 %v7861_v37  ;;  %v7789_v37 = vor.u32 %v8382_v4, %v7786_v40  ;;  %v7842_v40 = vld [vmem:[%s12081_s3 + $0x118] sm:$0xf0] }
 0x7bb   :  { %v4410_v62 = vadd.f32 %v4409_v5, %v10888_v6 }
 0x7bc   :  { %v5258_v2 = vpop.f32.mrf.mxu2  ;;  %v5082_v18 = vpop.f32.mrf.mxu0  ;;  %5407 = vmatpush.bf16.msra.mxu0 %v7725_v28  ;;  %5496 = vmatpush.bf16.msra.mxu1 %v7789_v37  ;;  %v7778_v28 = vld [vmem:[%s12081_s3 + $0x98] sm:$0xf0]  ;;  %v8362_v37 = vld [vmem:[%s12081_s3 + $0x4] sm:$0xf] }
 0x7bd   :  { %v11265_v1 = vadd.f32 %v5258_v2, %v5170_v55  ;;  %v5083_v6 = vadd.f32 %v5082_v18, %v11064_v56  ;;  %v5171_v5 = vpop.f32.mrf.mxu1  ;;  %v8380_v55 = vld [vmem:[%s12081_s3 + $0x94] sm:$0xf]  ;;  %v7717_v2 = vor.u32 %v8364_v10, %v7714_v31 }
 0x7be   :  { %5585 = vmatpush.bf16.msra.mxu2 %v7853_v47  ;;  %v8396_v47 = vld [vmem:[%s12081_s3 + $0x114] sm:$0xf]  ;;  %v7781_v46 = vor.u32 %v8380_v55, %v7778_v28  ;;  %v8394_v28 = vld [vmem:[%s12081_s3 + $0x104] sm:$0xf] }
 0x7bf   :  { %12878 = vst [vmem:[#allocation96_spill] sm:$0xff] %v11265_v1  ;;  %v5172_v4 = vadd.f32 %v5171_v5, %v5083_v6  ;;  %v7845_v7 = vor.u32 %v8396_v47, %v7842_v40  ;;  %v7706_v6 = vld [vmem:[%s12081_s3 + $0x8] sm:$0xf0]  ;;  %v8378_v5 = vld [vmem:[%s12081_s3 + $0x84] sm:$0xf] }
 0x7c0   :  { %5408 = vmatpush.bf16.msra.mxu0 %v7717_v2  ;;  %5497 = vmatpush.bf16.msra.mxu1 %v7781_v46  ;;  %v7709_v55 = vor.u32 %v8362_v37, %v7706_v6  ;;  %v7770_v2 = vld [vmem:[%s12081_s3 + $0x88] sm:$0xf0] }
 0x7c1   :  { %v7834_v47 = vld [vmem:[%s12081_s3 + $0x108] sm:$0xf0] }
 0x7c2   :  { %v4411_v18 = vpop.f32.mrf.mxu3  ;;  %5586 = vmatpush.bf16.msra.mxu2 %v7845_v7  ;;  %v7773_v7 = vor.u32 %v8378_v5, %v7770_v2  ;;  %v7837_v1 = vor.u32 %v8394_v28, %v7834_v47  ;;  %v12881_v5 = vld [vmem:[#allocation15_spill] sm:$0xff] }
 0x7c3   :  { %v4412_v10 = vadd.f32 %v4411_v18, %v10913_v54  ;;  %v4507_v54 = vmax.f32 %v4410_v62, 0.0  ;;  %v8424_v62 = vld [vmem:[%s12081_s3 + $0x1f4] sm:$0xf] }
 0x7c4   :  { %v5260_v31 = vpop.f32.mrf.mxu2  ;;  %v5085_v46 = vpop.f32.mrf.mxu0  ;;  %5409 = vmatpush.bf16.msra.mxu0 %v7709_v55  ;;  %5498 = vmatpush.bf16.msra.mxu1 %v7773_v7 }
 0x7c5   :  { %v11305_v40 = vadd.f32 %v5260_v31, %v5172_v4  ;;  %v4511_v18 = vmax.f32 %v4412_v10, 0.0  ;;  %v5086_v37 = vadd.f32 %v5085_v46, %v11064_v56  ;;  %v5174_v6 = vpop.f32.mrf.mxu1  ;;  %v12880_v4 = vld [vmem:[#allocation21_spill] sm:$0xff] }
 0x7c6   :  { %5587 = vmatpush.bf16.msra.mxu2 %v7837_v1  ;;  %v7954_v1 = vld [vmem:[%s12081_s3 + $0x1f8] sm:$0xf0] }
 0x7c7   :  { %v5175_v63 = vadd.f32 %v5174_v6, %v5086_v37  ;;  %7700 = vmatmul.msk.bf16.gmra.mxu3 %vm1923_vm0, %v12749_v39  ;;  %5124 = vmatmul.bf16.gmra.mxu0 %v12879_v58  ;;  %v11311_v53 = vpack.c.bf16 %v4511_v18, %v4507_v54  ;;  %v7957_v10 = vor.u32 %v8424_v62, %v7954_v1 }
 0x7c8   :  { %5213 = vmatmul.bf16.gmra.mxu1 %v12880_v4 }
 0x7c9   :  { %5302 = vmatmul.bf16.gmra.mxu2 %v12881_v5  ;;  %5669 = vmatpush.bf16.msrb.mxu3 %v7957_v10 }
 0x7ca   :  { %v4414_v31 = vpop.f32.mrf.mxu3 }
 0x7cb   :  { %v4415_v39 = vadd.f32 %v4414_v31, %v10922_v12 }
 0x7cc   :  { %v5263_v55 = vpop.f32.mrf.mxu2  ;;  %v5087_v28 = vpop.f32.mrf.mxu0 }
 0x7cd   :  { %v11322_v2 = vadd.f32 %v5263_v55, %v5175_v63  ;;  %v5088_v47 = vadd.f32 %v5087_v28, %v11064_v56  ;;  %v5176_v46 = vpop.f32.mrf.mxu1  ;;  %v4515_v62 = vmax.f32 %v4415_v39, 0.0  ;;  %v12883_v63 = vld [vmem:[#allocation127_spill] sm:$0xff] }
 0x7ce   :  { %v12884_v55 = vld [vmem:[#allocation83_spill] sm:$0xff] }
 0x7cf   :  { %v5177_v7 = vadd.f32 %v5176_v46, %v5088_v47  ;;  %v12885_v47 = vld [vmem:[#allocation136_spill] sm:$0xff] }
 0x7d2   :  { %v4416_v54 = vpop.f32.mrf.mxu3 }
 0x7d3   :  { %v4417_v18 = vadd.f32 %v4416_v54, %v10929_v60  ;;  %v12886_v60 = vld [vmem:[#allocation69_spill] sm:$0xff] }
 0x7d4   :  { %v5265_v37 = vpop.f32.mrf.mxu2  ;;  %v5090_v5 = vpop.f32.mrf.mxu0 }
 0x7d5   :  { %v11326_v6 = vadd.f32 %v5265_v37, %v5177_v7  ;;  %v4519_v1 = vmax.f32 %v4417_v18, 0.0  ;;  %v5091_v12 = vadd.f32 %v5090_v5, %v11064_v56  ;;  %v5179_v31 = vpop.f32.mrf.mxu1 }
 0x7d7   :  { %12882 = vst [vmem:[#allocation39_spill] sm:$0xff] %v11326_v6  ;;  %v5180_v10 = vadd.f32 %v5179_v31, %v5091_v12  ;;  %7701 = vmatmul.msk.bf16.gmra.mxu3 %vm1923_vm0, %v12883_v63  ;;  %5129 = vmatmul.bf16.gmra.mxu0 %v12884_v55  ;;  %v11332_v28 = vpack.c.bf16 %v4519_v1, %v4515_v62 }
 0x7d8   :  { %5218 = vmatmul.bf16.gmra.mxu1 %v12885_v47 }
 0x7d9   :  { %5307 = vmatmul.bf16.gmra.mxu2 %v12886_v60 }
 0x7da   :  { %v4419_v46 = vpop.f32.mrf.mxu3 }
 0x7db   :  { %v4420_v7 = vadd.f32 %v4419_v46, %v10932_v24 }
 0x7dc   :  { %v5268_v39 = vpop.f32.mrf.mxu2  ;;  %v5092_v5 = vpop.f32.mrf.mxu0 }
 0x7dd   :  { %v11337_v54 = vadd.f32 %v5268_v39, %v5180_v10  ;;  %v5093_v18 = vadd.f32 %v5092_v5, %v11064_v56  ;;  %v5181_v37 = vpop.f32.mrf.mxu1  ;;  %v4523_v55 = vmax.f32 %v4420_v7, 0.0  ;;  %v12887_v39 = vld [vmem:[#allocation140_spill] sm:$0xff]  ;;  %v12888_v5 = vld [vmem:[#allocation138_spill] sm:$0xff] }
 0x7df   :  { %v5182_v12 = vadd.f32 %v5181_v37, %v5093_v18 }
 0x7e2   :  { %v4421_v31 = vpop.f32.mrf.mxu3 }
 0x7e3   :  { %v4422_v63 = vadd.f32 %v4421_v31, %v10940_v27  ;;  %v8422_v27 = vld [vmem:[%s12081_s3 + $0x1e4] sm:$0xf] }
 0x7e4   :  { %v5270_v62 = vpop.f32.mrf.mxu2  ;;  %v5095_v47 = vpop.f32.mrf.mxu0 }
 0x7e5   :  { %v11341_v1 = vadd.f32 %v5270_v62, %v5182_v12  ;;  %v4527_v60 = vmax.f32 %v4422_v63, 0.0  ;;  %v5096_v6 = vadd.f32 %v5095_v47, %v11064_v56  ;;  %v5184_v24 = vpop.f32.mrf.mxu1  ;;  %v7946_v47 = vld [vmem:[%s12081_s3 + $0x1e8] sm:$0xf0] }
 0x7e6   :  { %v7949_v7 = vor.u32 %v8422_v27, %v7946_v47 }
 0x7e7   :  { %v5185_v46 = vadd.f32 %v5184_v24, %v5096_v6  ;;  %5321 = vmatmul.bf16.vlgmr.msra.gmra.mxu3 %v11089_v35  ;;  %5410 = vmatmul.bf16.vlgmr.msra.gmra.mxu0 %v12820_v11  ;;  %v11346_v10 = vpack.c.bf16 %v4527_v60, %v4523_v55 }
 0x7e8   :  { %5499 = vmatmul.bf16.vlgmr.msra.gmra.mxu1 %v12887_v39  ;;  %5670 = vmatpush.bf16.msrb.mxu3 %v7949_v7 }
 0x7e9   :  { %5588 = vmatmul.bf16.vlgmr.msra.gmra.mxu2 %v12888_v5 }
 0x7ea   :  { %v4424_v6 = vpop.f32.mrf.mxu3 }
 0x7eb   :  { %v4425_v18 = vadd.f32 %v4424_v6, %v10949_v59 }
 0x7ec   :  { %v5273_v37 = vpop.f32.mrf.mxu2  ;;  %v5097_v55 = vpop.f32.mrf.mxu0 }
 0x7ed   :  { %v11357_v11 = vadd.f32 %v5273_v37, %v5185_v46  ;;  %v5098_v60 = vadd.f32 %v5097_v55, %v11064_v56  ;;  %v5186_v12 = vpop.f32.mrf.mxu1  ;;  %v4531_v27 = vmax.f32 %v4425_v18, 0.0  ;;  %v12889_v37 = vld [vmem:[#allocation139_spill] sm:$0xff] }
 0x7ee   :  { %v12890_v55 = vld [vmem:[#allocation19_spill] sm:$0xff] }
 0x7ef   :  { %v5187_v31 = vadd.f32 %v5186_v12, %v5098_v60 }
 0x7f2   :  { %v4426_v63 = vpop.f32.mrf.mxu3 }
 0x7f3   :  { %v4427_v62 = vadd.f32 %v4426_v63, %v10957_v23 }
 0x7f4   :  { %v5275_v24 = vpop.f32.mrf.mxu2  ;;  %v5100_v5 = vpop.f32.mrf.mxu0 }
 0x7f5   :  { %v11361_v39 = vadd.f32 %v5275_v24, %v5187_v31  ;;  %v4535_v47 = vmax.f32 %v4427_v62, 0.0  ;;  %v5101_v59 = vadd.f32 %v5100_v5, %v11064_v56  ;;  %v5189_v6 = vpop.f32.mrf.mxu1 }
 0x7f7   :  { %v5190_v7 = vadd.f32 %v5189_v6, %v5101_v59  ;;  %5326 = vmatmul.bf16.gmra.mxu3 %v11119_v13  ;;  %5415 = vmatmul.bf16.gmra.mxu0 %v12824_v15  ;;  %v11366_v46 = vpack.c.bf16 %v4535_v47, %v4531_v27  ;;  %v12891_v59 = vld [vmem:[#allocation75_spill] sm:$0xff] }
 0x7f8   :  { %5504 = vmatmul.bf16.gmra.mxu1 %v12825_v57 }
 0x7f9   :  { %5593 = vmatmul.bf16.gmra.mxu2 %v12889_v37 }
 0x7fa   :  { %v4429_v23 = vpop.f32.mrf.mxu3 }
 0x7fb   :  { %v4430_v60 = vadd.f32 %v4429_v23, %v12890_v55 }
 0x7fc   :  { %v5278_v12 = vpop.f32.mrf.mxu2  ;;  %v5102_v31 = vpop.f32.mrf.mxu0 }
 0x7fd   :  { %v11371_v18 = vadd.f32 %v5278_v12, %v5190_v7  ;;  %v5103_v63 = vadd.f32 %v5102_v31, %v11064_v56  ;;  %v5191_v62 = vpop.f32.mrf.mxu1  ;;  %v4539_v6 = vmax.f32 %v4430_v60, 0.0  ;;  %v12892_v7 = vld [vmem:[#allocation108_spill] sm:$0xff]  ;;  %v12893_v31 = vld [vmem:[#allocation142_spill] sm:$0xff] }
 0x7fe   :  { %v7938_v60 = vld [vmem:[%s12081_s3 + $0x1d8] sm:$0xf0] }
 0x7ff   :  { %v5192_v24 = vadd.f32 %v5191_v62, %v5103_v63  ;;  %v12894_v63 = vld [vmem:[#allocation45_spill] sm:$0xff]  ;;  %v8420_v62 = vld [vmem:[%s12081_s3 + $0x1d4] sm:$0xf] }
 0x802   :  { %v4431_v5 = vpop.f32.mrf.mxu3 }
 0x803   :  { %v4432_v15 = vadd.f32 %v4431_v5, %v12891_v59 }
 0x804   :  { %v5280_v27 = vpop.f32.mrf.mxu2  ;;  %v5105_v57 = vpop.f32.mrf.mxu0 }
 0x805   :  { %v11375_v47 = vadd.f32 %v5280_v27, %v5192_v24  ;;  %v4543_v37 = vmax.f32 %v4432_v15, 0.0  ;;  %v5106_v13 = vadd.f32 %v5105_v57, %v11064_v56  ;;  %v5194_v23 = vpop.f32.mrf.mxu1  ;;  %v7941_v24 = vor.u32 %v8420_v62, %v7938_v60 }
 0x807   :  { %v5195_v55 = vadd.f32 %v5194_v23, %v5106_v13  ;;  %5331 = vmatmul.bf16.gmra.mxu3 %v11140_v51  ;;  %5420 = vmatmul.bf16.gmra.mxu0 %v12892_v7  ;;  %v11380_v12 = vpack.c.bf16 %v4543_v37, %v4539_v6 }
 0x808   :  { %5509 = vmatmul.bf16.gmra.mxu1 %v12893_v31  ;;  %5671 = vmatpush.bf16.msrb.mxu3 %v7941_v24 }
 0x809   :  { %5598 = vmatmul.bf16.gmra.mxu2 %v12894_v63 }
 0x80a   :  { %v4434_v13 = vpop.f32.mrf.mxu3 }
 0x80b   :  { %v4435_v5 = vadd.f32 %v4434_v13, %v10977_v14 }
 0x80c   :  { %v5283_v59 = vpop.f32.mrf.mxu2  ;;  %v5107_v27 = vpop.f32.mrf.mxu0 }
 0x80d   :  { %v11391_v15 = vadd.f32 %v5283_v59, %v5195_v55  ;;  %v5108_v57 = vadd.f32 %v5107_v27, %v11064_v56  ;;  %v5196_v6 = vpop.f32.mrf.mxu1  ;;  %v4547_v62 = vmax.f32 %v4435_v5, 0.0  ;;  %v12895_v59 = vld [vmem:[#allocation145_spill] sm:$0xff]  ;;  %v12896_v27 = vld [vmem:[#allocation23_spill] sm:$0xff] }
 0x80f   :  { %v5197_v37 = vadd.f32 %v5196_v6, %v5108_v57 }
 0x812   :  { %v4436_v23 = vpop.f32.mrf.mxu3 }
 0x813   :  { %v4437_v7 = vadd.f32 %v4436_v23, %v10985_v9 }
 0x814   :  { %v5285_v31 = vpop.f32.mrf.mxu2  ;;  %v5110_v51 = vpop.f32.mrf.mxu0 }
 0x815   :  { %v11395_v63 = vadd.f32 %v5285_v31, %v5197_v37  ;;  %v4551_v60 = vmax.f32 %v4437_v7, 0.0  ;;  %v5111_v14 = vadd.f32 %v5110_v51, %v11064_v56  ;;  %v5199_v13 = vpop.f32.mrf.mxu1 }
 0x817   :  { %v5200_v24 = vadd.f32 %v5199_v13, %v5111_v14  ;;  %5336 = vmatmul.bf16.gmra.mxu3 %v11173_v29  ;;  %5425 = vmatmul.bf16.gmra.mxu0 %v12834_v0  ;;  %v11400_v55 = vpack.c.bf16 %v4551_v60, %v4547_v62  ;;  %v12897_v14 = vld [vmem:[#allocation81_spill] sm:$0xff] }
 0x818   :  { %5514 = vmatmul.bf16.gmra.mxu1 %v12835_v32 }
 0x819   :  { %5603 = vmatmul.bf16.gmra.mxu2 %v12895_v59 }
 0x81a   :  { %v4439_v9 = vpop.f32.mrf.mxu3 }
 0x81b   :  { %v4440_v57 = vadd.f32 %v4439_v9, %v12896_v27 }
 0x81c   :  { %v5288_v6 = vpop.f32.mrf.mxu2  ;;  %v5112_v37 = vpop.f32.mrf.mxu0 }
 0x81d   :  { %v11405_v5 = vadd.f32 %v5288_v6, %v5200_v24  ;;  %v5113_v51 = vadd.f32 %v5112_v37, %v11064_v56  ;;  %v5201_v23 = vpop.f32.mrf.mxu1  ;;  %v4555_v13 = vmax.f32 %v4440_v57, 0.0  ;;  %v12898_v24 = vld [vmem:[#allocation118_spill] sm:$0xff] }
 0x81e   :  { %v12900_v37 = vld [vmem:[#allocation146_spill] sm:$0xff] }
 0x81f   :  { %v5202_v7 = vadd.f32 %v5201_v23, %v5113_v51  ;;  %v12901_v51 = vld [vmem:[#allocation32_spill] sm:$0xff]  ;;  %v8418_v23 = vld [vmem:[%s12081_s3 + $0x1c4] sm:$0xf]  ;;  %v7930_v57 = vld [vmem:[%s12081_s3 + $0x1c8] sm:$0xf0] }
 0x822   :  { %v4441_v31 = vpop.f32.mrf.mxu3 }
 0x823   :  { %v4442_v0 = vadd.f32 %v4441_v31, %v12897_v14 }
 0x824   :  { %v5290_v62 = vpop.f32.mrf.mxu2  ;;  %v5115_v32 = vpop.f32.mrf.mxu0 }
 0x825   :  { %v11409_v60 = vadd.f32 %v5290_v62, %v5202_v7  ;;  %v4559_v59 = vmax.f32 %v4442_v0, 0.0  ;;  %v5116_v29 = vadd.f32 %v5115_v32, %v11064_v56  ;;  %v5204_v9 = vpop.f32.mrf.mxu1  ;;  %v7933_v7 = vor.u32 %v8418_v23, %v7930_v57 }
 0x827   :  { %v5205_v27 = vadd.f32 %v5204_v9, %v5116_v29  ;;  %5341 = vmatmul.bf16.gmra.mxu3 %v11242_v30  ;;  %5430 = vmatmul.bf16.gmra.mxu0 %v12898_v24  ;;  %v11414_v6 = vpack.c.bf16 %v4559_v59, %v4555_v13 }
 0x828   :  { %5519 = vmatmul.bf16.gmra.mxu1 %v12900_v37  ;;  %5672 = vmatpush.bf16.msrb.mxu3 %v7933_v7 }
 0x829   :  { %12899 = vst [vmem:[#allocation101_spill] sm:$0xff] %v11414_v6  ;;  %5608 = vmatmul.bf16.gmra.mxu2 %v12901_v51 }
 0x82a   :  { %v4444_v29 = vpop.f32.mrf.mxu3 }
 0x82b   :  { %v4445_v31 = vadd.f32 %v4444_v29, %v11005_v3 }
 0x82c   :  { %v5293_v14 = vpop.f32.mrf.mxu2  ;;  %v5117_v62 = vpop.f32.mrf.mxu0 }
 0x82d   :  { %v11425_v0 = vadd.f32 %v5293_v14, %v5205_v27  ;;  %v5118_v32 = vadd.f32 %v5117_v62, %v11064_v56  ;;  %v5206_v13 = vpop.f32.mrf.mxu1  ;;  %v4563_v23 = vmax.f32 %v4445_v31, 0.0 }
 0x82f   :  { %v5207_v59 = vadd.f32 %v5206_v13, %v5118_v32 }
 0x832   :  { %v4446_v9 = vpop.f32.mrf.mxu3 }
 0x833   :  { %v4447_v24 = vadd.f32 %v4446_v9, %v11013_v41 }
 0x834   :  { %v5295_v37 = vpop.f32.mrf.mxu2  ;;  %v5120_v30 = vpop.f32.mrf.mxu0 }
 0x835   :  { %v11429_v51 = vadd.f32 %v5295_v37, %v5207_v59  ;;  %v4567_v57 = vmax.f32 %v4447_v24, 0.0  ;;  %v5121_v3 = vadd.f32 %v5120_v30, %v11064_v56  ;;  %v5209_v29 = vpop.f32.mrf.mxu1  ;;  %v12902_v24 = vld [vmem:[#allocation27_spill] sm:$0xff] }
 0x837   :  { %v5210_v7 = vadd.f32 %v5209_v29, %v5121_v3  ;;  %5346 = vmatmul.bf16.gmra.mxu3 %v11311_v53  ;;  %5435 = vmatmul.bf16.gmra.mxu0 %v12844_v44  ;;  %v11434_v27 = vpack.c.bf16 %v4567_v57, %v4563_v23 }
 0x838   :  { %5524 = vmatmul.bf16.gmra.mxu1 %v12845_v19 }
 0x839   :  { %5613 = vmatmul.bf16.gmra.mxu2 %v10569_v34 }
 0x83a   :  { %v4449_v41 = vpop.f32.mrf.mxu3 }
 0x83b   :  { %v4450_v14 = vadd.f32 %v4449_v41, %v11016_v48 }
 0x83c   :  { %v5298_v62 = vpop.f32.mrf.mxu2  ;;  %v5122_v32 = vpop.f32.mrf.mxu0 }
 0x83d   :  { %v11439_v31 = vadd.f32 %v5298_v62, %v5210_v7  ;;  %v5123_v30 = vadd.f32 %v5122_v32, %v11064_v56  ;;  %v5211_v13 = vpop.f32.mrf.mxu1  ;;  %v4571_v57 = vmax.f32 %v4450_v14, 0.0  ;;  %v12903_v7 = vld [vmem:[#allocation128_spill] sm:$0xff]  ;;  %v12905_v32 = vld [vmem:[#allocation53_spill] sm:$0xff] }
 0x83e   :  { %v12904_v62 = vld [vmem:[#allocation148_spill] sm:$0xff] }
 0x83f   :  { %v5212_v59 = vadd.f32 %v5211_v13, %v5123_v30  ;;  %v8416_v30 = vld [vmem:[%s12081_s3 + $0x1b4] sm:$0xf]  ;;  %v7922_v14 = vld [vmem:[%s12081_s3 + $0x1b8] sm:$0xf0] }
 0x840   :  { %v7925_v13 = vor.u32 %v8416_v30, %v7922_v14 }
 0x842   :  { %v4451_v9 = vpop.f32.mrf.mxu3  ;;  %5673 = vmatpush.bf16.msrb.mxu3 %v7925_v13 }
 0x843   :  { %v4452_v44 = vadd.f32 %v4451_v9, %v12902_v24 }
 0x844   :  { %v5300_v37 = vpop.f32.mrf.mxu2  ;;  %v5125_v19 = vpop.f32.mrf.mxu0 }
 0x845   :  { %v11443_v23 = vadd.f32 %v5300_v37, %v5212_v59  ;;  %v4575_v34 = vmax.f32 %v4452_v44, 0.0  ;;  %v5126_v3 = vadd.f32 %v5125_v19, %v11064_v56  ;;  %v5214_v48 = vpop.f32.mrf.mxu1 }
 0x847   :  { %v5215_v29 = vadd.f32 %v5214_v48, %v5126_v3  ;;  %5351 = vmatmul.bf16.gmra.mxu3 %v11332_v28  ;;  %5440 = vmatmul.bf16.gmra.mxu0 %v12903_v7  ;;  %v11448_v41 = vpack.c.bf16 %v4575_v34, %v4571_v57 }
 0x848   :  { %5529 = vmatmul.bf16.gmra.mxu1 %v12904_v62 }
 0x849   :  { %5618 = vmatmul.bf16.gmra.mxu2 %v12905_v32 }
 0x84a   :  { %v4454_v59 = vpop.f32.mrf.mxu3 }
 0x84b   :  { %v4455_v9 = vadd.f32 %v4454_v59, %v11033_v36 }
 0x84c   :  { %v5303_v24 = vpop.f32.mrf.mxu2  ;;  %v5127_v37 = vpop.f32.mrf.mxu0 }
 0x84d   :  { %v11459_v44 = vadd.f32 %v5303_v24, %v5215_v29  ;;  %v5128_v19 = vadd.f32 %v5127_v37, %v11064_v56  ;;  %v5216_v57 = vpop.f32.mrf.mxu1  ;;  %v4579_v30 = vmax.f32 %v4455_v9, 0.0  ;;  %v8441_v9 = vld [vmem:[%s12083_s5 + $0x78] sm:$0xff] }
 0x84e   :  { %6075 = vmatpush.bf16.msrb.mxu1 %v8441_v9 }
 0x84f   :  { %v5217_v34 = vadd.f32 %v5216_v57, %v5128_v19 }
 0x852   :  { %v4456_v3 = vpop.f32.mrf.mxu3 }
 0x853   :  { %v4457_v48 = vadd.f32 %v4456_v3, %v11050_v17  ;;  %v8433_v17 = vld [vmem:[%s12083_s5 + $0x38] sm:$0xff]  ;;  %v11483_v3 = vperm.slane %v11059_v16, 1 }
 0x854   :  { %v5305_v7 = vpop.f32.mrf.mxu2  ;;  %v5130_v32 = vpop.f32.mrf.mxu0  ;;  %5986 = vmatpush.bf16.msrb.mxu0 %v8433_v17  ;;  %v12909_v16 = vld [vmem:[#allocation88_spill] sm:$0xff] }
 0x855   :  { %v11463_v62 = vadd.f32 %v5305_v7, %v5217_v34  ;;  %v4583_v14 = vmax.f32 %v4457_v48, 0.0  ;;  %v5131_v36 = vadd.f32 %v5130_v32, %v11064_v56  ;;  %v5219_v59 = vpop.f32.mrf.mxu1 }
 0x857   :  { %v5220_v13 = vadd.f32 %v5219_v59, %v5131_v36  ;;  %5356 = vmatmul.bf16.gmra.mxu3 %v11346_v10  ;;  %5445 = vmatmul.bf16.gmra.mxu0 %v12851_v50  ;;  %v11468_v29 = vpack.c.bf16 %v4583_v14, %v4579_v30 }
 0x858   :  { %5534 = vmatmul.bf16.gmra.mxu1 %v12852_v33 }
 0x859   :  { %12906 = vst [vmem:[#allocation43_spill] sm:$0xff] %v11468_v29  ;;  %5623 = vmatmul.bf16.gmra.mxu2 %v10598_v52 }
 0x85a   :  { %v4459_v24 = vpop.f32.mrf.mxu3 }
 0x85b   :  { %v4460_v37 = vadd.f32 %v4459_v24, %v11061_v22  ;;  %v12910_v24 = vld [vmem:[#allocation5_spill] sm:$0xff] }
 0x85c   :  { %v5308_v50 = vpop.f32.mrf.mxu2  ;;  %v5132_v57 = vpop.f32.mrf.mxu0 }
 0x85d   :  { %v11479_v19 = vadd.f32 %v5308_v50, %v5220_v13  ;;  %v5133_v33 = vadd.f32 %v5132_v57, %v11064_v56  ;;  %v5221_v52 = vpop.f32.mrf.mxu1  ;;  %v4587_v36 = vmax.f32 %v4460_v37, 0.0  ;;  %v12907_v56 = vld [vmem:[#allocation130_spill] sm:$0xff] }
 0x85e   :  { %v7914_v37 = vld [vmem:[%s12081_s3 + $0x1a8] sm:$0xf0] }
 0x85f   :  { %v5222_v34 = vadd.f32 %v5221_v52, %v5133_v33 }
 0x862   :  { %v4461_v48 = vpop.f32.mrf.mxu3 }
 0x863   :  { %v4462_v7 = vadd.f32 %v4461_v48, %v11079_v61  ;;  %v8414_v61 = vld [vmem:[%s12081_s3 + $0x1a4] sm:$0xf] }
 0x864   :  { %v5310_v32 = vpop.f32.mrf.mxu2  ;;  %v5411_v14 = vpop.f32.mrf.mxu0  ;;  %v7917_v50 = vor.u32 %v8414_v61, %v7914_v37 }
 0x865   :  { %v11486_v30 = vadd.f32 %v5310_v32, %v5222_v34  ;;  %v4591_v22 = vmax.f32 %v4462_v7, 0.0  ;;  %v5412_v59 = vadd.f32 %v5411_v14, %v11483_v3  ;;  %v5500_v13 = vpop.f32.mrf.mxu1 }
 0x866   :  { %5674 = vmatpush.bf16.msrb.mxu3 %v7917_v50  ;;  %v12911_v50 = vld [vmem:[#allocation131_spill] sm:$0xff] }
 0x867   :  { %v5501_v17 = vadd.f32 %v5500_v13, %v5412_v59  ;;  %5361 = vmatmul.bf16.gmra.mxu3 %v11366_v46  ;;  %5450 = vmatmul.bf16.gmra.mxu0 %v12907_v56  ;;  %v11491_v9 = vpack.c.bf16 %v4591_v22, %v4587_v36 }
 0x868   :  { %5539 = vmatmul.bf16.gmra.mxu1 %v12909_v16 }
 0x869   :  { %12908 = vst [vmem:[#allocation47_spill] sm:$0xff] %v11491_v9  ;;  %5628 = vmatmul.bf16.gmra.mxu2 %v12910_v24 }
 0x86a   :  { %v5322_v57 = vpop.f32.mrf.mxu3 }
 0x86b   :  { %v5323_v33 = vadd.f32 %v5322_v57, %v11082_v49  ;;  %v12912_v57 = vld [vmem:[#allocation89_spill] sm:$0xff] }
 0x86c   :  { %v5589_v52 = vpop.f32.mrf.mxu2  ;;  %v5413_v48 = vpop.f32.mrf.mxu0 }
 0x86d   :  { %v11502_v34 = vadd.f32 %v5589_v52, %v5501_v17  ;;  %v5414_v7 = vadd.f32 %v5413_v48, %v11483_v3  ;;  %v5502_v32 = vpop.f32.mrf.mxu1  ;;  %v5758_v16 = vmax.f32 %v5323_v33, 0.0  ;;  %v12913_v52 = vld [vmem:[#allocation57_spill] sm:$0xff]  ;;  %v8440_v33 = vld [vmem:[%s12083_s5 + $0x70] sm:$0xff] }
 0x86e   :  { %6076 = vmatpush.bf16.msrb.mxu1 %v8440_v33 }
 0x86f   :  { %v5503_v14 = vadd.f32 %v5502_v32, %v5414_v7 }
 0x872   :  { %v5324_v36 = vpop.f32.mrf.mxu3 }
 0x873   :  { %v5325_v22 = vadd.f32 %v5324_v36, %v11086_v45  ;;  %v8432_v45 = vld [vmem:[%s12083_s5 + $0x30] sm:$0xff] }
 0x874   :  { %v5591_v59 = vpop.f32.mrf.mxu2  ;;  %v5416_v56 = vpop.f32.mrf.mxu0  ;;  %5987 = vmatpush.bf16.msrb.mxu0 %v8432_v45 }
 0x875   :  { %v11506_v13 = vadd.f32 %v5591_v59, %v5503_v14  ;;  %v5760_v24 = vmax.f32 %v5325_v22, 0.0  ;;  %v5417_v49 = vadd.f32 %v5416_v56, %v11483_v3  ;;  %v5505_v61 = vpop.f32.mrf.mxu1 }
 0x877   :  { %v11509_v37 = vpack.c.bf16 %v5760_v24, %v5758_v16  ;;  %v5506_v17 = vadd.f32 %v5505_v61, %v5417_v49  ;;  %5366 = vmatmul.bf16.gmra.mxu3 %v11380_v12  ;;  %5455 = vmatmul.bf16.gmra.mxu0 %v12911_v50 }
 0x878   :  { %5544 = vmatmul.bf16.gmra.mxu1 %v12912_v57 }
 0x879   :  { %5633 = vmatmul.bf16.gmra.mxu2 %v12913_v52 }
 0x87a   :  { %v5327_v48 = vpop.f32.mrf.mxu3 }
 0x87b   :  { %v5328_v7 = vadd.f32 %v5327_v48, %v11109_v43  ;;  %v12914_v48 = vld [vmem:[#allocation13_spill] sm:$0xff] }
 0x87c   :  { %v5594_v32 = vpop.f32.mrf.mxu2  ;;  %v5418_v36 = vpop.f32.mrf.mxu0 }
 0x87d   :  { %v11522_v14 = vadd.f32 %v5594_v32, %v5506_v17  ;;  %v5419_v22 = vadd.f32 %v5418_v36, %v11483_v3  ;;  %v5507_v59 = vpop.f32.mrf.mxu1  ;;  %v5762_v57 = vmax.f32 %v5328_v7, 0.0  ;;  %v12915_v32 = vld [vmem:[#allocation8_spill] sm:$0xff] }
 0x87e   :  { %v7906_v7 = vld [vmem:[%s12081_s3 + $0x198] sm:$0xf0] }
 0x87f   :  { %v5508_v56 = vadd.f32 %v5507_v59, %v5419_v22 }
 0x882   :  { %v5329_v16 = vpop.f32.mrf.mxu3 }
 0x883   :  { %v5330_v24 = vadd.f32 %v5329_v16, %v11113_v20  ;;  %v8412_v20 = vld [vmem:[%s12081_s3 + $0x194] sm:$0xf] }
 0x884   :  { %v5596_v49 = vpop.f32.mrf.mxu2  ;;  %v5421_v50 = vpop.f32.mrf.mxu0  ;;  %v7909_v36 = vor.u32 %v8412_v20, %v7906_v7 }
 0x885   :  { %v11526_v61 = vadd.f32 %v5596_v49, %v5508_v56  ;;  %v5764_v52 = vmax.f32 %v5330_v24, 0.0  ;;  %v5422_v45 = vadd.f32 %v5421_v50, %v11483_v3  ;;  %v5510_v43 = vpop.f32.mrf.mxu1 }
 0x886   :  { %5675 = vmatpush.bf16.msrb.mxu3 %v7909_v36 }
 0x887   :  { %v5511_v33 = vadd.f32 %v5510_v43, %v5422_v45  ;;  %5371 = vmatmul.bf16.gmra.mxu3 %v11400_v55  ;;  %5460 = vmatmul.bf16.gmra.mxu0 %v12860_v8  ;;  %v11531_v17 = vpack.c.bf16 %v5764_v52, %v5762_v57  ;;  %v12916_v52 = vld [vmem:[#allocation33_spill] sm:$0xff] }
 0x888   :  { %5549 = vmatmul.bf16.gmra.mxu1 %v12914_v48 }
 0x889   :  { %5638 = vmatmul.bf16.gmra.mxu2 %v12915_v32 }
 0x88a   :  { %v5332_v22 = vpop.f32.mrf.mxu3 }
 0x88b   :  { %v5333_v59 = vadd.f32 %v5332_v22, %v11130_v26 }
 0x88c   :  { %v5599_v56 = vpop.f32.mrf.mxu2  ;;  %v5423_v16 = vpop.f32.mrf.mxu0 }
 0x88d   :  { %v11542_v8 = vadd.f32 %v5599_v56, %v5511_v33  ;;  %v5424_v24 = vadd.f32 %v5423_v16, %v11483_v3  ;;  %v5512_v49 = vpop.f32.mrf.mxu1  ;;  %v5766_v20 = vmax.f32 %v5333_v59, 0.0  ;;  %v12917_v33 = vld [vmem:[#allocation71_spill] sm:$0xff]  ;;  %v12918_v16 = vld [vmem:[#allocation17_spill] sm:$0xff]  ;;  %v8439_v59 = vld [vmem:[%s12083_s5 + $0x68] sm:$0xff] }
 0x88e   :  { %6077 = vmatpush.bf16.msrb.mxu1 %v8439_v59 }
 0x88f   :  { %v5513_v50 = vadd.f32 %v5512_v49, %v5424_v24  ;;  %v12919_v24 = vld [vmem:[#allocation61_spill] sm:$0xff]  ;;  %v8431_v49 = vld [vmem:[%s12083_s5 + $0x28] sm:$0xff] }
 0x890   :  { %5988 = vmatpush.bf16.msrb.mxu0 %v8431_v49 }
 0x892   :  { %v5334_v57 = vpop.f32.mrf.mxu3 }
 0x893   :  { %v5335_v45 = vadd.f32 %v5334_v57, %v12916_v52 }
 0x894   :  { %v5601_v43 = vpop.f32.mrf.mxu2  ;;  %v5426_v32 = vpop.f32.mrf.mxu0 }
 0x895   :  { %v11546_v48 = vadd.f32 %v5601_v43, %v5513_v50  ;;  %v5768_v7 = vmax.f32 %v5335_v45, 0.0  ;;  %v5427_v26 = vadd.f32 %v5426_v32, %v11483_v3  ;;  %v5515_v22 = vpop.f32.mrf.mxu1 }
 0x897   :  { %v5516_v36 = vadd.f32 %v5515_v22, %v5427_v26  ;;  %5376 = vmatmul.bf16.gmra.mxu3 %v11414_v6  ;;  %5465 = vmatmul.bf16.gmra.mxu0 %v12917_v33  ;;  %v11551_v56 = vpack.c.bf16 %v5768_v7, %v5766_v20 }
 0x898   :  { %5554 = vmatmul.bf16.gmra.mxu1 %v12918_v16 }
 0x899   :  { %5643 = vmatmul.bf16.gmra.mxu2 %v12919_v24 }
 0x89a   :  { %v5337_v50 = vpop.f32.mrf.mxu3 }
 0x89b   :  { %v5338_v57 = vadd.f32 %v5337_v50, %v11157_v38 }
 0x89c   :  { %v5604_v52 = vpop.f32.mrf.mxu2  ;;  %v5428_v43 = vpop.f32.mrf.mxu0 }
 0x89d   :  { %v11562_v45 = vadd.f32 %v5604_v52, %v5516_v36  ;;  %v5429_v32 = vadd.f32 %v5428_v43, %v11483_v3  ;;  %v5517_v20 = vpop.f32.mrf.mxu1  ;;  %v5770_v6 = vmax.f32 %v5338_v57, 0.0  ;;  %v8410_v57 = vld [vmem:[%s12081_s3 + $0x184] sm:$0xf]  ;;  %v7898_v52 = vld [vmem:[%s12081_s3 + $0x188] sm:$0xf0] }
 0x89e   :  { %v7901_v43 = vor.u32 %v8410_v57, %v7898_v52  ;;  %v12923_v52 = vld [vmem:[#allocation77_spill] sm:$0xff] }
 0x89f   :  { %v5518_v7 = vadd.f32 %v5517_v20, %v5429_v32  ;;  %v12921_v20 = vld [vmem:[#allocation92_spill] sm:$0xff] }
 0x8a0   :  { %5676 = vmatpush.bf16.msrb.mxu3 %v7901_v43  ;;  %v8429_v43 = vld [vmem:[%s12083_s5 + $0x18] sm:$0xff] }
 0x8a2   :  { %v5339_v26 = vpop.f32.mrf.mxu3 }
 0x8a3   :  { %v5340_v22 = vadd.f32 %v5339_v26, %v11161_v42  ;;  %v12920_v42 = vld [vmem:[#allocation11_spill] sm:$0xff] }
 0x8a4   :  { %v5606_v33 = vpop.f32.mrf.mxu2  ;;  %v5431_v24 = vpop.f32.mrf.mxu0  ;;  %v12922_v26 = vld [vmem:[#allocation35_spill] sm:$0xff] }
 0x8a5   :  { %v11566_v16 = vadd.f32 %v5606_v33, %v5518_v7  ;;  %v5772_v49 = vmax.f32 %v5340_v22, 0.0  ;;  %v5432_v59 = vadd.f32 %v5431_v24, %v11483_v3  ;;  %v5520_v38 = vpop.f32.mrf.mxu1  ;;  %v8430_v33 = vld [vmem:[%s12083_s5 + $0x20] sm:$0xff] }
 0x8a6   :  { %5989 = vmatpush.bf16.msrb.mxu0 %v8430_v33 }
 0x8a7   :  { %v11569_v50 = vadd.f32 %v5520_v38, %v5432_v59  ;;  %5381 = vmatmul.bf16.gmra.mxu3 %v11434_v27  ;;  %5470 = vmatmul.bf16.gmra.mxu0 %v12869_v25  ;;  %v11573_v36 = vpack.c.bf16 %v5772_v49, %v5770_v6 }
 0x8a8   :  { %5559 = vmatmul.bf16.gmra.mxu1 %v12871_v21 }
 0x8a9   :  { %5648 = vmatmul.bf16.gmra.mxu2 %v12920_v42 }
 0x8aa   :  { %v5342_v32 = vpop.f32.mrf.mxu3  ;;  %5990 = vmatpush.bf16.msrb.mxu0 %v8429_v43  ;;  %v8426_v43 = vld [vmem:[%s12083_s5] sm:$0xff] }
 0x8ab   :  { %v5343_v7 = vadd.f32 %v5342_v32, %v12921_v20  ;;  %v12924_v20 = vld [vmem:[#allocation134_spill] sm:$0xff] }
 0x8ac   :  { %v11584_v25 = vpop.f32.mrf.mxu0 }
 0x8ad   :  { %v11586_v6 = vpop.f32.mrf.mxu1  ;;  %v5774_v49 = vmax.f32 %v5343_v7, 0.0  ;;  %v12925_v7 = vld [vmem:[#allocation65_spill] sm:$0xff] }
 0x8b2   :  { %v5344_v21 = vpop.f32.mrf.mxu3 }
 0x8b3   :  { %v5345_v22 = vadd.f32 %v5344_v21, %v12922_v26  ;;  %v8438_v21 = vld [vmem:[%s12083_s5 + $0x60] sm:$0xff] }
 0x8b4   :  { %v5436_v24 = vpop.f32.mrf.mxu0  ;;  %6078 = vmatpush.bf16.msrb.mxu1 %v8438_v21 }
 0x8b5   :  { %v5776_v59 = vmax.f32 %v5345_v22, 0.0  ;;  %v5437_v38 = vadd.f32 %v5436_v24, %v11483_v3  ;;  %v5525_v42 = vpop.f32.mrf.mxu1  ;;  %v12926_v22 = vld [vmem:[#allocation96_spill] sm:$0xff]  ;;  %v8428_v24 = vld [vmem:[%s12083_s5 + $0x10] sm:$0xff] }
 0x8b6   :  { %5991 = vmatpush.bf16.msrb.mxu0 %v8428_v24 }
 0x8b7   :  { %v11593_v57 = vadd.f32 %v5525_v42, %v5437_v38  ;;  %5386 = vmatmul.bf16.gmra.mxu3 %v11448_v41  ;;  %5475 = vmatmul.bf16.gmra.mxu0 %v12923_v52  ;;  %v11600_v32 = vpack.c.bf16 %v5776_v59, %v5774_v49  ;;  %v8427_v59 = vld [vmem:[%s12083_s5 + $0x8] sm:$0xff] }
 0x8b8   :  { %5564 = vmatmul.bf16.gmra.mxu1 %v12924_v20 }
 0x8b9   :  { %5653 = vmatmul.bf16.gmra.mxu2 %v12925_v7 }
 0x8ba   :  { %v5347_v26 = vpop.f32.mrf.mxu3  ;;  %5992 = vmatpush.bf16.msrb.mxu0 %v8427_v59 }
 0x8bb   :  { %v5348_v33 = vadd.f32 %v5347_v26, %v12926_v22 }
 0x8bc   :  { %v11611_v38 = vpop.f32.mrf.mxu0 }
 0x8bd   :  { %v11613_v49 = vpop.f32.mrf.mxu1  ;;  %v5778_v7 = vmax.f32 %v5348_v33, 0.0 }
 0x8be   :  { %12927 = vst [vmem:[#allocation137_spill] sm:$0xff] %v11613_v49  ;;  %5993 = vmatpush.bf16.msrb.mxu0 %v8426_v43 }
 0x8c2   :  { %v5349_v42 = vpop.f32.mrf.mxu3 }
 0x8c3   :  { %v5350_v52 = vadd.f32 %v5349_v42, %v11305_v40  ;;  %v12929_v40 = vld [vmem:[#allocation15_spill] sm:$0xff] }
 0x8c4   :  { %v5441_v20 = vpop.f32.mrf.mxu0 }
 0x8c5   :  { %v5780_v21 = vmax.f32 %v5350_v52, 0.0  ;;  %v5442_v26 = vadd.f32 %v5441_v20, %v11483_v3  ;;  %v5530_v22 = vpop.f32.mrf.mxu1 }
 0x8c7   :  { %v11623_v24 = vadd.f32 %v5530_v22, %v5442_v26  ;;  %5391 = vmatmul.bf16.gmra.mxu3 %v11468_v29  ;;  %5480 = vmatmul.bf16.gmra.mxu0 %v12879_v58  ;;  %v11627_v59 = vpack.c.bf16 %v5780_v21, %v5778_v7  ;;  %v12930_v26 = vld [vmem:[#allocation39_spill] sm:$0xff] }
 0x8c8   :  { %5569 = vmatmul.bf16.gmra.mxu1 %v12880_v4  ;;  %v12932_v4 = vld [vmem:[#allocation83_spill] sm:$0xff] }
 0x8c9   :  { %12928 = vst [vmem:[#allocation29_spill] sm:$0xff] %v11623_v24  ;;  %5658 = vmatmul.bf16.gmra.mxu2 %v12929_v40 }
 0x8ca   :  { %v5352_v42 = vpop.f32.mrf.mxu3 }
 0x8cb   :  { %v5353_v33 = vadd.f32 %v5352_v42, %v11322_v2  ;;  %v8437_v2 = vld [vmem:[%s12083_s5 + $0x58] sm:$0xff] }
 0x8cc   :  { %v11632_v52 = vpop.f32.mrf.mxu0  ;;  %v12933_v42 = vld [vmem:[#allocation136_spill] sm:$0xff]  ;;  %6079 = vmatpush.bf16.msrb.mxu1 %v8437_v2 }
 0x8cd   :  { %v11634_v20 = vpop.f32.mrf.mxu1  ;;  %v5782_v29 = vmax.f32 %v5353_v33, 0.0 }
 0x8d2   :  { %v5354_v43 = vpop.f32.mrf.mxu3 }
 0x8d3   :  { %v5355_v22 = vadd.f32 %v5354_v43, %v12930_v26  ;;  %v12934_v43 = vld [vmem:[#allocation69_spill] sm:$0xff] }
 0x8d4   :  { %v5446_v24 = vpop.f32.mrf.mxu0 }
 0x8d5   :  { %v5784_v49 = vmax.f32 %v5355_v22, 0.0  ;;  %v5447_v58 = vadd.f32 %v5446_v24, %v11483_v3  ;;  %v5535_v7 = vpop.f32.mrf.mxu1 }
 0x8d7   :  { %v11638_v21 = vadd.f32 %v5535_v7, %v5447_v58  ;;  %5396 = vmatmul.bf16.gmra.mxu3 %v11491_v9  ;;  %5485 = vmatmul.bf16.gmra.mxu0 %v12932_v4  ;;  %v11645_v40 = vpack.c.bf16 %v5784_v49, %v5782_v29 }
 0x8d8   :  { %5574 = vmatmul.bf16.gmra.mxu1 %v12933_v42 }
 0x8d9   :  { %12931 = vst [vmem:[#allocation6_spill] sm:$0xff] %v11638_v21  ;;  %5663 = vmatmul.bf16.gmra.mxu2 %v12934_v43 }
 0x8da   :  { %v5357_v33 = vpop.f32.mrf.mxu3 }
 0x8db   :  { %v5358_v24 = vadd.f32 %v5357_v33, %v11337_v54  ;;  %v8449_v54 = vld [vmem:[%s12085_s7 + $0x38] sm:$0xff] }
 0x8dc   :  { %v11650_v26 = vpop.f32.mrf.mxu0  ;;  %6280 = vmatpush.bf16.msrb.mxu2 %v8449_v54 }
 0x8dd   :  { %v11652_v22 = vpop.f32.mrf.mxu1  ;;  %v5786_v21 = vmax.f32 %v5358_v24, 0.0 }
 0x8e2   :  { %v5359_v58 = vpop.f32.mrf.mxu3 }
 0x8e3   :  { %v5360_v7 = vadd.f32 %v5359_v58, %v11341_v1 }
 0x8e4   :  { %v5451_v4 = vpop.f32.mrf.mxu0 }
 0x8e5   :  { %v5788_v9 = vmax.f32 %v5360_v7, 0.0  ;;  %v5452_v29 = vadd.f32 %v5451_v4, %v11483_v3  ;;  %v5540_v49 = vpop.f32.mrf.mxu1 }
 0x8e7   :  { %v11656_v42 = vadd.f32 %v5540_v49, %v5452_v29  ;;  %5677 = vmatmul.bf16.vlgmr.msrb.gmra.mxu3 %v11089_v35  ;;  %5994 = vmatmul.bf16.vlgmr.msrb.gmra.mxu0 %v11509_v37  ;;  %v11663_v2 = vpack.c.bf16 %v5788_v9, %v5786_v21  ;;  %v12937_v9 = vld [vmem:[#allocation31_spill] sm:$0xff] }
 0x8e9   :  { %12935 = vst [vmem:[#allocation20_spill] sm:$0xff] %v11656_v42 }
 0x8ea   :  { %v5362_v1 = vpop.f32.mrf.mxu3 }
 0x8eb   :  { %v5363_v43 = vadd.f32 %v5362_v1, %v11357_v11  ;;  %v8436_v11 = vld [vmem:[%s12083_s5 + $0x50] sm:$0xff] }
 0x8ec   :  { %v11666_v33 = vpop.f32.mrf.mxu0  ;;  %6080 = vmatpush.bf16.msrb.mxu1 %v8436_v11 }
 0x8ed   :  { %v11668_v24 = vpop.f32.mrf.mxu1  ;;  %v5790_v4 = vmax.f32 %v5363_v43, 0.0 }
 0x8f2   :  { %v5364_v58 = vpop.f32.mrf.mxu3 }
 0x8f3   :  { %v5365_v7 = vadd.f32 %v5364_v58, %v11361_v39 }
 0x8f4   :  { %v5456_v35 = vpop.f32.mrf.mxu0 }
 0x8f5   :  { %v5792_v37 = vmax.f32 %v5365_v7, 0.0  ;;  %v5457_v29 = vadd.f32 %v5456_v35, %v11483_v3  ;;  %v5545_v49 = vpop.f32.mrf.mxu1 }
 0x8f7   :  { %v11672_v42 = vadd.f32 %v5545_v49, %v5457_v29  ;;  %5682 = vmatmul.bf16.gmra.mxu3 %v12937_v9  ;;  %5999 = vmatmul.bf16.gmra.mxu0 %v11531_v17  ;;  %v11679_v21 = vpack.c.bf16 %v5792_v37, %v5790_v4  ;;  %v12939_v4 = vld [vmem:[#allocation25_spill] sm:$0xff] }
 0x8f9   :  { %12936 = vst [vmem:[#allocation9_spill] sm:$0xff] %v11672_v42 }
 0x8fa   :  { %v5367_v39 = vpop.f32.mrf.mxu3 }
 0x8fb   :  { %v5368_v54 = vadd.f32 %v5367_v39, %v11371_v18  ;;  %v8448_v18 = vld [vmem:[%s12085_s7 + $0x30] sm:$0xff] }
 0x8fc   :  { %v11682_v1 = vpop.f32.mrf.mxu0  ;;  %6281 = vmatpush.bf16.msrb.mxu2 %v8448_v18 }
 0x8fd   :  { %v11684_v43 = vpop.f32.mrf.mxu1  ;;  %v5794_v29 = vmax.f32 %v5368_v54, 0.0 }
 0x902   :  { %v5369_v58 = vpop.f32.mrf.mxu3 }
 0x903   :  { %v5370_v7 = vadd.f32 %v5369_v58, %v11375_v47 }
 0x904   :  { %v5461_v35 = vpop.f32.mrf.mxu0 }
 0x905   :  { %v5796_v17 = vmax.f32 %v5370_v7, 0.0  ;;  %v5462_v49 = vadd.f32 %v5461_v35, %v11483_v3  ;;  %v5550_v9 = vpop.f32.mrf.mxu1 }
 0x907   :  { %v11688_v42 = vadd.f32 %v5550_v9, %v5462_v49  ;;  %5687 = vmatmul.bf16.gmra.mxu3 %v12939_v4  ;;  %6004 = vmatmul.bf16.gmra.mxu0 %v11551_v56  ;;  %v11695_v37 = vpack.c.bf16 %v5796_v17, %v5794_v29  ;;  %v12941_v29 = vld [vmem:[#allocation135_spill] sm:$0xff] }
 0x909   :  { %12938 = vst [vmem:[#allocation24_spill] sm:$0xff] %v11688_v42 }
 0x90a   :  { %v5372_v47 = vpop.f32.mrf.mxu3 }
 0x90b   :  { %v5373_v11 = vadd.f32 %v5372_v47, %v11391_v15  ;;  %v8435_v15 = vld [vmem:[%s12083_s5 + $0x48] sm:$0xff] }
 0x90c   :  { %v11698_v39 = vpop.f32.mrf.mxu0  ;;  %6081 = vmatpush.bf16.msrb.mxu1 %v8435_v15 }
 0x90d   :  { %v11700_v54 = vpop.f32.mrf.mxu1  ;;  %v5798_v49 = vmax.f32 %v5373_v11, 0.0 }
 0x912   :  { %v5374_v58 = vpop.f32.mrf.mxu3 }
 0x913   :  { %v5375_v7 = vadd.f32 %v5374_v58, %v11395_v63 }
 0x914   :  { %v5466_v35 = vpop.f32.mrf.mxu0 }
 0x915   :  { %v5800_v56 = vmax.f32 %v5375_v7, 0.0  ;;  %v5467_v9 = vadd.f32 %v5466_v35, %v11483_v3  ;;  %v5555_v4 = vpop.f32.mrf.mxu1 }
 0x917   :  { %v11704_v42 = vadd.f32 %v5555_v4, %v5467_v9  ;;  %5692 = vmatmul.bf16.gmra.mxu3 %v12941_v29  ;;  %6009 = vmatmul.bf16.gmra.mxu0 %v11573_v36  ;;  %v11711_v17 = vpack.c.bf16 %v5800_v56, %v5798_v49  ;;  %v12943_v49 = vld [vmem:[#allocation37_spill] sm:$0xff] }
 0x919   :  { %12940 = vst [vmem:[#allocation121_spill] sm:$0xff] %v11704_v42 }
 0x91a   :  { %v5377_v63 = vpop.f32.mrf.mxu3 }
 0x91b   :  { %v5378_v18 = vadd.f32 %v5377_v63, %v11405_v5  ;;  %v8447_v5 = vld [vmem:[%s12085_s7 + $0x28] sm:$0xff] }
 0x91c   :  { %v11714_v47 = vpop.f32.mrf.mxu0  ;;  %6282 = vmatpush.bf16.msrb.mxu2 %v8447_v5 }
 0x91d   :  { %v11716_v11 = vpop.f32.mrf.mxu1  ;;  %v5802_v9 = vmax.f32 %v5378_v18, 0.0 }
 0x922   :  { %v5379_v58 = vpop.f32.mrf.mxu3 }
 0x923   :  { %v5380_v7 = vadd.f32 %v5379_v58, %v11409_v60 }
 0x924   :  { %v5471_v35 = vpop.f32.mrf.mxu0 }
 0x925   :  { %v5804_v36 = vmax.f32 %v5380_v7, 0.0  ;;  %v5472_v4 = vadd.f32 %v5471_v35, %v11483_v3  ;;  %v5560_v29 = vpop.f32.mrf.mxu1 }
 0x927   :  { %v11720_v42 = vadd.f32 %v5560_v29, %v5472_v4  ;;  %5697 = vmatmul.bf16.gmra.mxu3 %v12943_v49  ;;  %6014 = vmatmul.bf16.gmra.mxu0 %v11600_v32  ;;  %v11727_v56 = vpack.c.bf16 %v5804_v36, %v5802_v9 }
 0x929   :  { %12942 = vst [vmem:[#allocation122_spill] sm:$0xff] %v11720_v42 }
 0x92a   :  { %v5382_v60 = vpop.f32.mrf.mxu3 }
 0x92b   :  { %v5383_v15 = vadd.f32 %v5382_v60, %v11425_v0  ;;  %v8434_v0 = vld [vmem:[%s12083_s5 + $0x40] sm:$0xff] }
 0x92c   :  { %v11730_v63 = vpop.f32.mrf.mxu0  ;;  %6082 = vmatpush.bf16.msrb.mxu1 %v8434_v0 }
 0x92d   :  { %v11732_v18 = vpop.f32.mrf.mxu1  ;;  %v5806_v4 = vmax.f32 %v5383_v15, 0.0 }
 0x932   :  { %v5384_v58 = vpop.f32.mrf.mxu3 }
 0x933   :  { %v5385_v7 = vadd.f32 %v5384_v58, %v11429_v51 }
 0x934   :  { %v5476_v35 = vpop.f32.mrf.mxu0 }
 0x935   :  { %v5808_v32 = vmax.f32 %v5385_v7, 0.0  ;;  %v5477_v29 = vadd.f32 %v5476_v35, %v11483_v3  ;;  %v5565_v49 = vpop.f32.mrf.mxu1 }
 0x937   :  { %v11736_v42 = vadd.f32 %v5565_v49, %v5477_v29  ;;  %5702 = vmatmul.bf16.gmra.mxu3 %v11311_v53  ;;  %6019 = vmatmul.bf16.gmra.mxu0 %v11627_v59  ;;  %v11743_v9 = vpack.c.bf16 %v5808_v32, %v5806_v4  ;;  %v8446_v4 = vld [vmem:[%s12085_s7 + $0x20] sm:$0xff] }
 0x938   :  { %6283 = vmatpush.bf16.msrb.mxu2 %v8446_v4 }
 0x93a   :  { %v5387_v51 = vpop.f32.mrf.mxu3 }
 0x93b   :  { %v5388_v36 = vadd.f32 %v5387_v51, %v11439_v31 }
 0x93c   :  { %v11746_v5 = vpop.f32.mrf.mxu0 }
 0x93d   :  { %v11748_v60 = vpop.f32.mrf.mxu1  ;;  %v5810_v7 = vmax.f32 %v5388_v36, 0.0 }
 0x942   :  { %v5389_v15 = vpop.f32.mrf.mxu3 }
 0x943   :  { %v5390_v58 = vadd.f32 %v5389_v15, %v11443_v23 }
 0x944   :  { %v5481_v53 = vpop.f32.mrf.mxu0 }
 0x945   :  { %v5812_v59 = vmax.f32 %v5390_v58, 0.0  ;;  %v5482_v35 = vadd.f32 %v5481_v53, %v11483_v3  ;;  %v5570_v29 = vpop.f32.mrf.mxu1 }
 0x947   :  { %v11755_v32 = vadd.f32 %v5570_v29, %v5482_v35  ;;  %5707 = vmatmul.bf16.gmra.mxu3 %v11332_v28  ;;  %6024 = vmatmul.bf16.gmra.mxu0 %v11645_v40  ;;  %v11759_v31 = vpack.c.bf16 %v5812_v59, %v5810_v7 }
 0x94a   :  { %v5392_v23 = vpop.f32.mrf.mxu3 }
 0x94b   :  { %v5393_v49 = vadd.f32 %v5392_v23, %v11459_v44 }
 0x94c   :  { %v11762_v0 = vpop.f32.mrf.mxu0 }
 0x94d   :  { %v11764_v51 = vpop.f32.mrf.mxu1  ;;  %v5814_v53 = vmax.f32 %v5393_v49, 0.0 }
 0x952   :  { %v5394_v36 = vpop.f32.mrf.mxu3 }
 0x953   :  { %v5395_v15 = vadd.f32 %v5394_v36, %v11463_v62  ;;  %v8445_v36 = vld [vmem:[%s12085_s7 + $0x18] sm:$0xff] }
 0x954   :  { %v5486_v58 = vpop.f32.mrf.mxu0  ;;  %6284 = vmatpush.bf16.msrb.mxu2 %v8445_v36 }
 0x955   :  { %v5816_v35 = vmax.f32 %v5395_v15, 0.0  ;;  %v5487_v28 = vadd.f32 %v5486_v58, %v11483_v3  ;;  %v5575_v29 = vpop.f32.mrf.mxu1 }
 0x957   :  { %v11768_v40 = vadd.f32 %v5575_v29, %v5487_v28  ;;  %5712 = vmatmul.bf16.gmra.mxu3 %v11346_v10  ;;  %6029 = vmatmul.bf16.gmra.mxu0 %v11663_v2  ;;  %v11772_v44 = vpack.c.bf16 %v5816_v35, %v5814_v53  ;;  %v5609_v35 = vpop.f32.mrf.mxu2 }
 0x95a   :  { %v5397_v7 = vpop.f32.mrf.mxu3 }
 0x95b   :  { %v5398_v59 = vadd.f32 %v5397_v7, %v11479_v19 }
 0x95d   :  { %v5818_v23 = vmax.f32 %v5398_v59, 0.0 }
 0x962   :  { %v5399_v4 = vpop.f32.mrf.mxu3 }
 0x963   :  { %v5400_v62 = vadd.f32 %v5399_v4, %v11486_v30 }
 0x965   :  { %v5820_v49 = vmax.f32 %v5400_v62, 0.0  ;;  %v11792_v62 = vpop.f32.mrf.mxu0 }
 0x967   :  { %5717 = vmatmul.bf16.gmra.mxu3 %v11366_v46  ;;  %6034 = vmatmul.bf16.gmra.mxu0 %v11679_v21  ;;  %v11781_v10 = vpack.c.bf16 %v5820_v49, %v5818_v23  ;;  %v5611_v21 = vpop.f32.mrf.mxu2 }
 0x96a   :  { %v5678_v2 = vpop.f32.mrf.mxu3 }
 0x96b   :  { %v5679_v15 = vadd.f32 %v5678_v2, %v11502_v34 }
 0x96d   :  { %v5759_v30 = vmax.f32 %v5679_v15, 0.0  ;;  %v11796_v23 = vpop.f32.mrf.mxu0 }
 0x972   :  { %v5680_v19 = vpop.f32.mrf.mxu3 }
 0x973   :  { %v5681_v58 = vadd.f32 %v5680_v19, %v11506_v13  ;;  %v8444_v13 = vld [vmem:[%s12085_s7 + $0x10] sm:$0xff] }
 0x974   :  { %6285 = vmatpush.bf16.msrb.mxu2 %v8444_v13 }
 0x975   :  { %v5761_v53 = vmax.f32 %v5681_v58, 0.0  ;;  %v12944_v58 = vld [vmem:[#allocation101_spill] sm:$0xff] }
 0x977   :  { %v5823_v28 = vpack.c.bf16 %v5761_v53, %v5759_v30  ;;  %5722 = vmatmul.bf16.gmra.mxu3 %v11380_v12  ;;  %6039 = vmatmul.bf16.gmra.mxu0 %v11695_v37  ;;  %v11802_v30 = vpop.f32.mrf.mxu0 }
 0x979   :  { %6083 = vmatmul.bf16.vlgmr.msrb.gmra.mxu1 %v5823_v28 }
 0x97a   :  { %v5683_v46 = vpop.f32.mrf.mxu3 }
 0x97b   :  { %v5684_v29 = vadd.f32 %v5683_v46, %v11522_v14  ;;  %v5614_v14 = vpop.f32.mrf.mxu2 }
 0x97d   :  { %v5763_v34 = vmax.f32 %v5684_v29, 0.0 }
 0x97f   :  { %v11806_v29 = vpop.f32.mrf.mxu0 }
 0x982   :  { %v5685_v7 = vpop.f32.mrf.mxu3 }
 0x983   :  { %v5686_v59 = vadd.f32 %v5685_v7, %v11526_v61  ;;  %v5616_v2 = vpop.f32.mrf.mxu2 }
 0x985   :  { %v5765_v4 = vmax.f32 %v5686_v59, 0.0  ;;  %v8443_v59 = vld [vmem:[%s12085_s7 + $0x8] sm:$0xff] }
 0x986   :  { %6286 = vmatpush.bf16.msrb.mxu2 %v8443_v59  ;;  %v12946_v59 = vld [vmem:[#allocation43_spill] sm:$0xff] }
 0x987   :  { %5727 = vmatmul.bf16.gmra.mxu3 %v11400_v55  ;;  %6044 = vmatmul.bf16.gmra.mxu0 %v11711_v17  ;;  %v5825_v12 = vpack.c.bf16 %v5765_v4, %v5763_v34  ;;  %v5610_v4 = vadd.f32 %v5609_v35, %v11569_v50  ;;  %v5615_v35 = vadd.f32 %v5614_v14, %v11593_v57  ;;  %v8442_v57 = vld [vmem:[%s12085_s7] sm:$0xff] }
 0x988   :  { %v5444_v14 = vadd.f32 %v11632_v52, %v11483_v3 }
 0x989   :  { %6088 = vmatmul.bf16.gmra.mxu1 %v5825_v12  ;;  %v11817_v12 = vpop.f32.mrf.mxu0 }
 0x98a   :  { %v5688_v37 = vpop.f32.mrf.mxu3  ;;  %6287 = vmatpush.bf16.msrb.mxu2 %v8442_v57 }
 0x98b   :  { %v5689_v61 = vadd.f32 %v5688_v37, %v11542_v8  ;;  %v5619_v53 = vpop.f32.mrf.mxu2 }
 0x98d   :  { %v5767_v15 = vmax.f32 %v5689_v61, 0.0 }
 0x992   :  { %v5690_v49 = vpop.f32.mrf.mxu3 }
 0x993   :  { %v5691_v36 = vadd.f32 %v5690_v49, %v11546_v48  ;;  %v5621_v34 = vpop.f32.mrf.mxu2 }
 0x995   :  { %v5769_v19 = vmax.f32 %v5691_v36, 0.0 }
 0x997   :  { %5732 = vmatmul.bf16.gmra.mxu3 %v12944_v58  ;;  %6049 = vmatmul.bf16.gmra.mxu0 %v11727_v56  ;;  %v5827_v55 = vpack.c.bf16 %v5769_v19, %v5767_v15  ;;  %v11821_v58 = vpop.f32.mrf.mxu0 }
 0x999   :  { %6093 = vmatmul.bf16.gmra.mxu1 %v5827_v55 }
 0x99a   :  { %v5693_v17 = vpop.f32.mrf.mxu3 }
 0x99b   :  { %v5694_v28 = vadd.f32 %v5693_v17, %v11562_v45  ;;  %v5624_v61 = vpop.f32.mrf.mxu2 }
 0x99d   :  { %v5771_v48 = vmax.f32 %v5694_v28, 0.0 }
 0x9a2   :  { %v5695_v46 = vpop.f32.mrf.mxu3 }
 0x9a3   :  { %v5696_v8 = vadd.f32 %v5695_v46, %v11566_v16  ;;  %v5434_v16 = vadd.f32 %v11584_v25, %v11483_v3  ;;  %v5439_v25 = vadd.f32 %v11611_v38, %v11483_v3 }
 0x9a5   :  { %v5773_v7 = vmax.f32 %v5696_v8, 0.0  ;;  %v5523_v13 = vadd.f32 %v11586_v6, %v5434_v16  ;;  %v5626_v6 = vpop.f32.mrf.mxu2  ;;  %v11827_v8 = vpop.f32.mrf.mxu0 }
 0x9a7   :  { %5737 = vmatmul.bf16.gmra.mxu3 %v11434_v27  ;;  %6054 = vmatmul.bf16.gmra.mxu0 %v11743_v9  ;;  %v5829_v56 = vpack.c.bf16 %v5773_v7, %v5771_v48  ;;  %v5612_v27 = vadd.f32 %v5611_v21, %v5523_v13  ;;  %v12945_v21 = vld [vmem:[#allocation137_spill] sm:$0xff] }
 0x9a8   :  { %v5528_v55 = vadd.f32 %v12945_v21, %v5439_v25 }
 0x9a9   :  { %6098 = vmatmul.bf16.gmra.mxu1 %v5829_v56 }
 0x9aa   :  { %v5698_v45 = vpop.f32.mrf.mxu3  ;;  %v5617_v17 = vadd.f32 %v5616_v2, %v5528_v55 }
 0x9ab   :  { %v5699_v9 = vadd.f32 %v5698_v45, %v5610_v4  ;;  %v12947_v45 = vld [vmem:[#allocation29_spill] sm:$0xff]  ;;  %v5533_v4 = vadd.f32 %v11634_v20, %v5444_v14 }
 0x9ac   :  { %v5620_v16 = vadd.f32 %v5619_v53, %v12947_v45  ;;  %v5449_v53 = vadd.f32 %v11650_v26, %v11483_v3  ;;  %v12950_v26 = vld [vmem:[#allocation20_spill] sm:$0xff] }
 0x9ad   :  { %v5775_v36 = vmax.f32 %v5699_v9, 0.0  ;;  %v5629_v7 = vpop.f32.mrf.mxu2  ;;  %v11836_v2 = vpop.f32.mrf.mxu0  ;;  %v5622_v13 = vadd.f32 %v5621_v34, %v5533_v4  ;;  %v12949_v34 = vld [vmem:[#allocation6_spill] sm:$0xff] }
 0x9ae   :  { %v5625_v25 = vadd.f32 %v5624_v61, %v12949_v34  ;;  %v5630_v57 = vadd.f32 %v5629_v7, %v12950_v26 }
 0x9b2   :  { %v5700_v37 = vpop.f32.mrf.mxu3 }
 0x9b3   :  { %v5701_v49 = vadd.f32 %v5700_v37, %v5612_v27 }
 0x9b5   :  { %v5777_v15 = vmax.f32 %v5701_v49, 0.0  ;;  %v5631_v27 = vpop.f32.mrf.mxu2 }
 0x9b7   :  { %v5831_v19 = vpack.c.bf16 %v5777_v15, %v5775_v36  ;;  %5742 = vmatmul.bf16.gmra.mxu3 %v11448_v41  ;;  %6059 = vmatmul.bf16.gmra.mxu0 %v11759_v31  ;;  %v11840_v15 = vpop.f32.mrf.mxu0 }
 0x9b9   :  { %6103 = vmatmul.bf16.gmra.mxu1 %v5831_v19 }
 0x9ba   :  { %v5703_v50 = vpop.f32.mrf.mxu3 }
 0x9bb   :  { %v5704_v28 = vadd.f32 %v5703_v50, %v5615_v35  ;;  %v12948_v50 = vld [vmem:[#allocation47_spill] sm:$0xff]  ;;  %v5538_v35 = vadd.f32 %v11652_v22, %v5449_v53 }
 0x9bd   :  { %v5779_v48 = vmax.f32 %v5704_v28, 0.0  ;;  %v5634_v20 = vpop.f32.mrf.mxu2  ;;  %v5627_v21 = vadd.f32 %v5626_v6, %v5538_v35 }
 0x9c2   :  { %v5705_v46 = vpop.f32.mrf.mxu3 }
 0x9c3   :  { %v5706_v41 = vadd.f32 %v5705_v46, %v5617_v17 }
 0x9c5   :  { %v5781_v31 = vmax.f32 %v5706_v41, 0.0  ;;  %v5636_v46 = vpop.f32.mrf.mxu2 }
 0x9c7   :  { %v5833_v56 = vpack.c.bf16 %v5781_v31, %v5779_v48  ;;  %5747 = vmatmul.bf16.gmra.mxu3 %v12946_v59  ;;  %6064 = vmatmul.bf16.gmra.mxu0 %v11772_v44  ;;  %v11850_v59 = vpop.f32.mrf.mxu1 }
 0x9c9   :  { %6108 = vmatmul.bf16.gmra.mxu1 %v5833_v56  ;;  %v5454_v56 = vadd.f32 %v11666_v33, %v11483_v3 }
 0x9ca   :  { %v5708_v38 = vpop.f32.mrf.mxu3 }
 0x9cb   :  { %v5709_v9 = vadd.f32 %v5708_v38, %v5620_v16  ;;  %v5543_v61 = vadd.f32 %v11668_v24, %v5454_v56  ;;  %v5459_v24 = vadd.f32 %v11682_v1, %v11483_v3 }
 0x9cd   :  { %v5783_v49 = vmax.f32 %v5709_v9, 0.0  ;;  %v5639_v22 = vpop.f32.mrf.mxu2  ;;  %v5632_v6 = vadd.f32 %v5631_v27, %v5543_v61  ;;  %v11857_v9 = vld [vmem:[%s12084_s6] ss:$0 sm:$0xff] }
 0x9ce   :  { %v5996_v7 = vadd.f32 %v11857_v9, %v11796_v23  ;;  %v5998_v27 = vadd.f32 %v11857_v9, %v11802_v30  ;;  %v6003_v56 = vadd.f32 %v11857_v9, %v11817_v12 }
 0x9d2   :  { %v5710_v44 = vpop.f32.mrf.mxu3 }
 0x9d3   :  { %v5711_v37 = vadd.f32 %v5710_v44, %v5622_v13 }
 0x9d5   :  { %v5785_v36 = vmax.f32 %v5711_v37, 0.0  ;;  %v5641_v44 = vpop.f32.mrf.mxu2 }
 0x9d7   :  { %v5835_v19 = vpack.c.bf16 %v5785_v36, %v5783_v49  ;;  %5752 = vmatmul.bf16.gmra.mxu3 %v12948_v50  ;;  %6069 = vmatmul.bf16.gmra.mxu0 %v11781_v10 }
 0x9d9   :  { %6113 = vmatmul.bf16.gmra.mxu1 %v5835_v19  ;;  %v12951_v19 = vld [vmem:[#allocation9_spill] sm:$0xff] }
 0x9da   :  { %v5713_v52 = vpop.f32.mrf.mxu3  ;;  %v5635_v50 = vadd.f32 %v5634_v20, %v12951_v19  ;;  %v6008_v19 = vadd.f32 %v11857_v9, %v11827_v8 }
 0x9db   :  { %v5714_v55 = vadd.f32 %v5713_v52, %v5625_v25  ;;  %v5548_v52 = vadd.f32 %v11684_v43, %v5459_v24  ;;  %v5464_v43 = vadd.f32 %v11698_v39, %v11483_v3 }
 0x9dd   :  { %v5787_v41 = vmax.f32 %v5714_v55, 0.0  ;;  %v5637_v34 = vadd.f32 %v5636_v46, %v5548_v52  ;;  %v6001_v46 = vadd.f32 %v11857_v9, %v11806_v29 }
 0x9e2   :  { %v5715_v17 = vpop.f32.mrf.mxu3 }
 0x9e3   :  { %v5716_v28 = vadd.f32 %v5715_v17, %v5627_v21  ;;  %v5644_v17 = vpop.f32.mrf.mxu2 }
 0x9e5   :  { %v5789_v48 = vmax.f32 %v5716_v28, 0.0 }
 0x9e7   :  { %v5837_v31 = vpack.c.bf16 %v5789_v48, %v5787_v41  ;;  %v11867_v41 = vpop.f32.mrf.mxu0 }
 0x9e9   :  { %6118 = vmatmul.bf16.gmra.mxu1 %v5837_v31 }
 0x9ea   :  { %v5718_v10 = vpop.f32.mrf.mxu3 }
 0x9eb   :  { %v5719_v38 = vadd.f32 %v5718_v10, %v5630_v57  ;;  %v5646_v10 = vpop.f32.mrf.mxu2 }
 0x9ed   :  { %v5791_v16 = vmax.f32 %v5719_v38, 0.0 }
 0x9ef   :  { %v11875_v57 = vpop.f32.mrf.mxu0 }
 0x9f2   :  { %v5720_v14 = vpop.f32.mrf.mxu3 }
 0x9f3   :  { %v5721_v45 = vadd.f32 %v5720_v14, %v5632_v6  ;;  %v12952_v6 = vld [vmem:[#allocation24_spill] sm:$0xff]  ;;  %v5553_v14 = vadd.f32 %v11700_v54, %v5464_v43  ;;  %v5469_v54 = vadd.f32 %v11714_v47, %v11483_v3 }
 0x9f4   :  { %v5640_v38 = vadd.f32 %v5639_v22, %v12952_v6 }
 0x9f5   :  { %v5793_v4 = vmax.f32 %v5721_v45, 0.0 }
 0x9f6   :  { %v6084_v13 = vpop.f32.mrf.mxu1 }
 0x9f7   :  { %v5839_v33 = vpack.c.bf16 %v5793_v4, %v5791_v16  ;;  %v6085_v49 = vadd.f32 %v6084_v13, %v5996_v7  ;;  %v5642_v16 = vadd.f32 %v5641_v44, %v5553_v14  ;;  %v6006_v44 = vadd.f32 %v11857_v9, %v11821_v58 }
 0x9f9   :  { %6123 = vmatmul.bf16.gmra.mxu1 %v5839_v33  ;;  %v6164_v25 = vmax.f32 %v6085_v49, 0.0 }
 0x9fa   :  { %v5723_v37 = vpop.f32.mrf.mxu3 }
 0x9fb   :  { %v5724_v35 = vadd.f32 %v5723_v37, %v5635_v50 }
 0x9fd   :  { %v5795_v23 = vmax.f32 %v5724_v35, 0.0 }
 0x9fe   :  { %v6086_v36 = vpop.f32.mrf.mxu1 }
 0x9ff   :  { %v6087_v53 = vadd.f32 %v6086_v36, %v5998_v27  ;;  %v5649_v27 = vpop.f32.mrf.mxu2  ;;  %v11879_v36 = vpop.f32.mrf.mxu0 }
 0xa01   :  { %v6165_v21 = vmax.f32 %v6087_v53, 0.0  ;;  %v12953_v53 = vld [vmem:[#allocation121_spill] sm:$0xff] }
 0xa02   :  { %v5725_v55 = vpop.f32.mrf.mxu3 }
 0xa03   :  { %v6196_v1 = vpack.c.bf16 %v6165_v21, %v6164_v25  ;;  %v5726_v28 = vadd.f32 %v5725_v55, %v5637_v34  ;;  %v5645_v34 = vadd.f32 %v5644_v17, %v12953_v53  ;;  %v5558_v25 = vadd.f32 %v11716_v11, %v5469_v54 }
 0xa04   :  { %v5474_v11 = vadd.f32 %v11730_v63, %v11483_v3  ;;  %v6018_v54 = vadd.f32 %v11857_v9, %v11875_v57 }
 0xa05   :  { %v5797_v48 = vmax.f32 %v5726_v28, 0.0  ;;  %6288 = vmatmul.bf16.vlgmr.msrb.gmra.mxu2 %v6196_v1  ;;  %v5647_v21 = vadd.f32 %v5646_v10, %v5558_v25  ;;  %v6011_v10 = vadd.f32 %v11857_v9, %v11836_v2 }
 0xa06   :  { %v6089_v30 = vpop.f32.mrf.mxu1 }
 0xa07   :  { %v5841_v31 = vpack.c.bf16 %v5797_v48, %v5795_v23  ;;  %v6090_v26 = vadd.f32 %v6089_v30, %v6001_v46  ;;  %v5651_v55 = vpop.f32.mrf.mxu2  ;;  %v11889_v48 = vpop.f32.mrf.mxu0 }
 0xa09   :  { %6128 = vmatmul.bf16.gmra.mxu1 %v5841_v31  ;;  %v6166_v4 = vmax.f32 %v6090_v26, 0.0  ;;  %v6013_v26 = vadd.f32 %v11857_v9, %v11840_v15 }
 0xa0a   :  { %v5728_v20 = vpop.f32.mrf.mxu3 }
 0xa0b   :  { %v5729_v13 = vadd.f32 %v5728_v20, %v5640_v38  ;;  %v12954_v38 = vld [vmem:[#allocation122_spill] sm:$0xff] }
 0xa0c   :  { %v5650_v14 = vadd.f32 %v5649_v27, %v12954_v38  ;;  %v6016_v27 = vadd.f32 %v11857_v9, %v11867_v41 }
 0xa0d   :  { %v5799_v24 = vmax.f32 %v5729_v13, 0.0 }
 0xa0e   :  { %v6091_v61 = vpop.f32.mrf.mxu1 }
 0xa0f   :  { %v6092_v45 = vadd.f32 %v6091_v61, %v6003_v56  ;;  %v5654_v46 = vpop.f32.mrf.mxu2  ;;  %v11895_v56 = vpop.f32.mrf.mxu0 }
 0xa11   :  { %v6167_v39 = vmax.f32 %v6092_v45, 0.0  ;;  %v5563_v45 = vadd.f32 %v11732_v18, %v5474_v11  ;;  %v5479_v18 = vadd.f32 %v11746_v5, %v11483_v3 }
 0xa12   :  { %v5730_v33 = vpop.f32.mrf.mxu3 }
 0xa13   :  { %v5731_v37 = vadd.f32 %v5730_v33, %v5642_v16  ;;  %v6197_v29 = vpack.c.bf16 %v6167_v39, %v6166_v4  ;;  %v5652_v4 = vadd.f32 %v5651_v55, %v5563_v45 }
 0xa15   :  { %v5801_v7 = vmax.f32 %v5731_v37, 0.0  ;;  %6293 = vmatmul.bf16.gmra.mxu2 %v6197_v29 }
 0xa16   :  { %v6094_v12 = vpop.f32.mrf.mxu1 }
 0xa17   :  { %v5843_v49 = vpack.c.bf16 %v5801_v7, %v5799_v24  ;;  %v6095_v50 = vadd.f32 %v6094_v12, %v6006_v44  ;;  %v5656_v2 = vpop.f32.mrf.mxu2  ;;  %v6027_v12 = vpop.f32.mrf.mxu0 }
 0xa19   :  { %6133 = vmatmul.bf16.gmra.mxu1 %v5843_v49  ;;  %v6168_v1 = vmax.f32 %v6095_v50, 0.0  ;;  %v5655_v50 = vadd.f32 %v5654_v46, %v11736_v42 }
 0xa1a   :  { %v5733_v22 = vpop.f32.mrf.mxu3 }
 0xa1b   :  { %v5734_v28 = vadd.f32 %v5733_v22, %v5645_v34 }
 0xa1d   :  { %v5803_v31 = vmax.f32 %v5734_v28, 0.0 }
 0xa1e   :  { %v6096_v52 = vpop.f32.mrf.mxu1 }
 0xa1f   :  { %v6097_v35 = vadd.f32 %v6096_v52, %v6008_v19  ;;  %v5568_v52 = vadd.f32 %v11748_v60, %v5479_v18  ;;  %v5659_v53 = vpop.f32.mrf.mxu2  ;;  %v11909_v25 = vpop.f32.mrf.mxu0 }
 0xa20   :  { %v5660_v11 = vadd.f32 %v5659_v53, %v11755_v32  ;;  %v5489_v32 = vadd.f32 %v11792_v62, %v11483_v3 }
 0xa21   :  { %v6169_v23 = vmax.f32 %v6097_v35, 0.0  ;;  %v5657_v35 = vadd.f32 %v5656_v2, %v5568_v52 }
 0xa22   :  { %v5735_v47 = vpop.f32.mrf.mxu3 }
 0xa23   :  { %v5736_v30 = vadd.f32 %v5735_v47, %v5647_v21  ;;  %v6198_v58 = vpack.c.bf16 %v6169_v23, %v6168_v1 }
 0xa25   :  { %v5805_v20 = vmax.f32 %v5736_v30, 0.0  ;;  %6298 = vmatmul.bf16.gmra.mxu2 %v6198_v58 }
 0xa26   :  { %v6099_v8 = vpop.f32.mrf.mxu1 }
 0xa27   :  { %v5845_v43 = vpack.c.bf16 %v5805_v20, %v5803_v31  ;;  %v6100_v61 = vadd.f32 %v6099_v8, %v6011_v10  ;;  %v5661_v58 = vpop.f32.mrf.mxu2  ;;  %v6032_v42 = vpop.f32.mrf.mxu0  ;;  %v5484_v31 = vadd.f32 %v11762_v0, %v11483_v3  ;;  %v6021_v20 = vadd.f32 %v11857_v9, %v11879_v36 }
 0xa28   :  { %v6023_v8 = vadd.f32 %v11857_v9, %v11889_v48 }
 0xa29   :  { %6138 = vmatmul.bf16.gmra.mxu1 %v5845_v43  ;;  %v6170_v13 = vmax.f32 %v6100_v61, 0.0  ;;  %v5573_v46 = vadd.f32 %v11764_v51, %v5484_v31  ;;  %v6026_v51 = vadd.f32 %v11857_v9, %v11895_v56  ;;  %v11934_v31 = vld [vmem:[%s12086_s8] ss:$0 sm:$0xff] }
 0xa2a   :  { %v5738_v17 = vpop.f32.mrf.mxu3 }
 0xa2b   :  { %v5739_v39 = vadd.f32 %v5738_v17, %v5650_v14 }
 0xa2d   :  { %v5807_v24 = vmax.f32 %v5739_v39, 0.0 }
 0xa2e   :  { %v6101_v6 = vpop.f32.mrf.mxu1 }
 0xa2f   :  { %v6102_v16 = vadd.f32 %v6101_v6, %v6013_v26  ;;  %v5662_v26 = vadd.f32 %v5661_v58, %v5573_v46  ;;  %v5664_v45 = vpop.f32.mrf.mxu2 }
 0xa31   :  { %v6171_v63 = vmax.f32 %v6102_v16, 0.0 }
 0xa32   :  { %v5740_v33 = vpop.f32.mrf.mxu3 }
 0xa33   :  { %v5741_v37 = vadd.f32 %v5740_v33, %v5652_v4  ;;  %v6199_v29 = vpack.c.bf16 %v6171_v63, %v6170_v13  ;;  %v6035_v4 = vpop.f32.mrf.mxu0 }
 0xa35   :  { %v5809_v7 = vmax.f32 %v5741_v37, 0.0  ;;  %6303 = vmatmul.bf16.gmra.mxu2 %v6199_v29  ;;  %v6028_v37 = vadd.f32 %v11857_v9, %v6027_v12 }
 0xa36   :  { %v6104_v15 = vpop.f32.mrf.mxu1 }
 0xa37   :  { %v5847_v49 = vpack.c.bf16 %v5809_v7, %v5807_v24  ;;  %v6105_v44 = vadd.f32 %v6104_v15, %v6016_v27  ;;  %v5666_v33 = vpop.f32.mrf.mxu2  ;;  %v5665_v7 = vadd.f32 %v5664_v45, %v11768_v40  ;;  %v5578_v15 = vadd.f32 %v11850_v59, %v5489_v32 }
 0xa38   :  { %v6031_v40 = vadd.f32 %v11857_v9, %v11909_v25  ;;  %v6033_v59 = vadd.f32 %v11857_v9, %v6032_v42 }
 0xa39   :  { %6143 = vmatmul.bf16.gmra.mxu1 %v5847_v49  ;;  %v6172_v21 = vmax.f32 %v6105_v44, 0.0 }
 0xa3a   :  { %v5743_v22 = vpop.f32.mrf.mxu3 }
 0xa3b   :  { %v5744_v55 = vadd.f32 %v5743_v22, %v5655_v50  ;;  %v6037_v2 = vpop.f32.mrf.mxu0  ;;  %v5667_v22 = vadd.f32 %v5666_v33, %v5578_v15 }
 0xa3d   :  { %v5811_v23 = vmax.f32 %v5744_v55, 0.0 }
 0xa3e   :  { %v6106_v19 = vpop.f32.mrf.mxu1 }
 0xa3f   :  { %v6107_v34 = vadd.f32 %v6106_v19, %v6018_v54 }
 0xa41   :  { %v6173_v5 = vmax.f32 %v6107_v34, 0.0 }
 0xa42   :  { %v5745_v1 = vpop.f32.mrf.mxu3 }
 0xa43   :  { %v6200_v28 = vpack.c.bf16 %v6173_v5, %v6172_v21  ;;  %v5746_v41 = vadd.f32 %v5745_v1, %v5657_v35  ;;  %v6040_v52 = vpop.f32.mrf.mxu0 }
 0xa45   :  { %v5813_v47 = vmax.f32 %v5746_v41, 0.0  ;;  %6308 = vmatmul.bf16.gmra.mxu2 %v6200_v28  ;;  %v6036_v41 = vadd.f32 %v11857_v9, %v6035_v4 }
 0xa46   :  { %v6109_v57 = vpop.f32.mrf.mxu1 }
 0xa47   :  { %v5849_v30 = vpack.c.bf16 %v5813_v47, %v5811_v23  ;;  %v6110_v43 = vadd.f32 %v6109_v57, %v6021_v20  ;;  %v6038_v47 = vadd.f32 %v11857_v9, %v6037_v2 }
 0xa49   :  { %6148 = vmatmul.bf16.gmra.mxu1 %v5849_v30  ;;  %v6174_v61 = vmax.f32 %v6110_v43, 0.0 }
 0xa4a   :  { %v5748_v60 = vpop.f32.mrf.mxu3 }
 0xa4b   :  { %v5749_v6 = vadd.f32 %v5748_v60, %v5660_v11  ;;  %v6042_v5 = vpop.f32.mrf.mxu0  ;;  %v6041_v11 = vadd.f32 %v11857_v9, %v6040_v52 }
 0xa4c   :  { %v6043_v46 = vadd.f32 %v11857_v9, %v6042_v5 }
 0xa4d   :  { %v5815_v36 = vmax.f32 %v5749_v6, 0.0 }
 0xa4e   :  { %v6111_v17 = vpop.f32.mrf.mxu1 }
 0xa4f   :  { %v6112_v10 = vadd.f32 %v6111_v17, %v6023_v8 }
 0xa51   :  { %v6175_v38 = vmax.f32 %v6112_v10, 0.0 }
 0xa52   :  { %v5750_v14 = vpop.f32.mrf.mxu3 }
 0xa53   :  { %v6201_v0 = vpack.c.bf16 %v6175_v38, %v6174_v61  ;;  %v5751_v16 = vadd.f32 %v5750_v14, %v5662_v26  ;;  %v6045_v23 = vpop.f32.mrf.mxu0 }
 0xa55   :  { %v5817_v13 = vmax.f32 %v5751_v16, 0.0  ;;  %6313 = vmatmul.bf16.gmra.mxu2 %v6201_v0 }
 0xa56   :  { %v6114_v48 = vpop.f32.mrf.mxu1 }
 0xa57   :  { %v5851_v39 = vpack.c.bf16 %v5817_v13, %v5815_v36  ;;  %v6115_v29 = vadd.f32 %v6114_v48, %v6026_v51 }
 0xa59   :  { %6153 = vmatmul.bf16.gmra.mxu1 %v5851_v39  ;;  %v6176_v18 = vmax.f32 %v6115_v29, 0.0  ;;  %v6046_v39 = vadd.f32 %v11857_v9, %v6045_v23 }
 0xa5a   :  { %v5753_v63 = vpop.f32.mrf.mxu3 }
 0xa5b   :  { %v5754_v27 = vadd.f32 %v5753_v63, %v5665_v7  ;;  %v6047_v20 = vpop.f32.mrf.mxu0 }
 0xa5c   :  { %v6048_v63 = vadd.f32 %v11857_v9, %v6047_v20 }
 0xa5d   :  { %v5819_v19 = vmax.f32 %v5754_v27, 0.0 }
 0xa5e   :  { %v6116_v24 = vpop.f32.mrf.mxu1 }
 0xa5f   :  { %v6117_v49 = vadd.f32 %v6116_v24, %v6028_v37 }
 0xa61   :  { %v6177_v54 = vmax.f32 %v6117_v49, 0.0 }
 0xa62   :  { %v5755_v44 = vpop.f32.mrf.mxu3 }
 0xa63   :  { %v6202_v3 = vpack.c.bf16 %v6177_v54, %v6176_v18  ;;  %v5756_v62 = vadd.f32 %v5755_v44, %v5667_v22  ;;  %v6050_v6 = vpop.f32.mrf.mxu0 }
 0xa64   :  { %v6051_v27 = vadd.f32 %v11857_v9, %v6050_v6 }
 0xa65   :  { %v5821_v56 = vmax.f32 %v5756_v62, 0.0  ;;  %6318 = vmatmul.bf16.gmra.mxu2 %v6202_v3 }
 0xa66   :  { %v6119_v50 = vpop.f32.mrf.mxu1 }
 0xa67   :  { %v5853_v12 = vpack.c.bf16 %v5821_v56, %v5819_v19  ;;  %v6120_v53 = vadd.f32 %v6119_v50, %v6031_v40 }
 0xa69   :  { %6158 = vmatmul.bf16.gmra.mxu1 %v5853_v12  ;;  %v6178_v21 = vmax.f32 %v6120_v53, 0.0 }
 0xa6b   :  { %v6052_v48 = vpop.f32.mrf.mxu0 }
 0xa6c   :  { %v6053_v54 = vadd.f32 %v11857_v9, %v6052_v48 }
 0xa6e   :  { %v6121_v34 = vpop.f32.mrf.mxu1 }
 0xa6f   :  { %v6122_v35 = vadd.f32 %v6121_v34, %v6033_v59 }
 0xa71   :  { %v6179_v55 = vmax.f32 %v6122_v35, 0.0 }
 0xa73   :  { %v6203_v1 = vpack.c.bf16 %v6179_v55, %v6178_v21  ;;  %v6055_v15 = vpop.f32.mrf.mxu0 }
 0xa74   :  { %v6056_v21 = vadd.f32 %v11857_v9, %v6055_v15 }
 0xa75   :  { %6323 = vmatmul.bf16.gmra.mxu2 %v6203_v1 }
 0xa76   :  { %v6124_v28 = vpop.f32.mrf.mxu1 }
 0xa77   :  { %v6125_v57 = vadd.f32 %v6124_v28, %v6036_v41 }
 0xa79   :  { %v6180_v25 = vmax.f32 %v6125_v57, 0.0 }
 0xa7b   :  { %v6057_v3 = vpop.f32.mrf.mxu0 }
 0xa7c   :  { %v6058_v55 = vadd.f32 %v11857_v9, %v6057_v3 }
 0xa7e   :  { %v6126_v30 = vpop.f32.mrf.mxu1 }
 0xa7f   :  { %v6127_v58 = vadd.f32 %v6126_v30, %v6038_v47 }
 0xa81   :  { %v6181_v60 = vmax.f32 %v6127_v58, 0.0 }
 0xa83   :  { %v6204_v42 = vpack.c.bf16 %v6181_v60, %v6180_v25  ;;  %v6060_v53 = vpop.f32.mrf.mxu0 }
 0xa84   :  { %v6061_v20 = vadd.f32 %v11857_v9, %v6060_v53 }
 0xa85   :  { %6328 = vmatmul.bf16.gmra.mxu2 %v6204_v42 }
 0xa86   :  { %v6129_v8 = vpop.f32.mrf.mxu1 }
 0xa87   :  { %v6130_v10 = vadd.f32 %v6129_v8, %v6041_v11 }
 0xa88   :  { %v6289_v43 = vpop.f32.mrf.mxu2 }
 0xa89   :  { %v6290_v17 = vadd.f32 %v11934_v31, %v6289_v43  ;;  %v6182_v14 = vmax.f32 %v6130_v10, 0.0 }
 0xa8b   :  { %6369 = vst [vmem:[%s12087_s9] sm:$0xff] %v6290_v17  ;;  %v6062_v30 = vpop.f32.mrf.mxu0 }
 0xa8c   :  { %v6063_v43 = vadd.f32 %v11857_v9, %v6062_v30 }
 0xa8e   :  { %v6131_v26 = vpop.f32.mrf.mxu1 }
 0xa8f   :  { %v6132_v61 = vadd.f32 %v6131_v26, %v6043_v46 }
 0xa90   :  { %v6291_v38 = vpop.f32.mrf.mxu2 }
 0xa91   :  { %v6183_v45 = vmax.f32 %v6132_v61, 0.0  ;;  %v6292_v0 = vadd.f32 %v11934_v31, %v6291_v38 }
 0xa93   :  { %v6205_v16 = vpack.c.bf16 %v6183_v45, %v6182_v14  ;;  %6370 = vst [vmem:[%s12087_s9 + $0x8] sm:$0xff] %v6292_v0  ;;  %v6065_v8 = vpop.f32.mrf.mxu0 }
 0xa95   :  { %6333 = vmatmul.bf16.gmra.mxu2 %v6205_v16 }
 0xa96   :  { %v6134_v4 = vpop.f32.mrf.mxu1 }
 0xa97   :  { %v6135_v32 = vadd.f32 %v6134_v4, %v6046_v39  ;;  %v6066_v4 = vadd.f32 %v11857_v9, %v6065_v8 }
 0xa98   :  { %v6294_v36 = vpop.f32.mrf.mxu2 }
 0xa99   :  { %v6295_v13 = vadd.f32 %v11934_v31, %v6294_v36  ;;  %v6184_v29 = vmax.f32 %v6135_v32, 0.0 }
 0xa9b   :  { %6371 = vst [vmem:[%s12087_s9 + $0x10] sm:$0xff] %v6295_v13  ;;  %v6067_v14 = vpop.f32.mrf.mxu0 }
 0xa9c   :  { %v6068_v36 = vadd.f32 %v11857_v9, %v6067_v14 }
 0xa9e   :  { %v6136_v51 = vpop.f32.mrf.mxu1 }
 0xa9f   :  { %v6137_v33 = vadd.f32 %v6136_v51, %v6048_v63 }
 0xaa0   :  { %v6296_v37 = vpop.f32.mrf.mxu2 }
 0xaa1   :  { %v6185_v2 = vmax.f32 %v6137_v33, 0.0  ;;  %v6297_v24 = vadd.f32 %v11934_v31, %v6296_v37 }
 0xaa3   :  { %v6206_v7 = vpack.c.bf16 %v6185_v2, %v6184_v29  ;;  %6372 = vst [vmem:[%s12087_s9 + $0x18] sm:$0xff] %v6297_v24  ;;  %v6070_v63 = vpop.f32.mrf.mxu0 }
 0xaa5   :  { %6338 = vmatmul.bf16.gmra.mxu2 %v6206_v7 }
 0xaa6   :  { %v6139_v49 = vpop.f32.mrf.mxu1 }
 0xaa7   :  { %v6140_v44 = vadd.f32 %v6139_v49, %v6051_v27  ;;  %v6071_v49 = vadd.f32 %v11857_v9, %v6070_v63 }
 0xaa8   :  { %v6299_v22 = vpop.f32.mrf.mxu2 }
 0xaa9   :  { %v6300_v18 = vadd.f32 %v11934_v31, %v6299_v22  ;;  %v6186_v50 = vmax.f32 %v6140_v44, 0.0 }
 0xaab   :  { %6373 = vst [vmem:[%s12087_s9 + $0x20] sm:$0xff] %v6300_v18  ;;  %v6072_v15 = vpop.f32.mrf.mxu0 }
 0xaac   :  { %v6073_v22 = vadd.f32 %v11857_v9, %v6072_v15 }
 0xaae   :  { %v6141_v62 = vpop.f32.mrf.mxu1 }
 0xaaf   :  { %v6142_v19 = vadd.f32 %v6141_v62, %v6053_v54 }
 0xab0   :  { %v6301_v56 = vpop.f32.mrf.mxu2 }
 0xab1   :  { %v6187_v12 = vmax.f32 %v6142_v19, 0.0  ;;  %v6302_v52 = vadd.f32 %v11934_v31, %v6301_v56 }
 0xab3   :  { %v6207_v40 = vpack.c.bf16 %v6187_v12, %v6186_v50  ;;  %6374 = vst [vmem:[%s12087_s9 + $0x28] sm:$0xff] %v6302_v52 }
 0xab5   :  { %6343 = vmatmul.bf16.gmra.mxu2 %v6207_v40 }
 0xab6   :  { %v6144_v59 = vpop.f32.mrf.mxu1 }
 0xab7   :  { %v6145_v5 = vadd.f32 %v6144_v59, %v6056_v21 }
 0xab8   :  { %v6304_v34 = vpop.f32.mrf.mxu2 }
 0xab9   :  { %v6305_v35 = vadd.f32 %v11934_v31, %v6304_v34  ;;  %v6188_v23 = vmax.f32 %v6145_v5, 0.0 }
 0xabb   :  { %6375 = vst [vmem:[%s12087_s9 + $0x30] sm:$0xff] %v6305_v35 }
 0xabe   :  { %v6146_v1 = vpop.f32.mrf.mxu1 }
 0xabf   :  { %v6147_v28 = vadd.f32 %v6146_v1, %v6058_v55 }
 0xac0   :  { %v6306_v41 = vpop.f32.mrf.mxu2 }
 0xac1   :  { %v6189_v47 = vmax.f32 %v6147_v28, 0.0  ;;  %v6307_v57 = vadd.f32 %v11934_v31, %v6306_v41 }
 0xac3   :  { %v6208_v58 = vpack.c.bf16 %v6189_v47, %v6188_v23  ;;  %6376 = vst [vmem:[%s12087_s9 + $0x38] sm:$0xff] %v6307_v57 }
 0xac5   :  { %6348 = vmatmul.bf16.gmra.mxu2 %v6208_v58 }
 0xac6   :  { %v6149_v25 = vpop.f32.mrf.mxu1 }
 0xac7   :  { %v6150_v17 = vadd.f32 %v6149_v25, %v6061_v20 }
 0xac8   :  { %v6309_v60 = vpop.f32.mrf.mxu2 }
 0xac9   :  { %v6310_v42 = vadd.f32 %v11934_v31, %v6309_v60  ;;  %v6190_v26 = vmax.f32 %v6150_v17, 0.0 }
 0xacb   :  { %6377 = vst [vmem:[%s12087_s9 + $0x40] sm:$0xff] %v6310_v42 }
 0xace   :  { %v6151_v11 = vpop.f32.mrf.mxu1 }
 0xacf   :  { %v6152_v46 = vadd.f32 %v6151_v11, %v6063_v43 }
 0xad0   :  { %v6311_v10 = vpop.f32.mrf.mxu2 }
 0xad1   :  { %v6191_v61 = vmax.f32 %v6152_v46, 0.0  ;;  %v6312_v6 = vadd.f32 %v11934_v31, %v6311_v10 }
 0xad3   :  { %v6209_v38 = vpack.c.bf16 %v6191_v61, %v6190_v26  ;;  %6378 = vst [vmem:[%s12087_s9 + $0x48] sm:$0xff] %v6312_v6 }
 0xad5   :  { %6353 = vmatmul.bf16.gmra.mxu2 %v6209_v38 }
 0xad6   :  { %v6154_v45 = vpop.f32.mrf.mxu1 }
 0xad7   :  { %v6155_v13 = vadd.f32 %v6154_v45, %v6066_v4 }
 0xad8   :  { %v6314_v0 = vpop.f32.mrf.mxu2 }
 0xad9   :  { %v6315_v16 = vadd.f32 %v11934_v31, %v6314_v0  ;;  %v6192_v51 = vmax.f32 %v6155_v13, 0.0 }
 0xadb   :  { %6379 = vst [vmem:[%s12087_s9 + $0x50] sm:$0xff] %v6315_v16 }
 0xade   :  { %v6156_v48 = vpop.f32.mrf.mxu1 }
 0xadf   :  { %v6157_v39 = vadd.f32 %v6156_v48, %v6068_v36 }
 0xae0   :  { %v6316_v32 = vpop.f32.mrf.mxu2 }
 0xae1   :  { %v6193_v33 = vmax.f32 %v6157_v39, 0.0  ;;  %v6317_v37 = vadd.f32 %v11934_v31, %v6316_v32 }
 0xae3   :  { %v6210_v29 = vpack.c.bf16 %v6193_v33, %v6192_v51  ;;  %6380 = vst [vmem:[%s12087_s9 + $0x58] sm:$0xff] %v6317_v37 }
 0xae5   :  { %6358 = vmatmul.bf16.gmra.mxu2 %v6210_v29 }
 0xae6   :  { %v6159_v2 = vpop.f32.mrf.mxu1 }
 0xae7   :  { %v6160_v18 = vadd.f32 %v6159_v2, %v6071_v49 }
 0xae8   :  { %v6319_v24 = vpop.f32.mrf.mxu2 }
 0xae9   :  { %v6320_v7 = vadd.f32 %v11934_v31, %v6319_v24  ;;  %v6194_v3 = vmax.f32 %v6160_v18, 0.0 }
 0xaeb   :  { %6381 = vst [vmem:[%s12087_s9 + $0x60] sm:$0xff] %v6320_v7 }
 0xaee   :  { %v6161_v27 = vpop.f32.mrf.mxu1 }
 0xaef   :  { %v6162_v54 = vadd.f32 %v6161_v27, %v6073_v22 }
 0xaf0   :  { %v6321_v44 = vpop.f32.mrf.mxu2 }
 0xaf1   :  { %v6195_v62 = vmax.f32 %v6162_v54, 0.0  ;;  %v6322_v19 = vadd.f32 %v11934_v31, %v6321_v44 }
 0xaf3   :  { %v6211_v56 = vpack.c.bf16 %v6195_v62, %v6194_v3  ;;  %6382 = vst [vmem:[%s12087_s9 + $0x68] sm:$0xff] %v6322_v19 }
 0xaf5   :  { %6363 = vmatmul.bf16.gmra.mxu2 %v6211_v56 }
 0xaf8   :  { %v6324_v50 = vpop.f32.mrf.mxu2 }
 0xaf9   :  { %v6325_v12 = vadd.f32 %v11934_v31, %v6324_v50 }
 0xafb   :  { %6383 = vst [vmem:[%s12087_s9 + $0x70] sm:$0xff] %v6325_v12 }
 0xb00   :  { %v6326_v9 = vpop.f32.mrf.mxu2 }
 0xb01   :  { %v6327_v52 = vadd.f32 %v11934_v31, %v6326_v9 }
 0xb03   :  { %6384 = vst [vmem:[%s12087_s9 + $0x78] sm:$0xff] %v6327_v52 }
 0xb08   :  { %v6329_v40 = vpop.f32.mrf.mxu2 }
 0xb09   :  { %v6330_v59 = vadd.f32 %v11934_v31, %v6329_v40 }
 0xb0b   :  { %6385 = vst [vmem:[%s12087_s9 + $0x80] sm:$0xff] %v6330_v59 }
 0xb10   :  { %v6331_v53 = vpop.f32.mrf.mxu2 }
 0xb11   :  { %v6332_v34 = vadd.f32 %v11934_v31, %v6331_v53 }
 0xb13   :  { %6386 = vst [vmem:[%s12087_s9 + $0x88] sm:$0xff] %v6332_v34 }
 0xb18   :  { %v6334_v35 = vpop.f32.mrf.mxu2 }
 0xb19   :  { %v6335_v21 = vadd.f32 %v11934_v31, %v6334_v35 }
 0xb1b   :  { %6387 = vst [vmem:[%s12087_s9 + $0x90] sm:$0xff] %v6335_v21 }
 0xb20   :  { %v6336_v55 = vpop.f32.mrf.mxu2 }
 0xb21   :  { %v6337_v5 = vadd.f32 %v11934_v31, %v6336_v55 }
 0xb23   :  { %6388 = vst [vmem:[%s12087_s9 + $0x98] sm:$0xff] %v6337_v5 }
 0xb28   :  { %v6339_v1 = vpop.f32.mrf.mxu2 }
 0xb29   :  { %v6340_v28 = vadd.f32 %v11934_v31, %v6339_v1 }
 0xb2b   :  { %6389 = vst [vmem:[%s12087_s9 + $0xa0] sm:$0xff] %v6340_v28 }
 0xb30   :  { %v6341_v41 = vpop.f32.mrf.mxu2 }
 0xb31   :  { %v6342_v23 = vadd.f32 %v11934_v31, %v6341_v41 }
 0xb33   :  { %6390 = vst [vmem:[%s12087_s9 + $0xa8] sm:$0xff] %v6342_v23 }
 0xb38   :  { %v6344_v47 = vpop.f32.mrf.mxu2 }
 0xb39   :  { %v6345_v57 = vadd.f32 %v11934_v31, %v6344_v47 }
 0xb3b   :  { %6391 = vst [vmem:[%s12087_s9 + $0xb0] sm:$0xff] %v6345_v57 }
 0xb40   :  { %v6346_v30 = vpop.f32.mrf.mxu2 }
 0xb41   :  { %v6347_v58 = vadd.f32 %v11934_v31, %v6346_v30 }
 0xb43   :  { %6392 = vst [vmem:[%s12087_s9 + $0xb8] sm:$0xff] %v6347_v58 }
 0xb48   :  { %v6349_v25 = vpop.f32.mrf.mxu2 }
 0xb49   :  { %v6350_v60 = vadd.f32 %v11934_v31, %v6349_v25 }
 0xb4b   :  { %6393 = vst [vmem:[%s12087_s9 + $0xc0] sm:$0xff] %v6350_v60 }
 0xb50   :  { %v6351_v42 = vpop.f32.mrf.mxu2 }
 0xb51   :  { %v6352_v20 = vadd.f32 %v11934_v31, %v6351_v42 }
 0xb53   :  { %6394 = vst [vmem:[%s12087_s9 + $0xc8] sm:$0xff] %v6352_v20 }
 0xb58   :  { %v6354_v8 = vpop.f32.mrf.mxu2 }
 0xb59   :  { %v6355_v43 = vadd.f32 %v11934_v31, %v6354_v8 }
 0xb5b   :  { %6395 = vst [vmem:[%s12087_s9 + $0xd0] sm:$0xff] %v6355_v43 }
 0xb60   :  { %v6356_v17 = vpop.f32.mrf.mxu2 }
 0xb61   :  { %v6357_v11 = vadd.f32 %v11934_v31, %v6356_v17 }
 0xb63   :  { %6396 = vst [vmem:[%s12087_s9 + $0xd8] sm:$0xff] %v6357_v11 }
 0xb68   :  { %v6359_v46 = vpop.f32.mrf.mxu2 }
 0xb69   :  { %v6360_v10 = vadd.f32 %v11934_v31, %v6359_v46 }
 0xb6b   :  { %6397 = vst [vmem:[%s12087_s9 + $0xe0] sm:$0xff] %v6360_v10 }
 0xb70   :  { %v6361_v26 = vpop.f32.mrf.mxu2 }
 0xb71   :  { %v6362_v61 = vadd.f32 %v11934_v31, %v6361_v26 }
 0xb73   :  { %6398 = vst [vmem:[%s12087_s9 + $0xe8] sm:$0xff] %v6362_v61 }
 0xb78   :  { %v6364_v6 = vpop.f32.mrf.mxu2 }
 0xb79   :  { %v6365_v38 = vadd.f32 %v11934_v31, %v6364_v6 }
 0xb7b   :  { %6399 = vst [vmem:[%s12087_s9 + $0xf0] sm:$0xff] %v6365_v38 }
 0xb80   :  { %v6366_v14 = vpop.f32.mrf.mxu2 }
 0xb81   :  { %v6367_v45 = vadd.f32 %v11934_v31, %v6366_v14 }
 0xb83   :  { %6400 = vst [vmem:[%s12087_s9 + $0xf8] sm:$0xff] %v6367_v45 }
 0xb84   :  { %6405 = vsyncpa [#allocation3], 1 }

</bundles_post_ra>
